<compile_context>
chip_gen: v6e
topology: v6e:2x2x1
jax: 0.10.0
libtpu: 0.0.40
codegen_flags: <defaults>
</compile_context>

<pallas_src>
import math
import numpy as np
import jax
import jax.numpy as jnp
from jax.experimental import pallas as pl
from jax.experimental.pallas import tpu as pltpu


# ----------------------------------------------------------------------------
# In-kernel helpers
# ----------------------------------------------------------------------------
def _layernorm(x, g, b, eps=1e-5):
    # single-pass: var = E[x^2] - mu^2 (two independent reductions)
    mu = jnp.mean(x, axis=-1, keepdims=True)
    ms = jnp.mean(x * x, axis=-1, keepdims=True)
    var = ms - mu * mu
    return (x - mu) * jax.lax.rsqrt(var + eps) * g + b


def _gelu_tanh(x):
    # tanh-approx GELU: transcendental stays on the EUP slot.
    c = math.sqrt(2.0 / math.pi)
    return 0.5 * x * (1.0 + jnp.tanh(c * (x + 0.044715 * x * x * x)))


# ----------------------------------------------------------------------------
# Fused kernel: [LN -> masked dense MHA -> +res -> LN -> MLP -> +res]  (window)
#               -> row permutation (window->grid, one-hot MXU matmul)
#               [LN -> masked dense MHA -> +res -> LN -> MLP -> +res]  (grid)
# One grid step = one batch element (R = windows_per_batch * tokens_per_window
# rows resident in VMEM for the whole fused block).
# ----------------------------------------------------------------------------
def fused_swap_kernel(x_ref, perm_ref, bias_ref, wqkv_ref, wout_ref,
                      ln1g_ref, ln1b_ref, w1_ref, b1_ref, w2_ref, b2_ref,
                      ln2g_ref, ln2b_ref, o_ref):
    R, D = x_ref.shape[1], x_ref.shape[2]
    heads = bias_ref.shape[1]
    dh = D // heads

    x = x_ref[0]                                           # (R, D) f32

    def stage(x, s):
        # --- PreNormResidual(Attention): dense masked attention over all
        #     windows of this batch (block-diagonal bias carries the -1e9
        #     off-window mask, so softmax == per-window softmax exactly). ---
        xn = _layernorm(x, ln1g_ref[s], ln1b_ref[s])
        qkv = jnp.dot(xn, wqkv_ref[s],
                      preferred_element_type=jnp.float32)  # (R, 3D); q pre-scaled
        head_outs = []
        for h in range(heads):                             # heads is tiny; unrolled
            q = qkv[:, h * dh:(h + 1) * dh]                # (R, dh)
            k = qkv[:, D + h * dh: D + (h + 1) * dh]
            v = qkv[:, 2 * D + h * dh: 2 * D + (h + 1) * dh]
            sim = jax.lax.dot_general(q, k, (((1,), (1,)), ((), ())),
                                      preferred_element_type=jnp.float32)  # (R, R)
            sim = sim + bias_ref[s, h]                     # block-diag bias + mask
            sim = sim - jnp.max(sim, axis=-1, keepdims=True)
            p = jnp.exp(sim)                               # masked entries -> 0.0
            attn = p * pl.reciprocal(jnp.sum(p, axis=-1, keepdims=True), approx=True)
            head_outs.append(jnp.dot(attn, v,
                                     preferred_element_type=jnp.float32))  # (R, dh)
        out = jnp.concatenate(head_outs, axis=-1)          # (R, D): lane concat
        x = x + jnp.dot(out, wout_ref[s], preferred_element_type=jnp.float32)

        # --- PreNormResidual(FeedForward) ---
        xn2 = _layernorm(x, ln2g_ref[s], ln2b_ref[s])
        hdn = jnp.dot(xn2, w1_ref[s], preferred_element_type=jnp.float32) + b1_ref[s]
        hdn = _gelu_tanh(hdn)
        return x + jnp.dot(hdn, w2_ref[s], preferred_element_type=jnp.float32) + b2_ref[s]

    x = stage(x, 0)                                        # window-attention stage
    # window -> grid re-partition: exact one-hot row permutation on the MXU.
    x = jnp.dot(perm_ref[...], x, preferred_element_type=jnp.float32)
    x = stage(x, 1)                                        # grid-attention stage
    o_ref[0] = x


def pallas_swap_fusion(x_win, perm_mat, dense_bias, wqkv, wout, ln1g, ln1b,
                       w1, b1, w2, b2, ln2g, ln2b):
    """x_win: (b, R, D) window-ordered rows per batch. Returns grid-ordered rows."""
    b, R, D = x_win.shape
    heads = dense_bias.shape[1]
    M = w1.shape[2]

    def rep(shape):  # replicated (read-only) operand: same block every grid step
        return pl.BlockSpec(shape, lambda i, _n=len(shape): (0,) * _n)

    in_specs = [
        pl.BlockSpec((1, R, D), lambda i: (i, 0, 0)),      # x: one batch per step
        rep((R, R)),                                       # window->grid permutation
        rep((2, heads, R, R)),                             # dense masked rel-pos bias
        rep((2, D, 3 * D)),                                # Wqkv (q-scale folded in)
        rep((2, D, D)),                                    # Wout
        rep((2, 1, D)), rep((2, 1, D)),                    # LN1 gamma / beta
        rep((2, D, M)), rep((2, 1, M)),                    # W1 / b1
        rep((2, M, D)), rep((2, 1, D)),                    # W2 / b2
        rep((2, 1, D)), rep((2, 1, D)),                    # LN2 gamma / beta
    ]
    return pl.pallas_call(
        fused_swap_kernel,
        out_shape=jax.ShapeDtypeStruct((b, R, D), jnp.float32),
        grid=(b,),
        in_specs=in_specs,
        out_specs=pl.BlockSpec((1, R, D), lambda i: (i, 0, 0)),
        compiler_params=pltpu.CompilerParams(
            dimension_semantics=("parallel",)),            # 2 TCs on v7x; loop on v5e/v6e
    )(x_win, perm_mat, dense_bias, wqkv, wout, ln1g, ln1b, w1, b1, w2, b2, ln2g, ln2b)


# ----------------------------------------------------------------------------
# Rearrange glue (plain JAX, fused by XLA under jit)
# ----------------------------------------------------------------------------
def window_partition(x, ws):
    # 'b m d (x w1) (y w2) -> (b x y) (m w1 w2) d'
    b, m, d, H, W = x.shape
    xh, yw = H // ws, W // ws
    t = x.reshape(b, m, d, xh, ws, yw, ws)
    t = t.transpose(0, 3, 5, 1, 4, 6, 2)
    return t.reshape(b * xh * yw, m * ws * ws, d)


def window_unpartition(t, b, m, d, H, W, ws):
    xh, yw = H // ws, W // ws
    t = t.reshape(b, xh, yw, m, ws, ws, d)
    t = t.transpose(0, 3, 6, 1, 4, 2, 5)
    return t.reshape(b, m, d, H, W)


def grid_partition(x, ws):
    # 'b m d (w1 x) (w2 y) -> (b x y) (m w1 w2) d'
    b, m, d, H, W = x.shape
    xh, yw = H // ws, W // ws
    t = x.reshape(b, m, d, ws, xh, ws, yw)
    t = t.transpose(0, 4, 6, 1, 3, 5, 2)
    return t.reshape(b * xh * yw, m * ws * ws, d)


def grid_unpartition(t, b, m, d, H, W, ws):
    xh, yw = H // ws, W // ws
    t = t.reshape(b, xh, yw, m, ws, ws, d)
    t = t.transpose(0, 3, 6, 4, 1, 5, 2)
    return t.reshape(b, m, d, H, W)


def make_win_to_grid_perm(m_sz, H, W, ws):
    """perm[p] = q s.t. per-batch grid-partition row p == window-partition row q."""
    xh, yw = H // ws, W // ws
    xg, yg, mm, w1g, w2g = np.meshgrid(np.arange(xh), np.arange(yw), np.arange(m_sz),
                                       np.arange(ws), np.arange(ws), indexing='ij')
    h = w1g * xh + xg                     # grid layout: H = (w1 x)
    w = w2g * yw + yg
    xw_, w1w = h // ws, h % ws            # window layout: H = (x w1)
    yw_, w2w = w // ws, w % ws
    q = (((xw_ * yw + yw_) * m_sz + mm) * ws + w1w) * ws + w2w
    return q.reshape(-1).astype(np.int32)


def _densify_bias(bias, nw):
    """(heads,N,N) window bias -> (heads,R,R) block-diag bias, off-window = -1e9."""
    heads, N, _ = bias.shape
    blockdiag = jnp.kron(jnp.eye(nw, dtype=jnp.float32),
                         jnp.ones((N, N), jnp.float32))      # (R, R)
    tiled = jnp.tile(bias, (1, nw, nw))                       # (heads, R, R)
    return jnp.where(blockdiag > 0.5, tiled, jnp.float32(-1e9))


def _fold_q_scale(wqkv, dh):
    """Fold 1/sqrt(dh) into the q-columns of Wqkv (exact, bias-free linear)."""
    D = wqkv.shape[0]
    col = jnp.concatenate([jnp.full((D,), dh ** (-0.5), jnp.float32),
                           jnp.ones((2 * D,), jnp.float32)])
    return wqkv * col[None, :]


def swap_fusion_block(x, p_win, p_grid, bias_win, bias_grid, ws):
    b, m, d, H, W = x.shape
    xh, yw = H // ws, W // ws
    nw = xh * yw                         # windows per batch
    N = m * ws * ws                      # tokens per window
    R = nw * N                           # rows per batch
    heads = bias_win.shape[0]
    dh = d // heads

    # window partition -> (b, R, d), rows window-ordered per batch
    t = window_partition(x, ws).reshape(b, R, d)

    # static one-hot row-permutation matrix (window -> grid), numpy constant
    P = jnp.asarray(np.eye(R, dtype=np.float32)[make_win_to_grid_perm(m, H, W, ws)])

    dense_bias = jnp.stack([_densify_bias(bias_win, nw), _densify_bias(bias_grid, nw)])
    wqkv = jnp.stack([_fold_q_scale(p_win['wqkv'], dh), _fold_q_scale(p_grid['wqkv'], dh)])
    stk = lambda k: jnp.stack([p_win[k], p_grid[k]])

    out = pallas_swap_fusion(t, P, dense_bias, wqkv, stk('wout'),
                             stk('ln1_g'), stk('ln1_b'),
                             stk('w1'), stk('b1'), stk('w2'), stk('b2'),
                             stk('ln2_g'), stk('ln2_b'))
    # out rows are grid-ordered per batch
    return grid_unpartition(out.reshape(b * nw, N, d), b, m, d, H, W, ws)


# ----------------------------------------------------------------------------
# Relative position index (mirrors the PyTorch constructor) + param init
# ----------------------------------------------------------------------------
def make_relative_position_index(agent, ws):
    coords = jnp.stack(jnp.meshgrid(jnp.arange(agent), jnp.arange(ws),
                                    jnp.arange(ws), indexing='ij'))          # (3,a,w,w)
    flat = coords.reshape(3, -1)
    rel = flat[:, :, None] - flat[:, None, :]                                # (3,L,L)
    rel = rel.transpose(1, 2, 0)
    rel = rel.at[..., 0].add(agent - 1)
    rel = rel.at[..., 1].add(ws - 1)
    rel = rel.at[..., 2].add(ws - 1)
    rel = rel.at[..., 0].multiply((2 * ws - 1) * (2 * ws - 1))
    rel = rel.at[..., 1].multiply(2 * ws - 1)
    return rel.sum(-1)                                                       # (L,L)


def init_params(key, dim, dim_head, mlp_dim, agent, ws):
    heads = dim // dim_head
    n_bias = (2 * agent - 1) * (2 * ws - 1) * (2 * ws - 1)
    ks = jax.random.split(key, 10)
    s = 0.05
    return {
        'ln1_g': 1.0 + s * jax.random.normal(ks[0], (1, dim), jnp.float32),
        'ln1_b': s * jax.random.normal(ks[1], (1, dim), jnp.float32),
        'wqkv': s * jax.random.normal(ks[2], (dim, 3 * dim), jnp.float32),
        'wout': s * jax.random.normal(ks[3], (dim, dim), jnp.float32),
        'bias_table': s * jax.random.normal(ks[4], (n_bias, heads), jnp.float32),
        'ln2_g': 1.0 + s * jax.random.normal(ks[5], (1, dim), jnp.float32),
        'ln2_b': s * jax.random.normal(ks[6], (1, dim), jnp.float32),
        'w1': s * jax.random.normal(ks[7], (dim, mlp_dim), jnp.float32),
        'b1': s * jax.random.normal(ks[8], (1, mlp_dim), jnp.float32),
        'w2': s * jax.random.normal(ks[9], (mlp_dim, dim), jnp.float32),
        'b2': jnp.zeros((1, dim), jnp.float32),
    }


# ----------------------------------------------------------------------------
# Pure-JAX reference (exact-erf GELU / exact softmax, mirrors the PyTorch spec)
# ----------------------------------------------------------------------------
def _ref_attn_ffn(xw, bias, p):
    hp = jax.lax.Precision.HIGHEST

    def ln(x, g, b):
        mu = x.mean(-1, keepdims=True)
        var = ((x - mu) ** 2).mean(-1, keepdims=True)
        return (x - mu) / jnp.sqrt(var + 1e-5) * g + b

    Bw, N, D = xw.shape
    heads = bias.shape[0]
    dh = D // heads
    xn = ln(xw, p['ln1_g'], p['ln1_b'])
    qkv = jnp.einsum('bnd,de->bne', xn, p['wqkv'], precision=hp)
    q, k, v = jnp.split(qkv, 3, axis=-1)
    sh = lambda t: t.reshape(Bw, N, heads, dh).transpose(0, 2, 1, 3)
    q, k, v = sh(q) * dh ** (-0.5), sh(k), sh(v)
    sim = jnp.einsum('bhid,bhjd->bhij', q, k, precision=hp) + bias[None]
    attn = jax.nn.softmax(sim, axis=-1)
    out = jnp.einsum('bhij,bhjd->bhid', attn, v, precision=hp)
    out = out.transpose(0, 2, 1, 3).reshape(Bw, N, D)
    xw = xw + jnp.einsum('bnd,de->bne', out, p['wout'], precision=hp)
    xn2 = ln(xw, p['ln2_g'], p['ln2_b'])
    h = jax.nn.gelu(jnp.einsum('bnd,dm->bnm', xn2, p['w1'], precision=hp) + p['b1'],
                    approximate=False)
    return xw + jnp.einsum('bnm,md->bnd', h, p['w2'], precision=hp) + p['b2']


def ref_swap_fusion_block(x, p_win, p_grid, bias_win, bias_grid, ws):
    b, m, d, H, W = x.shape
    t = window_partition(x, ws)
    t = _ref_attn_ffn(t, bias_win, p_win)
    x = window_unpartition(t, b, m, d, H, W, ws)
    t = grid_partition(x, ws)
    t = _ref_attn_ffn(t, bias_grid, p_grid)
    return grid_unpartition(t, b, m, d, H, W, ws)


# ----------------------------------------------------------------------------
if __name__ == "__main__":
    input_dim, dim_head, mlp_dim = 32, 16, 64
    window_size, agent_size = 4, 2
    batch, H, W = 2, 8, 8

    key = jax.random.PRNGKey(0)
    kx, k1, k2 = jax.random.split(key, 3)
    x = jax.random.normal(kx, (batch, agent_size, input_dim, H, W), jnp.float32)

    p_win = init_params(k1, input_dim, dim_head, mlp_dim, agent_size, window_size)
    p_grid = init_params(k2, input_dim, dim_head, mlp_dim, agent_size, window_size)

    rel_idx = make_relative_position_index(agent_size, window_size)
    L = agent_size * window_size * window_size
    bias_win = p_win['bias_table'][rel_idx[:L, :L]].transpose(2, 0, 1)   # (heads, L, L)
    bias_grid = p_grid['bias_table'][rel_idx[:L, :L]].transpose(2, 0, 1)

    fwd = jax.jit(lambda x_, pw, pg, bw, bg:
                  swap_fusion_block(x_, pw, pg, bw, bg, window_size))
    out = jax.block_until_ready(fwd(x, p_win, p_grid, bias_win, bias_grid))
    assert out.shape == x.shape and out.dtype == jnp.float32

    ref = ref_swap_fusion_block(x, p_win, p_grid, bias_win, bias_grid, window_size)
    err = float(jnp.max(jnp.abs(out - ref)))
    assert err < 5e-3, f"max abs error {err}"
    print("KERNEL_OK")
</pallas_src>

<mosaic_0001>
module attributes {stable_mosaic.version = 11 : i64} {
  func.func @fused_swap_kernel(%arg0: i32, %arg1: memref<1x128x32xf32, #tpu.memory_space<vmem>>, %arg2: memref<128x128xf32, #tpu.memory_space<vmem>>, %arg3: memref<2x2x128x128xf32, #tpu.memory_space<vmem>>, %arg4: memref<2x32x96xf32, #tpu.memory_space<vmem>>, %arg5: memref<2x32x32xf32, #tpu.memory_space<vmem>>, %arg6: memref<2x1x32xf32, #tpu.memory_space<vmem>>, %arg7: memref<2x1x32xf32, #tpu.memory_space<vmem>>, %arg8: memref<2x32x64xf32, #tpu.memory_space<vmem>>, %arg9: memref<2x1x64xf32, #tpu.memory_space<vmem>>, %arg10: memref<2x64x32xf32, #tpu.memory_space<vmem>>, %arg11: memref<2x1x32xf32, #tpu.memory_space<vmem>>, %arg12: memref<2x1x32xf32, #tpu.memory_space<vmem>>, %arg13: memref<2x1x32xf32, #tpu.memory_space<vmem>>, %arg14: memref<1x128x32xf32, #tpu.memory_space<vmem>>) attributes {dimension_semantics = [#tpu.dimension_semantics<parallel>], iteration_bounds = array<i64: 2>, scalar_prefetch = 0 : i64, scratch_operands = 0 : i64, tpu.core_type = #tpu.core_type<tc>, window_params = [{transform_indices = @transform_0, window_bounds = array<i64: 1, 128, 32>}, {pipeline_mode = #tpu.pipeline_mode<synchronous>, transform_indices = @transform_1, window_bounds = array<i64: 128, 128>}, {pipeline_mode = #tpu.pipeline_mode<synchronous>, transform_indices = @transform_2, window_bounds = array<i64: 2, 2, 128, 128>}, {pipeline_mode = #tpu.pipeline_mode<synchronous>, transform_indices = @transform_3, window_bounds = array<i64: 2, 32, 96>}, {pipeline_mode = #tpu.pipeline_mode<synchronous>, transform_indices = @transform_4, window_bounds = array<i64: 2, 32, 32>}, {pipeline_mode = #tpu.pipeline_mode<synchronous>, transform_indices = @transform_5, window_bounds = array<i64: 2, 1, 32>}, {pipeline_mode = #tpu.pipeline_mode<synchronous>, transform_indices = @transform_6, window_bounds = array<i64: 2, 1, 32>}, {pipeline_mode = #tpu.pipeline_mode<synchronous>, transform_indices = @transform_7, window_bounds = array<i64: 2, 32, 64>}, {pipeline_mode = #tpu.pipeline_mode<synchronous>, transform_indices = @transform_8, window_bounds = array<i64: 2, 1, 64>}, {pipeline_mode = #tpu.pipeline_mode<synchronous>, transform_indices = @transform_9, window_bounds = array<i64: 2, 64, 32>}, {pipeline_mode = #tpu.pipeline_mode<synchronous>, transform_indices = @transform_10, window_bounds = array<i64: 2, 1, 32>}, {pipeline_mode = #tpu.pipeline_mode<synchronous>, transform_indices = @transform_11, window_bounds = array<i64: 2, 1, 32>}, {pipeline_mode = #tpu.pipeline_mode<synchronous>, transform_indices = @transform_12, window_bounds = array<i64: 2, 1, 32>}, {transform_indices = @transform_13, window_bounds = array<i64: 1, 128, 32>}]} {
    %c0 = arith.constant 0 : index
    %c0_0 = arith.constant 0 : index
    %c0_1 = arith.constant 0 : index
    %0 = vector.load %arg1[%c0, %c0_0, %c0_1] : memref<1x128x32xf32, #tpu.memory_space<vmem>>, vector<1x128x32xf32>
    %1 = vector.shape_cast %0 : vector<1x128x32xf32> to vector<128x32xf32>
    %c0_2 = arith.constant 0 : index
    %c0_3 = arith.constant 0 : index
    %c0_4 = arith.constant 0 : index
    %2 = vector.load %arg6[%c0_2, %c0_3, %c0_4] : memref<2x1x32xf32, #tpu.memory_space<vmem>>, vector<1x1x32xf32>
    %3 = vector.shape_cast %2 : vector<1x1x32xf32> to vector<1x32xf32>
    %c0_5 = arith.constant 0 : index
    %c0_6 = arith.constant 0 : index
    %c0_7 = arith.constant 0 : index
    %4 = vector.load %arg7[%c0_5, %c0_6, %c0_7] : memref<2x1x32xf32, #tpu.memory_space<vmem>>, vector<1x1x32xf32>
    %5 = vector.shape_cast %4 : vector<1x1x32xf32> to vector<1x32xf32>
    %cst = arith.constant dense<0.000000e+00> : vector<128xf32>
    %6 = vector.multi_reduction <add>, %1, %cst [1] : vector<128x32xf32> to vector<128xf32>
    %7 = vector.shape_cast %6 : vector<128xf32> to vector<128x1xf32>
    %cst_8 = arith.constant 3.200000e+01 : f32
    %8 = vector.broadcast %cst_8 : f32 to vector<128x1xf32>
    %9 = arith.divf %7, %8 : vector<128x1xf32>
    %10 = arith.mulf %1, %1 : vector<128x32xf32>
    %cst_9 = arith.constant dense<0.000000e+00> : vector<128xf32>
    %11 = vector.multi_reduction <add>, %10, %cst_9 [1] : vector<128x32xf32> to vector<128xf32>
    %12 = vector.shape_cast %11 : vector<128xf32> to vector<128x1xf32>
    %cst_10 = arith.constant 3.200000e+01 : f32
    %13 = vector.broadcast %cst_10 : f32 to vector<128x1xf32>
    %14 = arith.divf %12, %13 : vector<128x1xf32>
    %15 = arith.mulf %9, %9 : vector<128x1xf32>
    %16 = arith.subf %14, %15 : vector<128x1xf32>
    %17 = vector.broadcast %9 : vector<128x1xf32> to vector<128x32xf32>
    %18 = arith.subf %1, %17 : vector<128x32xf32>
    %cst_11 = arith.constant 9.99999974E-6 : f32
    %19 = vector.broadcast %cst_11 : f32 to vector<128x1xf32>
    %20 = arith.addf %16, %19 : vector<128x1xf32>
    %21 = math.rsqrt %20 : vector<128x1xf32>
    %22 = vector.broadcast %21 : vector<128x1xf32> to vector<128x32xf32>
    %23 = arith.mulf %18, %22 : vector<128x32xf32>
    %24 = vector.broadcast %3 : vector<1x32xf32> to vector<128x32xf32>
    %25 = arith.mulf %23, %24 : vector<128x32xf32>
    %26 = vector.broadcast %5 : vector<1x32xf32> to vector<128x32xf32>
    %27 = arith.addf %25, %26 : vector<128x32xf32>
    %c0_12 = arith.constant 0 : index
    %c0_13 = arith.constant 0 : index
    %c0_14 = arith.constant 0 : index
    %28 = vector.load %arg4[%c0_12, %c0_13, %c0_14] : memref<2x32x96xf32, #tpu.memory_space<vmem>>, vector<1x32x96xf32>
    %29 = vector.shape_cast %28 : vector<1x32x96xf32> to vector<32x96xf32>
    %cst_15 = arith.constant dense<0.000000e+00> : vector<128x96xf32>
    %30 = tpu.matmul %27, %29, %cst_15 {dimension_numbers = #tpu.dot_dimension_numbers<[1], [0], [0], [1], [0, 0, 1, 1], [], []>} : vector<128x32xf32>, vector<32x96xf32>, vector<128x96xf32> -> vector<128x96xf32>
    %31 = vector.extract_strided_slice %30 {offsets = [0, 0], sizes = [128, 16], strides = [1, 1]} : vector<128x96xf32> to vector<128x16xf32>
    %32 = vector.extract_strided_slice %30 {offsets = [0, 32], sizes = [128, 16], strides = [1, 1]} : vector<128x96xf32> to vector<128x16xf32>
    %33 = vector.extract_strided_slice %30 {offsets = [0, 64], sizes = [128, 16], strides = [1, 1]} : vector<128x96xf32> to vector<128x16xf32>
    %cst_16 = arith.constant dense<0.000000e+00> : vector<128x128xf32>
    %34 = tpu.matmul %31, %32, %cst_16 {dimension_numbers = #tpu.dot_dimension_numbers<[1], [1], [0], [0], [0, 0, 1, 0], [], []>} : vector<128x16xf32>, vector<128x16xf32>, vector<128x128xf32> -> vector<128x128xf32>
    %c0_17 = arith.constant 0 : index
    %c0_18 = arith.constant 0 : index
    %c0_19 = arith.constant 0 : index
    %c0_20 = arith.constant 0 : index
    %35 = vector.load %arg3[%c0_17, %c0_18, %c0_19, %c0_20] : memref<2x2x128x128xf32, #tpu.memory_space<vmem>>, vector<1x1x128x128xf32>
    %36 = vector.shape_cast %35 : vector<1x1x128x128xf32> to vector<128x128xf32>
    %37 = arith.addf %34, %36 : vector<128x128xf32>
    %cst_21 = arith.constant dense<0xFF800000> : vector<128xf32>
    %38 = vector.multi_reduction <maximumf>, %37, %cst_21 [1] : vector<128x128xf32> to vector<128xf32>
    %39 = vector.shape_cast %38 : vector<128xf32> to vector<128x1xf32>
    %40 = vector.broadcast %39 : vector<128x1xf32> to vector<128x128xf32>
    %41 = arith.subf %37, %40 : vector<128x128xf32>
    %42 = math.exp %41 : vector<128x128xf32>
    %cst_22 = arith.constant dense<0.000000e+00> : vector<128xf32>
    %43 = vector.multi_reduction <add>, %42, %cst_22 [1] : vector<128x128xf32> to vector<128xf32>
    %44 = vector.shape_cast %43 : vector<128xf32> to vector<128x1xf32>
    %45 = tpu.reciprocal %44 {approx = true} : vector<128x1xf32> -> vector<128x1xf32>
    %46 = vector.broadcast %45 : vector<128x1xf32> to vector<128x128xf32>
    %47 = arith.mulf %42, %46 : vector<128x128xf32>
    %cst_23 = arith.constant dense<0.000000e+00> : vector<128x16xf32>
    %48 = tpu.matmul %47, %33, %cst_23 {dimension_numbers = #tpu.dot_dimension_numbers<[1], [0], [0], [1], [0, 0, 1, 1], [], []>} : vector<128x128xf32>, vector<128x16xf32>, vector<128x16xf32> -> vector<128x16xf32>
    %49 = vector.extract_strided_slice %30 {offsets = [0, 16], sizes = [128, 16], strides = [1, 1]} : vector<128x96xf32> to vector<128x16xf32>
    %50 = vector.extract_strided_slice %30 {offsets = [0, 48], sizes = [128, 16], strides = [1, 1]} : vector<128x96xf32> to vector<128x16xf32>
    %51 = vector.extract_strided_slice %30 {offsets = [0, 80], sizes = [128, 16], strides = [1, 1]} : vector<128x96xf32> to vector<128x16xf32>
    %cst_24 = arith.constant dense<0.000000e+00> : vector<128x128xf32>
    %52 = tpu.matmul %49, %50, %cst_24 {dimension_numbers = #tpu.dot_dimension_numbers<[1], [1], [0], [0], [0, 0, 1, 0], [], []>} : vector<128x16xf32>, vector<128x16xf32>, vector<128x128xf32> -> vector<128x128xf32>
    %c0_25 = arith.constant 0 : index
    %c1 = arith.constant 1 : index
    %c0_26 = arith.constant 0 : index
    %c0_27 = arith.constant 0 : index
    %53 = vector.load %arg3[%c0_25, %c1, %c0_26, %c0_27] : memref<2x2x128x128xf32, #tpu.memory_space<vmem>>, vector<1x1x128x128xf32>
    %54 = vector.shape_cast %53 : vector<1x1x128x128xf32> to vector<128x128xf32>
    %55 = arith.addf %52, %54 : vector<128x128xf32>
    %cst_28 = arith.constant dense<0xFF800000> : vector<128xf32>
    %56 = vector.multi_reduction <maximumf>, %55, %cst_28 [1] : vector<128x128xf32> to vector<128xf32>
    %57 = vector.shape_cast %56 : vector<128xf32> to vector<128x1xf32>
    %58 = vector.broadcast %57 : vector<128x1xf32> to vector<128x128xf32>
    %59 = arith.subf %55, %58 : vector<128x128xf32>
    %60 = math.exp %59 : vector<128x128xf32>
    %cst_29 = arith.constant dense<0.000000e+00> : vector<128xf32>
    %61 = vector.multi_reduction <add>, %60, %cst_29 [1] : vector<128x128xf32> to vector<128xf32>
    %62 = vector.shape_cast %61 : vector<128xf32> to vector<128x1xf32>
    %63 = tpu.reciprocal %62 {approx = true} : vector<128x1xf32> -> vector<128x1xf32>
    %64 = vector.broadcast %63 : vector<128x1xf32> to vector<128x128xf32>
    %65 = arith.mulf %60, %64 : vector<128x128xf32>
    %cst_30 = arith.constant dense<0.000000e+00> : vector<128x16xf32>
    %66 = tpu.matmul %65, %51, %cst_30 {dimension_numbers = #tpu.dot_dimension_numbers<[1], [0], [0], [1], [0, 0, 1, 1], [], []>} : vector<128x128xf32>, vector<128x16xf32>, vector<128x16xf32> -> vector<128x16xf32>
    %67 = tpu.concatenate %48, %66 in 1 : vector<128x16xf32>, vector<128x16xf32> -> vector<128x32xf32>
    %c0_31 = arith.constant 0 : index
    %c0_32 = arith.constant 0 : index
    %c0_33 = arith.constant 0 : index
    %68 = vector.load %arg5[%c0_31, %c0_32, %c0_33] : memref<2x32x32xf32, #tpu.memory_space<vmem>>, vector<1x32x32xf32>
    %69 = vector.shape_cast %68 : vector<1x32x32xf32> to vector<32x32xf32>
    %cst_34 = arith.constant dense<0.000000e+00> : vector<128x32xf32>
    %70 = tpu.matmul %67, %69, %cst_34 {dimension_numbers = #tpu.dot_dimension_numbers<[1], [0], [0], [1], [0, 0, 1, 1], [], []>} : vector<128x32xf32>, vector<32x32xf32>, vector<128x32xf32> -> vector<128x32xf32>
    %71 = arith.addf %1, %70 : vector<128x32xf32>
    %c0_35 = arith.constant 0 : index
    %c0_36 = arith.constant 0 : index
    %c0_37 = arith.constant 0 : index
    %72 = vector.load %arg12[%c0_35, %c0_36, %c0_37] : memref<2x1x32xf32, #tpu.memory_space<vmem>>, vector<1x1x32xf32>
    %73 = vector.shape_cast %72 : vector<1x1x32xf32> to vector<1x32xf32>
    %c0_38 = arith.constant 0 : index
    %c0_39 = arith.constant 0 : index
    %c0_40 = arith.constant 0 : index
    %74 = vector.load %arg13[%c0_38, %c0_39, %c0_40] : memref<2x1x32xf32, #tpu.memory_space<vmem>>, vector<1x1x32xf32>
    %75 = vector.shape_cast %74 : vector<1x1x32xf32> to vector<1x32xf32>
    %cst_41 = arith.constant dense<0.000000e+00> : vector<128xf32>
    %76 = vector.multi_reduction <add>, %71, %cst_41 [1] : vector<128x32xf32> to vector<128xf32>
    %77 = vector.shape_cast %76 : vector<128xf32> to vector<128x1xf32>
    %cst_42 = arith.constant 3.200000e+01 : f32
    %78 = vector.broadcast %cst_42 : f32 to vector<128x1xf32>
    %79 = arith.divf %77, %78 : vector<128x1xf32>
    %80 = arith.mulf %71, %71 : vector<128x32xf32>
    %cst_43 = arith.constant dense<0.000000e+00> : vector<128xf32>
    %81 = vector.multi_reduction <add>, %80, %cst_43 [1] : vector<128x32xf32> to vector<128xf32>
    %82 = vector.shape_cast %81 : vector<128xf32> to vector<128x1xf32>
    %cst_44 = arith.constant 3.200000e+01 : f32
    %83 = vector.broadcast %cst_44 : f32 to vector<128x1xf32>
    %84 = arith.divf %82, %83 : vector<128x1xf32>
    %85 = arith.mulf %79, %79 : vector<128x1xf32>
    %86 = arith.subf %84, %85 : vector<128x1xf32>
    %87 = vector.broadcast %79 : vector<128x1xf32> to vector<128x32xf32>
    %88 = arith.subf %71, %87 : vector<128x32xf32>
    %cst_45 = arith.constant 9.99999974E-6 : f32
    %89 = vector.broadcast %cst_45 : f32 to vector<128x1xf32>
    %90 = arith.addf %86, %89 : vector<128x1xf32>
    %91 = math.rsqrt %90 : vector<128x1xf32>
    %92 = vector.broadcast %91 : vector<128x1xf32> to vector<128x32xf32>
    %93 = arith.mulf %88, %92 : vector<128x32xf32>
    %94 = vector.broadcast %73 : vector<1x32xf32> to vector<128x32xf32>
    %95 = arith.mulf %93, %94 : vector<128x32xf32>
    %96 = vector.broadcast %75 : vector<1x32xf32> to vector<128x32xf32>
    %97 = arith.addf %95, %96 : vector<128x32xf32>
    %c0_46 = arith.constant 0 : index
    %c0_47 = arith.constant 0 : index
    %c0_48 = arith.constant 0 : index
    %98 = vector.load %arg8[%c0_46, %c0_47, %c0_48] : memref<2x32x64xf32, #tpu.memory_space<vmem>>, vector<1x32x64xf32>
    %99 = vector.shape_cast %98 : vector<1x32x64xf32> to vector<32x64xf32>
    %cst_49 = arith.constant dense<0.000000e+00> : vector<128x64xf32>
    %100 = tpu.matmul %97, %99, %cst_49 {dimension_numbers = #tpu.dot_dimension_numbers<[1], [0], [0], [1], [0, 0, 1, 1], [], []>} : vector<128x32xf32>, vector<32x64xf32>, vector<128x64xf32> -> vector<128x64xf32>
    %c0_50 = arith.constant 0 : index
    %c0_51 = arith.constant 0 : index
    %c0_52 = arith.constant 0 : index
    %101 = vector.load %arg9[%c0_50, %c0_51, %c0_52] : memref<2x1x64xf32, #tpu.memory_space<vmem>>, vector<1x1x64xf32>
    %102 = vector.shape_cast %101 : vector<1x1x64xf32> to vector<1x64xf32>
    %103 = vector.broadcast %102 : vector<1x64xf32> to vector<128x64xf32>
    %104 = arith.addf %100, %103 : vector<128x64xf32>
    %cst_53 = arith.constant 5.000000e-01 : f32
    %105 = vector.broadcast %cst_53 : f32 to vector<128x64xf32>
    %106 = arith.mulf %105, %104 : vector<128x64xf32>
    %cst_54 = arith.constant 4.471500e-02 : f32
    %107 = vector.broadcast %cst_54 : f32 to vector<128x64xf32>
    %108 = arith.mulf %107, %104 : vector<128x64xf32>
    %109 = arith.mulf %108, %104 : vector<128x64xf32>
    %110 = arith.mulf %109, %104 : vector<128x64xf32>
    %111 = arith.addf %104, %110 : vector<128x64xf32>
    %cst_55 = arith.constant 0.797884583 : f32
    %112 = vector.broadcast %cst_55 : f32 to vector<128x64xf32>
    %113 = arith.mulf %112, %111 : vector<128x64xf32>
    %114 = math.tanh %113 : vector<128x64xf32>
    %cst_56 = arith.constant 1.000000e+00 : f32
    %115 = vector.broadcast %cst_56 : f32 to vector<128x64xf32>
    %116 = arith.addf %115, %114 : vector<128x64xf32>
    %117 = arith.mulf %106, %116 : vector<128x64xf32>
    %c0_57 = arith.constant 0 : index
    %c0_58 = arith.constant 0 : index
    %c0_59 = arith.constant 0 : index
    %118 = vector.load %arg10[%c0_57, %c0_58, %c0_59] : memref<2x64x32xf32, #tpu.memory_space<vmem>>, vector<1x64x32xf32>
    %119 = vector.shape_cast %118 : vector<1x64x32xf32> to vector<64x32xf32>
    %cst_60 = arith.constant dense<0.000000e+00> : vector<128x32xf32>
    %120 = tpu.matmul %117, %119, %cst_60 {dimension_numbers = #tpu.dot_dimension_numbers<[1], [0], [0], [1], [0, 0, 1, 1], [], []>} : vector<128x64xf32>, vector<64x32xf32>, vector<128x32xf32> -> vector<128x32xf32>
    %121 = arith.addf %71, %120 : vector<128x32xf32>
    %c0_61 = arith.constant 0 : index
    %c0_62 = arith.constant 0 : index
    %c0_63 = arith.constant 0 : index
    %122 = vector.load %arg11[%c0_61, %c0_62, %c0_63] : memref<2x1x32xf32, #tpu.memory_space<vmem>>, vector<1x1x32xf32>
    %123 = vector.shape_cast %122 : vector<1x1x32xf32> to vector<1x32xf32>
    %124 = vector.broadcast %123 : vector<1x32xf32> to vector<128x32xf32>
    %125 = arith.addf %121, %124 : vector<128x32xf32>
    %c0_64 = arith.constant 0 : index
    %c0_65 = arith.constant 0 : index
    %126 = vector.load %arg2[%c0_64, %c0_65] : memref<128x128xf32, #tpu.memory_space<vmem>>, vector<128x128xf32>
    %cst_66 = arith.constant dense<0.000000e+00> : vector<128x32xf32>
    %127 = tpu.matmul %126, %125, %cst_66 {dimension_numbers = #tpu.dot_dimension_numbers<[1], [0], [0], [1], [0, 0, 1, 1], [], []>} : vector<128x128xf32>, vector<128x32xf32>, vector<128x32xf32> -> vector<128x32xf32>
    %c1_67 = arith.constant 1 : index
    %c0_68 = arith.constant 0 : index
    %c0_69 = arith.constant 0 : index
    %128 = vector.load %arg6[%c1_67, %c0_68, %c0_69] : memref<2x1x32xf32, #tpu.memory_space<vmem>>, vector<1x1x32xf32>
    %129 = vector.shape_cast %128 : vector<1x1x32xf32> to vector<1x32xf32>
    %c1_70 = arith.constant 1 : index
    %c0_71 = arith.constant 0 : index
    %c0_72 = arith.constant 0 : index
    %130 = vector.load %arg7[%c1_70, %c0_71, %c0_72] : memref<2x1x32xf32, #tpu.memory_space<vmem>>, vector<1x1x32xf32>
    %131 = vector.shape_cast %130 : vector<1x1x32xf32> to vector<1x32xf32>
    %cst_73 = arith.constant dense<0.000000e+00> : vector<128xf32>
    %132 = vector.multi_reduction <add>, %127, %cst_73 [1] : vector<128x32xf32> to vector<128xf32>
    %133 = vector.shape_cast %132 : vector<128xf32> to vector<128x1xf32>
    %cst_74 = arith.constant 3.200000e+01 : f32
    %134 = vector.broadcast %cst_74 : f32 to vector<128x1xf32>
    %135 = arith.divf %133, %134 : vector<128x1xf32>
    %136 = arith.mulf %127, %127 : vector<128x32xf32>
    %cst_75 = arith.constant dense<0.000000e+00> : vector<128xf32>
    %137 = vector.multi_reduction <add>, %136, %cst_75 [1] : vector<128x32xf32> to vector<128xf32>
    %138 = vector.shape_cast %137 : vector<128xf32> to vector<128x1xf32>
    %cst_76 = arith.constant 3.200000e+01 : f32
    %139 = vector.broadcast %cst_76 : f32 to vector<128x1xf32>
    %140 = arith.divf %138, %139 : vector<128x1xf32>
    %141 = arith.mulf %135, %135 : vector<128x1xf32>
    %142 = arith.subf %140, %141 : vector<128x1xf32>
    %143 = vector.broadcast %135 : vector<128x1xf32> to vector<128x32xf32>
    %144 = arith.subf %127, %143 : vector<128x32xf32>
    %cst_77 = arith.constant 9.99999974E-6 : f32
    %145 = vector.broadcast %cst_77 : f32 to vector<128x1xf32>
    %146 = arith.addf %142, %145 : vector<128x1xf32>
    %147 = math.rsqrt %146 : vector<128x1xf32>
    %148 = vector.broadcast %147 : vector<128x1xf32> to vector<128x32xf32>
    %149 = arith.mulf %144, %148 : vector<128x32xf32>
    %150 = vector.broadcast %129 : vector<1x32xf32> to vector<128x32xf32>
    %151 = arith.mulf %149, %150 : vector<128x32xf32>
    %152 = vector.broadcast %131 : vector<1x32xf32> to vector<128x32xf32>
    %153 = arith.addf %151, %152 : vector<128x32xf32>
    %c1_78 = arith.constant 1 : index
    %c0_79 = arith.constant 0 : index
    %c0_80 = arith.constant 0 : index
    %154 = vector.load %arg4[%c1_78, %c0_79, %c0_80] : memref<2x32x96xf32, #tpu.memory_space<vmem>>, vector<1x32x96xf32>
    %155 = vector.shape_cast %154 : vector<1x32x96xf32> to vector<32x96xf32>
    %cst_81 = arith.constant dense<0.000000e+00> : vector<128x96xf32>
    %156 = tpu.matmul %153, %155, %cst_81 {dimension_numbers = #tpu.dot_dimension_numbers<[1], [0], [0], [1], [0, 0, 1, 1], [], []>} : vector<128x32xf32>, vector<32x96xf32>, vector<128x96xf32> -> vector<128x96xf32>
    %157 = vector.extract_strided_slice %156 {offsets = [0, 0], sizes = [128, 16], strides = [1, 1]} : vector<128x96xf32> to vector<128x16xf32>
    %158 = vector.extract_strided_slice %156 {offsets = [0, 32], sizes = [128, 16], strides = [1, 1]} : vector<128x96xf32> to vector<128x16xf32>
    %159 = vector.extract_strided_slice %156 {offsets = [0, 64], sizes = [128, 16], strides = [1, 1]} : vector<128x96xf32> to vector<128x16xf32>
    %cst_82 = arith.constant dense<0.000000e+00> : vector<128x128xf32>
    %160 = tpu.matmul %157, %158, %cst_82 {dimension_numbers = #tpu.dot_dimension_numbers<[1], [1], [0], [0], [0, 0, 1, 0], [], []>} : vector<128x16xf32>, vector<128x16xf32>, vector<128x128xf32> -> vector<128x128xf32>
    %c1_83 = arith.constant 1 : index
    %c0_84 = arith.constant 0 : index
    %c0_85 = arith.constant 0 : index
    %c0_86 = arith.constant 0 : index
    %161 = vector.load %arg3[%c1_83, %c0_84, %c0_85, %c0_86] : memref<2x2x128x128xf32, #tpu.memory_space<vmem>>, vector<1x1x128x128xf32>
    %162 = vector.shape_cast %161 : vector<1x1x128x128xf32> to vector<128x128xf32>
    %163 = arith.addf %160, %162 : vector<128x128xf32>
    %cst_87 = arith.constant dense<0xFF800000> : vector<128xf32>
    %164 = vector.multi_reduction <maximumf>, %163, %cst_87 [1] : vector<128x128xf32> to vector<128xf32>
    %165 = vector.shape_cast %164 : vector<128xf32> to vector<128x1xf32>
    %166 = vector.broadcast %165 : vector<128x1xf32> to vector<128x128xf32>
    %167 = arith.subf %163, %166 : vector<128x128xf32>
    %168 = math.exp %167 : vector<128x128xf32>
    %cst_88 = arith.constant dense<0.000000e+00> : vector<128xf32>
    %169 = vector.multi_reduction <add>, %168, %cst_88 [1] : vector<128x128xf32> to vector<128xf32>
    %170 = vector.shape_cast %169 : vector<128xf32> to vector<128x1xf32>
    %171 = tpu.reciprocal %170 {approx = true} : vector<128x1xf32> -> vector<128x1xf32>
    %172 = vector.broadcast %171 : vector<128x1xf32> to vector<128x128xf32>
    %173 = arith.mulf %168, %172 : vector<128x128xf32>
    %cst_89 = arith.constant dense<0.000000e+00> : vector<128x16xf32>
    %174 = tpu.matmul %173, %159, %cst_89 {dimension_numbers = #tpu.dot_dimension_numbers<[1], [0], [0], [1], [0, 0, 1, 1], [], []>} : vector<128x128xf32>, vector<128x16xf32>, vector<128x16xf32> -> vector<128x16xf32>
    %175 = vector.extract_strided_slice %156 {offsets = [0, 16], sizes = [128, 16], strides = [1, 1]} : vector<128x96xf32> to vector<128x16xf32>
    %176 = vector.extract_strided_slice %156 {offsets = [0, 48], sizes = [128, 16], strides = [1, 1]} : vector<128x96xf32> to vector<128x16xf32>
    %177 = vector.extract_strided_slice %156 {offsets = [0, 80], sizes = [128, 16], strides = [1, 1]} : vector<128x96xf32> to vector<128x16xf32>
    %cst_90 = arith.constant dense<0.000000e+00> : vector<128x128xf32>
    %178 = tpu.matmul %175, %176, %cst_90 {dimension_numbers = #tpu.dot_dimension_numbers<[1], [1], [0], [0], [0, 0, 1, 0], [], []>} : vector<128x16xf32>, vector<128x16xf32>, vector<128x128xf32> -> vector<128x128xf32>
    %c1_91 = arith.constant 1 : index
    %c1_92 = arith.constant 1 : index
    %c0_93 = arith.constant 0 : index
    %c0_94 = arith.constant 0 : index
    %179 = vector.load %arg3[%c1_91, %c1_92, %c0_93, %c0_94] : memref<2x2x128x128xf32, #tpu.memory_space<vmem>>, vector<1x1x128x128xf32>
    %180 = vector.shape_cast %179 : vector<1x1x128x128xf32> to vector<128x128xf32>
    %181 = arith.addf %178, %180 : vector<128x128xf32>
    %cst_95 = arith.constant dense<0xFF800000> : vector<128xf32>
    %182 = vector.multi_reduction <maximumf>, %181, %cst_95 [1] : vector<128x128xf32> to vector<128xf32>
    %183 = vector.shape_cast %182 : vector<128xf32> to vector<128x1xf32>
    %184 = vector.broadcast %183 : vector<128x1xf32> to vector<128x128xf32>
    %185 = arith.subf %181, %184 : vector<128x128xf32>
    %186 = math.exp %185 : vector<128x128xf32>
    %cst_96 = arith.constant dense<0.000000e+00> : vector<128xf32>
    %187 = vector.multi_reduction <add>, %186, %cst_96 [1] : vector<128x128xf32> to vector<128xf32>
    %188 = vector.shape_cast %187 : vector<128xf32> to vector<128x1xf32>
    %189 = tpu.reciprocal %188 {approx = true} : vector<128x1xf32> -> vector<128x1xf32>
    %190 = vector.broadcast %189 : vector<128x1xf32> to vector<128x128xf32>
    %191 = arith.mulf %186, %190 : vector<128x128xf32>
    %cst_97 = arith.constant dense<0.000000e+00> : vector<128x16xf32>
    %192 = tpu.matmul %191, %177, %cst_97 {dimension_numbers = #tpu.dot_dimension_numbers<[1], [0], [0], [1], [0, 0, 1, 1], [], []>} : vector<128x128xf32>, vector<128x16xf32>, vector<128x16xf32> -> vector<128x16xf32>
    %193 = tpu.concatenate %174, %192 in 1 : vector<128x16xf32>, vector<128x16xf32> -> vector<128x32xf32>
    %c1_98 = arith.constant 1 : index
    %c0_99 = arith.constant 0 : index
    %c0_100 = arith.constant 0 : index
    %194 = vector.load %arg5[%c1_98, %c0_99, %c0_100] : memref<2x32x32xf32, #tpu.memory_space<vmem>>, vector<1x32x32xf32>
    %195 = vector.shape_cast %194 : vector<1x32x32xf32> to vector<32x32xf32>
    %cst_101 = arith.constant dense<0.000000e+00> : vector<128x32xf32>
    %196 = tpu.matmul %193, %195, %cst_101 {dimension_numbers = #tpu.dot_dimension_numbers<[1], [0], [0], [1], [0, 0, 1, 1], [], []>} : vector<128x32xf32>, vector<32x32xf32>, vector<128x32xf32> -> vector<128x32xf32>
    %197 = arith.addf %127, %196 : vector<128x32xf32>
    %c1_102 = arith.constant 1 : index
    %c0_103 = arith.constant 0 : index
    %c0_104 = arith.constant 0 : index
    %198 = vector.load %arg12[%c1_102, %c0_103, %c0_104] : memref<2x1x32xf32, #tpu.memory_space<vmem>>, vector<1x1x32xf32>
    %199 = vector.shape_cast %198 : vector<1x1x32xf32> to vector<1x32xf32>
    %c1_105 = arith.constant 1 : index
    %c0_106 = arith.constant 0 : index
    %c0_107 = arith.constant 0 : index
    %200 = vector.load %arg13[%c1_105, %c0_106, %c0_107] : memref<2x1x32xf32, #tpu.memory_space<vmem>>, vector<1x1x32xf32>
    %201 = vector.shape_cast %200 : vector<1x1x32xf32> to vector<1x32xf32>
    %cst_108 = arith.constant dense<0.000000e+00> : vector<128xf32>
    %202 = vector.multi_reduction <add>, %197, %cst_108 [1] : vector<128x32xf32> to vector<128xf32>
    %203 = vector.shape_cast %202 : vector<128xf32> to vector<128x1xf32>
    %cst_109 = arith.constant 3.200000e+01 : f32
    %204 = vector.broadcast %cst_109 : f32 to vector<128x1xf32>
    %205 = arith.divf %203, %204 : vector<128x1xf32>
    %206 = arith.mulf %197, %197 : vector<128x32xf32>
    %cst_110 = arith.constant dense<0.000000e+00> : vector<128xf32>
    %207 = vector.multi_reduction <add>, %206, %cst_110 [1] : vector<128x32xf32> to vector<128xf32>
    %208 = vector.shape_cast %207 : vector<128xf32> to vector<128x1xf32>
    %cst_111 = arith.constant 3.200000e+01 : f32
    %209 = vector.broadcast %cst_111 : f32 to vector<128x1xf32>
    %210 = arith.divf %208, %209 : vector<128x1xf32>
    %211 = arith.mulf %205, %205 : vector<128x1xf32>
    %212 = arith.subf %210, %211 : vector<128x1xf32>
    %213 = vector.broadcast %205 : vector<128x1xf32> to vector<128x32xf32>
    %214 = arith.subf %197, %213 : vector<128x32xf32>
    %cst_112 = arith.constant 9.99999974E-6 : f32
    %215 = vector.broadcast %cst_112 : f32 to vector<128x1xf32>
    %216 = arith.addf %212, %215 : vector<128x1xf32>
    %217 = math.rsqrt %216 : vector<128x1xf32>
    %218 = vector.broadcast %217 : vector<128x1xf32> to vector<128x32xf32>
    %219 = arith.mulf %214, %218 : vector<128x32xf32>
    %220 = vector.broadcast %199 : vector<1x32xf32> to vector<128x32xf32>
    %221 = arith.mulf %219, %220 : vector<128x32xf32>
    %222 = vector.broadcast %201 : vector<1x32xf32> to vector<128x32xf32>
    %223 = arith.addf %221, %222 : vector<128x32xf32>
    %c1_113 = arith.constant 1 : index
    %c0_114 = arith.constant 0 : index
    %c0_115 = arith.constant 0 : index
    %224 = vector.load %arg8[%c1_113, %c0_114, %c0_115] : memref<2x32x64xf32, #tpu.memory_space<vmem>>, vector<1x32x64xf32>
    %225 = vector.shape_cast %224 : vector<1x32x64xf32> to vector<32x64xf32>
    %cst_116 = arith.constant dense<0.000000e+00> : vector<128x64xf32>
    %226 = tpu.matmul %223, %225, %cst_116 {dimension_numbers = #tpu.dot_dimension_numbers<[1], [0], [0], [1], [0, 0, 1, 1], [], []>} : vector<128x32xf32>, vector<32x64xf32>, vector<128x64xf32> -> vector<128x64xf32>
    %c1_117 = arith.constant 1 : index
    %c0_118 = arith.constant 0 : index
    %c0_119 = arith.constant 0 : index
    %227 = vector.load %arg9[%c1_117, %c0_118, %c0_119] : memref<2x1x64xf32, #tpu.memory_space<vmem>>, vector<1x1x64xf32>
    %228 = vector.shape_cast %227 : vector<1x1x64xf32> to vector<1x64xf32>
    %229 = vector.broadcast %228 : vector<1x64xf32> to vector<128x64xf32>
    %230 = arith.addf %226, %229 : vector<128x64xf32>
    %cst_120 = arith.constant 5.000000e-01 : f32
    %231 = vector.broadcast %cst_120 : f32 to vector<128x64xf32>
    %232 = arith.mulf %231, %230 : vector<128x64xf32>
    %cst_121 = arith.constant 4.471500e-02 : f32
    %233 = vector.broadcast %cst_121 : f32 to vector<128x64xf32>
    %234 = arith.mulf %233, %230 : vector<128x64xf32>
    %235 = arith.mulf %234, %230 : vector<128x64xf32>
    %236 = arith.mulf %235, %230 : vector<128x64xf32>
    %237 = arith.addf %230, %236 : vector<128x64xf32>
    %cst_122 = arith.constant 0.797884583 : f32
    %238 = vector.broadcast %cst_122 : f32 to vector<128x64xf32>
    %239 = arith.mulf %238, %237 : vector<128x64xf32>
    %240 = math.tanh %239 : vector<128x64xf32>
    %cst_123 = arith.constant 1.000000e+00 : f32
    %241 = vector.broadcast %cst_123 : f32 to vector<128x64xf32>
    %242 = arith.addf %241, %240 : vector<128x64xf32>
    %243 = arith.mulf %232, %242 : vector<128x64xf32>
    %c1_124 = arith.constant 1 : index
    %c0_125 = arith.constant 0 : index
    %c0_126 = arith.constant 0 : index
    %244 = vector.load %arg10[%c1_124, %c0_125, %c0_126] : memref<2x64x32xf32, #tpu.memory_space<vmem>>, vector<1x64x32xf32>
    %245 = vector.shape_cast %244 : vector<1x64x32xf32> to vector<64x32xf32>
    %cst_127 = arith.constant dense<0.000000e+00> : vector<128x32xf32>
    %246 = tpu.matmul %243, %245, %cst_127 {dimension_numbers = #tpu.dot_dimension_numbers<[1], [0], [0], [1], [0, 0, 1, 1], [], []>} : vector<128x64xf32>, vector<64x32xf32>, vector<128x32xf32> -> vector<128x32xf32>
    %247 = arith.addf %197, %246 : vector<128x32xf32>
    %c1_128 = arith.constant 1 : index
    %c0_129 = arith.constant 0 : index
    %c0_130 = arith.constant 0 : index
    %248 = vector.load %arg11[%c1_128, %c0_129, %c0_130] : memref<2x1x32xf32, #tpu.memory_space<vmem>>, vector<1x1x32xf32>
    %249 = vector.shape_cast %248 : vector<1x1x32xf32> to vector<1x32xf32>
    %250 = vector.broadcast %249 : vector<1x32xf32> to vector<128x32xf32>
    %251 = arith.addf %247, %250 : vector<128x32xf32>
    %c0_131 = arith.constant 0 : index
    %c0_132 = arith.constant 0 : index
    %c0_133 = arith.constant 0 : index
    %252 = vector.load %arg14[%c0_131, %c0_132, %c0_133] : memref<1x128x32xf32, #tpu.memory_space<vmem>>, vector<1x128x32xf32>
    %253 = vector.shape_cast %252 : vector<1x128x32xf32> to vector<128x32xf32>
    %254 = vector.shape_cast %251 : vector<128x32xf32> to vector<1x128x32xf32>
    tpu.vector_store %arg14[%c0_131, %c0_132, %c0_133], %254 {strides = array<i32>} : memref<1x128x32xf32, #tpu.memory_space<vmem>>, vector<1x128x32xf32>,
    return
  }
  func.func @transform_0(%arg0: i32) -> (i32, i32, i32) {
    %c0_i32 = arith.constant 0 : i32
    %c0_i32_0 = arith.constant 0 : i32
    %c0_i32_1 = arith.constant 0 : i32
    return %arg0, %c0_i32, %c0_i32_0 : i32, i32, i32
  }
  func.func @transform_1(%arg0: i32) -> (i32, i32) {
    %c0_i32 = arith.constant 0 : i32
    %c0_i32_0 = arith.constant 0 : i32
    %c0_i32_1 = arith.constant 0 : i32
    return %c0_i32, %c0_i32_0 : i32, i32
  }
  func.func @transform_2(%arg0: i32) -> (i32, i32, i32, i32) {
    %c0_i32 = arith.constant 0 : i32
    %c0_i32_0 = arith.constant 0 : i32
    %c0_i32_1 = arith.constant 0 : i32
    %c0_i32_2 = arith.constant 0 : i32
    %c0_i32_3 = arith.constant 0 : i32
    return %c0_i32, %c0_i32_0, %c0_i32_1, %c0_i32_2 : i32, i32, i32, i32
  }
  func.func @transform_3(%arg0: i32) -> (i32, i32, i32) {
    %c0_i32 = arith.constant 0 : i32
    %c0_i32_0 = arith.constant 0 : i32
    %c0_i32_1 = arith.constant 0 : i32
    %c0_i32_2 = arith.constant 0 : i32
    return %c0_i32, %c0_i32_0, %c0_i32_1 : i32, i32, i32
  }
  func.func @transform_4(%arg0: i32) -> (i32, i32, i32) {
    %c0_i32 = arith.constant 0 : i32
    %c0_i32_0 = arith.constant 0 : i32
    %c0_i32_1 = arith.constant 0 : i32
    %c0_i32_2 = arith.constant 0 : i32
    return %c0_i32, %c0_i32_0, %c0_i32_1 : i32, i32, i32
  }
  func.func @transform_5(%arg0: i32) -> (i32, i32, i32) {
    %c0_i32 = arith.constant 0 : i32
    %c0_i32_0 = arith.constant 0 : i32
    %c0_i32_1 = arith.constant 0 : i32
    %c0_i32_2 = arith.constant 0 : i32
    return %c0_i32, %c0_i32_0, %c0_i32_1 : i32, i32, i32
  }
  func.func @transform_6(%arg0: i32) -> (i32, i32, i32) {
    %c0_i32 = arith.constant 0 : i32
    %c0_i32_0 = arith.constant 0 : i32
    %c0_i32_1 = arith.constant 0 : i32
    %c0_i32_2 = arith.constant 0 : i32
    return %c0_i32, %c0_i32_0, %c0_i32_1 : i32, i32, i32
  }
  func.func @transform_7(%arg0: i32) -> (i32, i32, i32) {
    %c0_i32 = arith.constant 0 : i32
    %c0_i32_0 = arith.constant 0 : i32
    %c0_i32_1 = arith.constant 0 : i32
    %c0_i32_2 = arith.constant 0 : i32
    return %c0_i32, %c0_i32_0, %c0_i32_1 : i32, i32, i32
  }
  func.func @transform_8(%arg0: i32) -> (i32, i32, i32) {
    %c0_i32 = arith.constant 0 : i32
    %c0_i32_0 = arith.constant 0 : i32
    %c0_i32_1 = arith.constant 0 : i32
    %c0_i32_2 = arith.constant 0 : i32
    return %c0_i32, %c0_i32_0, %c0_i32_1 : i32, i32, i32
  }
  func.func @transform_9(%arg0: i32) -> (i32, i32, i32) {
    %c0_i32 = arith.constant 0 : i32
    %c0_i32_0 = arith.constant 0 : i32
    %c0_i32_1 = arith.constant 0 : i32
    %c0_i32_2 = arith.constant 0 : i32
    return %c0_i32, %c0_i32_0, %c0_i32_1 : i32, i32, i32
  }
  func.func @transform_10(%arg0: i32) -> (i32, i32, i32) {
    %c0_i32 = arith.constant 0 : i32
    %c0_i32_0 = arith.constant 0 : i32
    %c0_i32_1 = arith.constant 0 : i32
    %c0_i32_2 = arith.constant 0 : i32
    return %c0_i32, %c0_i32_0, %c0_i32_1 : i32, i32, i32
  }
  func.func @transform_11(%arg0: i32) -> (i32, i32, i32) {
    %c0_i32 = arith.constant 0 : i32
    %c0_i32_0 = arith.constant 0 : i32
    %c0_i32_1 = arith.constant 0 : i32
    %c0_i32_2 = arith.constant 0 : i32
    return %c0_i32, %c0_i32_0, %c0_i32_1 : i32, i32, i32
  }
  func.func @transform_12(%arg0: i32) -> (i32, i32, i32) {
    %c0_i32 = arith.constant 0 : i32
    %c0_i32_0 = arith.constant 0 : i32
    %c0_i32_1 = arith.constant 0 : i32
    %c0_i32_2 = arith.constant 0 : i32
    return %c0_i32, %c0_i32_0, %c0_i32_1 : i32, i32, i32
  }
  func.func @transform_13(%arg0: i32) -> (i32, i32, i32) {
    %c0_i32 = arith.constant 0 : i32
    %c0_i32_0 = arith.constant 0 : i32
    %c0_i32_1 = arith.constant 0 : i32
    return %arg0, %c0_i32, %c0_i32_0 : i32, i32, i32
  }
}

</mosaic_0001>

<bundles_post_ra>
// kernel: _lambda_.1
= control target key start
LH: loop header
LB: loop body
LE: loop exit
PB: predicated region body
PF: predicated region fallthrough
CT: control target
= control target key end

     0   :  { %s8643_s25 = smov 0   ;;  %s11780_s0 = inlined_call_operand.vmem [shape: f32[2,128,32], index: 0, kind: input, shape index: {}]   ;;  %s11781_s1 = inlined_call_operand.vmem [shape: f32[128,128], index: 1, kind: input, shape index: {}]   ;;  %s11782_s2 = inlined_call_operand.vmem [shape: f32[2,2,128,128], index: 2, kind: input, shape index: {}]   ;;  %s11783_s3 = inlined_call_operand.vmem [shape: f32[2,32,96], index: 3, kind: input, shape index: {}]   ;;  %s11784_s4 = inlined_call_operand.vmem [shape: f32[2,32,32], index: 4, kind: input, shape index: {}]   ;;  %s11785_s5 = inlined_call_operand.vmem [shape: f32[2,1,32], index: 5, kind: input, shape index: {}]   ;;  %s11786_s6 = inlined_call_operand.vmem [shape: f32[2,1,32], index: 6, kind: input, shape index: {}]   ;;  %s11787_s7 = inlined_call_operand.vmem [shape: f32[2,32,64], index: 7, kind: input, shape index: {}]   ;;  %s11788_s8 = inlined_call_operand.vmem [shape: f32[2,1,64], index: 8, kind: input, shape index: {}]   ;;  %s11789_s9 = inlined_call_operand.vmem [shape: f32[2,64,32], index: 9, kind: input, shape index: {}]   ;;  %s11790_s10 = inlined_call_operand.vmem [shape: f32[2,1,32], index: 10, kind: input, shape index: {}]   ;;  %s11791_s11 = inlined_call_operand.vmem [shape: f32[2,1,32], index: 11, kind: input, shape index: {}]   ;;  %s11792_s12 = inlined_call_operand.vmem [shape: f32[2,1,32], index: 12, kind: input, shape index: {}]   ;;  %s11793_s13 = inlined_call_operand.vmem [shape: f32[2,128,32], index: 13, kind: output, shape index: {}]  }
   0x1 LB: > { %s6478_s26 = sadd.s32 4294967295, %s8565_s25   ;;  %p6482_p0 = scmp.ge.s32.totalorder %s8565_s25, 1  ;;  %s8565_s25 = sphi %s8643_s25, %s23_s25  }
   0x2   : > { %p387_p1 = scmp.lt.s32.totalorder %s8565_s25, 3 }
   0x4   : > { %p388_p2 = pnand %p6482_p0, %p387_p1 }
   0x6   : > { %391 = sbr.rel (%p388_p2) target bundleno = 6034 (0x1792), region = 72 }
   0xb   : > { %p431_p3 = scmp.lt.s32.totalorder %s6478_s26, 1  ;;  %vm459_vm0 = vcmask 261120   ;;  %v748_v42 = vld [vmem:[%s11783_s3 + $0x18] sm:$0xff]  ;;  %v747_v47 = vld [vmem:[%s11783_s3 + $0x10] sm:$0xff]  ;;  %v746_v48 = vld [vmem:[%s11783_s3 + $0x8] sm:$0xff]  ;;  %vm1006_vm1 = vcmask 130048  }
   0xc   : > { %7289 = vmatprep.subr.mxu0 %v748_v42  ;;  %v745_v53 = vld [vmem:[%s11783_s3] sm:$0xff]  ;;  %s8567_s29 = smov 96   ;;  %s8568_s14 = smov 64   ;;  %vm3115_vm2 = vcmask 523264  }
   0xd   : > { %s11839_s26 = smov (!%p431_p3, %s6478_s26), 1  ;;  %7290 = vmatpush3.msra.mxu0 %v748_v42  ;;  %s8569_s15 = smov 80  }
   0xe   : > { %s11794_s27 = sshll.u32 %s11839_s26, 7  ;;  %7291 = vmatprep.subr.mxu0 %v747_v47  ;;  %s8570_s18 = smov 112  }
   0xf   : > { %s8659_s30 = scalar_lea.vmem %s11780_s0, %s11794_s27  ;;  %7292 = vmatpush3.msra.mxu0 %v747_v47  ;;  %s8571_s19 = smov 48  }
  0x10   : > { %v8662_v0 = vld [vmem:[%s8659_s30 + $0x18] sm:$0xff]  ;;  %v8665_v1 = vld [vmem:[%s8659_s30] sm:$0xff]  ;;  %v8668_v2 = vld [vmem:[%s8659_s30 + $0x8] sm:$0xff]  ;;  %7293 = vmatprep.subr.mxu0 %v746_v48  ;;  %s11795_s20 = smov 16   ;;  %s11823_s21 = smov 16  }
  0x11   : > { %v469_v3 = vsel %vm459_vm0, %v8662_v0, 0.0  ;;  %v460_v4 = vsel %vm459_vm0, %v8665_v1, 0.0  ;;  %v525_v5 = vmul.f32 %v8665_v1, %v8665_v1  ;;  %v463_v7 = vsel %vm459_vm0, %v8668_v2, 0.0  ;;  %v8682_v9 = vld [vmem:[%s8659_s30 + $0x10] sm:$0xff]  ;;  %v8694_v16 = vld [vmem:[%s8659_s30 + $0x28] sm:$0xff]  ;;  %v8697_v17 = vld [vmem:[%s8659_s30 + $0x20] sm:$0xff]  ;;  %7294 = vmatpush3.msra.mxu0 %v746_v48 }
  0x12   : > { %470 = vadd.xlane.f32.xlu1 %v469_v3  ;;  %461 = vadd.xlane.f32.xlu0 %v460_v4  ;;  %v526_v8 = vmul.f32 %v8668_v2, %v8668_v2  ;;  %v466_v11 = vsel %vm459_vm0, %v8682_v9, 0.0  ;;  %v528_v12 = vmul.f32 %v8662_v0, %v8662_v0  ;;  %v527_v13 = vmul.f32 %v8682_v9, %v8682_v9  ;;  %v8710_v24 = vld [vmem:[%s8659_s30 + $0x38] sm:$0xff]  ;;  %v8713_v25 = vld [vmem:[%s8659_s30 + $0x30] sm:$0xff]  ;;  %v8726_v32 = vld [vmem:[%s8659_s30 + $0x48] sm:$0xff] }
  0x13   : > { %v541_v6 = vsel %vm459_vm0, %v525_v5, 0.0  ;;  %v475_v18 = vsel %vm459_vm0, %v8694_v16, 0.0  ;;  %v472_v19 = vsel %vm459_vm0, %v8697_v17, 0.0  ;;  %v530_v20 = vmul.f32 %v8694_v16, %v8694_v16  ;;  %v8729_v33 = vld [vmem:[%s8659_s30 + $0x40] sm:$0xff]  ;;  %v8742_v40 = vld [vmem:[%s8659_s30 + $0x58] sm:$0xff]  ;;  %v8745_v41 = vld [vmem:[%s8659_s30 + $0x50] sm:$0xff]  ;;  %7295 = vmatprep.subr.mxu0 %v745_v53 }
  0x14   : > { %v544_v10 = vsel %vm459_vm0, %v526_v8, 0.0  ;;  %v550_v14 = vsel %vm459_vm0, %v528_v12, 0.0  ;;  %v547_v15 = vsel %vm459_vm0, %v527_v13, 0.0  ;;  %v529_v21 = vmul.f32 %v8697_v17, %v8697_v17  ;;  %v8767_v51 = vld [vmem:[%s8659_s30 + $0x68] sm:$0xff]  ;;  %v8770_v52 = vld [vmem:[%s8659_s30 + $0x60] sm:$0xff]  ;;  %7296 = vmatpush3.msra.mxu0 %v745_v53  ;;  %v8786_v60 = vld [vmem:[%s8659_s30 + $0x78] sm:$0xff] }
  0x15   : > { %v556_v22 = vsel %vm459_vm0, %v530_v20, 0.0  ;;  %v481_v26 = vsel %vm459_vm0, %v8710_v24, 0.0  ;;  %v478_v27 = vsel %vm459_vm0, %v8713_v25, 0.0  ;;  %v532_v28 = vmul.f32 %v8710_v24, %v8710_v24  ;;  %v8789_v61 = vld [vmem:[%s8659_s30 + $0x70] sm:$0xff] }
  0x16   : > { %542 = vadd.xlane.f32.xlu1 %v541_v6  ;;  %464 = vadd.xlane.f32.xlu0 %v463_v7  ;;  %v553_v23 = vsel %vm459_vm0, %v529_v21, 0.0  ;;  %v531_v29 = vmul.f32 %v8713_v25, %v8713_v25  ;;  %v487_v34 = vsel %vm459_vm0, %v8726_v32, 0.0  ;;  %v484_v35 = vsel %vm459_vm0, %v8729_v33, 0.0 }
  0x17   : > { %v562_v30 = vsel %vm459_vm0, %v532_v28, 0.0  ;;  %v534_v36 = vmul.f32 %v8726_v32, %v8726_v32  ;;  %v533_v37 = vmul.f32 %v8729_v33, %v8729_v33  ;;  %v493_v43 = vsel %vm459_vm0, %v8742_v40, 0.0 }
  0x18   : > { %v559_v31 = vsel %vm459_vm0, %v531_v29, 0.0  ;;  %v490_v44 = vsel %vm459_vm0, %v8745_v41, 0.0  ;;  %v536_v45 = vmul.f32 %v8742_v40, %v8742_v40  ;;  %v535_v46 = vmul.f32 %v8745_v41, %v8745_v41 }
  0x19   : > { %v568_v38 = vsel %vm459_vm0, %v534_v36, 0.0  ;;  %v565_v39 = vsel %vm459_vm0, %v533_v37, 0.0  ;;  %v499_v54 = vsel %vm459_vm0, %v8767_v51, 0.0  ;;  %v496_v55 = vsel %vm459_vm0, %v8770_v52, 0.0 }
  0x1a   : > { %545 = vadd.xlane.f32.xlu1 %v544_v10  ;;  %467 = vadd.xlane.f32.xlu0 %v466_v11  ;;  %v574_v49 = vsel %vm459_vm0, %v536_v45, 0.0  ;;  %v571_v50 = vsel %vm459_vm0, %v535_v46, 0.0  ;;  %v538_v56 = vmul.f32 %v8767_v51, %v8767_v51  ;;  %v537_v57 = vmul.f32 %v8770_v52, %v8770_v52 }
  0x1b   : > { %v505_v62 = vsel %vm459_vm0, %v8786_v60, 0.0  ;;  %v502_v63 = vsel %vm459_vm0, %v8789_v61, 0.0  ;;  %v540_v3 = vmul.f32 %v8786_v60, %v8786_v60  ;;  %v539_v4 = vmul.f32 %v8789_v61, %v8789_v61 }
  0x1c   : > { %v580_v58 = vsel %vm459_vm0, %v538_v56, 0.0  ;;  %v577_v59 = vsel %vm459_vm0, %v537_v57, 0.0 }
  0x1d   : > { %v586_v5 = vsel %vm459_vm0, %v540_v3, 0.0  ;;  %v583_v6 = vsel %vm459_vm0, %v539_v4, 0.0  ;;  %v8821_v3 = vld [vmem:[%s11785_s5] ss:$0 sm:$0xff] }
  0x1e   : > { %551 = vadd.xlane.f32.xlu1 %v550_v14  ;;  %548 = vadd.xlane.f32.xlu0 %v547_v15 }
  0x22   : > { %476 = vadd.xlane.f32.xlu1 %v475_v18  ;;  %473 = vadd.xlane.f32.xlu0 %v472_v19 }
  0x26   : > { %557 = vadd.xlane.f32.xlu1 %v556_v22  ;;  %554 = vadd.xlane.f32.xlu0 %v553_v23 }
  0x2a   : > { %482 = vadd.xlane.f32.xlu1 %v481_v26  ;;  %479 = vadd.xlane.f32.xlu0 %v478_v27 }
  0x2e   : > { %563 = vadd.xlane.f32.xlu1 %v562_v30  ;;  %560 = vadd.xlane.f32.xlu0 %v559_v31 }
  0x32   : > { %488 = vadd.xlane.f32.xlu1 %v487_v34  ;;  %485 = vadd.xlane.f32.xlu0 %v484_v35 }
  0x36   : > { %569 = vadd.xlane.f32.xlu1 %v568_v38  ;;  %566 = vadd.xlane.f32.xlu0 %v565_v39 }
  0x3a   : > { %494 = vadd.xlane.f32.xlu1 %v493_v43  ;;  %491 = vadd.xlane.f32.xlu0 %v490_v44 }
  0x3e   : > { %575 = vadd.xlane.f32.xlu1 %v574_v49  ;;  %572 = vadd.xlane.f32.xlu0 %v571_v50 }
  0x42   : > { %500 = vadd.xlane.f32.xlu1 %v499_v54  ;;  %497 = vadd.xlane.f32.xlu0 %v496_v55 }
  0x46   : > { %581 = vadd.xlane.f32.xlu1 %v580_v58  ;;  %578 = vadd.xlane.f32.xlu0 %v577_v59 }
  0x4a   : > { %506 = vadd.xlane.f32.xlu1 %v505_v62  ;;  %503 = vadd.xlane.f32.xlu0 %v502_v63 }
  0x4e   : > { %587 = vadd.xlane.f32.xlu1 %v586_v5  ;;  %584 = vadd.xlane.f32.xlu0 %v583_v6 }
  0x9b   : > { %v471_v7 = vpop.xlane.xlu1 %470  ;;  %v462_v8 = vpop.xlane.xlu0 %461 }
  0x9c   : > { %v509_v10 = vmul.f32 0.03125, %v462_v8  ;;  %v8801_v19 = vmul.f32 0.03125, %v471_v7 }
  0x9e   : > { %v605_v13 = vmul.f32 %v509_v10, %v509_v10  ;;  %v608_v29 = vmul.f32 %v8801_v19, %v8801_v19  ;;  %v637_v59 = vsub.f32 %v8665_v1, %v509_v10  ;;  %v8833_v10 = vld [vmem:[%s11786_s6] ss:$0 sm:$0xff] }
  0x9f   : > { %v543_v11 = vpop.xlane.xlu1 %542  ;;  %v465_v12 = vpop.xlane.xlu0 %464 }
  0xa0   : > { %v589_v14 = vmul.f32 0.03125, %v543_v11  ;;  %v510_v15 = vmul.f32 0.03125, %v465_v12 }
  0xa2   : > { %v621_v18 = vsub.f32 %v589_v14, %v605_v13  ;;  %v606_v23 = vmul.f32 %v510_v15, %v510_v15  ;;  %v638_v11 = vsub.f32 %v8668_v2, %v510_v15 }
  0xa3   : > { %v546_v20 = vpop.xlane.xlu1 %545  ;;  %v468_v21 = vpop.xlane.xlu0 %467 }
  0xa4   : > { %v653_v22 = vadd.f32 1e-05, %v621_v18  ;;  %v590_v26 = vmul.f32 0.03125, %v546_v20  ;;  %v8803_v27 = vmul.f32 0.03125, %v468_v21 }
  0xa6   : > { %8095 = vrsqrt.f32 %v653_v22  ;;  %v622_v28 = vsub.f32 %v590_v26, %v606_v23  ;;  %v607_v35 = vmul.f32 %v8803_v27, %v8803_v27 }
  0xa7   : > { %v552_v30 = vpop.xlane.xlu1 %551  ;;  %v549_v31 = vpop.xlane.xlu0 %548 }
  0xa8   : > { %v654_v34 = vadd.f32 1e-05, %v622_v28  ;;  %v592_v36 = vmul.f32 0.03125, %v552_v30  ;;  %v591_v37 = vmul.f32 0.03125, %v549_v31  ;;  %v640_v30 = vsub.f32 %v8662_v0, %v8801_v19 }
  0xa9   : > { %v639_v31 = vsub.f32 %v8682_v9, %v8803_v27 }
  0xaa   : > { %8097 = vrsqrt.f32 %v654_v34  ;;  %v624_v38 = vsub.f32 %v592_v36, %v608_v29  ;;  %v623_v39 = vsub.f32 %v591_v37, %v607_v35 }
  0xab   : > { %v477_v42 = vpop.xlane.xlu1 %476  ;;  %v474_v43 = vpop.xlane.xlu0 %473 }
  0xac   : > { %v656_v44 = vadd.f32 1e-05, %v624_v38  ;;  %v655_v45 = vadd.f32 1e-05, %v623_v39  ;;  %v8809_v46 = vmul.f32 0.03125, %v477_v42  ;;  %v8811_v47 = vmul.f32 0.03125, %v474_v43 }
  0xae   : > { %8099 = vrsqrt.f32 %v656_v44  ;;  %v610_v48 = vmul.f32 %v8809_v46, %v8809_v46  ;;  %v609_v53 = vmul.f32 %v8811_v47, %v8811_v47 }
  0xaf   : > { %8101 = vrsqrt.f32 %v655_v45  ;;  %v558_v49 = vpop.xlane.xlu1 %557  ;;  %v555_v50 = vpop.xlane.xlu0 %554 }
  0xb0   : > { %v594_v54 = vmul.f32 0.03125, %v558_v49  ;;  %v593_v55 = vmul.f32 0.03125, %v555_v50 }
  0xb2   : > { %v626_v56 = vsub.f32 %v594_v54, %v610_v48  ;;  %v625_v57 = vsub.f32 %v593_v55, %v609_v53 }
  0xb3   : > { %v8096_v58 = vpop.eup %8095  ;;  %v483_v62 = vpop.xlane.xlu1 %482 }
  0xb4   : > { %v480_v63 = vpop.xlane.xlu0 %479  ;;  %v658_v4 = vadd.f32 1e-05, %v626_v56  ;;  %v657_v5 = vadd.f32 1e-05, %v625_v57  ;;  %v8823_v6 = vmul.f32 0.03125, %v483_v62  ;;  %v685_v8 = vmul.f32 %v8096_v58, %v637_v59 }
  0xb5   : > { %v8825_v7 = vmul.f32 0.03125, %v480_v63  ;;  %v642_v59 = vsub.f32 %v8694_v16, %v8809_v46  ;;  %v641_v62 = vsub.f32 %v8697_v17, %v8811_v47 }
  0xb6   : > { %8103 = vrsqrt.f32 %v658_v4  ;;  %v612_v1 = vmul.f32 %v8823_v6, %v8823_v6  ;;  %v707_v18 = vmul.f32 %v8821_v3, %v685_v8 }
  0xb7   : > { %v8098_v12 = vpop.eup %8097  ;;  %8105 = vrsqrt.f32 %v657_v5  ;;  %v564_v13 = vpop.xlane.xlu1 %563  ;;  %v611_v20 = vmul.f32 %v8825_v7, %v8825_v7 }
  0xb8   : > { %v561_v14 = vpop.xlane.xlu0 %560  ;;  %v596_v21 = vmul.f32 0.03125, %v564_v13  ;;  %v686_v15 = vmul.f32 %v8098_v12, %v638_v11  ;;  %v729_v22 = vadd.f32 %v8833_v10, %v707_v18 }
  0xb9   : > { %v595_v2 = vmul.f32 0.03125, %v561_v14 }
  0xba   : > { %v628_v23 = vsub.f32 %v596_v21, %v612_v1  ;;  %v708_v28 = vmul.f32 %v8821_v3, %v686_v15  ;;  %7297 = vmatprep.mubr.msk.f32.mxu0 %vm459_vm0, %v729_v22 }
  0xbb   : > { %v627_v26 = vsub.f32 %v595_v2, %v611_v20  ;;  %v8100_v29 = vpop.eup %8099  ;;  %v489_v34 = vpop.xlane.xlu1 %488 }
  0xbc   : > { %v486_v35 = vpop.xlane.xlu0 %485  ;;  %v8102_v36 = vpop.eup %8101  ;;  %v660_v37 = vadd.f32 1e-05, %v628_v23  ;;  %v8845_v39 = vmul.f32 0.03125, %v489_v34  ;;  %v730_v43 = vadd.f32 %v8833_v10, %v708_v28  ;;  %v688_v45 = vmul.f32 %v8100_v29, %v640_v30 }
  0xbd   : > { %v659_v38 = vadd.f32 1e-05, %v627_v26  ;;  %v8847_v42 = vmul.f32 0.03125, %v486_v35  ;;  %v687_v44 = vmul.f32 %v8102_v36, %v639_v31  ;;  %v644_v29 = vsub.f32 %v8710_v24, %v8823_v6 }
  0xbe   : > { %8107 = vrsqrt.f32 %v660_v37  ;;  %v614_v0 = vmul.f32 %v8845_v39, %v8845_v39  ;;  %7298 = vmatmul.mubr.msk.f32.vlgmr.msra.gmra.mxu0 %vm459_vm0, %v730_v43  ;;  %v710_v48 = vmul.f32 %v8821_v3, %v688_v45  ;;  %v643_v30 = vsub.f32 %v8713_v25, %v8825_v7 }
  0xbf   : > { %8109 = vrsqrt.f32 %v659_v38  ;;  %v570_v9 = vpop.xlane.xlu1 %569  ;;  %v709_v27 = vmul.f32 %v8821_v3, %v687_v44  ;;  %v613_v49 = vmul.f32 %v8847_v42, %v8847_v42 }
  0xc0   : > { %v567_v19 = vpop.xlane.xlu0 %566  ;;  %v598_v50 = vmul.f32 0.03125, %v570_v9  ;;  %v732_v55 = vadd.f32 %v8833_v10, %v710_v48 }
  0xc1   : > { %v597_v53 = vmul.f32 0.03125, %v567_v19  ;;  %v731_v54 = vadd.f32 %v8833_v10, %v709_v27 }
  0xc2   : > { %v630_v56 = vsub.f32 %v598_v50, %v614_v0 }
  0xc3   : > { %v629_v57 = vsub.f32 %v597_v53, %v613_v49  ;;  %v8104_v58 = vpop.eup %8103  ;;  %7300 = vmatprep.mubr.msk.f32.mxu0 %vm459_vm0, %v731_v54  ;;  %v495_v63 = vpop.xlane.xlu1 %494 }
  0xc4   : > { %v492_v4 = vpop.xlane.xlu0 %491  ;;  %v8106_v5 = vpop.eup %8105  ;;  %v662_v8 = vadd.f32 1e-05, %v630_v56  ;;  %v8864_v1 = vmul.f32 0.03125, %v495_v63  ;;  %7301 = vmatmul.mubr.msk.f32.gmra.mxu0 %vm459_vm0, %v732_v55  ;;  %v690_v14 = vmul.f32 %v8104_v58, %v642_v59  ;;  %v646_v55 = vsub.f32 %v8726_v32, %v8845_v39 }
  0xc5   : > { %v661_v11 = vadd.f32 1e-05, %v629_v57  ;;  %v8867_v12 = vmul.f32 0.03125, %v492_v4  ;;  %v689_v13 = vmul.f32 %v8106_v5, %v641_v62  ;;  %v645_v56 = vsub.f32 %v8729_v33, %v8847_v42 }
  0xc6   : > { %8111 = vrsqrt.f32 %v662_v8  ;;  %v616_v16 = vmul.f32 %v8864_v1, %v8864_v1  ;;  %v712_v18 = vmul.f32 %v8821_v3, %v690_v14 }
  0xc7   : > { %8113 = vrsqrt.f32 %v661_v11  ;;  %v576_v17 = vpop.xlane.xlu1 %575  ;;  %v711_v47 = vmul.f32 %v8821_v3, %v689_v13  ;;  %v615_v20 = vmul.f32 %v8867_v12, %v8867_v12 }
  0xc8   : > { %v573_v46 = vpop.xlane.xlu0 %572  ;;  %v600_v21 = vmul.f32 0.03125, %v576_v17  ;;  %v734_v22 = vadd.f32 %v8833_v10, %v712_v18  ;;  %v648_v18 = vsub.f32 %v8742_v40, %v8864_v1 }
  0xc9   : > { %v599_v2 = vmul.f32 0.03125, %v573_v46  ;;  %v733_v15 = vadd.f32 %v8833_v10, %v711_v47 }
  0xca   : > { %v632_v23 = vsub.f32 %v600_v21, %v616_v16 }
  0xcb   : > { %v631_v26 = vsub.f32 %v599_v2, %v615_v20  ;;  %v8108_v28 = vpop.eup %8107  ;;  %7303 = vmatprep.mubr.msk.f32.mxu0 %vm459_vm0, %v733_v15  ;;  %v501_v31 = vpop.xlane.xlu1 %500  ;;  %v647_v15 = vsub.f32 %v8745_v41, %v8867_v12 }
  0xcc   : > { %v498_v34 = vpop.xlane.xlu0 %497  ;;  %v8110_v35 = vpop.eup %8109  ;;  %v664_v36 = vadd.f32 1e-05, %v632_v23  ;;  %v8882_v38 = vmul.f32 0.03125, %v501_v31  ;;  %7304 = vmatmul.mubr.msk.f32.gmra.mxu0 %vm459_vm0, %v734_v22  ;;  %v692_v45 = vmul.f32 %v8108_v28, %v644_v29 }
  0xcd   : > { %v663_v37 = vadd.f32 1e-05, %v631_v26  ;;  %v8885_v43 = vmul.f32 0.03125, %v498_v34  ;;  %v691_v44 = vmul.f32 %v8110_v35, %v643_v30 }
  0xce   : > { %8115 = vrsqrt.f32 %v664_v36  ;;  %v618_v24 = vmul.f32 %v8882_v38, %v8882_v38  ;;  %v714_v0 = vmul.f32 %v8821_v3, %v692_v45  ;;  %v650_v41 = vsub.f32 %v8767_v51, %v8882_v38 }
  0xcf   : > { %8117 = vrsqrt.f32 %v663_v37  ;;  %v582_v25 = vpop.xlane.xlu1 %581  ;;  %v713_v7 = vmul.f32 %v8821_v3, %v691_v44  ;;  %v617_v9 = vmul.f32 %v8885_v43, %v8885_v43  ;;  %v649_v34 = vsub.f32 %v8770_v52, %v8885_v43 }
  0xd0   : > { %v579_v6 = vpop.xlane.xlu0 %578  ;;  %v602_v19 = vmul.f32 0.03125, %v582_v25  ;;  %v736_v49 = vadd.f32 %v8833_v10, %v714_v0 }
  0xd1   : > { %v601_v27 = vmul.f32 0.03125, %v579_v6  ;;  %v735_v48 = vadd.f32 %v8833_v10, %v713_v7 }
  0xd2   : > { %v634_v50 = vsub.f32 %v602_v19, %v618_v24 }
  0xd3   : > { %v633_v53 = vsub.f32 %v601_v27, %v617_v9  ;;  %v8112_v54 = vpop.eup %8111  ;;  %7306 = vmatprep.mubr.msk.f32.mxu0 %vm459_vm0, %v735_v48  ;;  %v507_v57 = vpop.xlane.xlu1 %506 }
  0xd4   : > { %v504_v58 = vpop.xlane.xlu0 %503  ;;  %v8114_v59 = vpop.eup %8113  ;;  %v666_v62 = vadd.f32 1e-05, %v634_v50  ;;  %v524_v4 = vmul.f32 0.03125, %v507_v57  ;;  %7307 = vmatmul.mubr.msk.f32.gmra.mxu0 %vm459_vm0, %v736_v49  ;;  %v694_v11 = vmul.f32 %v8112_v54, %v646_v55 }
  0xd5   : > { %v665_v63 = vadd.f32 1e-05, %v633_v53  ;;  %v523_v5 = vmul.f32 0.03125, %v504_v58  ;;  %v693_v8 = vmul.f32 %v8114_v59, %v645_v56 }
  0xd6   : > { %8119 = vrsqrt.f32 %v666_v62  ;;  %v620_v13 = vmul.f32 %v524_v4, %v524_v4  ;;  %v716_v42 = vmul.f32 %v8821_v3, %v694_v11  ;;  %v652_v51 = vsub.f32 %v8786_v60, %v524_v4 }
  0xd7   : > { %8121 = vrsqrt.f32 %v665_v63  ;;  %v588_v32 = vpop.xlane.xlu1 %587  ;;  %v715_v33 = vmul.f32 %v8821_v3, %v693_v8  ;;  %v619_v14 = vmul.f32 %v523_v5, %v523_v5  ;;  %v651_v52 = vsub.f32 %v8789_v61, %v523_v5 }
  0xd8   : > { %v585_v39 = vpop.xlane.xlu0 %584  ;;  %v604_v16 = vmul.f32 0.03125, %v588_v32  ;;  %v738_v47 = vadd.f32 %v8833_v10, %v716_v42 }
  0xd9   : > { %v603_v17 = vmul.f32 0.03125, %v585_v39  ;;  %v737_v46 = vadd.f32 %v8833_v10, %v715_v33 }
  0xda   : > { %v636_v20 = vsub.f32 %v604_v16, %v620_v13 }
  0xdb   : > { %v635_v21 = vsub.f32 %v603_v17, %v619_v14  ;;  %v8116_v2 = vpop.eup %8115  ;;  %7309 = vmatprep.mubr.msk.f32.mxu0 %vm459_vm0, %v737_v46 }
  0xdc   : > { %v8118_v22 = vpop.eup %8117  ;;  %v668_v23 = vadd.f32 1e-05, %v636_v20  ;;  %7310 = vmatmul.mubr.msk.f32.gmra.mxu0 %vm459_vm0, %v738_v47  ;;  %v696_v28 = vmul.f32 %v8116_v2, %v648_v18 }
  0xdd   : > { %v667_v26 = vadd.f32 1e-05, %v635_v21  ;;  %v695_v29 = vmul.f32 %v8118_v22, %v647_v15 }
  0xde   : > { %8123 = vrsqrt.f32 %v668_v23  ;;  %v718_v30 = vmul.f32 %v8821_v3, %v696_v28 }
  0xdf   : > { %8125 = vrsqrt.f32 %v667_v26  ;;  %v717_v40 = vmul.f32 %v8821_v3, %v695_v29 }
  0xe0   : > { %v740_v1 = vadd.f32 %v8833_v10, %v718_v30 }
  0xe1   : > { %v739_v31 = vadd.f32 %v8833_v10, %v717_v40 }
  0xe3   : > { %v8120_v12 = vpop.eup %8119  ;;  %7312 = vmatprep.mubr.msk.f32.mxu0 %vm459_vm0, %v739_v31 }
  0xe4   : > { %v8122_v35 = vpop.eup %8121  ;;  %7313 = vmatmul.mubr.msk.f32.gmra.mxu0 %vm459_vm0, %v740_v1  ;;  %v698_v36 = vmul.f32 %v8120_v12, %v650_v41 }
  0xe5   : > { %v697_v37 = vmul.f32 %v8122_v35, %v649_v34 }
  0xe6   : > { %v720_v44 = vmul.f32 %v8821_v3, %v698_v36 }
  0xe7   : > { %v719_v45 = vmul.f32 %v8821_v3, %v697_v37 }
  0xe8   : > { %v742_v24 = vadd.f32 %v8833_v10, %v720_v44  ;;  %v943_v44 = vld [vmem:[%s11782_s2 + $0x8] sm:$0xff] }
  0xe9   : > { %v741_v25 = vadd.f32 %v8833_v10, %v719_v45 }
  0xeb   : > { %v8124_v38 = vpop.eup %8123  ;;  %7315 = vmatprep.mubr.msk.f32.mxu0 %vm459_vm0, %v741_v25 }
  0xec   : > { %v8126_v43 = vpop.eup %8125  ;;  %7316 = vmatmul.mubr.msk.f32.gmra.mxu0 %vm459_vm0, %v742_v24  ;;  %v700_v6 = vmul.f32 %v8124_v38, %v652_v51  ;;  %v942_v24 = vld [vmem:[%s11782_s2] sm:$0xff] }
  0xed   : > { %v699_v7 = vmul.f32 %v8126_v43, %v651_v52  ;;  %v945_v52 = vld [vmem:[%s11782_s2 + $0x18] sm:$0xff] }
  0xee   : > { %v722_v0 = vmul.f32 %v8821_v3, %v700_v6 }
  0xef   : > { %v721_v9 = vmul.f32 %v8821_v3, %v699_v7  ;;  %v947_v7 = vld [vmem:[%s11782_s2 + $0x28] sm:$0xff] }
  0xf0   : > { %v744_v19 = vadd.f32 %v8833_v10, %v722_v0 }
  0xf1   : > { %v743_v27 = vadd.f32 %v8833_v10, %v721_v9 }
  0xf3   : > { %7318 = vmatprep.mubr.msk.f32.mxu0 %vm459_vm0, %v743_v27 }
  0xf4   : > { %7319 = vmatmul.mubr.msk.f32.gmra.mxu0 %vm459_vm0, %v744_v19  ;;  %v944_v19 = vld [vmem:[%s11782_s2 + $0x10] sm:$0xff] }
 0x17e   : > { %v8935_v60 = vpop.f32.mrf.mxu0 }
 0x180   : > { %v8937_v61 = vpop.f32.mrf.mxu0 }
 0x181   : > { %7353 = vmatprep.mubr.msk.f32.mxu1 %vm1006_vm1, %v8937_v61 }
 0x184   : > { %v8941_v48 = vpop.f32.mrf.mxu0 }
 0x186   : > { %v8943_v49 = vpop.f32.mrf.mxu0 }
 0x18c   : > { %v8945_v3 = vpop.f32.mrf.mxu0 }
 0x18e   : > { %v8947_v50 = vpop.f32.mrf.mxu0 }
 0x194   : > { %v8949_v10 = vpop.f32.mrf.mxu0 }
 0x196   : > { %v8951_v53 = vpop.f32.mrf.mxu0 }
 0x19c   : > { %v8953_v54 = vpop.f32.mrf.mxu0 }
 0x19e   : > { %v8955_v55 = vpop.f32.mrf.mxu0 }
 0x1a4   : > { %v8957_v56 = vpop.f32.mrf.mxu0 }
 0x1a6   : > { %v8959_v57 = vpop.f32.mrf.mxu0 }
 0x1ac   : > { %v8961_v58 = vpop.f32.mrf.mxu0 }
 0x1ae   : > { %v8963_v59 = vpop.f32.mrf.mxu0 }
 0x1b4   : > { %v8965_v62 = vpop.f32.mrf.mxu0 }
 0x1b5   : > { %1004 = vrot.lane.b32.xlu0 %v8965_v62, %s8567_s29 }
 0x1b6   : > { %v8969_v63 = vpop.f32.mrf.mxu0 }
 0x1b7   : > { %1002 = vrot.lane.b32.xlu1 %v8969_v63, %s8567_s29 }
 0x1b9   : > { %996 = vrot.lane.b32.xlu0 %v8957_v56, %s8567_s29 }
 0x1bb   : > { %1000 = vrot.lane.b32.xlu1 %v8961_v58, %s8567_s29 }
 0x1bd   : > { %992 = vrot.lane.b32.xlu0 %v8953_v54, %s8567_s29 }
 0x1bf   : > { %998 = vrot.lane.b32.xlu1 %v8963_v59, %s8567_s29 }
 0x1c1   : > { %988 = vrot.lane.b32.xlu0 %v8949_v10, %s8567_s29 }
 0x1c3   : > { %994 = vrot.lane.b32.xlu1 %v8959_v57, %s8567_s29 }
 0x1c5   : > { %984 = vrot.lane.b32.xlu0 %v8945_v3, %s8567_s29 }
 0x1c7   : > { %990 = vrot.lane.b32.xlu1 %v8955_v55, %s8567_s29 }
 0x1c9   : > { %980 = vrot.lane.b32.xlu0 %v8941_v48, %s8567_s29 }
 0x1cb   : > { %986 = vrot.lane.b32.xlu1 %v8951_v53, %s8567_s29 }
 0x1cd   : > { %976 = vrot.lane.b32.xlu0 %v8935_v60, %s8567_s29 }
 0x1cf   : > { %982 = vrot.lane.b32.xlu1 %v8947_v50, %s8567_s29 }
 0x1d1   : > { %1390 = vrot.lane.b32.xlu0 %v8965_v62, %s8568_s14 }
 0x1d3   : > { %978 = vrot.lane.b32.xlu1 %v8943_v49, %s8567_s29 }
 0x1d5   : > { %1386 = vrot.lane.b32.xlu0 %v8961_v58, %s8568_s14 }
 0x1d7   : > { %974 = vrot.lane.b32.xlu1 %v8937_v61, %s8567_s29 }
 0x1d9   : > { %1382 = vrot.lane.b32.xlu0 %v8957_v56, %s8568_s14 }
 0x1db   : > { %1384 = vrot.lane.b32.xlu1 %v8963_v59, %s8568_s14 }
 0x1dd   : > { %1374 = vrot.lane.b32.xlu0 %v8949_v10, %s8568_s14 }
 0x1df   : > { %1380 = vrot.lane.b32.xlu1 %v8959_v57, %s8568_s14 }
 0x1e1   : > { %1370 = vrot.lane.b32.xlu0 %v8945_v3, %s8568_s14 }
 0x1e3   : > { %1378 = vrot.lane.b32.xlu1 %v8953_v54, %s8568_s14 }
 0x1e5   : > { %1366 = vrot.lane.b32.xlu0 %v8941_v48, %s8568_s14 }
 0x1e7   : > { %1376 = vrot.lane.b32.xlu1 %v8955_v55, %s8568_s14 }
 0x1e9   : > { %1362 = vrot.lane.b32.xlu0 %v8935_v60, %s8568_s14 }
 0x1eb   : > { %1372 = vrot.lane.b32.xlu1 %v8951_v53, %s8568_s14 }
 0x1ed   : > { %1632 = vrot.lane.b32.xlu0 %v8965_v62, %s8569_s15 }
 0x1ef   : > { %1368 = vrot.lane.b32.xlu1 %v8947_v50, %s8568_s14 }
 0x1f1   : > { %1628 = vrot.lane.b32.xlu0 %v8961_v58, %s8569_s15 }
 0x1f3   : > { %1364 = vrot.lane.b32.xlu1 %v8943_v49, %s8568_s14 }
 0x1f5   : > { %1624 = vrot.lane.b32.xlu0 %v8957_v56, %s8569_s15 }
 0x1f7   : > { %1360 = vrot.lane.b32.xlu1 %v8937_v61, %s8568_s14 }
 0x1fb   : > { %1626 = vrot.lane.b32.xlu1 %v8963_v59, %s8569_s15 }
 0x1ff   : > { %1388 = vrot.lane.b32.xlu1 %v8969_v63, %s8568_s14 }
 0x203   : > { %1630 = vrot.lane.b32.xlu1 %v8969_v63, %s8569_s15 }
 0x227   : > { %v1005_v4 = vpop.permute.xlu0 %1004 }
 0x228   : > { %7321 = vmatprep.subr.msk.mxu1 %vm1006_vm1, %v1005_v4 }
 0x229   : > { %7322 = vmatpush3.xpose.msk.msra.mxu1 %vm1006_vm1, %v1005_v4  ;;  %v1003_v5 = vpop.permute.xlu1 %1002 }
 0x22a   : > { %7323 = vmatprep.subr.msk.mxu1 %vm1006_vm1, %v1003_v5 }
 0x22b   : > { %v997_v8 = vpop.permute.xlu0 %996 }
 0x22d   : > { %7324 = vmatpush3.xpose.msk.msra.mxu1 %vm1006_vm1, %v1003_v5  ;;  %v1001_v11 = vpop.permute.xlu1 %1000  ;;  %v949_v5 = vld [vmem:[%s11782_s2 + $0x38] sm:$0xff] }
 0x22e   : > { %7325 = vmatprep.subr.msk.mxu1 %vm1006_vm1, %v1001_v11 }
 0x22f   : > { %v993_v13 = vpop.permute.xlu0 %992 }
 0x231   : > { %7326 = vmatpush3.xpose.msk.msra.mxu1 %vm1006_vm1, %v1001_v11  ;;  %v999_v32 = vpop.permute.xlu1 %998 }
 0x232   : > { %7327 = vmatprep.subr.msk.mxu1 %vm1006_vm1, %v999_v32 }
 0x233   : > { %v989_v39 = vpop.permute.xlu0 %988 }
 0x235   : > { %7328 = vmatpush3.xpose.msk.msra.mxu1 %vm1006_vm1, %v999_v32  ;;  %v995_v33 = vpop.permute.xlu1 %994 }
 0x236   : > { %7329 = vmatprep.subr.msk.mxu1 %vm1006_vm1, %v997_v8 }
 0x237   : > { %v985_v42 = vpop.permute.xlu0 %984 }
 0x239   : > { %7330 = vmatpush3.xpose.msk.msra.mxu1 %vm1006_vm1, %v997_v8  ;;  %v991_v14 = vpop.permute.xlu1 %990 }
 0x23a   : > { %7331 = vmatprep.subr.msk.mxu1 %vm1006_vm1, %v995_v33 }
 0x23b   : > { %v981_v16 = vpop.permute.xlu0 %980 }
 0x23d   : > { %7332 = vmatpush3.xpose.msk.msra.mxu1 %vm1006_vm1, %v995_v33  ;;  %v987_v17 = vpop.permute.xlu1 %986  ;;  %v951_v33 = vld [vmem:[%s11782_s2 + $0x48] sm:$0xff] }
 0x23e   : > { %7333 = vmatprep.subr.msk.mxu1 %vm1006_vm1, %v993_v13 }
 0x23f   : > { %v977_v46 = vpop.permute.xlu0 %976 }
 0x241   : > { %7334 = vmatpush3.xpose.msk.msra.mxu1 %vm1006_vm1, %v993_v13  ;;  %v983_v47 = vpop.permute.xlu1 %982  ;;  %v946_v13 = vld [vmem:[%s11782_s2 + $0x20] sm:$0xff] }
 0x242   : > { %7335 = vmatprep.subr.msk.mxu1 %vm1006_vm1, %v991_v14 }
 0x243   : > { %v1391_v18 = vpop.permute.xlu0 %1390 }
 0x244   : > { %7377 = vmatprep.subr.mxu0 %v1391_v18 }
 0x245   : > { %7336 = vmatpush3.xpose.msk.msra.mxu1 %vm1006_vm1, %v991_v14  ;;  %7378 = vmatpush3.msra.mxu0 %v1391_v18  ;;  %v979_v20 = vpop.permute.xlu1 %978 }
 0x246   : > { %7337 = vmatprep.subr.msk.mxu1 %vm1006_vm1, %v989_v39 }
 0x247   : > { %v1387_v40 = vpop.permute.xlu0 %1386 }
 0x249   : > { %7338 = vmatpush3.xpose.msk.msra.mxu1 %vm1006_vm1, %v989_v39  ;;  %v975_v21 = vpop.permute.xlu1 %974 }
 0x24a   : > { %7339 = vmatprep.subr.msk.mxu1 %vm1006_vm1, %v987_v17 }
 0x24b   : > { %v1383_v31 = vpop.permute.xlu0 %1382 }
 0x24d   : > { %7340 = vmatpush3.xpose.msk.msra.mxu1 %vm1006_vm1, %v987_v17  ;;  %v1385_v2 = vpop.permute.xlu1 %1384 }
 0x24e   : > { %7341 = vmatprep.subr.msk.mxu1 %vm1006_vm1, %v985_v42 }
 0x24f   : > { %v1375_v12 = vpop.permute.xlu0 %1374 }
 0x251   : > { %7342 = vmatpush3.xpose.msk.msra.mxu1 %vm1006_vm1, %v985_v42  ;;  %v1381_v15 = vpop.permute.xlu1 %1380 }
 0x252   : > { %7343 = vmatprep.subr.msk.mxu1 %vm1006_vm1, %v983_v47 }
 0x253   : > { %v1371_v34 = vpop.permute.xlu0 %1370 }
 0x255   : > { %7344 = vmatpush3.xpose.msk.msra.mxu1 %vm1006_vm1, %v983_v47  ;;  %v1379_v22 = vpop.permute.xlu1 %1378  ;;  %v953_v47 = vld [vmem:[%s11782_s2 + $0x58] sm:$0xff] }
 0x256   : > { %7345 = vmatprep.subr.msk.mxu1 %vm1006_vm1, %v981_v16 }
 0x257   : > { %v1367_v35 = vpop.permute.xlu0 %1366 }
 0x259   : > { %7346 = vmatpush3.xpose.msk.msra.mxu1 %vm1006_vm1, %v981_v16  ;;  %v1377_v23 = vpop.permute.xlu1 %1376  ;;  %v948_v16 = vld [vmem:[%s11782_s2 + $0x30] sm:$0xff] }
 0x25a   : > { %7347 = vmatprep.subr.msk.mxu1 %vm1006_vm1, %v979_v20 }
 0x25b   : > { %v1363_v36 = vpop.permute.xlu0 %1362 }
 0x25d   : > { %7348 = vmatpush3.xpose.msk.msra.mxu1 %vm1006_vm1, %v979_v20  ;;  %v1373_v26 = vpop.permute.xlu1 %1372 }
 0x25e   : > { %7349 = vmatprep.subr.msk.mxu1 %vm1006_vm1, %v977_v46 }
 0x25f   : > { %v9107_v37 = vpop.permute.xlu0 %1632 }
 0x261   : > { %7350 = vmatpush3.xpose.msk.msra.mxu1 %vm1006_vm1, %v977_v46  ;;  %v1369_v28 = vpop.permute.xlu1 %1368 }
 0x262   : > { %7351 = vmatprep.subr.msk.mxu1 %vm1006_vm1, %v975_v21 }
 0x265   : > { %7352 = vmatpush3.xpose.msk.msra.mxu1 %vm1006_vm1, %v975_v21  ;;  %v1365_v29 = vpop.permute.xlu1 %1364  ;;  %v950_v21 = vld [vmem:[%s11782_s2 + $0x40] sm:$0xff] }
 0x268   : > { %7354 = vmatmul.mubr.msk.f32.vlgmr.msra.gmra.mxu1 %vm1006_vm1, %v8935_v60 }
 0x269   : > { %7356 = vmatprep.mubr.msk.f32.mxu1 %vm1006_vm1, %v8943_v49  ;;  %v1361_v30 = vpop.permute.xlu1 %1360 }
 0x26c   : > { %7357 = vmatmul.mubr.msk.f32.gmra.mxu1 %vm1006_vm1, %v8941_v48 }
 0x26d   : > { %7359 = vmatprep.mubr.msk.f32.mxu1 %vm1006_vm1, %v8947_v50  ;;  %v9083_v1 = vpop.permute.xlu1 %1626 }
 0x270   : > { %7360 = vmatmul.mubr.msk.f32.gmra.mxu1 %vm1006_vm1, %v8945_v3 }
 0x271   : > { %7362 = vmatprep.mubr.msk.f32.mxu1 %vm1006_vm1, %v8951_v53  ;;  %v1389_v41 = vpop.permute.xlu1 %1388 }
 0x272   : > { %7379 = vmatprep.subr.mxu0 %v1389_v41 }
 0x273   : > { %7380 = vmatpush3.msra.mxu0 %v1389_v41 }
 0x274   : > { %7363 = vmatmul.mubr.msk.f32.gmra.mxu1 %vm1006_vm1, %v8949_v10  ;;  %7381 = vmatprep.subr.mxu0 %v1387_v40 }
 0x275   : > { %7365 = vmatprep.mubr.msk.f32.mxu1 %vm1006_vm1, %v8955_v55  ;;  %7382 = vmatpush3.msra.mxu0 %v1387_v40  ;;  %v957_v40 = vld [vmem:[%s11782_s2 + $0x78] sm:$0xff] }
 0x276   : > { %7383 = vmatprep.subr.mxu0 %v1385_v2 }
 0x277   : > { %7384 = vmatpush3.msra.mxu0 %v1385_v2 }
 0x278   : > { %7366 = vmatmul.mubr.msk.f32.gmra.mxu1 %vm1006_vm1, %v8953_v54  ;;  %7385 = vmatprep.subr.mxu0 %v1383_v31 }
 0x279   : > { %7368 = vmatprep.mubr.msk.f32.mxu1 %vm1006_vm1, %v8959_v57  ;;  %7386 = vmatpush3.msra.mxu0 %v1383_v31 }
 0x27a   : > { %7387 = vmatprep.subr.mxu0 %v1381_v15 }
 0x27b   : > { %7388 = vmatpush3.msra.mxu0 %v1381_v15 }
 0x27c   : > { %7369 = vmatmul.mubr.msk.f32.gmra.mxu1 %vm1006_vm1, %v8957_v56  ;;  %7389 = vmatprep.subr.mxu0 %v1379_v22 }
 0x27d   : > { %7371 = vmatprep.mubr.msk.f32.mxu1 %vm1006_vm1, %v8963_v59  ;;  %7390 = vmatpush3.msra.mxu0 %v1379_v22  ;;  %v955_v22 = vld [vmem:[%s11782_s2 + $0x68] sm:$0xff] }
 0x27e   : > { %7391 = vmatprep.subr.mxu0 %v1377_v23 }
 0x27f   : > { %7392 = vmatpush3.msra.mxu0 %v1377_v23 }
 0x280   : > { %7372 = vmatmul.mubr.msk.f32.gmra.mxu1 %vm1006_vm1, %v8961_v58  ;;  %7393 = vmatprep.subr.mxu0 %v1375_v12 }
 0x281   : > { %7374 = vmatprep.mubr.msk.f32.mxu1 %vm1006_vm1, %v8969_v63  ;;  %7394 = vmatpush3.msra.mxu0 %v1375_v12  ;;  %v954_v12 = vld [vmem:[%s11782_s2 + $0x60] sm:$0xff] }
 0x282   : > { %7395 = vmatprep.subr.mxu0 %v1373_v26 }
 0x283   : > { %7396 = vmatpush3.msra.mxu0 %v1373_v26 }
 0x284   : > { %7375 = vmatmul.mubr.msk.f32.gmra.mxu1 %vm1006_vm1, %v8965_v62  ;;  %7397 = vmatprep.subr.mxu0 %v1371_v34 }
 0x285   : > { %7398 = vmatpush3.msra.mxu0 %v1371_v34 }
 0x286   : > { %7399 = vmatprep.subr.mxu0 %v1369_v28 }
 0x287   : > { %7400 = vmatpush3.msra.mxu0 %v1369_v28  ;;  %v952_v28 = vld [vmem:[%s11782_s2 + $0x50] sm:$0xff] }
 0x288   : > { %7401 = vmatprep.subr.mxu0 %v1367_v35 }
 0x289   : > { %7402 = vmatpush3.msra.mxu0 %v1367_v35 }
 0x28a   : > { %7403 = vmatprep.subr.mxu0 %v1365_v29 }
 0x28b   : > { %7404 = vmatpush3.msra.mxu0 %v1365_v29 }
 0x28c   : > { %7405 = vmatprep.subr.mxu0 %v1363_v36 }
 0x28d   : > { %7406 = vmatpush3.msra.mxu0 %v1363_v36 }
 0x28e   : > { %7407 = vmatprep.subr.mxu0 %v1361_v30 }
 0x28f   : > { %7408 = vmatpush3.msra.mxu0 %v1361_v30 }
 0x290   : > { %7433 = vmatprep.subr.msk.mxu0 %vm1006_vm1, %v9107_v37 }
 0x328   : > { %v7355_v45 = vpop.f32.mrf.mxu1 }
 0x329   : > { %v9117_v25 = vadd.f32 %v7355_v45, %v943_v44  ;;  %v956_v44 = vld [vmem:[%s11782_s2 + $0x70] sm:$0xff] }
 0x32a   : > { %v1137_v51 = vpop.f32.mrf.mxu1 }
 0x32b   : > { %1218 = vmax.xlane.f32.xlu1 %v9117_v25  ;;  %v9120_v38 = vadd.f32 %v1137_v51, %v942_v24  ;;  %v9219_v24 = vpop.permute.xlu0 %1628  ;;  %v9221_v51 = vpop.permute.xlu1 %1630 }
 0x32c   : > { %v7358_v43 = vpop.f32.mrf.mxu1 }
 0x32d   : > { %1216 = vmax.xlane.f32.xlu0 %v9120_v38  ;;  %v9129_v0 = vadd.f32 %v7358_v43, %v945_v52 }
 0x32e   : > { %v1147_v6 = vpop.f32.mrf.mxu1 }
 0x32f   : > { %v9141_v8 = vadd.f32 %v1147_v6, %v944_v19  ;;  %v9223_v52 = vpop.permute.xlu0 %1624 }
 0x330   : > { %v7361_v9 = vpop.f32.mrf.mxu1 }
 0x331   : > { %v9134_v27 = vadd.f32 %v7361_v9, %v947_v7  ;;  %1222 = vmax.xlane.f32.xlu0 %v9129_v0 }
 0x332   : > { %v1157_v4 = vpop.f32.mrf.mxu1 }
 0x333   : > { %1226 = vmax.xlane.f32.xlu1 %v9134_v27  ;;  %v9153_v42 = vadd.f32 %v1157_v4, %v946_v13 }
 0x334   : > { %v7364_v11 = vpop.f32.mrf.mxu1 }
 0x335   : > { %v9146_v32 = vadd.f32 %v7364_v11, %v949_v5  ;;  %1220 = vmax.xlane.f32.xlu0 %v9141_v8 }
 0x336   : > { %v1167_v39 = vpop.f32.mrf.mxu1 }
 0x337   : > { %1230 = vmax.xlane.f32.xlu1 %v9146_v32  ;;  %v9165_v18 = vadd.f32 %v1167_v39, %v948_v16 }
 0x338   : > { %v7367_v14 = vpop.f32.mrf.mxu1 }
 0x339   : > { %v9158_v17 = vadd.f32 %v7367_v14, %v951_v33  ;;  %1224 = vmax.xlane.f32.xlu0 %v9153_v42 }
 0x33a   : > { %v1177_v46 = vpop.f32.mrf.mxu1 }
 0x33b   : > { %1234 = vmax.xlane.f32.xlu1 %v9158_v17  ;;  %v9177_v23 = vadd.f32 %v1177_v46, %v950_v21 }
 0x33c   : > { %v7370_v20 = vpop.f32.mrf.mxu1 }
 0x33d   : > { %v9170_v2 = vadd.f32 %v7370_v20, %v953_v47  ;;  %1228 = vmax.xlane.f32.xlu0 %v9165_v18 }
 0x33e   : > { %v1187_v15 = vpop.f32.mrf.mxu1 }
 0x33f   : > { %1238 = vmax.xlane.f32.xlu1 %v9170_v2  ;;  %v9189_v31 = vadd.f32 %v1187_v15, %v952_v28 }
 0x340   : > { %v7373_v26 = vpop.f32.mrf.mxu1 }
 0x341   : > { %v9182_v29 = vadd.f32 %v7373_v26, %v955_v22  ;;  %1232 = vmax.xlane.f32.xlu0 %v9177_v23 }
 0x342   : > { %v1197_v30 = vpop.f32.mrf.mxu1 }
 0x343   : > { %1242 = vmax.xlane.f32.xlu1 %v9182_v29  ;;  %v9198_v35 = vadd.f32 %v1197_v30, %v954_v12 }
 0x344   : > { %v7376_v41 = vpop.f32.mrf.mxu1 }
 0x345   : > { %v9194_v34 = vadd.f32 %v7376_v41, %v957_v40  ;;  %1236 = vmax.xlane.f32.xlu0 %v9189_v31 }
 0x346   : > { %v1207_v36 = vpop.f32.mrf.mxu1 }
 0x347   : > { %1246 = vmax.xlane.f32.xlu1 %v9194_v34  ;;  %v9204_v45 = vadd.f32 %v1207_v36, %v956_v44 }
 0x349   : > { %1240 = vmax.xlane.f32.xlu0 %v9198_v35 }
 0x34d   : > { %1244 = vmax.xlane.f32.xlu0 %v9204_v45 }
 0x358   : > { %1620 = vrot.lane.b32.xlu1 %v8953_v54, %s8569_s15 }
 0x35c   : > { %1616 = vrot.lane.b32.xlu1 %v8949_v10, %s8569_s15 }
 0x360   : > { %1614 = vrot.lane.b32.xlu1 %v8951_v53, %s8569_s15 }
 0x363   : > { %1622 = vrot.lane.b32.xlu0 %v8959_v57, %s8569_s15 }
 0x364   : > { %1612 = vrot.lane.b32.xlu1 %v8945_v3, %s8569_s15 }
 0x368   : > { %1610 = vrot.lane.b32.xlu1 %v8947_v50, %s8569_s15 }
 0x3b4   : > { %v1219_v43 = vpop.xlane.xlu1 %1218 }
 0x3b5   : > { %v1249_v6 = vsub.f32 %v9117_v25, %v1219_v43 }
 0x3b6   : > { %v1217_v7 = vpop.xlane.xlu0 %1216 }
 0x3b7   : > { %v1266_v9 = vmul.f32 1.442695, %v1249_v6  ;;  %v1248_v19 = vsub.f32 %v9120_v38, %v1217_v7 }
 0x3b9   : > { %8127 = vpow2.f32 %v1266_v9  ;;  %v1264_v4 = vmul.f32 1.442695, %v1248_v19 }
 0x3ba   : > { %v1223_v5 = vpop.xlane.xlu0 %1222 }
 0x3bb   : > { %8129 = vpow2.f32 %v1264_v4  ;;  %v1251_v11 = vsub.f32 %v9129_v0, %v1223_v5 }
 0x3bc   : > { %v1227_v13 = vpop.xlane.xlu1 %1226 }
 0x3bd   : > { %v1270_v39 = vmul.f32 1.442695, %v1251_v11  ;;  %v1253_v33 = vsub.f32 %v9134_v27, %v1227_v13 }
 0x3be   : > { %v1221_v14 = vpop.xlane.xlu0 %1220 }
 0x3bf   : > { %8131 = vpow2.f32 %v1270_v39  ;;  %v1274_v16 = vmul.f32 1.442695, %v1253_v33  ;;  %v1250_v19 = vsub.f32 %v9141_v8, %v1221_v14 }
 0x3c0   : > { %v1231_v46 = vpop.xlane.xlu1 %1230 }
 0x3c1   : > { %8133 = vpow2.f32 %v1274_v16  ;;  %v1255_v25 = vsub.f32 %v9146_v32, %v1231_v46  ;;  %v1268_v11 = vmul.f32 1.442695, %v1250_v19 }
 0x3c2   : > { %v1225_v47 = vpop.xlane.xlu0 %1224 }
 0x3c3   : > { %v1252_v38 = vsub.f32 %v9153_v42, %v1225_v47  ;;  %v1278_v0 = vmul.f32 1.442695, %v1255_v25 }
 0x3c4   : > { %v1235_v20 = vpop.xlane.xlu1 %1234 }
 0x3c5   : > { %v1272_v21 = vmul.f32 1.442695, %v1252_v38  ;;  %v1257_v26 = vsub.f32 %v9158_v17, %v1235_v20 }
 0x3c6   : > { %v9231_v15 = vpop.eup %8127  ;;  %v1229_v22 = vpop.xlane.xlu0 %1228 }
 0x3c7   : > { %8135 = vpow2.f32 %v1272_v21  ;;  %1298 = vadd.xlane.f32.xlu0 %v9231_v15  ;;  %v1282_v32 = vmul.f32 1.442695, %v1257_v26  ;;  %v1254_v13 = vsub.f32 %v9165_v18, %v1229_v22 }
 0x3c8   : > { %v9235_v27 = vpop.eup %8129  ;;  %8137 = vpow2.f32 %v1278_v0  ;;  %v1239_v4 = vpop.xlane.xlu1 %1238 }
 0x3c9   : > { %1296 = vadd.xlane.f32.xlu1 %v9235_v27  ;;  %8139 = vpow2.f32 %v1282_v32  ;;  %v1276_v33 = vmul.f32 1.442695, %v1254_v13  ;;  %v1259_v16 = vsub.f32 %v9170_v2, %v1239_v4 }
 0x3ca   : > { %v1233_v28 = vpop.xlane.xlu0 %1232 }
 0x3cb   : > { %v1256_v42 = vsub.f32 %v9177_v23, %v1233_v28  ;;  %v1286_v46 = vmul.f32 1.442695, %v1259_v16 }
 0x3cc   : > { %v9239_v30 = vpop.eup %8131  ;;  %v1243_v39 = vpop.xlane.xlu1 %1242 }
 0x3cd   : > { %1302 = vadd.xlane.f32.xlu1 %v9239_v30  ;;  %v1280_v41 = vmul.f32 1.442695, %v1256_v42  ;;  %v1261_v47 = vsub.f32 %v9182_v29, %v1243_v39 }
 0x3ce   : > { %v1237_v40 = vpop.xlane.xlu0 %1236  ;;  %v9243_v12 = vpop.eup %8133 }
 0x3cf   : > { %v1258_v17 = vsub.f32 %v9189_v31, %v1237_v40  ;;  %8141 = vpow2.f32 %v1280_v41  ;;  %v1290_v8 = vmul.f32 1.442695, %v1261_v47 }
 0x3d0   : > { %v1247_v25 = vpop.xlane.xlu1 %1246 }
 0x3d1   : > { %1306 = vadd.xlane.f32.xlu1 %v9243_v12  ;;  %v1284_v44 = vmul.f32 1.442695, %v1258_v17  ;;  %v1263_v14 = vsub.f32 %v9194_v34, %v1247_v25 }
 0x3d2   : > { %v1241_v36 = vpop.xlane.xlu0 %1240 }
 0x3d3   : > { %v1260_v43 = vsub.f32 %v9198_v35, %v1241_v36  ;;  %8143 = vpow2.f32 %v1284_v44  ;;  %v1294_v38 = vmul.f32 1.442695, %v1263_v14 }
 0x3d4   : > { %v9247_v6 = vpop.eup %8135 }
 0x3d5   : > { %1304 = vadd.xlane.f32.xlu1 %v9247_v6  ;;  %v1288_v23 = vmul.f32 1.442695, %v1260_v43  ;;  %v9250_v7 = vpop.eup %8137 }
 0x3d6   : > { %v9253_v31 = vpop.eup %8139  ;;  %v1245_v21 = vpop.xlane.xlu0 %1244 }
 0x3d7   : > { %8145 = vpow2.f32 %v1288_v23  ;;  %v1262_v22 = vsub.f32 %v9204_v45, %v1245_v21  ;;  %v1621_v45 = vpop.permute.xlu1 %1620 }
 0x3d8   : > { %8147 = vpow2.f32 %v1268_v11 }
 0x3d9   : > { %1310 = vadd.xlane.f32.xlu1 %v9250_v7  ;;  %8149 = vpow2.f32 %v1276_v33  ;;  %v1292_v0 = vmul.f32 1.442695, %v1262_v22 }
 0x3da   : > { %8151 = vpow2.f32 %v1286_v46  ;;  %v1623_v40 = vpop.permute.xlu0 %1622 }
 0x3db   : > { %8153 = vpow2.f32 %v1290_v8  ;;  %v1617_v28 = vpop.permute.xlu1 %1616 }
 0x3dc   : > { %v9258_v9 = vpop.eup %8141  ;;  %8155 = vpow2.f32 %v1294_v38 }
 0x3dd   : > { %1618 = vrot.lane.b32.xlu0 %v8955_v55, %s8569_s15  ;;  %1314 = vadd.xlane.f32.xlu1 %v9253_v31  ;;  %8157 = vpow2.f32 %v1292_v0 }
 0x3df   : > { %v1615_v32 = vpop.permute.xlu1 %1614 }
 0x3e0   : > { %v9261_v35 = vpop.eup %8143 }
 0x3e1   : > { %1312 = vadd.xlane.f32.xlu1 %v9258_v9 }
 0x3e3   : > { %v1613_v42 = vpop.permute.xlu1 %1612 }
 0x3e4   : > { %v9265_v5 = vpop.eup %8145 }
 0x3e5   : > { %1316 = vadd.xlane.f32.xlu1 %v9261_v35  ;;  %v9274_v18 = vpop.eup %8147 }
 0x3e6   : > { %v9279_v2 = vpop.eup %8149 }
 0x3e7   : > { %v9284_v29 = vpop.eup %8151  ;;  %v9331_v41 = vpop.permute.xlu1 %1610 }
 0x3e8   : > { %v9289_v34 = vpop.eup %8153 }
 0x3e9   : > { %1320 = vadd.xlane.f32.xlu1 %v9265_v5  ;;  %v9294_v20 = vpop.eup %8155 }
 0x3ea   : > { %v9304_v26 = vpop.eup %8157 }
 0x3fa   : > { %1606 = vrot.lane.b32.xlu1 %v8943_v49, %s8569_s15 }
 0x3fc   : > { %1300 = vadd.xlane.f32.xlu0 %v9274_v18 }
 0x3fe   : > { %1604 = vrot.lane.b32.xlu1 %v8935_v60, %s8569_s15 }
 0x400   : > { %1308 = vadd.xlane.f32.xlu0 %v9279_v2 }
 0x402   : > { %1602 = vrot.lane.b32.xlu1 %v8937_v61, %s8569_s15 }
 0x404   : > { %1318 = vadd.xlane.f32.xlu0 %v9284_v29 }
 0x406   : > { %1570 = vrot.lane.b32.xlu1 %v8937_v61, %s8570_s18 }
 0x408   : > { %1322 = vadd.xlane.f32.xlu0 %v9289_v34 }
 0x40a   : > { %1572 = vrot.lane.b32.xlu1 %v8935_v60, %s8570_s18 }
 0x40c   : > { %1326 = vadd.xlane.f32.xlu0 %v9294_v20 }
 0x422   : > { %1608 = vrot.lane.b32.xlu0 %v8941_v48, %s8569_s15 }
 0x426   : > { %1576 = vrot.lane.b32.xlu0 %v8941_v48, %s8570_s18 }
 0x42a   : > { %1580 = vrot.lane.b32.xlu0 %v8945_v3, %s8570_s18 }
 0x42e   : > { %1324 = vadd.xlane.f32.xlu1 %v9304_v26  ;;  %1584 = vrot.lane.b32.xlu0 %v8949_v10, %s8570_s18 }
 0x432   : > { %1588 = vrot.lane.b32.xlu0 %v8953_v54, %s8570_s18 }
 0x436   : > { %1592 = vrot.lane.b32.xlu0 %v8957_v56, %s8570_s18 }
 0x43a   : > { %1596 = vrot.lane.b32.xlu0 %v8961_v58, %s8570_s18 }
 0x43e   : > { %1600 = vrot.lane.b32.xlu0 %v8965_v62, %s8570_s18 }
 0x43f   : > { %1574 = vrot.lane.b32.xlu1 %v8943_v49, %s8570_s18 }
 0x442   : > { %2017 = vrot.lane.b32.xlu0 %v8965_v62, %s8571_s19 }
 0x443   : > { %1578 = vrot.lane.b32.xlu1 %v8947_v50, %s8570_s18 }
 0x446   : > { %2013 = vrot.lane.b32.xlu0 %v8961_v58, %s8571_s19 }
 0x447   : > { %1582 = vrot.lane.b32.xlu1 %v8951_v53, %s8570_s18 }
 0x44a   : > { %2009 = vrot.lane.b32.xlu0 %v8957_v56, %s8571_s19 }
 0x44b   : > { %1586 = vrot.lane.b32.xlu1 %v8955_v55, %s8570_s18 }
 0x44e   : > { %2005 = vrot.lane.b32.xlu0 %v8953_v54, %s8571_s19 }
 0x44f   : > { %1590 = vrot.lane.b32.xlu1 %v8959_v57, %s8570_s18 }
 0x450   : > { %v1299_v58 = vpop.xlane.xlu0 %1298 }
 0x451   : > { %8159 = vrcp.f32 %v1299_v58 }
 0x452   : > { %2001 = vrot.lane.b32.xlu0 %v8949_v10, %s8571_s19  ;;  %v1297_v62 = vpop.xlane.xlu1 %1296 }
 0x453   : > { %8161 = vrcp.f32 %v1297_v62  ;;  %1594 = vrot.lane.b32.xlu1 %v8963_v59, %s8570_s18 }
 0x457   : > { %1598 = vrot.lane.b32.xlu1 %v8969_v63, %s8570_s18 }
 0x45b   : > { %2015 = vrot.lane.b32.xlu1 %v8969_v63, %s8571_s19  ;;  %v1619_v63 = vpop.permute.xlu0 %1618 }
 0x45e   : > { %v8160_v54 = vpop.eup %8159 }
 0x45f   : > { %2011 = vrot.lane.b32.xlu1 %v8963_v59, %s8571_s19  ;;  %v1345_v10 = vmul.f32 %v8160_v54, %v9231_v15  ;;  %v1303_v59 = vpop.xlane.xlu1 %1302 }
 0x460   : > { %v8162_v56 = vpop.eup %8161  ;;  %8163 = vrcp.f32 %v1303_v59 }
 0x461   : > { %v1344_v17 = vmul.f32 %v8162_v56, %v9235_v27 }
 0x463   : > { %2007 = vrot.lane.b32.xlu1 %v8959_v57, %s8571_s19  ;;  %7409 = vmatprep.mubr.f32.mxu0 %v1344_v17  ;;  %v1307_v57 = vpop.xlane.xlu1 %1306 }
 0x464   : > { %7410 = vmatmul.mubr.f32.vlgmr.msra.gmra.mxu0 %v1345_v10 }
 0x465   : > { %7434 = vmatpush3.xpose.msk.msra.mxu0 %vm1006_vm1, %v9107_v37 }
 0x466   : > { %7435 = vmatprep.subr.msk.mxu0 %vm1006_vm1, %v9221_v51 }
 0x467   : > { %2003 = vrot.lane.b32.xlu1 %v8955_v55, %s8571_s19  ;;  %v1305_v55 = vpop.xlane.xlu1 %1304 }
 0x468   : > { %8165 = vrcp.f32 %v1305_v55 }
 0x469   : > { %7436 = vmatpush3.xpose.msk.msra.mxu0 %vm1006_vm1, %v9221_v51 }
 0x46a   : > { %7437 = vmatprep.subr.msk.mxu0 %vm1006_vm1, %v9219_v24 }
 0x46b   : > { %1999 = vrot.lane.b32.xlu1 %v8951_v53, %s8571_s19  ;;  %v1311_v53 = vpop.xlane.xlu1 %1310 }
 0x46d   : > { %7438 = vmatpush3.xpose.msk.msra.mxu0 %vm1006_vm1, %v9219_v24  ;;  %v8164_v27 = vpop.eup %8163 }
 0x46e   : > { %7439 = vmatprep.subr.msk.mxu0 %vm1006_vm1, %v9083_v1  ;;  %v1347_v11 = vmul.f32 %v8164_v27, %v9239_v30 }
 0x471   : > { %7440 = vmatpush3.xpose.msk.msra.mxu0 %vm1006_vm1, %v9083_v1  ;;  %v1315_v1 = vpop.xlane.xlu1 %1314 }
 0x472   : > { %7441 = vmatprep.subr.msk.mxu0 %vm1006_vm1, %v9223_v52 }
 0x475   : > { %7442 = vmatpush3.xpose.msk.msra.mxu0 %vm1006_vm1, %v9223_v52  ;;  %v1313_v24 = vpop.xlane.xlu1 %1312  ;;  %v8166_v44 = vpop.eup %8165 }
 0x476   : > { %7443 = vmatprep.subr.msk.mxu0 %vm1006_vm1, %v1623_v40  ;;  %v1348_v39 = vmul.f32 %v8166_v44, %v9247_v6 }
 0x479   : > { %7444 = vmatpush3.xpose.msk.msra.mxu0 %vm1006_vm1, %v1623_v40  ;;  %v1317_v52 = vpop.xlane.xlu1 %1316 }
 0x47a   : > { %7445 = vmatprep.subr.msk.mxu0 %vm1006_vm1, %v1621_v45 }
 0x47d   : > { %7446 = vmatpush3.xpose.msk.msra.mxu0 %vm1006_vm1, %v1621_v45  ;;  %v1321_v43 = vpop.xlane.xlu1 %1320 }
 0x47e   : > { %7447 = vmatprep.subr.msk.mxu0 %vm1006_vm1, %v1619_v63 }
 0x481   : > { %7448 = vmatpush3.xpose.msk.msra.mxu0 %vm1006_vm1, %v1619_v63  ;;  %v1607_v16 = vpop.permute.xlu1 %1606 }
 0x482   : > { %7449 = vmatprep.subr.msk.mxu0 %vm1006_vm1, %v1617_v28 }
 0x485   : > { %7450 = vmatpush3.xpose.msk.msra.mxu0 %vm1006_vm1, %v1617_v28  ;;  %v1301_v37 = vpop.xlane.xlu0 %1300 }
 0x486   : > { %8167 = vrcp.f32 %v1301_v37  ;;  %7451 = vmatprep.subr.msk.mxu0 %vm1006_vm1, %v1615_v32 }
 0x487   : > { %8169 = vrcp.f32 %v1307_v57 }
 0x489   : > { %7452 = vmatpush3.xpose.msk.msra.mxu0 %vm1006_vm1, %v1615_v32  ;;  %v1309_v51 = vpop.xlane.xlu0 %1308 }
 0x48a   : > { %8171 = vrcp.f32 %v1309_v51  ;;  %7453 = vmatprep.subr.msk.mxu0 %vm1006_vm1, %v1613_v42 }
 0x48b   : > { %8173 = vrcp.f32 %v1311_v53 }
 0x48c   : > { %8175 = vrcp.f32 %v1313_v24 }
 0x48d   : > { %7454 = vmatpush3.xpose.msk.msra.mxu0 %vm1006_vm1, %v1613_v42  ;;  %v1319_v15 = vpop.xlane.xlu0 %1318  ;;  %8177 = vrcp.f32 %v1315_v1 }
 0x48e   : > { %7455 = vmatprep.subr.msk.mxu0 %vm1006_vm1, %v9331_v41  ;;  %8179 = vrcp.f32 %v1317_v52 }
 0x48f   : > { %8181 = vrcp.f32 %v1319_v15 }
 0x490   : > { %8183 = vrcp.f32 %v1321_v43 }
 0x491   : > { %7456 = vmatpush3.xpose.msk.msra.mxu0 %vm1006_vm1, %v9331_v41  ;;  %v1323_v36 = vpop.xlane.xlu0 %1322 }
 0x492   : > { %8185 = vrcp.f32 %v1323_v36 }
 0x493   : > { %v8168_v23 = vpop.eup %8167 }
 0x494   : > { %v1346_v19 = vmul.f32 %v8168_v23, %v9274_v18  ;;  %v8170_v13 = vpop.eup %8169  ;;  %v1605_v18 = vpop.permute.xlu1 %1604 }
 0x495   : > { %v1327_v4 = vpop.xlane.xlu0 %1326  ;;  %v1349_v47 = vmul.f32 %v8170_v13, %v9243_v12 }
 0x496   : > { %7412 = vmatprep.mubr.f32.mxu0 %v1346_v19  ;;  %8187 = vrcp.f32 %v1327_v4 }
 0x497   : > { %v8172_v33 = vpop.eup %8171  ;;  %7413 = vmatmul.mubr.f32.gmra.mxu0 %v1347_v11 }
 0x498   : > { %7415 = vmatprep.mubr.f32.mxu0 %v1348_v39  ;;  %v8174_v25 = vpop.eup %8173  ;;  %v1350_v8 = vmul.f32 %v8172_v33, %v9279_v2 }
 0x499   : > { %v1609_v46 = vpop.permute.xlu0 %1608  ;;  %v8176_v14 = vpop.eup %8175  ;;  %v1351_v6 = vmul.f32 %v8174_v25, %v9250_v7 }
 0x49a   : > { %7457 = vmatprep.subr.msk.mxu0 %vm1006_vm1, %v1609_v46  ;;  %v8178_v38 = vpop.eup %8177  ;;  %v1352_v21 = vmul.f32 %v8176_v14, %v9258_v9  ;;  %v1603_v7 = vpop.permute.xlu1 %1602 }
 0x49b   : > { %7416 = vmatmul.mubr.f32.gmra.mxu0 %v1349_v47  ;;  %v8180_v12 = vpop.eup %8179  ;;  %v1353_v22 = vmul.f32 %v8178_v38, %v9253_v31 }
 0x49c   : > { %7458 = vmatpush3.xpose.msk.msra.mxu0 %vm1006_vm1, %v1609_v46  ;;  %7418 = vmatprep.mubr.f32.mxu0 %v1350_v8  ;;  %v8182_v0 = vpop.eup %8181  ;;  %v1354_v45 = vmul.f32 %v8180_v12, %v9261_v35  ;;  %v6537_v12 = vld [vmem:[%s11782_s2 + $0x80] sm:$0xff] }
 0x49d   : > { %7459 = vmatprep.subr.msk.mxu0 %vm1006_vm1, %v1607_v16  ;;  %v1577_v30 = vpop.permute.xlu0 %1576  ;;  %v8184_v28 = vpop.eup %8183  ;;  %v1355_v32 = vmul.f32 %v8182_v0, %v9284_v29 }
 0x49e   : > { %v1356_v40 = vmul.f32 %v8184_v28, %v9265_v5  ;;  %v1571_v41 = vpop.permute.xlu1 %1570 }
 0x49f   : > { %7419 = vmatmul.mubr.f32.gmra.mxu0 %v1351_v6  ;;  %v8186_v42 = vpop.eup %8185 }
 0x4a0   : > { %7460 = vmatpush3.xpose.msk.msra.mxu0 %vm1006_vm1, %v1607_v16  ;;  %7421 = vmatprep.mubr.f32.mxu0 %v1352_v21  ;;  %v1357_v35 = vmul.f32 %v8186_v42, %v9289_v34 }
 0x4a1   : > { %7461 = vmatprep.subr.msk.mxu0 %vm1006_vm1, %v1605_v18  ;;  %v1581_v2 = vpop.permute.xlu0 %1580 }
 0x4a2   : > { %v1573_v54 = vpop.permute.xlu1 %1572 }
 0x4a3   : > { %7422 = vmatmul.mubr.f32.gmra.mxu0 %v1353_v22  ;;  %v8188_v57 = vpop.eup %8187 }
 0x4a4   : > { %7462 = vmatpush3.xpose.msk.msra.mxu0 %vm1006_vm1, %v1605_v18  ;;  %7424 = vmatprep.mubr.f32.mxu0 %v1354_v45  ;;  %v1359_v63 = vmul.f32 %v8188_v57, %v9294_v20  ;;  %v6538_v18 = vld [vmem:[%s11782_s2 + $0x88] sm:$0xff]  ;;  %v6540_v45 = vld [vmem:[%s11782_s2 + $0x98] sm:$0xff] }
 0x4a5   : > { %7463 = vmatprep.subr.msk.mxu0 %vm1006_vm1, %v1603_v7  ;;  %v1585_v9 = vpop.permute.xlu0 %1584 }
 0x4a7   : > { %7425 = vmatmul.mubr.f32.gmra.mxu0 %v1355_v32 }
 0x4a8   : > { %7464 = vmatpush3.xpose.msk.msra.mxu0 %vm1006_vm1, %v1603_v7  ;;  %7427 = vmatprep.mubr.f32.mxu0 %v1356_v40  ;;  %v6539_v7 = vld [vmem:[%s11782_s2 + $0x90] sm:$0xff]  ;;  %v6542_v40 = vld [vmem:[%s11782_s2 + $0xa8] sm:$0xff] }
 0x4a9   : > { %v1589_v31 = vpop.permute.xlu0 %1588 }
 0x4ab   : > { %7428 = vmatmul.mubr.f32.gmra.mxu0 %v1357_v35  ;;  %v6541_v35 = vld [vmem:[%s11782_s2 + $0xa0] sm:$0xff] }
 0x4ad   : > { %v1593_v58 = vpop.permute.xlu0 %1592 }
 0x4b1   : > { %v1597_v62 = vpop.permute.xlu0 %1596 }
 0x4b5   : > { %v1601_v56 = vpop.permute.xlu0 %1600 }
 0x4b7   : > { %v1325_v17 = vpop.xlane.xlu1 %1324 }
 0x4b8   : > { %8189 = vrcp.f32 %v1325_v17  ;;  %v6543_v17 = vld [vmem:[%s11782_s2 + $0xb0] sm:$0xff] }
 0x4b9   : > { %v2018_v29 = vpop.permute.xlu0 %2017 }
 0x4ba   : > { %7489 = vmatprep.subr.mxu1 %v2018_v29 }
 0x4bb   : > { %7490 = vmatpush3.msra.mxu1 %v2018_v29  ;;  %v1575_v5 = vpop.permute.xlu1 %1574 }
 0x4bd   : > { %v2014_v24 = vpop.permute.xlu0 %2013 }
 0x4bf   : > { %v1579_v10 = vpop.permute.xlu1 %1578 }
 0x4c3   : > { %v1583_v59 = vpop.permute.xlu1 %1582 }
 0x4c5   : > { %v8190_v55 = vpop.eup %8189 }
 0x4c6   : > { %v1358_v53 = vmul.f32 %v8190_v55, %v9304_v26  ;;  %v2010_v26 = vpop.permute.xlu0 %2009  ;;  %v6545_v55 = vld [vmem:[%s11782_s2 + $0xc0] sm:$0xff] }
 0x4c7   : > { %v1587_v34 = vpop.permute.xlu1 %1586 }
 0x4c8   : > { %7430 = vmatprep.mubr.f32.mxu0 %v1358_v53 }
 0x4c9   : > { %7431 = vmatmul.mubr.f32.gmra.mxu0 %v1359_v63 }
 0x4ca   : > { %7465 = vmatprep.mubr.msk.f32.mxu0 %vm1006_vm1, %v1571_v41  ;;  %v2006_v15 = vpop.permute.xlu0 %2005 }
 0x4cb   : > { %v1591_v1 = vpop.permute.xlu1 %1590 }
 0x4cd   : > { %7466 = vmatmul.mubr.msk.f32.vlgmr.msra.gmra.mxu0 %vm1006_vm1, %v1573_v54  ;;  %v6544_v54 = vld [vmem:[%s11782_s2 + $0xb8] sm:$0xff] }
 0x4ce   : > { %7468 = vmatprep.mubr.msk.f32.mxu0 %vm1006_vm1, %v1575_v5  ;;  %v2002_v44 = vpop.permute.xlu0 %2001 }
 0x4cf   : > { %v1595_v37 = vpop.permute.xlu1 %1594 }
 0x4d1   : > { %7469 = vmatmul.mubr.msk.f32.gmra.mxu0 %vm1006_vm1, %v1577_v30 }
 0x4d2   : > { %7471 = vmatprep.mubr.msk.f32.mxu0 %vm1006_vm1, %v1579_v10 }
 0x4d3   : > { %v1599_v51 = vpop.permute.xlu1 %1598 }
 0x4d5   : > { %7472 = vmatmul.mubr.msk.f32.gmra.mxu0 %vm1006_vm1, %v1581_v2 }
 0x4d6   : > { %7474 = vmatprep.mubr.msk.f32.mxu0 %vm1006_vm1, %v1583_v59  ;;  %v6546_v59 = vld [vmem:[%s11782_s2 + $0xc8] sm:$0xff] }
 0x4d7   : > { %v2016_v20 = vpop.permute.xlu1 %2015 }
 0x4d8   : > { %7491 = vmatprep.subr.mxu1 %v2016_v20 }
 0x4d9   : > { %7475 = vmatmul.mubr.msk.f32.gmra.mxu0 %vm1006_vm1, %v1585_v9  ;;  %7492 = vmatpush3.msra.mxu1 %v2016_v20 }
 0x4da   : > { %7477 = vmatprep.mubr.msk.f32.mxu0 %vm1006_vm1, %v1587_v34  ;;  %7493 = vmatprep.subr.mxu1 %v2014_v24 }
 0x4db   : > { %7494 = vmatpush3.msra.mxu1 %v2014_v24  ;;  %v2012_v52 = vpop.permute.xlu1 %2011  ;;  %v6547_v24 = vld [vmem:[%s11782_s2 + $0xd0] sm:$0xff] }
 0x4dc   : > { %7495 = vmatprep.subr.mxu1 %v2012_v52 }
 0x4dd   : > { %7478 = vmatmul.mubr.msk.f32.gmra.mxu0 %vm1006_vm1, %v1589_v31  ;;  %7496 = vmatpush3.msra.mxu1 %v2012_v52  ;;  %v6550_v52 = vld [vmem:[%s11782_s2 + $0xe8] sm:$0xff] }
 0x4de   : > { %7480 = vmatprep.mubr.msk.f32.mxu0 %vm1006_vm1, %v1591_v1  ;;  %7497 = vmatprep.subr.mxu1 %v2010_v26  ;;  %v6548_v1 = vld [vmem:[%s11782_s2 + $0xd8] sm:$0xff] }
 0x4df   : > { %7498 = vmatpush3.msra.mxu1 %v2010_v26  ;;  %v2008_v27 = vpop.permute.xlu1 %2007 }
 0x4e0   : > { %7499 = vmatprep.subr.mxu1 %v2008_v27 }
 0x4e1   : > { %7481 = vmatmul.mubr.msk.f32.gmra.mxu0 %vm1006_vm1, %v1593_v58  ;;  %7500 = vmatpush3.msra.mxu1 %v2008_v27  ;;  %v6549_v27 = vld [vmem:[%s11782_s2 + $0xe0] sm:$0xff] }
 0x4e2   : > { %7483 = vmatprep.mubr.msk.f32.mxu0 %vm1006_vm1, %v1595_v37  ;;  %7501 = vmatprep.subr.mxu1 %v2006_v15 }
 0x4e3   : > { %7502 = vmatpush3.msra.mxu1 %v2006_v15  ;;  %v2004_v36 = vpop.permute.xlu1 %2003 }
 0x4e4   : > { %7503 = vmatprep.subr.mxu1 %v2004_v36 }
 0x4e5   : > { %7484 = vmatmul.mubr.msk.f32.gmra.mxu0 %vm1006_vm1, %v1597_v62  ;;  %7504 = vmatpush3.msra.mxu1 %v2004_v36 }
 0x4e6   : > { %7486 = vmatprep.mubr.msk.f32.mxu0 %vm1006_vm1, %v1599_v51  ;;  %7505 = vmatprep.subr.mxu1 %v2002_v44 }
 0x4e7   : > { %7506 = vmatpush3.msra.mxu1 %v2002_v44  ;;  %v2000_v43 = vpop.permute.xlu1 %1999 }
 0x4e8   : > { %7507 = vmatprep.subr.mxu1 %v2000_v43 }
 0x4e9   : > { %7487 = vmatmul.mubr.msk.f32.gmra.mxu0 %vm1006_vm1, %v1601_v56  ;;  %7508 = vmatpush3.msra.mxu1 %v2000_v43 }
 0x524   : > { %v9427_v23 = vpop.f32.mrf.mxu0 }
 0x526   : > { %v9429_v19 = vpop.f32.mrf.mxu0 }
 0x557   : > { %v9431_v4 = vpop.f32.mrf.mxu0 }
 0x559   : > { %v9433_v11 = vpop.f32.mrf.mxu0 }
 0x55b   : > { %v9435_v13 = vpop.f32.mrf.mxu0 }
 0x55d   : > { %v9437_v39 = vpop.f32.mrf.mxu0 }
 0x55f   : > { %v9439_v33 = vpop.f32.mrf.mxu0 }
 0x561   : > { %v9441_v16 = vpop.f32.mrf.mxu0 }
 0x563   : > { %v9443_v46 = vpop.f32.mrf.mxu0 }
 0x565   : > { %v9445_v47 = vpop.f32.mrf.mxu0 }
 0x567   : > { %v9447_v25 = vpop.f32.mrf.mxu0 }
 0x569   : > { %v9449_v8 = vpop.f32.mrf.mxu0 }
 0x56b   : > { %v9451_v14 = vpop.f32.mrf.mxu0 }
 0x56d   : > { %v9453_v30 = vpop.f32.mrf.mxu0 }
 0x589   : > { %v9455_v6 = vpop.f32.mrf.mxu0 }
 0x58b   : > { %v9457_v38 = vpop.f32.mrf.mxu0 }
 0x58d   : > { %v7467_v21 = vpop.f32.mrf.mxu0 }
 0x58e   : > { %v9465_v2 = vadd.f32 %v7467_v21, %v6538_v18  ;;  %v6552_v18 = vld [vmem:[%s11782_s2 + $0xf8] sm:$0xff] }
 0x58f   : > { %v1764_v22 = vpop.f32.mrf.mxu0 }
 0x590   : > { %v9467_v0 = vadd.f32 %v6537_v12, %v1764_v22  ;;  %1845 = vmax.xlane.f32.xlu0 %v9465_v2  ;;  %v6551_v12 = vld [vmem:[%s11782_s2 + $0xf0] sm:$0xff] }
 0x591   : > { %v7470_v28 = vpop.f32.mrf.mxu0 }
 0x592   : > { %1843 = vmax.xlane.f32.xlu1 %v9467_v0  ;;  %v9477_v32 = vadd.f32 %v7470_v28, %v6540_v45 }
 0x593   : > { %v1774_v9 = vpop.f32.mrf.mxu0 }
 0x594   : > { %v9479_v42 = vadd.f32 %v6539_v7, %v1774_v9 }
 0x595   : > { %v7473_v31 = vpop.f32.mrf.mxu0 }
 0x596   : > { %1849 = vmax.xlane.f32.xlu1 %v9477_v32  ;;  %1847 = vmax.xlane.f32.xlu0 %v9479_v42  ;;  %v9489_v58 = vadd.f32 %v7473_v31, %v6542_v40 }
 0x597   : > { %v1784_v41 = vpop.f32.mrf.mxu0 }
 0x598   : > { %v9491_v62 = vadd.f32 %v6541_v35, %v1784_v41 }
 0x599   : > { %v7476_v56 = vpop.f32.mrf.mxu0 }
 0x59a   : > { %1853 = vmax.xlane.f32.xlu1 %v9489_v58  ;;  %1851 = vmax.xlane.f32.xlu0 %v9491_v62  ;;  %v9501_v5 = vadd.f32 %v7476_v56, %v6544_v54 }
 0x59b   : > { %v1794_v29 = vpop.f32.mrf.mxu0 }
 0x59c   : > { %v9503_v10 = vadd.f32 %v6543_v17, %v1794_v29 }
 0x59d   : > { %v7479_v57 = vpop.f32.mrf.mxu0 }
 0x59e   : > { %1857 = vmax.xlane.f32.xlu1 %v9501_v5  ;;  %1855 = vmax.xlane.f32.xlu0 %v9503_v10  ;;  %v9513_v34 = vadd.f32 %v7479_v57, %v6546_v59 }
 0x59f   : > { %v1804_v53 = vpop.f32.mrf.mxu0 }
 0x5a0   : > { %v9515_v63 = vadd.f32 %v6545_v55, %v1804_v53 }
 0x5a1   : > { %v7482_v37 = vpop.f32.mrf.mxu0 }
 0x5a2   : > { %1861 = vmax.xlane.f32.xlu1 %v9513_v34  ;;  %1859 = vmax.xlane.f32.xlu0 %v9515_v63  ;;  %v9525_v20 = vadd.f32 %v7482_v37, %v6548_v1 }
 0x5a3   : > { %v1814_v51 = vpop.f32.mrf.mxu0 }
 0x5a4   : > { %v9527_v26 = vadd.f32 %v6547_v24, %v1814_v51 }
 0x5a5   : > { %v7485_v15 = vpop.f32.mrf.mxu0 }
 0x5a6   : > { %1865 = vmax.xlane.f32.xlu1 %v9525_v20  ;;  %1863 = vmax.xlane.f32.xlu0 %v9527_v26  ;;  %v9537_v44 = vadd.f32 %v7485_v15, %v6550_v52 }
 0x5a7   : > { %v1824_v36 = vpop.f32.mrf.mxu0 }
 0x5a8   : > { %v9539_v43 = vadd.f32 %v6549_v27, %v1824_v36 }
 0x5a9   : > { %v7488_v21 = vpop.f32.mrf.mxu0 }
 0x5aa   : > { %1869 = vmax.xlane.f32.xlu1 %v9537_v44  ;;  %1867 = vmax.xlane.f32.xlu0 %v9539_v43  ;;  %v9549_v45 = vadd.f32 %v7488_v21, %v6552_v18 }
 0x5ab   : > { %v1834_v22 = vpop.f32.mrf.mxu0 }
 0x5ac   : > { %v9551_v28 = vadd.f32 %v6551_v12, %v1834_v22 }
 0x5ae   : > { %1873 = vmax.xlane.f32.xlu1 %v9549_v45  ;;  %1871 = vmax.xlane.f32.xlu0 %v9551_v28 }
 0x5bf   : > { %1995 = vrot.lane.b32.xlu1 %v8947_v50, %s8571_s19 }
 0x5c3   : > { %1991 = vrot.lane.b32.xlu1 %v8943_v49, %s8571_s19 }
 0x5c4   : > { %1997 = vrot.lane.b32.xlu0 %v8945_v3, %s8571_s19 }
 0x5c7   : > { %1987 = vrot.lane.b32.xlu1 %v8937_v61, %s8571_s19 }
 0x5c8   : > { %1993 = vrot.lane.b32.xlu0 %v8941_v48, %s8571_s19 }
 0x5cc   : > { %1989 = vrot.lane.b32.xlu0 %v8935_v60, %s8571_s19 }
 0x619   : > { %v1846_v7 = vpop.xlane.xlu0 %1845 }
 0x61a   : > { %v1876_v9 = vsub.f32 %v9465_v2, %v1846_v7 }
 0x61b   : > { %v1844_v40 = vpop.xlane.xlu1 %1843 }
 0x61c   : > { %v1893_v50 = vmul.f32 1.442695, %v1876_v9  ;;  %v1875_v31 = vsub.f32 %v9467_v0, %v1844_v40 }
 0x61e   : > { %8191 = vpow2.f32 %v1893_v50  ;;  %v1891_v49 = vmul.f32 1.442695, %v1875_v31 }
 0x61f   : > { %v1848_v35 = vpop.xlane.xlu0 %1847  ;;  %v1850_v3 = vpop.xlane.xlu1 %1849 }
 0x620   : > { %8193 = vpow2.f32 %v1891_v49  ;;  %v1877_v61 = vsub.f32 %v9479_v42, %v1848_v35  ;;  %v1878_v41 = vsub.f32 %v9477_v32, %v1850_v3 }
 0x622   : > { %v1895_v48 = vmul.f32 1.442695, %v1877_v61  ;;  %v1897_v54 = vmul.f32 1.442695, %v1878_v41 }
 0x623   : > { %v1852_v56 = vpop.xlane.xlu0 %1851  ;;  %v1854_v60 = vpop.xlane.xlu1 %1853 }
 0x624   : > { %8195 = vpow2.f32 %v1895_v48  ;;  %v1879_v2 = vsub.f32 %v9491_v62, %v1852_v56  ;;  %v1880_v17 = vsub.f32 %v9489_v58, %v1854_v60 }
 0x625   : > { %8197 = vpow2.f32 %v1897_v54 }
 0x626   : > { %v1899_v0 = vmul.f32 1.442695, %v1879_v2  ;;  %v1901_v29 = vmul.f32 1.442695, %v1880_v17 }
 0x627   : > { %v1856_v59 = vpop.xlane.xlu0 %1855  ;;  %v1858_v57 = vpop.xlane.xlu1 %1857 }
 0x628   : > { %8199 = vpow2.f32 %v1899_v0  ;;  %v1881_v55 = vsub.f32 %v9503_v10, %v1856_v59  ;;  %v1882_v42 = vsub.f32 %v9501_v5, %v1858_v57 }
 0x629   : > { %8201 = vpow2.f32 %v1901_v29 }
 0x62a   : > { %v1903_v32 = vmul.f32 1.442695, %v1881_v55  ;;  %v1905_v53 = vmul.f32 1.442695, %v1882_v42 }
 0x62b   : > { %v9575_v1 = vpop.eup %8191  ;;  %v1860_v37 = vpop.xlane.xlu0 %1859 }
 0x62c   : > { %v1862_v24 = vpop.xlane.xlu1 %1861  ;;  %8203 = vpow2.f32 %v1903_v32  ;;  %v1883_v58 = vsub.f32 %v9515_v63, %v1860_v37  ;;  %1925 = vadd.xlane.f32.xlu0 %v9575_v1 }
 0x62d   : > { %v1884_v62 = vsub.f32 %v9513_v34, %v1862_v24  ;;  %v9580_v51 = vpop.eup %8193  ;;  %8205 = vpow2.f32 %v1905_v53 }
 0x62e   : > { %v1907_v10 = vmul.f32 1.442695, %v1883_v58  ;;  %1923 = vadd.xlane.f32.xlu1 %v9580_v51 }
 0x62f   : > { %v1909_v52 = vmul.f32 1.442695, %v1884_v62  ;;  %v1864_v5 = vpop.xlane.xlu0 %1863 }
 0x630   : > { %v1866_v15 = vpop.xlane.xlu1 %1865  ;;  %8207 = vpow2.f32 %v1907_v10  ;;  %v1885_v27 = vsub.f32 %v9527_v26, %v1864_v5 }
 0x631   : > { %v1886_v36 = vsub.f32 %v9525_v20, %v1866_v15  ;;  %v9585_v18 = vpop.eup %8195  ;;  %8209 = vpow2.f32 %v1909_v52 }
 0x632   : > { %v9587_v34 = vpop.eup %8197  ;;  %v1911_v63 = vmul.f32 1.442695, %v1885_v27  ;;  %1927 = vadd.xlane.f32.xlu1 %v9585_v18 }
 0x633   : > { %v1913_v21 = vmul.f32 1.442695, %v1886_v36  ;;  %1929 = vadd.xlane.f32.xlu0 %v9587_v34  ;;  %v1868_v12 = vpop.xlane.xlu0 %1867 }
 0x634   : > { %v1870_v22 = vpop.xlane.xlu1 %1869  ;;  %8211 = vpow2.f32 %v1911_v63  ;;  %v1887_v7 = vsub.f32 %v9539_v43, %v1868_v12 }
 0x635   : > { %v1888_v26 = vsub.f32 %v9537_v44, %v1870_v22  ;;  %v9593_v9 = vpop.eup %8199  ;;  %8213 = vpow2.f32 %v1913_v21 }
 0x636   : > { %v9595_v20 = vpop.eup %8201  ;;  %v1915_v40 = vmul.f32 1.442695, %v1887_v7  ;;  %1931 = vadd.xlane.f32.xlu1 %v9593_v9 }
 0x637   : > { %v1917_v50 = vmul.f32 1.442695, %v1888_v26  ;;  %1933 = vadd.xlane.f32.xlu0 %v9595_v20  ;;  %v1872_v31 = vpop.xlane.xlu0 %1871 }
 0x638   : > { %v1874_v49 = vpop.xlane.xlu1 %1873  ;;  %8215 = vpow2.f32 %v1915_v40  ;;  %v1889_v35 = vsub.f32 %v9551_v28, %v1872_v31 }
 0x639   : > { %v1890_v43 = vsub.f32 %v9549_v45, %v1874_v49  ;;  %v9601_v3 = vpop.eup %8203  ;;  %8217 = vpow2.f32 %v1917_v50 }
 0x63a   : > { %v9603_v44 = vpop.eup %8205  ;;  %v1919_v61 = vmul.f32 1.442695, %v1889_v35  ;;  %1935 = vadd.xlane.f32.xlu1 %v9601_v3 }
 0x63b   : > { %v1921_v41 = vmul.f32 1.442695, %v1890_v43  ;;  %1937 = vadd.xlane.f32.xlu0 %v9603_v44  ;;  %v1998_v48 = vpop.permute.xlu0 %1997 }
 0x63c   : > { %v1996_v54 = vpop.permute.xlu1 %1995  ;;  %8219 = vpow2.f32 %v1919_v61  ;;  %7509 = vmatprep.subr.mxu1 %v1998_v48 }
 0x63d   : > { %v9607_v56 = vpop.eup %8207  ;;  %8221 = vpow2.f32 %v1921_v41  ;;  %7510 = vmatpush3.msra.mxu1 %v1998_v48 }
 0x63e   : > { %v9609_v45 = vpop.eup %8209  ;;  %1939 = vadd.xlane.f32.xlu1 %v9607_v56  ;;  %7511 = vmatprep.subr.mxu1 %v1996_v54 }
 0x63f   : > { %1941 = vadd.xlane.f32.xlu0 %v9609_v45  ;;  %v1994_v28 = vpop.permute.xlu0 %1993  ;;  %7512 = vmatpush3.msra.mxu1 %v1996_v54 }
 0x640   : > { %v1992_v60 = vpop.permute.xlu1 %1991  ;;  %7513 = vmatprep.subr.mxu1 %v1994_v28 }
 0x641   : > { %v9613_v2 = vpop.eup %8211  ;;  %7514 = vmatpush3.msra.mxu1 %v1994_v28 }
 0x642   : > { %v9615_v17 = vpop.eup %8213  ;;  %1943 = vadd.xlane.f32.xlu1 %v9613_v2  ;;  %7515 = vmatprep.subr.mxu1 %v1992_v60 }
 0x643   : > { %1945 = vadd.xlane.f32.xlu0 %v9615_v17  ;;  %v1990_v0 = vpop.permute.xlu0 %1989  ;;  %7516 = vmatpush3.msra.mxu1 %v1992_v60 }
 0x644   : > { %7517 = vmatprep.subr.mxu1 %v1990_v0  ;;  %v1988_v59 = vpop.permute.xlu1 %1987 }
 0x645   : > { %v9619_v29 = vpop.eup %8215  ;;  %7518 = vmatpush3.msra.mxu1 %v1990_v0 }
 0x646   : > { %v9621_v57 = vpop.eup %8217  ;;  %1947 = vadd.xlane.f32.xlu1 %v9619_v29  ;;  %7519 = vmatprep.subr.mxu1 %v1988_v59 }
 0x647   : > { %1949 = vadd.xlane.f32.xlu0 %v9621_v57  ;;  %7520 = vmatpush3.msra.mxu1 %v1988_v59 }
 0x649   : > { %v9625_v55 = vpop.eup %8219 }
 0x64a   : > { %v9627_v42 = vpop.eup %8221  ;;  %1951 = vadd.xlane.f32.xlu1 %v9625_v55 }
 0x64b   : > { %1953 = vadd.xlane.f32.xlu0 %v9627_v42 }
 0x6b5   : > { %v1926_v32 = vpop.xlane.xlu0 %1925 }
 0x6b6   : > { %8223 = vrcp.f32 %v1926_v32 }
 0x6b7   : > { %v1924_v53 = vpop.xlane.xlu1 %1923 }
 0x6b8   : > { %8225 = vrcp.f32 %v1924_v53 }
 0x6bb   : > { %v1928_v37 = vpop.xlane.xlu1 %1927 }
 0x6bc   : > { %v1930_v24 = vpop.xlane.xlu0 %1929  ;;  %8227 = vrcp.f32 %v1928_v37 }
 0x6bd   : > { %8229 = vrcp.f32 %v1930_v24 }
 0x6bf   : > { %v1932_v58 = vpop.xlane.xlu1 %1931 }
 0x6c0   : > { %v1934_v62 = vpop.xlane.xlu0 %1933  ;;  %8231 = vrcp.f32 %v1932_v58 }
 0x6c1   : > { %8233 = vrcp.f32 %v1934_v62 }
 0x6c3   : > { %v1936_v10 = vpop.xlane.xlu1 %1935  ;;  %v8224_v52 = vpop.eup %8223 }
 0x6c4   : > { %v1938_v5 = vpop.xlane.xlu0 %1937  ;;  %8235 = vrcp.f32 %v1936_v10  ;;  %v1972_v63 = vmul.f32 %v8224_v52, %v9575_v1 }
 0x6c5   : > { %v8226_v15 = vpop.eup %8225  ;;  %8237 = vrcp.f32 %v1938_v5 }
 0x6c6   : > { %v1971_v27 = vmul.f32 %v8226_v15, %v9580_v51 }
 0x6c7   : > { %v1940_v36 = vpop.xlane.xlu1 %1939 }
 0x6c8   : > { %v1942_v21 = vpop.xlane.xlu0 %1941  ;;  %8239 = vrcp.f32 %v1940_v36  ;;  %7521 = vmatprep.mubr.f32.mxu1 %v1971_v27 }
 0x6c9   : > { %v8228_v12 = vpop.eup %8227  ;;  %8241 = vrcp.f32 %v1942_v21  ;;  %7522 = vmatmul.mubr.f32.vlgmr.msra.gmra.mxu1 %v1972_v63 }
 0x6ca   : > { %v8230_v22 = vpop.eup %8229  ;;  %v1973_v7 = vmul.f32 %v8228_v12, %v9585_v18 }
 0x6cb   : > { %v1944_v26 = vpop.xlane.xlu1 %1943  ;;  %v1974_v40 = vmul.f32 %v8230_v22, %v9587_v34 }
 0x6cc   : > { %v1946_v50 = vpop.xlane.xlu0 %1945  ;;  %8243 = vrcp.f32 %v1944_v26  ;;  %7524 = vmatprep.mubr.f32.mxu1 %v1973_v7 }
 0x6cd   : > { %v8232_v31 = vpop.eup %8231  ;;  %8245 = vrcp.f32 %v1946_v50  ;;  %7525 = vmatmul.mubr.f32.gmra.mxu1 %v1974_v40 }
 0x6ce   : > { %v8234_v51 = vpop.eup %8233  ;;  %v1975_v1 = vmul.f32 %v8232_v31, %v9593_v9 }
 0x6cf   : > { %v1948_v49 = vpop.xlane.xlu1 %1947  ;;  %v1976_v35 = vmul.f32 %v8234_v51, %v9595_v20 }
 0x6d0   : > { %v1950_v43 = vpop.xlane.xlu0 %1949  ;;  %8247 = vrcp.f32 %v1948_v49  ;;  %7527 = vmatprep.mubr.f32.mxu1 %v1975_v1 }
 0x6d1   : > { %v8236_v61 = vpop.eup %8235  ;;  %8249 = vrcp.f32 %v1950_v43  ;;  %7528 = vmatmul.mubr.f32.gmra.mxu1 %v1976_v35 }
 0x6d2   : > { %v8238_v18 = vpop.eup %8237  ;;  %v1977_v34 = vmul.f32 %v8236_v61, %v9601_v3 }
 0x6d3   : > { %v1952_v41 = vpop.xlane.xlu1 %1951  ;;  %v1978_v48 = vmul.f32 %v8238_v18, %v9603_v44 }
 0x6d4   : > { %v1954_v54 = vpop.xlane.xlu0 %1953  ;;  %8251 = vrcp.f32 %v1952_v41  ;;  %7530 = vmatprep.mubr.f32.mxu1 %v1977_v34 }
 0x6d5   : > { %v8240_v28 = vpop.eup %8239  ;;  %8253 = vrcp.f32 %v1954_v54  ;;  %7531 = vmatmul.mubr.f32.gmra.mxu1 %v1978_v48 }
 0x6d6   : > { %v8242_v9 = vpop.eup %8241  ;;  %v1979_v20 = vmul.f32 %v8240_v28, %v9607_v56 }
 0x6d7   : > { %v1980_v60 = vmul.f32 %v8242_v9, %v9609_v45 }
 0x6d8   : > { %7533 = vmatprep.mubr.f32.mxu1 %v1979_v20 }
 0x6d9   : > { %v8244_v0 = vpop.eup %8243  ;;  %7534 = vmatmul.mubr.f32.gmra.mxu1 %v1980_v60 }
 0x6da   : > { %v8246_v59 = vpop.eup %8245  ;;  %v1981_v3 = vmul.f32 %v8244_v0, %v9613_v2  ;;  %v2263_v2 = vld [vmem:[%s11784_s4 + $0x18] sm:$0xff] }
 0x6db   : > { %v1982_v32 = vmul.f32 %v8246_v59, %v9615_v17  ;;  %v2262_v17 = vld [vmem:[%s11784_s4 + $0x10] sm:$0xff]  ;;  %7545 = vmatprep.subr.mxu1 %v2263_v2 }
 0x6dc   : > { %7536 = vmatprep.mubr.f32.mxu1 %v1981_v3  ;;  %7546 = vmatpush3.msra.mxu1 %v2263_v2  ;;  %v8545_v2 = vld [vmem:[%s8659_s30 + $0x10] sm:$0xff] }
 0x6dd   : > { %v8248_v44 = vpop.eup %8247  ;;  %7537 = vmatmul.mubr.f32.gmra.mxu1 %v1982_v32  ;;  %7547 = vmatprep.subr.mxu1 %v2262_v17 }
 0x6de   : > { %v8250_v53 = vpop.eup %8249  ;;  %v1983_v37 = vmul.f32 %v8248_v44, %v9619_v29  ;;  %v2261_v29 = vld [vmem:[%s11784_s4 + $0x8] sm:$0xff]  ;;  %7548 = vmatpush3.msra.mxu1 %v2262_v17 }
 0x6df   : > { %v1984_v24 = vmul.f32 %v8250_v53, %v9621_v57  ;;  %v2260_v57 = vld [vmem:[%s11784_s4] sm:$0xff]  ;;  %7549 = vmatprep.subr.mxu1 %v2261_v29  ;;  %v8543_v44 = vld [vmem:[%s8659_s30 + $0x8] sm:$0xff] }
 0x6e0   : > { %7539 = vmatprep.mubr.f32.mxu1 %v1983_v37  ;;  %7550 = vmatpush3.msra.mxu1 %v2261_v29  ;;  %v8544_v37 = vld [vmem:[%s8659_s30] sm:$0xff] }
 0x6e1   : > { %v8252_v56 = vpop.eup %8251  ;;  %7540 = vmatmul.mubr.f32.gmra.mxu1 %v1984_v24  ;;  %7551 = vmatprep.subr.mxu1 %v2260_v57 }
 0x6e2   : > { %v8254_v45 = vpop.eup %8253  ;;  %v1985_v58 = vmul.f32 %v8252_v56, %v9625_v55  ;;  %7552 = vmatpush3.msra.mxu1 %v2260_v57 }
 0x6e3   : > { %v1986_v62 = vmul.f32 %v8254_v45, %v9627_v42 }
 0x6e4   : > { %7542 = vmatprep.mubr.f32.mxu1 %v1985_v58 }
 0x6e5   : > { %7543 = vmatmul.mubr.f32.gmra.mxu1 %v1986_v62 }
 0x789   : > { %v7523_v55 = vpop.f32.mrf.mxu1 }
 0x78a   : > { %2198 = vrot.lane.b32.xlu1 %v7523_v55, %s11795_s20  ;;  %v8546_v55 = vld [vmem:[%s8659_s30 + $0x18] sm:$0xff] }
 0x78b   : > { %v2101_v42 = vpop.f32.mrf.mxu1 }
 0x78c   : > { %2196 = vrot.lane.b32.xlu0 %v2101_v42, %s11795_s20 }
 0x78d   : > { %v7526_v10 = vpop.f32.mrf.mxu1 }
 0x78f   : > { %v2111_v52 = vpop.f32.mrf.mxu1 }
 0x790   : > { %2202 = vrot.lane.b32.xlu0 %v7526_v10, %s11795_s20  ;;  %2200 = vrot.lane.b32.xlu1 %v2111_v52, %s11795_s20 }
 0x791   : > { %v7529_v5 = vpop.f32.mrf.mxu1 }
 0x793   : > { %v2121_v15 = vpop.f32.mrf.mxu1 }
 0x794   : > { %2206 = vrot.lane.b32.xlu0 %v7529_v5, %s11795_s20  ;;  %2204 = vrot.lane.b32.xlu1 %v2121_v15, %s11795_s20 }
 0x795   : > { %v7532_v27 = vpop.f32.mrf.mxu1 }
 0x797   : > { %v2131_v36 = vpop.f32.mrf.mxu1 }
 0x798   : > { %2210 = vrot.lane.b32.xlu0 %v7532_v27, %s11795_s20  ;;  %2208 = vrot.lane.b32.xlu1 %v2131_v36, %s11795_s20 }
 0x799   : > { %v7535_v63 = vpop.f32.mrf.mxu1 }
 0x79b   : > { %v2141_v21 = vpop.f32.mrf.mxu1 }
 0x79c   : > { %2214 = vrot.lane.b32.xlu0 %v7535_v63, %s11795_s20  ;;  %2212 = vrot.lane.b32.xlu1 %v2141_v21, %s11795_s20  ;;  %v8547_v63 = vld [vmem:[%s8659_s30 + $0x20] sm:$0xff] }
 0x79d   : > { %v7538_v12 = vpop.f32.mrf.mxu1 }
 0x79f   : > { %v2151_v22 = vpop.f32.mrf.mxu1 }
 0x7a0   : > { %2218 = vrot.lane.b32.xlu0 %v7538_v12, %s11795_s20  ;;  %2216 = vrot.lane.b32.xlu1 %v2151_v22, %s11795_s20 }
 0x7a1   : > { %v7541_v7 = vpop.f32.mrf.mxu1 }
 0x7a3   : > { %v2161_v26 = vpop.f32.mrf.mxu1 }
 0x7a4   : > { %2222 = vrot.lane.b32.xlu0 %v7541_v7, %s11795_s20  ;;  %2220 = vrot.lane.b32.xlu1 %v2161_v26, %s11795_s20  ;;  %v8548_v7 = vld [vmem:[%s8659_s30 + $0x28] sm:$0xff] }
 0x7a5   : > { %v7544_v40 = vpop.f32.mrf.mxu1 }
 0x7a7   : > { %v2171_v50 = vpop.f32.mrf.mxu1 }
 0x7a8   : > { %2226 = vrot.lane.b32.xlu0 %v7544_v40, %s11795_s20  ;;  %2224 = vrot.lane.b32.xlu1 %v2171_v50, %s11795_s20 }
 0x7fc   : > { %v2199_v31 = vpop.permute.xlu1 %2198 }
 0x7fd   : > { %v2245_v49 = vsel %vm1006_vm1, %v9427_v23, %v2199_v31 }
 0x7fe   : > { %v2197_v51 = vpop.permute.xlu0 %2196 }
 0x7ff   : > { %v2244_v1 = vsel %vm1006_vm1, %v9429_v19, %v2197_v51 }
 0x800   : > { %7553 = vmatprep.mubr.msk.f32.mxu1 %vm459_vm0, %v2244_v1 }
 0x801   : > { %7554 = vmatmul.mubr.msk.f32.vlgmr.msra.gmra.mxu1 %vm459_vm0, %v2245_v49 }
 0x802   : > { %v2203_v35 = vpop.permute.xlu0 %2202  ;;  %v2201_v43 = vpop.permute.xlu1 %2200 }
 0x803   : > { %v2247_v61 = vsel %vm1006_vm1, %v9431_v4, %v2203_v35  ;;  %v2246_v18 = vsel %vm1006_vm1, %v9433_v11, %v2201_v43  ;;  %v8549_v35 = vld [vmem:[%s8659_s30 + $0x30] sm:$0xff] }
 0x804   : > { %7556 = vmatprep.mubr.msk.f32.mxu1 %vm459_vm0, %v2246_v18 }
 0x805   : > { %7557 = vmatmul.mubr.msk.f32.gmra.mxu1 %vm459_vm0, %v2247_v61 }
 0x806   : > { %v2207_v19 = vpop.permute.xlu0 %2206  ;;  %v2205_v34 = vpop.permute.xlu1 %2204 }
 0x807   : > { %v2249_v23 = vsel %vm1006_vm1, %v9435_v13, %v2207_v19  ;;  %v2248_v41 = vsel %vm1006_vm1, %v9437_v39, %v2205_v34  ;;  %v8550_v19 = vld [vmem:[%s8659_s30 + $0x38] sm:$0xff] }
 0x808   : > { %7559 = vmatprep.mubr.msk.f32.mxu1 %vm459_vm0, %v2248_v41 }
 0x809   : > { %7560 = vmatmul.mubr.msk.f32.gmra.mxu1 %vm459_vm0, %v2249_v23 }
 0x80a   : > { %v2211_v4 = vpop.permute.xlu0 %2210  ;;  %v2209_v48 = vpop.permute.xlu1 %2208 }
 0x80b   : > { %v2251_v11 = vsel %vm1006_vm1, %v9439_v33, %v2211_v4  ;;  %v2250_v54 = vsel %vm1006_vm1, %v9441_v16, %v2209_v48 }
 0x80c   : > { %7562 = vmatprep.mubr.msk.f32.mxu1 %vm459_vm0, %v2250_v54 }
 0x80d   : > { %7563 = vmatmul.mubr.msk.f32.gmra.mxu1 %vm459_vm0, %v2251_v11 }
 0x80e   : > { %v2215_v13 = vpop.permute.xlu0 %2214  ;;  %v2213_v28 = vpop.permute.xlu1 %2212 }
 0x80f   : > { %v2253_v39 = vsel %vm1006_vm1, %v9443_v46, %v2215_v13  ;;  %v2252_v9 = vsel %vm1006_vm1, %v9445_v47, %v2213_v28  ;;  %v8551_v13 = vld [vmem:[%s8659_s30 + $0x40] sm:$0xff] }
 0x810   : > { %7565 = vmatprep.mubr.msk.f32.mxu1 %vm459_vm0, %v2252_v9 }
 0x811   : > { %7566 = vmatmul.mubr.msk.f32.gmra.mxu1 %vm459_vm0, %v2253_v39 }
 0x812   : > { %v2219_v33 = vpop.permute.xlu0 %2218  ;;  %v2217_v20 = vpop.permute.xlu1 %2216 }
 0x813   : > { %v2255_v16 = vsel %vm1006_vm1, %v9447_v25, %v2219_v33  ;;  %v2254_v60 = vsel %vm1006_vm1, %v9449_v8, %v2217_v20  ;;  %v8552_v33 = vld [vmem:[%s8659_s30 + $0x48] sm:$0xff] }
 0x814   : > { %7568 = vmatprep.mubr.msk.f32.mxu1 %vm459_vm0, %v2254_v60 }
 0x815   : > { %7569 = vmatmul.mubr.msk.f32.gmra.mxu1 %vm459_vm0, %v2255_v16 }
 0x816   : > { %v2223_v46 = vpop.permute.xlu0 %2222  ;;  %v2221_v47 = vpop.permute.xlu1 %2220 }
 0x817   : > { %v2257_v0 = vsel %vm1006_vm1, %v9451_v14, %v2223_v46  ;;  %v2256_v59 = vsel %vm1006_vm1, %v9453_v30, %v2221_v47 }
 0x818   : > { %7571 = vmatprep.mubr.msk.f32.mxu1 %vm459_vm0, %v2256_v59 }
 0x819   : > { %7572 = vmatmul.mubr.msk.f32.gmra.mxu1 %vm459_vm0, %v2257_v0 }
 0x81a   : > { %v2227_v25 = vpop.permute.xlu0 %2226  ;;  %v2225_v8 = vpop.permute.xlu1 %2224 }
 0x81b   : > { %v2259_v3 = vsel %vm1006_vm1, %v9455_v6, %v2227_v25  ;;  %v2258_v32 = vsel %vm1006_vm1, %v9457_v38, %v2225_v8  ;;  %v2762_v25 = vld [vmem:[%s11787_s7 + $0x18] sm:$0xff]  ;;  %v8553_v8 = vld [vmem:[%s8659_s30 + $0x50] sm:$0xff] }
 0x81c   : > { %7574 = vmatprep.mubr.msk.f32.mxu1 %vm459_vm0, %v2258_v32  ;;  %7577 = vmatprep.subr.mxu0 %v2762_v25 }
 0x81d   : > { %7575 = vmatmul.mubr.msk.f32.gmra.mxu1 %vm459_vm0, %v2259_v3  ;;  %7578 = vmatpush3.msra.mxu0 %v2762_v25 }
 0x8c1   : > { %v7555_v14 = vpop.f32.mrf.mxu1 }
 0x8c2   : > { %v9724_v30 = vadd.f32 %v8543_v44, %v7555_v14  ;;  %v2761_v44 = vld [vmem:[%s11787_s7 + $0x10] sm:$0xff] }
 0x8c3   : > { %v2378_v53 = vpop.f32.mrf.mxu1  ;;  %7579 = vmatprep.subr.mxu0 %v2761_v44 }
 0x8c4   : > { %v9727_v24 = vadd.f32 %v8544_v37, %v2378_v53  ;;  %v2478_v6 = vsel %vm459_vm0, %v9724_v30, 0.0  ;;  %v2540_v58 = vmul.f32 %v9724_v30, %v9724_v30  ;;  %v8554_v53 = vld [vmem:[%s8659_s30 + $0x58] sm:$0xff]  ;;  %7580 = vmatpush3.msra.mxu0 %v2761_v44 }
 0x8c5   : > { %2479 = vadd.xlane.f32.xlu0 %v2478_v6  ;;  %v7558_v56 = vpop.f32.mrf.mxu1 }
 0x8c6   : > { %v2475_v38 = vsel %vm459_vm0, %v9727_v24, 0.0  ;;  %v2539_v45 = vmul.f32 %v9727_v24, %v9727_v24  ;;  %v9742_v42 = vadd.f32 %v8546_v55, %v7558_v56  ;;  %v2558_v10 = vsel %vm459_vm0, %v2540_v58, 0.0  ;;  %v2760_v56 = vld [vmem:[%s11787_s7 + $0x8] sm:$0xff] }
 0x8c7   : > { %2476 = vadd.xlane.f32.xlu1 %v2475_v38  ;;  %v2388_v62 = vpop.f32.mrf.mxu1  ;;  %7581 = vmatprep.subr.mxu0 %v2760_v56 }
 0x8c8   : > { %v9738_v17 = vadd.f32 %v8545_v2, %v2388_v62  ;;  %v2555_v29 = vsel %vm459_vm0, %v2539_v45, 0.0  ;;  %v2484_v27 = vsel %vm459_vm0, %v9742_v42, 0.0  ;;  %v2542_v36 = vmul.f32 %v9742_v42, %v9742_v42  ;;  %7582 = vmatpush3.msra.mxu0 %v2760_v56  ;;  %v2759_v62 = vld [vmem:[%s11787_s7] sm:$0xff] }
 0x8c9   : > { %2556 = vadd.xlane.f32.xlu0 %v2555_v29  ;;  %v7561_v57 = vpop.f32.mrf.mxu1  ;;  %7583 = vmatprep.subr.mxu0 %v2759_v62 }
 0x8ca   : > { %v2481_v52 = vsel %vm459_vm0, %v9738_v17, 0.0  ;;  %v2541_v5 = vmul.f32 %v9738_v17, %v9738_v17  ;;  %v9758_v26 = vadd.f32 %v8548_v7, %v7561_v57  ;;  %v2564_v40 = vsel %vm459_vm0, %v2542_v36, 0.0  ;;  %7584 = vmatpush3.msra.mxu0 %v2759_v62  ;;  %v8555_v57 = vld [vmem:[%s8659_s30 + $0x60] sm:$0xff] }
 0x8cb   : > { %2559 = vadd.xlane.f32.xlu1 %v2558_v10  ;;  %v2398_v15 = vpop.f32.mrf.mxu1 }
 0x8cc   : > { %v9754_v21 = vadd.f32 %v8547_v63, %v2398_v15  ;;  %v2561_v12 = vsel %vm459_vm0, %v2541_v5, 0.0  ;;  %v2490_v1 = vsel %vm459_vm0, %v9758_v26, 0.0  ;;  %v2544_v49 = vmul.f32 %v9758_v26, %v9758_v26  ;;  %v8556_v5 = vld [vmem:[%s8659_s30 + $0x68] sm:$0xff] }
 0x8cd   : > { %2482 = vadd.xlane.f32.xlu0 %v2481_v52  ;;  %v7564_v22 = vpop.f32.mrf.mxu1 }
 0x8ce   : > { %v2487_v50 = vsel %vm459_vm0, %v9754_v21, 0.0  ;;  %v2543_v31 = vmul.f32 %v9754_v21, %v9754_v21  ;;  %v9774_v34 = vadd.f32 %v8550_v19, %v7564_v22  ;;  %v2570_v23 = vsel %vm459_vm0, %v2544_v49, 0.0 }
 0x8cf   : > { %2485 = vadd.xlane.f32.xlu1 %v2484_v27  ;;  %v2408_v51 = vpop.f32.mrf.mxu1 }
 0x8d0   : > { %v9770_v43 = vadd.f32 %v8549_v35, %v2408_v51  ;;  %v2567_v61 = vsel %vm459_vm0, %v2543_v31, 0.0  ;;  %v2496_v11 = vsel %vm459_vm0, %v9774_v34, 0.0  ;;  %v2546_v54 = vmul.f32 %v9774_v34, %v9774_v34  ;;  %v8558_v51 = vld [vmem:[%s8659_s30 + $0x78] sm:$0xff] }
 0x8d1   : > { %2562 = vadd.xlane.f32.xlu0 %v2561_v12  ;;  %v7567_v18 = vpop.f32.mrf.mxu1 }
 0x8d2   : > { %v2493_v41 = vsel %vm459_vm0, %v9770_v43, 0.0  ;;  %v2545_v4 = vmul.f32 %v9770_v43, %v9770_v43  ;;  %v9790_v20 = vadd.f32 %v8552_v33, %v7567_v18  ;;  %v2576_v16 = vsel %vm459_vm0, %v2546_v54, 0.0 }
 0x8d3   : > { %2565 = vadd.xlane.f32.xlu1 %v2564_v40  ;;  %v2418_v48 = vpop.f32.mrf.mxu1  ;;  %v8557_v40 = vld [vmem:[%s8659_s30 + $0x70] sm:$0xff] }
 0x8d4   : > { %v9786_v28 = vadd.f32 %v8551_v13, %v2418_v48  ;;  %v2573_v39 = vsel %vm459_vm0, %v2545_v4, 0.0  ;;  %v2502_v0 = vsel %vm459_vm0, %v9790_v20, 0.0  ;;  %v2548_v59 = vmul.f32 %v9790_v20, %v9790_v20 }
 0x8d5   : > { %2488 = vadd.xlane.f32.xlu0 %v2487_v50  ;;  %v7570_v9 = vpop.f32.mrf.mxu1 }
 0x8d6   : > { %v2499_v60 = vsel %vm459_vm0, %v9786_v28, 0.0  ;;  %v2547_v46 = vmul.f32 %v9786_v28, %v9786_v28  ;;  %v9812_v37 = vadd.f32 %v8554_v53, %v7570_v9  ;;  %v2582_v6 = vsel %vm459_vm0, %v2548_v59, 0.0 }
 0x8d7   : > { %2491 = vadd.xlane.f32.xlu1 %v2490_v1  ;;  %v2428_v47 = vpop.f32.mrf.mxu1 }
 0x8d8   : > { %v9805_v3 = vadd.f32 %v8553_v8, %v2428_v47  ;;  %v2579_v32 = vsel %vm459_vm0, %v2547_v46, 0.0  ;;  %v2508_v2 = vsel %vm459_vm0, %v9812_v37, 0.0  ;;  %v2550_v29 = vmul.f32 %v9812_v37, %v9812_v37 }
 0x8d9   : > { %2568 = vadd.xlane.f32.xlu0 %v2567_v61  ;;  %v7573_v14 = vpop.f32.mrf.mxu1 }
 0x8da   : > { %v2505_v38 = vsel %vm459_vm0, %v9805_v3, 0.0  ;;  %v2549_v45 = vmul.f32 %v9805_v3, %v9805_v3  ;;  %v9834_v15 = vadd.f32 %v8556_v5, %v7573_v14  ;;  %v2588_v27 = vsel %vm459_vm0, %v2550_v29, 0.0 }
 0x8db   : > { %2571 = vadd.xlane.f32.xlu1 %v2570_v23  ;;  %v2438_v58 = vpop.f32.mrf.mxu1 }
 0x8dc   : > { %v9830_v55 = vadd.f32 %v8555_v57, %v2438_v58  ;;  %v2585_v10 = vsel %vm459_vm0, %v2549_v45, 0.0  ;;  %v2514_v22 = vsel %vm459_vm0, %v9834_v15, 0.0  ;;  %v2552_v7 = vmul.f32 %v9834_v15, %v9834_v15 }
 0x8dd   : > { %2494 = vadd.xlane.f32.xlu0 %v2493_v41  ;;  %v7576_v52 = vpop.f32.mrf.mxu1 }
 0x8de   : > { %v2511_v36 = vsel %vm459_vm0, %v9830_v55, 0.0  ;;  %v2551_v63 = vmul.f32 %v9830_v55, %v9830_v55  ;;  %v9850_v1 = vadd.f32 %v8558_v51, %v7576_v52  ;;  %v2594_v49 = vsel %vm459_vm0, %v2552_v7, 0.0 }
 0x8df   : > { %2497 = vadd.xlane.f32.xlu1 %v2496_v11  ;;  %v2448_v12 = vpop.f32.mrf.mxu1 }
 0x8e0   : > { %v9846_v50 = vadd.f32 %v8557_v40, %v2448_v12  ;;  %v2591_v31 = vsel %vm459_vm0, %v2551_v63, 0.0  ;;  %v2520_v18 = vsel %vm459_vm0, %v9850_v1, 0.0  ;;  %v2554_v19 = vmul.f32 %v9850_v1, %v9850_v1 }
 0x8e1   : > { %2574 = vadd.xlane.f32.xlu0 %v2573_v39 }
 0x8e2   : > { %v2517_v35 = vsel %vm459_vm0, %v9846_v50, 0.0  ;;  %v2553_v61 = vmul.f32 %v9846_v50, %v9846_v50  ;;  %v2600_v41 = vsel %vm459_vm0, %v2554_v19, 0.0 }
 0x8e3   : > { %2577 = vadd.xlane.f32.xlu1 %v2576_v16 }
 0x8e4   : > { %v2597_v23 = vsel %vm459_vm0, %v2553_v61, 0.0 }
 0x8e5   : > { %2500 = vadd.xlane.f32.xlu0 %v2499_v60 }
 0x8e7   : > { %2503 = vadd.xlane.f32.xlu1 %v2502_v0 }
 0x8e9   : > { %2580 = vadd.xlane.f32.xlu0 %v2579_v32 }
 0x8eb   : > { %2583 = vadd.xlane.f32.xlu1 %v2582_v6 }
 0x8ed   : > { %2506 = vadd.xlane.f32.xlu0 %v2505_v38 }
 0x8ef   : > { %2509 = vadd.xlane.f32.xlu1 %v2508_v2 }
 0x8f1   : > { %2586 = vadd.xlane.f32.xlu0 %v2585_v10 }
 0x8f3   : > { %2589 = vadd.xlane.f32.xlu1 %v2588_v27 }
 0x8f5   : > { %2512 = vadd.xlane.f32.xlu0 %v2511_v36 }
 0x8f7   : > { %2515 = vadd.xlane.f32.xlu1 %v2514_v22 }
 0x8f9   : > { %2592 = vadd.xlane.f32.xlu0 %v2591_v31 }
 0x8fb   : > { %2595 = vadd.xlane.f32.xlu1 %v2594_v49 }
 0x8fd   : > { %2518 = vadd.xlane.f32.xlu0 %v2517_v35 }
 0x8ff   : > { %2521 = vadd.xlane.f32.xlu1 %v2520_v18 }
 0x901   : > { %2598 = vadd.xlane.f32.xlu0 %v2597_v23  ;;  %v9886_v23 = vld [vmem:[%s11791_s11] ss:$0 sm:$0xff] }
 0x903   : > { %2601 = vadd.xlane.f32.xlu1 %v2600_v41 }
 0x94e   : > { %v2480_v4 = vpop.xlane.xlu0 %2479 }
 0x94f   : > { %v2524_v11 = vmul.f32 0.03125, %v2480_v4 }
 0x950   : > { %v2477_v48 = vpop.xlane.xlu1 %2476 }
 0x951   : > { %v2523_v54 = vmul.f32 0.03125, %v2477_v48  ;;  %v2620_v16 = vmul.f32 %v2524_v11, %v2524_v11  ;;  %v2652_v49 = vsub.f32 %v9724_v30, %v2524_v11  ;;  %v9891_v11 = vld [vmem:[%s11792_s12] ss:$0 sm:$0xff] }
 0x952   : > { %v2557_v13 = vpop.xlane.xlu0 %2556 }
 0x953   : > { %v2619_v39 = vmul.f32 %v2523_v54, %v2523_v54  ;;  %v2603_v9 = vmul.f32 0.03125, %v2557_v13  ;;  %v2651_v22 = vsub.f32 %v9727_v24, %v2523_v54 }
 0x954   : > { %v2560_v33 = vpop.xlane.xlu1 %2559 }
 0x955   : > { %v2635_v60 = vsub.f32 %v2603_v9, %v2619_v39  ;;  %v2604_v46 = vmul.f32 0.03125, %v2560_v33 }
 0x956   : > { %v2483_v47 = vpop.xlane.xlu0 %2482 }
 0x957   : > { %v2667_v0 = vadd.f32 1e-05, %v2635_v60  ;;  %v2636_v59 = vsub.f32 %v2604_v46, %v2620_v16  ;;  %v9863_v25 = vmul.f32 0.03125, %v2483_v47 }
 0x958   : > { %v2486_v8 = vpop.xlane.xlu1 %2485 }
 0x959   : > { %8255 = vrsqrt.f32 %v2667_v0  ;;  %v2668_v32 = vadd.f32 1e-05, %v2636_v59  ;;  %v9865_v14 = vmul.f32 0.03125, %v2486_v8  ;;  %v2621_v53 = vmul.f32 %v9863_v25, %v9863_v25 }
 0x95a   : > { %v2563_v44 = vpop.xlane.xlu0 %2562  ;;  %v2653_v47 = vsub.f32 %v9738_v17, %v9863_v25 }
 0x95b   : > { %8257 = vrsqrt.f32 %v2668_v32  ;;  %v2605_v6 = vmul.f32 0.03125, %v2563_v44  ;;  %v2622_v38 = vmul.f32 %v9865_v14, %v9865_v14 }
 0x95c   : > { %v2566_v56 = vpop.xlane.xlu1 %2565 }
 0x95d   : > { %v2637_v45 = vsub.f32 %v2605_v6, %v2621_v53  ;;  %v2606_v58 = vmul.f32 0.03125, %v2566_v56 }
 0x95e   : > { %v2489_v62 = vpop.xlane.xlu0 %2488 }
 0x95f   : > { %v2669_v2 = vadd.f32 1e-05, %v2637_v45  ;;  %v2638_v29 = vsub.f32 %v2606_v58, %v2622_v38  ;;  %v9871_v57 = vmul.f32 0.03125, %v2489_v62 }
 0x960   : > { %v2492_v10 = vpop.xlane.xlu1 %2491 }
 0x961   : > { %8259 = vrsqrt.f32 %v2669_v2  ;;  %v2670_v52 = vadd.f32 1e-05, %v2638_v29  ;;  %v9873_v5 = vmul.f32 0.03125, %v2492_v10  ;;  %v2623_v36 = vmul.f32 %v9871_v57, %v9871_v57 }
 0x962   : > { %v2569_v27 = vpop.xlane.xlu0 %2568  ;;  %v2654_v2 = vsub.f32 %v9742_v42, %v9865_v14  ;;  %v2655_v14 = vsub.f32 %v9754_v21, %v9871_v57 }
 0x963   : > { %8261 = vrsqrt.f32 %v2670_v52  ;;  %v2607_v63 = vmul.f32 0.03125, %v2569_v27  ;;  %v2624_v7 = vmul.f32 %v9873_v5, %v9873_v5  ;;  %v2656_v57 = vsub.f32 %v9758_v26, %v9873_v5 }
 0x964   : > { %v2572_v12 = vpop.xlane.xlu1 %2571 }
 0x965   : > { %v2639_v40 = vsub.f32 %v2607_v63, %v2623_v36  ;;  %v2608_v31 = vmul.f32 0.03125, %v2572_v12 }
 0x966   : > { %v8256_v51 = vpop.eup %8255  ;;  %v2495_v35 = vpop.xlane.xlu0 %2494 }
 0x967   : > { %v2671_v61 = vadd.f32 1e-05, %v2639_v40  ;;  %v2640_v18 = vsub.f32 %v2608_v31, %v2624_v7  ;;  %v9881_v19 = vmul.f32 0.03125, %v2495_v35  ;;  %v2699_v41 = vmul.f32 %v8256_v51, %v2651_v22 }
 0x968   : > { %v8258_v4 = vpop.eup %8257  ;;  %v2498_v48 = vpop.xlane.xlu1 %2497 }
 0x969   : > { %v2700_v54 = vmul.f32 %v8258_v4, %v2652_v49  ;;  %8263 = vrsqrt.f32 %v2671_v61  ;;  %v2672_v13 = vadd.f32 1e-05, %v2640_v18  ;;  %v9893_v39 = vmul.f32 0.03125, %v2498_v48 }
 0x96a   : > { %v2575_v9 = vpop.xlane.xlu0 %2574  ;;  %v2721_v33 = vmul.f32 %v9886_v23, %v2699_v41  ;;  %v2625_v16 = vmul.f32 %v9881_v19, %v9881_v19 }
 0x96b   : > { %8265 = vrsqrt.f32 %v2672_v13  ;;  %v2609_v60 = vmul.f32 0.03125, %v2575_v9  ;;  %v2722_v46 = vmul.f32 %v9886_v23, %v2700_v54  ;;  %v2626_v8 = vmul.f32 %v9893_v39, %v9893_v39 }
 0x96c   : > { %v2578_v0 = vpop.xlane.xlu1 %2577  ;;  %v2743_v59 = vadd.f32 %v9891_v11, %v2721_v33 }
 0x96d   : > { %v2641_v32 = vsub.f32 %v2609_v60, %v2625_v16  ;;  %v2610_v44 = vmul.f32 0.03125, %v2578_v0  ;;  %v2744_v53 = vadd.f32 %v9891_v11, %v2722_v46 }
 0x96e   : > { %v8260_v6 = vpop.eup %8259  ;;  %7585 = vmatprep.mubr.msk.f32.mxu0 %vm459_vm0, %v2743_v59  ;;  %v2501_v56 = vpop.xlane.xlu0 %2500 }
 0x96f   : > { %v2673_v38 = vadd.f32 1e-05, %v2641_v32  ;;  %v2642_v45 = vsub.f32 %v2610_v44, %v2626_v8  ;;  %v9906_v58 = vmul.f32 0.03125, %v2501_v56  ;;  %7586 = vmatmul.mubr.msk.f32.vlgmr.msra.gmra.mxu0 %vm459_vm0, %v2744_v53  ;;  %v2701_v25 = vmul.f32 %v8260_v6, %v2653_v47 }
 0x970   : > { %v8262_v62 = vpop.eup %8261  ;;  %v2504_v29 = vpop.xlane.xlu1 %2503  ;;  %v2657_v53 = vsub.f32 %v9770_v43, %v9881_v19  ;;  %v2658_v19 = vsub.f32 %v9774_v34, %v9893_v39 }
 0x971   : > { %8267 = vrsqrt.f32 %v2673_v38  ;;  %v2674_v10 = vadd.f32 1e-05, %v2642_v45  ;;  %v9911_v52 = vmul.f32 0.03125, %v2504_v29  ;;  %v2723_v36 = vmul.f32 %v9886_v23, %v2701_v25 }
 0x972   : > { %v2581_v27 = vpop.xlane.xlu0 %2580  ;;  %v2702_v63 = vmul.f32 %v8262_v62, %v2654_v2  ;;  %v2627_v12 = vmul.f32 %v9906_v58, %v9906_v58 }
 0x973   : > { %8269 = vrsqrt.f32 %v2674_v10  ;;  %v2611_v22 = vmul.f32 0.03125, %v2581_v27  ;;  %v2745_v40 = vadd.f32 %v9891_v11, %v2723_v36  ;;  %v2628_v51 = vmul.f32 %v9911_v52, %v9911_v52 }
 0x974   : > { %v2584_v7 = vpop.xlane.xlu1 %2583  ;;  %v2724_v31 = vmul.f32 %v9886_v23, %v2702_v63 }
 0x975   : > { %v2643_v49 = vsub.f32 %v2611_v22, %v2627_v12  ;;  %v2612_v35 = vmul.f32 0.03125, %v2584_v7  ;;  %7588 = vmatprep.mubr.msk.f32.mxu0 %vm459_vm0, %v2745_v40 }
 0x976   : > { %v8264_v61 = vpop.eup %8263  ;;  %v2507_v18 = vpop.xlane.xlu0 %2506  ;;  %v2746_v41 = vadd.f32 %v9891_v11, %v2724_v31 }
 0x977   : > { %v2675_v4 = vadd.f32 1e-05, %v2643_v49  ;;  %v2644_v48 = vsub.f32 %v2612_v35, %v2628_v51  ;;  %v9924_v54 = vmul.f32 0.03125, %v2507_v18  ;;  %v2703_v13 = vmul.f32 %v8264_v61, %v2655_v14 }
 0x978   : > { %v8266_v9 = vpop.eup %8265  ;;  %7589 = vmatmul.mubr.msk.f32.gmra.mxu0 %vm459_vm0, %v2746_v41  ;;  %v2510_v33 = vpop.xlane.xlu1 %2509  ;;  %v2659_v61 = vsub.f32 %v9786_v28, %v9906_v58 }
 0x979   : > { %8271 = vrsqrt.f32 %v2675_v4  ;;  %v2676_v16 = vadd.f32 1e-05, %v2644_v48  ;;  %v9929_v60 = vmul.f32 0.03125, %v2510_v33  ;;  %v2725_v47 = vmul.f32 %v9886_v23, %v2703_v13 }
 0x97a   : > { %v2587_v46 = vpop.xlane.xlu0 %2586  ;;  %v2704_v0 = vmul.f32 %v8266_v9, %v2656_v57  ;;  %v2629_v59 = vmul.f32 %v9924_v54, %v9924_v54 }
 0x97b   : > { %8273 = vrsqrt.f32 %v2676_v16  ;;  %v2613_v8 = vmul.f32 0.03125, %v2587_v46  ;;  %v2747_v44 = vadd.f32 %v9891_v11, %v2725_v47  ;;  %v2630_v6 = vmul.f32 %v9929_v60, %v9929_v60 }
 0x97c   : > { %v2590_v32 = vpop.xlane.xlu1 %2589  ;;  %v2726_v5 = vmul.f32 %v9886_v23, %v2704_v0  ;;  %v2660_v0 = vsub.f32 %v9790_v20, %v9911_v52  ;;  %v2661_v52 = vsub.f32 %v9805_v3, %v9924_v54 }
 0x97d   : > { %v2645_v56 = vsub.f32 %v2613_v8, %v2629_v59  ;;  %v2614_v38 = vmul.f32 0.03125, %v2590_v32  ;;  %7591 = vmatprep.mubr.msk.f32.mxu0 %vm459_vm0, %v2747_v44 }
 0x97e   : > { %v8268_v45 = vpop.eup %8267  ;;  %v2513_v25 = vpop.xlane.xlu0 %2512  ;;  %v2748_v62 = vadd.f32 %v9891_v11, %v2726_v5 }
 0x97f   : > { %v2677_v2 = vadd.f32 1e-05, %v2645_v56  ;;  %v2646_v29 = vsub.f32 %v2614_v38, %v2630_v6  ;;  %v9942_v10 = vmul.f32 0.03125, %v2513_v25  ;;  %v2705_v27 = vmul.f32 %v8268_v45, %v2657_v53 }
 0x980   : > { %v8270_v36 = vpop.eup %8269  ;;  %7592 = vmatmul.mubr.msk.f32.gmra.mxu0 %vm459_vm0, %v2748_v62  ;;  %v2516_v63 = vpop.xlane.xlu1 %2515 }
 0x981   : > { %8275 = vrsqrt.f32 %v2677_v2  ;;  %v2678_v12 = vadd.f32 1e-05, %v2646_v29  ;;  %v9947_v22 = vmul.f32 0.03125, %v2516_v63  ;;  %v2727_v40 = vmul.f32 %v9886_v23, %v2705_v27 }
 0x982   : > { %v2593_v7 = vpop.xlane.xlu0 %2592  ;;  %v2706_v31 = vmul.f32 %v8270_v36, %v2658_v19  ;;  %v2631_v14 = vmul.f32 %v9942_v10, %v9942_v10  ;;  %v2662_v36 = vsub.f32 %v9812_v37, %v9929_v60 }
 0x983   : > { %8277 = vrsqrt.f32 %v2678_v12  ;;  %v2615_v51 = vmul.f32 0.03125, %v2593_v7  ;;  %v2749_v35 = vadd.f32 %v9891_v11, %v2727_v40  ;;  %v2632_v18 = vmul.f32 %v9947_v22, %v9947_v22 }
 0x984   : > { %v2596_v49 = vpop.xlane.xlu1 %2595  ;;  %v2728_v39 = vmul.f32 %v9886_v23, %v2706_v31 }
 0x985   : > { %v2647_v41 = vsub.f32 %v2615_v51, %v2631_v14  ;;  %v2616_v4 = vmul.f32 0.03125, %v2596_v49  ;;  %7594 = vmatprep.mubr.msk.f32.mxu0 %vm459_vm0, %v2749_v35  ;;  %v2663_v49 = vsub.f32 %v9830_v55, %v9942_v10 }
 0x986   : > { %v8272_v48 = vpop.eup %8271  ;;  %v2519_v13 = vpop.xlane.xlu0 %2518  ;;  %v2750_v9 = vadd.f32 %v9891_v11, %v2728_v39  ;;  %v2664_v39 = vsub.f32 %v9834_v15, %v9947_v22 }
 0x987   : > { %v2679_v57 = vadd.f32 1e-05, %v2647_v41  ;;  %v2648_v33 = vsub.f32 %v2616_v4, %v2632_v18  ;;  %v2537_v16 = vmul.f32 0.03125, %v2519_v13  ;;  %v2707_v46 = vmul.f32 %v8272_v48, %v2659_v61 }
 0x988   : > { %v8274_v47 = vpop.eup %8273  ;;  %7595 = vmatmul.mubr.msk.f32.gmra.mxu0 %vm459_vm0, %v2750_v9  ;;  %v2522_v58 = vpop.xlane.xlu1 %2521 }
 0x989   : > { %8279 = vrsqrt.f32 %v2679_v57  ;;  %v2680_v59 = vadd.f32 1e-05, %v2648_v33  ;;  %v2538_v8 = vmul.f32 0.03125, %v2522_v58  ;;  %v2729_v44 = vmul.f32 %v9886_v23, %v2707_v46 }
 0x98a   : > { %v2599_v32 = vpop.xlane.xlu0 %2598  ;;  %v2708_v5 = vmul.f32 %v8274_v47, %v2660_v0  ;;  %v2633_v53 = vmul.f32 %v2537_v16, %v2537_v16  ;;  %v2665_v10 = vsub.f32 %v9846_v50, %v2537_v16 }
 0x98b   : > { %8281 = vrsqrt.f32 %v2680_v59  ;;  %v2617_v6 = vmul.f32 0.03125, %v2599_v32  ;;  %v2751_v38 = vadd.f32 %v9891_v11, %v2729_v44  ;;  %v2634_v25 = vmul.f32 %v2538_v8, %v2538_v8  ;;  %v3113_v32 = vld [vmem:[%s11789_s9 + $0x30] sm:$0xff]  ;;  %v3110_v44 = vld [vmem:[%s11789_s9 + $0x18] sm:$0xff] }
 0x98c   : > { %v2602_v56 = vpop.xlane.xlu1 %2601  ;;  %v2730_v45 = vmul.f32 %v9886_v23, %v2708_v5  ;;  %v2666_v22 = vsub.f32 %v9850_v1, %v2538_v8  ;;  %v3114_v8 = vld [vmem:[%s11789_s9 + $0x38] sm:$0xff]  ;;  %v3109_v5 = vld [vmem:[%s11789_s9 + $0x10] sm:$0xff] }
 0x98d   : > { %v2649_v62 = vsub.f32 %v2617_v6, %v2633_v53  ;;  %v2618_v2 = vmul.f32 0.03125, %v2602_v56  ;;  %7597 = vmatprep.mubr.msk.f32.mxu0 %vm459_vm0, %v2751_v38  ;;  %7609 = vmatprep.subr.mxu1 %v3114_v8  ;;  %v3108_v53 = vld [vmem:[%s11789_s9 + $0x8] sm:$0xff]  ;;  %v3107_v6 = vld [vmem:[%s11789_s9] sm:$0xff] }
 0x98e   : > { %v8276_v29 = vpop.eup %8275  ;;  %v2752_v27 = vadd.f32 %v9891_v11, %v2730_v45  ;;  %7610 = vmatpush3.msra.mxu1 %v3114_v8  ;;  %v10024_v56 = vld [vmem:[%s11788_s8] ss:$0 sm:$0xff] }
 0x98f   : > { %v2681_v19 = vadd.f32 1e-05, %v2649_v62  ;;  %v2650_v63 = vsub.f32 %v2618_v2, %v2634_v25  ;;  %v2709_v12 = vmul.f32 %v8276_v29, %v2661_v52  ;;  %7611 = vmatprep.subr.mxu1 %v3113_v32 }
 0x990   : > { %v8278_v7 = vpop.eup %8277  ;;  %7598 = vmatmul.mubr.msk.f32.gmra.mxu0 %vm459_vm0, %v2752_v27  ;;  %7612 = vmatpush3.msra.mxu1 %v3113_v32 }
 0x991   : > { %8283 = vrsqrt.f32 %v2681_v19  ;;  %v2682_v40 = vadd.f32 1e-05, %v2650_v63  ;;  %v2731_v54 = vmul.f32 %v9886_v23, %v2709_v12  ;;  %v2710_v31 = vmul.f32 %v8278_v7, %v2662_v36 }
 0x993   : > { %8285 = vrsqrt.f32 %v2682_v40  ;;  %v2753_v14 = vadd.f32 %v9891_v11, %v2731_v54  ;;  %v2732_v51 = vmul.f32 %v9886_v23, %v2710_v31 }
 0x995   : > { %7600 = vmatprep.mubr.msk.f32.mxu0 %vm459_vm0, %v2753_v14  ;;  %v2754_v60 = vadd.f32 %v9891_v11, %v2732_v51 }
 0x996   : > { %v8280_v35 = vpop.eup %8279 }
 0x997   : > { %7601 = vmatmul.mubr.msk.f32.gmra.mxu0 %vm459_vm0, %v2754_v60  ;;  %v2711_v61 = vmul.f32 %v8280_v35, %v2663_v49 }
 0x998   : > { %v8282_v18 = vpop.eup %8281 }
 0x999   : > { %v2733_v41 = vmul.f32 %v9886_v23, %v2711_v61  ;;  %v2712_v4 = vmul.f32 %v8282_v18, %v2664_v39 }
 0x99b   : > { %v2755_v48 = vadd.f32 %v9891_v11, %v2733_v41  ;;  %v2734_v13 = vmul.f32 %v9886_v23, %v2712_v4 }
 0x99d   : > { %7603 = vmatprep.mubr.msk.f32.mxu0 %vm459_vm0, %v2755_v48  ;;  %v2756_v9 = vadd.f32 %v9891_v11, %v2734_v13 }
 0x99e   : > { %v8284_v57 = vpop.eup %8283 }
 0x99f   : > { %7604 = vmatmul.mubr.msk.f32.gmra.mxu0 %vm459_vm0, %v2756_v9  ;;  %v2713_v33 = vmul.f32 %v8284_v57, %v2665_v10 }
 0x9a0   : > { %v8286_v46 = vpop.eup %8285 }
 0x9a1   : > { %v2735_v47 = vmul.f32 %v9886_v23, %v2713_v33  ;;  %v2714_v0 = vmul.f32 %v8286_v46, %v2666_v22 }
 0x9a3   : > { %v2757_v58 = vadd.f32 %v9891_v11, %v2735_v47  ;;  %v2736_v59 = vmul.f32 %v9886_v23, %v2714_v0  ;;  %v3112_v23 = vld [vmem:[%s11789_s9 + $0x28] sm:$0xff] }
 0x9a4   : > { %7613 = vmatprep.subr.mxu1 %v3112_v23 }
 0x9a5   : > { %7606 = vmatprep.mubr.msk.f32.mxu0 %vm459_vm0, %v2757_v58  ;;  %v2758_v16 = vadd.f32 %v9891_v11, %v2736_v59  ;;  %7614 = vmatpush3.msra.mxu1 %v3112_v23  ;;  %v3111_v11 = vld [vmem:[%s11789_s9 + $0x20] sm:$0xff] }
 0x9a6   : > { %7615 = vmatprep.subr.mxu1 %v3111_v11 }
 0x9a7   : > { %7607 = vmatmul.mubr.msk.f32.gmra.mxu0 %vm459_vm0, %v2758_v16  ;;  %7616 = vmatpush3.msra.mxu1 %v3111_v11 }
 0x9a8   : > { %7617 = vmatprep.subr.mxu1 %v3110_v44 }
 0x9a9   : > { %7618 = vmatpush3.msra.mxu1 %v3110_v44 }
 0x9aa   : > { %7619 = vmatprep.subr.mxu1 %v3109_v5 }
 0x9ab   : > { %7620 = vmatpush3.msra.mxu1 %v3109_v5 }
 0x9ac   : > { %7621 = vmatprep.subr.mxu1 %v3108_v53 }
 0x9ad   : > { %7622 = vmatpush3.msra.mxu1 %v3108_v53 }
 0x9ae   : > { %7623 = vmatprep.subr.mxu1 %v3107_v6 }
 0x9af   : > { %7624 = vmatpush3.msra.mxu1 %v3107_v6 }
 0xa2f   : > { %v7587_v38 = vpop.f32.mrf.mxu0 }
 0xa30   : > { %v2890_v45 = vadd.f32 %v7587_v38, %v10024_v56 }
 0xa31   : > { %v2884_v52 = vpop.f32.mrf.mxu0 }
 0xa32   : > { %v2980_v25 = vmul.f32 0.044715, %v2890_v45  ;;  %v2885_v62 = vadd.f32 %v10024_v56, %v2884_v52 }
 0xa34   : > { %v2996_v2 = vmul.f32 %v2980_v25, %v2890_v45  ;;  %v2979_v29 = vmul.f32 0.044715, %v2885_v62  ;;  %v2964_v25 = vmul.f32 0.5, %v2890_v45 }
 0xa36   : > { %v3012_v27 = vmul.f32 %v2996_v2, %v2890_v45  ;;  %v2995_v36 = vmul.f32 %v2979_v29, %v2885_v62  ;;  %v2963_v2 = vmul.f32 0.5, %v2885_v62 }
 0xa38   : > { %v3028_v19 = vadd.f32 %v3012_v27, %v2890_v45  ;;  %v3011_v63 = vmul.f32 %v2995_v36, %v2885_v62  ;;  %v7590_v12 = vpop.f32.mrf.mxu0 }
 0xa39   : > { %v10029_v7 = vadd.f32 %v7590_v12, %v10024_v56 }
 0xa3a   : > { %v3044_v40 = vmul.f32 0.7978846, %v3028_v19  ;;  %v3027_v54 = vadd.f32 %v3011_v63, %v2885_v62  ;;  %v2894_v31 = vpop.f32.mrf.mxu0 }
 0xa3b   : > { %v2982_v14 = vmul.f32 0.044715, %v10029_v7  ;;  %v10033_v51 = vadd.f32 %v10024_v56, %v2894_v31 }
 0xa3c   : > { %8287 = vtanh.f32 %v3044_v40  ;;  %v3043_v49 = vmul.f32 0.7978846, %v3027_v54 }
 0xa3d   : > { %v2998_v60 = vmul.f32 %v2982_v14, %v10029_v7  ;;  %v2981_v35 = vmul.f32 0.044715, %v10033_v51 }
 0xa3e   : > { %8289 = vtanh.f32 %v3043_v49 }
 0xa3f   : > { %v3014_v39 = vmul.f32 %v2998_v60, %v10029_v7  ;;  %v2997_v61 = vmul.f32 %v2981_v35, %v10033_v51 }
 0xa40   : > { %v7593_v18 = vpop.f32.mrf.mxu0 }
 0xa41   : > { %v3030_v41 = vadd.f32 %v3014_v39, %v10029_v7  ;;  %v3013_v4 = vmul.f32 %v2997_v61, %v10033_v51  ;;  %v10042_v48 = vadd.f32 %v7593_v18, %v10024_v56 }
 0xa42   : > { %v2904_v13 = vpop.f32.mrf.mxu0 }
 0xa43   : > { %v3029_v10 = vadd.f32 %v3013_v4, %v10033_v51  ;;  %v2984_v9 = vmul.f32 0.044715, %v10042_v48  ;;  %v10047_v57 = vadd.f32 %v10024_v56, %v2904_v13  ;;  %v3046_v22 = vmul.f32 0.7978846, %v3030_v41 }
 0xa45   : > { %v3000_v33 = vmul.f32 %v2984_v9, %v10042_v48  ;;  %v2983_v46 = vmul.f32 0.044715, %v10047_v57  ;;  %v3045_v47 = vmul.f32 0.7978846, %v3029_v10  ;;  %8291 = vtanh.f32 %v3046_v22 }
 0xa46   : > { %v2965_v9 = vmul.f32 0.5, %v10033_v51 }
 0xa47   : > { %v3016_v0 = vmul.f32 %v3000_v33, %v10042_v48  ;;  %v2999_v58 = vmul.f32 %v2983_v46, %v10047_v57  ;;  %8293 = vtanh.f32 %v3045_v47  ;;  %v2966_v33 = vmul.f32 0.5, %v10029_v7 }
 0xa48   : > { %v7596_v59 = vpop.f32.mrf.mxu0 }
 0xa49   : > { %v8288_v16 = vpop.eup %8287  ;;  %v3032_v8 = vadd.f32 %v3016_v0, %v10042_v48  ;;  %v3015_v32 = vmul.f32 %v2999_v58, %v10047_v57  ;;  %v10056_v23 = vadd.f32 %v7596_v59, %v10024_v56 }
 0xa4a   : > { %v3076_v11 = vadd.f32 1.0, %v8288_v16  ;;  %v2914_v44 = vpop.f32.mrf.mxu0 }
 0xa4b   : > { %v8290_v5 = vpop.eup %8289  ;;  %v3031_v53 = vadd.f32 %v3015_v32, %v10047_v57  ;;  %v2986_v6 = vmul.f32 0.044715, %v10056_v23  ;;  %v10061_v38 = vadd.f32 %v10024_v56, %v2914_v44  ;;  %v3048_v52 = vmul.f32 0.7978846, %v3032_v8 }
 0xa4c   : > { %v3075_v29 = vadd.f32 1.0, %v8290_v5  ;;  %v3092_v12 = vmul.f32 %v3076_v11, %v2964_v25 }
 0xa4d   : > { %v3002_v27 = vmul.f32 %v2986_v6, %v10056_v23  ;;  %v2985_v36 = vmul.f32 0.044715, %v10061_v38  ;;  %v3047_v19 = vmul.f32 0.7978846, %v3031_v53  ;;  %8295 = vtanh.f32 %v3048_v52 }
 0xa4e   : > { %v3091_v63 = vmul.f32 %v3075_v29, %v2963_v2 }
 0xa4f   : > { %v3018_v40 = vmul.f32 %v3002_v27, %v10056_v23  ;;  %v3001_v54 = vmul.f32 %v2985_v36, %v10061_v38  ;;  %8297 = vtanh.f32 %v3047_v19  ;;  %v2967_v27 = vmul.f32 0.5, %v10047_v57 }
 0xa50   : > { %v7599_v31 = vpop.f32.mrf.mxu0  ;;  %7625 = vmatprep.mubr.msk.f32.mxu1 %vm3115_vm2, %v3091_v63 }
 0xa51   : > { %v3034_v45 = vadd.f32 %v3018_v40, %v10056_v23  ;;  %v3017_v62 = vmul.f32 %v3001_v54, %v10061_v38  ;;  %v10071_v14 = vadd.f32 %v7599_v31, %v10024_v56  ;;  %7626 = vmatmul.mubr.msk.f32.vlgmr.msra.gmra.mxu1 %vm3115_vm2, %v3092_v12  ;;  %v2968_v40 = vmul.f32 0.5, %v10042_v48 }
 0xa52   : > { %v8292_v49 = vpop.eup %8291  ;;  %v2924_v60 = vpop.f32.mrf.mxu0 }
 0xa53   : > { %v3033_v35 = vadd.f32 %v3017_v62, %v10061_v38  ;;  %v2988_v39 = vmul.f32 0.044715, %v10071_v14  ;;  %v10077_v61 = vadd.f32 %v10024_v56, %v2924_v60  ;;  %v3078_v41 = vadd.f32 1.0, %v8292_v49 }
 0xa54   : > { %v8294_v18 = vpop.eup %8293  ;;  %v3050_v4 = vmul.f32 0.7978846, %v3034_v45 }
 0xa55   : > { %v3004_v13 = vmul.f32 %v2988_v39, %v10071_v14  ;;  %v2987_v10 = vmul.f32 0.044715, %v10077_v61  ;;  %v3077_v22 = vadd.f32 1.0, %v8294_v18  ;;  %v3049_v46 = vmul.f32 0.7978846, %v3033_v35 }
 0xa56   : > { %8299 = vtanh.f32 %v3050_v4  ;;  %v3094_v8 = vmul.f32 %v3078_v41, %v2966_v33 }
 0xa57   : > { %v3020_v47 = vmul.f32 %v3004_v13, %v10071_v14  ;;  %v3003_v0 = vmul.f32 %v2987_v10, %v10077_v61  ;;  %v7602_v58 = vpop.f32.mrf.mxu0  ;;  %v3093_v59 = vmul.f32 %v3077_v22, %v2965_v9  ;;  %8301 = vtanh.f32 %v3049_v46 }
 0xa58   : > { %v10086_v16 = vadd.f32 %v7602_v58, %v10024_v56 }
 0xa59   : > { %v3036_v32 = vadd.f32 %v3020_v47, %v10071_v14  ;;  %v3019_v51 = vmul.f32 %v3003_v0, %v10077_v61  ;;  %7628 = vmatprep.mubr.msk.f32.mxu1 %vm3115_vm2, %v3093_v59  ;;  %v2934_v7 = vpop.f32.mrf.mxu0  ;;  %v2969_v47 = vmul.f32 0.5, %v10061_v38  ;;  %v2970_v59 = vmul.f32 0.5, %v10056_v23 }
 0xa5a   : > { %v8296_v11 = vpop.eup %8295  ;;  %v2990_v44 = vmul.f32 0.044715, %v10086_v16  ;;  %v10093_v5 = vadd.f32 %v10024_v56, %v2934_v7  ;;  %7629 = vmatmul.mubr.msk.f32.gmra.mxu1 %vm3115_vm2, %v3094_v8 }
 0xa5b   : > { %v3035_v53 = vadd.f32 %v3019_v51, %v10077_v61  ;;  %v3052_v6 = vmul.f32 0.7978846, %v3036_v32  ;;  %v3080_v29 = vadd.f32 1.0, %v8296_v11 }
 0xa5c   : > { %v8298_v52 = vpop.eup %8297  ;;  %v3006_v25 = vmul.f32 %v2990_v44, %v10086_v16  ;;  %v2989_v2 = vmul.f32 0.044715, %v10093_v5 }
 0xa5d   : > { %v3079_v36 = vadd.f32 1.0, %v8298_v52  ;;  %v3051_v19 = vmul.f32 0.7978846, %v3035_v53  ;;  %8303 = vtanh.f32 %v3052_v6  ;;  %v3096_v57 = vmul.f32 %v3080_v29, %v2968_v40 }
 0xa5e   : > { %v3022_v63 = vmul.f32 %v3006_v25, %v10086_v16  ;;  %v3005_v12 = vmul.f32 %v2989_v2, %v10093_v5 }
 0xa5f   : > { %v7605_v54 = vpop.f32.mrf.mxu0  ;;  %v3095_v31 = vmul.f32 %v3079_v36, %v2967_v27  ;;  %8305 = vtanh.f32 %v3051_v19  ;;  %v2971_v19 = vmul.f32 0.5, %v10077_v61 }
 0xa60   : > { %v3038_v45 = vadd.f32 %v3022_v63, %v10086_v16  ;;  %v3021_v62 = vmul.f32 %v3005_v12, %v10093_v5  ;;  %v10106_v49 = vadd.f32 %v7605_v54, %v10024_v56  ;;  %v2972_v54 = vmul.f32 0.5, %v10071_v14 }
 0xa61   : > { %7631 = vmatprep.mubr.msk.f32.mxu1 %vm3115_vm2, %v3095_v31  ;;  %v2944_v60 = vpop.f32.mrf.mxu0  ;;  %v2974_v14 = vmul.f32 0.5, %v10086_v16 }
 0xa62   : > { %v3037_v35 = vadd.f32 %v3021_v62, %v10093_v5  ;;  %v2992_v39 = vmul.f32 0.044715, %v10106_v49  ;;  %v10112_v48 = vadd.f32 %v10024_v56, %v2944_v60  ;;  %7632 = vmatmul.mubr.msk.f32.gmra.mxu1 %vm3115_vm2, %v3096_v57  ;;  %v3054_v18 = vmul.f32 0.7978846, %v3038_v45 }
 0xa63   : > { %v8300_v41 = vpop.eup %8299 }
 0xa64   : > { %v3008_v4 = vmul.f32 %v2992_v39, %v10106_v49  ;;  %v2991_v13 = vmul.f32 0.044715, %v10112_v48  ;;  %v3053_v10 = vmul.f32 0.7978846, %v3037_v35  ;;  %v8302_v9 = vpop.eup %8301  ;;  %v3082_v22 = vadd.f32 1.0, %v8300_v41 }
 0xa65   : > { %8307 = vtanh.f32 %v3054_v18  ;;  %v3081_v0 = vadd.f32 1.0, %v8302_v9  ;;  %v2973_v41 = vmul.f32 0.5, %v10093_v5 }
 0xa66   : > { %v3024_v33 = vmul.f32 %v3008_v4, %v10106_v49  ;;  %v3007_v46 = vmul.f32 %v2991_v13, %v10112_v48  ;;  %8309 = vtanh.f32 %v3053_v10  ;;  %v3098_v44 = vmul.f32 %v3082_v22, %v2970_v59 }
 0xa67   : > { %v7608_v58 = vpop.f32.mrf.mxu0  ;;  %v3097_v7 = vmul.f32 %v3081_v0, %v2969_v47  ;;  %v2976_v0 = vmul.f32 0.5, %v10106_v49 }
 0xa68   : > { %v3040_v8 = vadd.f32 %v3024_v33, %v10106_v49  ;;  %v3023_v32 = vmul.f32 %v3007_v46, %v10112_v48  ;;  %v2960_v51 = vadd.f32 %v7608_v58, %v10024_v56  ;;  %v2975_v46 = vmul.f32 0.5, %v10112_v48  ;;  %v3348_v49 = vld [vmem:[%s11781_s1] sm:$0xff] }
 0xa69   : > { %v2954_v11 = vpop.f32.mrf.mxu0  ;;  %7634 = vmatprep.mubr.msk.f32.mxu1 %vm3115_vm2, %v3097_v7  ;;  %7681 = vmatprep.mubr.f32.mxu0 %v3348_v49  ;;  %v3363_v49 = vld [vmem:[%s11781_s1 + $0x78] sm:$0xff] }
 0xa6a   : > { %v8304_v53 = vpop.eup %8303  ;;  %v3039_v6 = vadd.f32 %v3023_v32, %v10112_v48  ;;  %v2994_v52 = vmul.f32 0.044715, %v2960_v51  ;;  %v2955_v38 = vadd.f32 %v10024_v56, %v2954_v11  ;;  %v3056_v25 = vmul.f32 0.7978846, %v3040_v8  ;;  %7635 = vmatmul.mubr.msk.f32.gmra.mxu1 %vm3115_vm2, %v3098_v44 }
 0xa6b   : > { %v3084_v23 = vadd.f32 1.0, %v8304_v53  ;;  %v2978_v11 = vmul.f32 0.5, %v2960_v51 }
 0xa6c   : > { %v8306_v2 = vpop.eup %8305  ;;  %v3010_v29 = vmul.f32 %v2994_v52, %v2960_v51  ;;  %v2993_v27 = vmul.f32 0.044715, %v2955_v38  ;;  %v3055_v36 = vmul.f32 0.7978846, %v3039_v6  ;;  %8311 = vtanh.f32 %v3056_v25 }
 0xa6d   : > { %v3083_v63 = vadd.f32 1.0, %v8306_v2  ;;  %v3100_v62 = vmul.f32 %v3084_v23, %v2972_v54  ;;  %v2977_v32 = vmul.f32 0.5, %v2955_v38 }
 0xa6e   : > { %v3026_v12 = vmul.f32 %v3010_v29, %v2960_v51  ;;  %v3009_v40 = vmul.f32 %v2993_v27, %v2955_v38  ;;  %8313 = vtanh.f32 %v3055_v36 }
 0xa6f   : > { %v3099_v31 = vmul.f32 %v3083_v63, %v2971_v19 }
 0xa70   : > { %v3042_v45 = vadd.f32 %v3026_v12, %v2960_v51  ;;  %v3025_v56 = vmul.f32 %v3009_v40, %v2955_v38 }
 0xa71   : > { %7637 = vmatprep.mubr.msk.f32.mxu1 %vm3115_vm2, %v3099_v31  ;;  %v6636_v31 = vld [vmem:[%s11790_s10] ss:$0 sm:$0xff] }
 0xa72   : > { %v8308_v57 = vpop.eup %8307  ;;  %v3041_v60 = vadd.f32 %v3025_v56, %v2955_v38  ;;  %7638 = vmatmul.mubr.msk.f32.gmra.mxu1 %vm3115_vm2, %v3100_v62  ;;  %v3058_v35 = vmul.f32 0.7978846, %v3042_v45 }
 0xa73   : > { %v8310_v39 = vpop.eup %8309  ;;  %v3086_v18 = vadd.f32 1.0, %v8308_v57 }
 0xa74   : > { %v3057_v61 = vmul.f32 0.7978846, %v3041_v60  ;;  %8315 = vtanh.f32 %v3058_v35  ;;  %v3085_v4 = vadd.f32 1.0, %v8310_v39 }
 0xa75   : > { %v3102_v10 = vmul.f32 %v3086_v18, %v2974_v14 }
 0xa76   : > { %8317 = vtanh.f32 %v3057_v61  ;;  %v3101_v13 = vmul.f32 %v3085_v4, %v2973_v41 }
 0xa78   : > { %7640 = vmatprep.mubr.msk.f32.mxu1 %vm3115_vm2, %v3101_v13 }
 0xa79   : > { %v8312_v9 = vpop.eup %8311  ;;  %7641 = vmatmul.mubr.msk.f32.gmra.mxu1 %vm3115_vm2, %v3102_v10 }
 0xa7a   : > { %v3088_v33 = vadd.f32 1.0, %v8312_v9 }
 0xa7b   : > { %v8314_v22 = vpop.eup %8313 }
 0xa7c   : > { %v3087_v47 = vadd.f32 1.0, %v8314_v22  ;;  %v3104_v5 = vmul.f32 %v3088_v33, %v2976_v0  ;;  %v3352_v0 = vld [vmem:[%s11781_s1 + $0x20] sm:$0xff] }
 0xa7e   : > { %v3103_v58 = vmul.f32 %v3087_v47, %v2975_v46 }
 0xa80   : > { %7643 = vmatprep.mubr.msk.f32.mxu1 %vm3115_vm2, %v3103_v58  ;;  %v3353_v58 = vld [vmem:[%s11781_s1 + $0x28] sm:$0xff] }
 0xa81   : > { %v8316_v16 = vpop.eup %8315  ;;  %7644 = vmatmul.mubr.msk.f32.gmra.mxu1 %vm3115_vm2, %v3104_v5  ;;  %v3354_v5 = vld [vmem:[%s11781_s1 + $0x30] sm:$0xff] }
 0xa82   : > { %v3090_v8 = vadd.f32 1.0, %v8316_v16  ;;  %v3355_v16 = vld [vmem:[%s11781_s1 + $0x38] sm:$0xff] }
 0xa83   : > { %v8318_v59 = vpop.eup %8317 }
 0xa84   : > { %v3089_v7 = vadd.f32 1.0, %v8318_v59  ;;  %v3106_v53 = vmul.f32 %v3090_v8, %v2978_v11  ;;  %v3356_v59 = vld [vmem:[%s11781_s1 + $0x40] sm:$0xff]  ;;  %v3357_v8 = vld [vmem:[%s11781_s1 + $0x48] sm:$0xff] }
 0xa85   : > { %v3360_v11 = vld [vmem:[%s11781_s1 + $0x60] sm:$0xff] }
 0xa86   : > { %v3105_v44 = vmul.f32 %v3089_v7, %v2977_v32  ;;  %v3358_v32 = vld [vmem:[%s11781_s1 + $0x50] sm:$0xff]  ;;  %v3359_v7 = vld [vmem:[%s11781_s1 + $0x58] sm:$0xff] }
 0xa88   : > { %7646 = vmatprep.mubr.msk.f32.mxu1 %vm3115_vm2, %v3105_v44  ;;  %v3361_v44 = vld [vmem:[%s11781_s1 + $0x68] sm:$0xff] }
 0xa89   : > { %7647 = vmatmul.mubr.msk.f32.gmra.mxu1 %vm3115_vm2, %v3106_v53  ;;  %v3362_v53 = vld [vmem:[%s11781_s1 + $0x70] sm:$0xff] }
 0xb11   : > { %v10145_v48 = vpop.f32.mrf.mxu1 }
 0xb13   : > { %v10147_v6 = vpop.f32.mrf.mxu1 }
 0xb1a   : > { %v7630_v52 = vpop.f32.mrf.mxu1 }
 0xb1c   : > { %v3240_v25 = vpop.f32.mrf.mxu1 }
 0xb22   : > { %v7633_v38 = vpop.f32.mrf.mxu1 }
 0xb24   : > { %v3250_v23 = vpop.f32.mrf.mxu1 }
 0xb2a   : > { %v7636_v51 = vpop.f32.mrf.mxu1 }
 0xb2c   : > { %v3260_v2 = vpop.f32.mrf.mxu1 }
 0xb32   : > { %v7639_v29 = vpop.f32.mrf.mxu1 }
 0xb34   : > { %v3270_v27 = vpop.f32.mrf.mxu1 }
 0xb39   : > { %v7642_v36 = vpop.f32.mrf.mxu1 }
 0xb3a   : > { %v3320_v39 = vadd.f32 %v7642_v36, %v9812_v37  ;;  %v3316_v37 = vadd.f32 %v7636_v51, %v9774_v34  ;;  %v3312_v34 = vadd.f32 %v7630_v52, %v9742_v42 }
 0xb3b   : > { %v3280_v19 = vpop.f32.mrf.mxu1 }
 0xb3c   : > { %v3343_v41 = vadd.f32 %v6636_v31, %v3320_v39  ;;  %v3339_v13 = vadd.f32 %v6636_v31, %v3316_v37  ;;  %v3335_v33 = vadd.f32 %v6636_v31, %v3312_v34 }
 0xb41   : > { %v7645_v63 = vpop.f32.mrf.mxu1 }
 0xb42   : > { %v3322_v56 = vadd.f32 %v7645_v63, %v9834_v15  ;;  %v3318_v15 = vadd.f32 %v7639_v29, %v9790_v20  ;;  %v3314_v20 = vadd.f32 %v7633_v38, %v9758_v26  ;;  %v3310_v26 = vadd.f32 %v10145_v48, %v9724_v30  ;;  %v3350_v30 = vld [vmem:[%s11781_s1 + $0x10] sm:$0xff] }
 0xb43   : > { %v3290_v12 = vpop.f32.mrf.mxu1 }
 0xb44   : > { %v3321_v60 = vadd.f32 %v3290_v12, %v9830_v55  ;;  %v3345_v18 = vadd.f32 %v6636_v31, %v3322_v56  ;;  %v3317_v55 = vadd.f32 %v3270_v27, %v9786_v28  ;;  %v3341_v4 = vadd.f32 %v6636_v31, %v3318_v15 }
 0xb45   : > { %v3313_v28 = vadd.f32 %v3250_v23, %v9754_v21  ;;  %v3337_v9 = vadd.f32 %v6636_v31, %v3314_v20  ;;  %v3309_v21 = vadd.f32 %v10147_v6, %v9727_v24  ;;  %v3333_v42 = vadd.f32 %v6636_v31, %v3310_v26  ;;  %v3351_v24 = vld [vmem:[%s11781_s1 + $0x18] sm:$0xff] }
 0xb46   : > { %v3344_v61 = vadd.f32 %v6636_v31, %v3321_v60  ;;  %v3340_v14 = vadd.f32 %v6636_v31, %v3317_v55 }
 0xb47   : > { %v3336_v22 = vadd.f32 %v6636_v31, %v3313_v28  ;;  %v3332_v47 = vadd.f32 %v6636_v31, %v3309_v21 }
 0xb49   : > { %v7648_v40 = vpop.f32.mrf.mxu1 }
 0xb4a   : > { %v3324_v54 = vadd.f32 %v7648_v40, %v9850_v1  ;;  %v3319_v1 = vadd.f32 %v3280_v19, %v9805_v3  ;;  %v3315_v3 = vadd.f32 %v3260_v2, %v9770_v43  ;;  %v3311_v43 = vadd.f32 %v3240_v25, %v9738_v17  ;;  %v3349_v17 = vld [vmem:[%s11781_s1 + $0x8] sm:$0xff] }
 0xb4b   : > { %v3300_v45 = vpop.f32.mrf.mxu1 }
 0xb4c   : > { %v3347_v62 = vadd.f32 %v6636_v31, %v3324_v54  ;;  %v3323_v57 = vadd.f32 %v3300_v45, %v9846_v50  ;;  %v3342_v50 = vadd.f32 %v6636_v31, %v3319_v1  ;;  %v3338_v10 = vadd.f32 %v6636_v31, %v3315_v3 }
 0xb4d   : > { %v3334_v46 = vadd.f32 %v6636_v31, %v3311_v43 }
 0xb4e   : > { %v3346_v35 = vadd.f32 %v6636_v31, %v3323_v57  ;;  %7649 = vmatprep.subr.mxu0 %v3347_v62 }
 0xb4f   : > { %7650 = vmatpush3.msra.mxu0 %v3347_v62 }
 0xb50   : > { %7651 = vmatprep.subr.mxu0 %v3346_v35 }
 0xb51   : > { %7652 = vmatpush3.msra.mxu0 %v3346_v35 }
 0xb52   : > { %7653 = vmatprep.subr.mxu0 %v3345_v18 }
 0xb53   : > { %7654 = vmatpush3.msra.mxu0 %v3345_v18 }
 0xb54   : > { %7655 = vmatprep.subr.mxu0 %v3344_v61 }
 0xb55   : > { %7656 = vmatpush3.msra.mxu0 %v3344_v61 }
 0xb56   : > { %7657 = vmatprep.subr.mxu0 %v3343_v41 }
 0xb57   : > { %7658 = vmatpush3.msra.mxu0 %v3343_v41 }
 0xb58   : > { %7659 = vmatprep.subr.mxu0 %v3342_v50 }
 0xb59   : > { %7660 = vmatpush3.msra.mxu0 %v3342_v50 }
 0xb5a   : > { %7661 = vmatprep.subr.mxu0 %v3341_v4 }
 0xb5b   : > { %7662 = vmatpush3.msra.mxu0 %v3341_v4 }
 0xb5c   : > { %7663 = vmatprep.subr.mxu0 %v3340_v14 }
 0xb5d   : > { %7664 = vmatpush3.msra.mxu0 %v3340_v14 }
 0xb5e   : > { %7665 = vmatprep.subr.mxu0 %v3339_v13 }
 0xb5f   : > { %7666 = vmatpush3.msra.mxu0 %v3339_v13 }
 0xb60   : > { %7667 = vmatprep.subr.mxu0 %v3338_v10 }
 0xb61   : > { %7668 = vmatpush3.msra.mxu0 %v3338_v10 }
 0xb62   : > { %7669 = vmatprep.subr.mxu0 %v3337_v9 }
 0xb63   : > { %7670 = vmatpush3.msra.mxu0 %v3337_v9  ;;  %v6644_v9 = vld [vmem:[%s11783_s3 + $0x38] sm:$0xff] }
 0xb64   : > { %7671 = vmatprep.subr.mxu0 %v3336_v22  ;;  %7705 = vmatprep.subr.mxu1 %v6644_v9 }
 0xb65   : > { %7672 = vmatpush3.msra.mxu0 %v3336_v22  ;;  %7706 = vmatpush3.msra.mxu1 %v6644_v9 }
 0xb66   : > { %7673 = vmatprep.subr.mxu0 %v3335_v33 }
 0xb67   : > { %7674 = vmatpush3.msra.mxu0 %v3335_v33  ;;  %v6643_v33 = vld [vmem:[%s11783_s3 + $0x30] sm:$0xff] }
 0xb68   : > { %7675 = vmatprep.subr.mxu0 %v3334_v46  ;;  %7707 = vmatprep.subr.mxu1 %v6643_v33 }
 0xb69   : > { %7676 = vmatpush3.msra.mxu0 %v3334_v46  ;;  %7708 = vmatpush3.msra.mxu1 %v6643_v33  ;;  %v6642_v46 = vld [vmem:[%s11783_s3 + $0x28] sm:$0xff] }
 0xb6a   : > { %7677 = vmatprep.subr.mxu0 %v3333_v42  ;;  %7709 = vmatprep.subr.mxu1 %v6642_v46 }
 0xb6b   : > { %7678 = vmatpush3.msra.mxu0 %v3333_v42  ;;  %7710 = vmatpush3.msra.mxu1 %v6642_v46 }
 0xb6c   : > { %7679 = vmatprep.subr.mxu0 %v3332_v47 }
 0xb6d   : > { %7680 = vmatpush3.msra.mxu0 %v3332_v47 }
 0xb6e   : > { %7682 = vmatmul.mubr.f32.vlgmr.msra.gmra.mxu0 %v3349_v17 }
 0xb6f   : > { %7684 = vmatprep.mubr.f32.mxu0 %v3350_v30  ;;  %v6641_v30 = vld [vmem:[%s11783_s3 + $0x20] sm:$0xff] }
 0xb70   : > { %7711 = vmatprep.subr.mxu1 %v6641_v30 }
 0xb71   : > { %7712 = vmatpush3.msra.mxu1 %v6641_v30 }
 0xb72   : > { %7685 = vmatmul.mubr.f32.gmra.mxu0 %v3351_v24 }
 0xb73   : > { %7687 = vmatprep.mubr.f32.mxu0 %v3352_v0 }
 0xb76   : > { %7688 = vmatmul.mubr.f32.gmra.mxu0 %v3353_v58 }
 0xb77   : > { %7690 = vmatprep.mubr.f32.mxu0 %v3354_v5 }
 0xb7a   : > { %7691 = vmatmul.mubr.f32.gmra.mxu0 %v3355_v16 }
 0xb7b   : > { %7693 = vmatprep.mubr.f32.mxu0 %v3356_v59 }
 0xb7e   : > { %7694 = vmatmul.mubr.f32.gmra.mxu0 %v3357_v8 }
 0xb7f   : > { %7696 = vmatprep.mubr.f32.mxu0 %v3358_v32 }
 0xb82   : > { %7697 = vmatmul.mubr.f32.gmra.mxu0 %v3359_v7 }
 0xb83   : > { %7699 = vmatprep.mubr.f32.mxu0 %v3360_v11 }
 0xb86   : > { %7700 = vmatmul.mubr.f32.gmra.mxu0 %v3361_v44 }
 0xb87   : > { %7702 = vmatprep.mubr.f32.mxu0 %v3362_v53 }
 0xb8a   : > { %7703 = vmatmul.mubr.f32.gmra.mxu0 %v3363_v49 }
 0xc2e   : > { %v10215_v48 = vpop.f32.mrf.mxu0 }
 0xc2f   : > { %v3516_v6 = vsel %vm459_vm0, %v10215_v48, 0.0  ;;  %v3578_v52 = vmul.f32 %v10215_v48, %v10215_v48 }
 0xc30   : > { %3517 = vadd.xlane.f32.xlu1 %v3516_v6  ;;  %v10221_v25 = vpop.f32.mrf.mxu0 }
 0xc31   : > { %v3513_v38 = vsel %vm459_vm0, %v10221_v25, 0.0  ;;  %v3577_v23 = vmul.f32 %v10221_v25, %v10221_v25  ;;  %v3596_v2 = vsel %vm459_vm0, %v3578_v52, 0.0 }
 0xc32   : > { %3514 = vadd.xlane.f32.xlu0 %v3513_v38  ;;  %v10227_v51 = vpop.f32.mrf.mxu0 }
 0xc33   : > { %11810 = vst [vmem:[#allocation2_spill] sm:$0xff] %v10227_v51  ;;  %v3593_v29 = vsel %vm459_vm0, %v3577_v23, 0.0  ;;  %v3522_v27 = vsel %vm459_vm0, %v10227_v51, 0.0  ;;  %v3580_v19 = vmul.f32 %v10227_v51, %v10227_v51 }
 0xc34   : > { %3597 = vadd.xlane.f32.xlu1 %v3596_v2  ;;  %v10233_v36 = vpop.f32.mrf.mxu0 }
 0xc35   : > { %v3519_v63 = vsel %vm459_vm0, %v10233_v36, 0.0  ;;  %v3579_v12 = vmul.f32 %v10233_v36, %v10233_v36  ;;  %v3602_v54 = vsel %vm459_vm0, %v3580_v19, 0.0 }
 0xc36   : > { %3594 = vadd.xlane.f32.xlu0 %v3593_v29  ;;  %v10241_v40 = vpop.f32.mrf.mxu0 }
 0xc37   : > { %11811 = vst [vmem:[#allocation3_spill] sm:$0xff] %v10241_v40  ;;  %v3599_v31 = vsel %vm459_vm0, %v3579_v12, 0.0  ;;  %v3528_v45 = vsel %vm459_vm0, %v10241_v40, 0.0  ;;  %v3582_v62 = vmul.f32 %v10241_v40, %v10241_v40 }
 0xc38   : > { %3523 = vadd.xlane.f32.xlu1 %v3522_v27  ;;  %v10247_v56 = vpop.f32.mrf.mxu0 }
 0xc39   : > { %11812 = vst [vmem:[#allocation4_spill] sm:$0xff] %v10247_v56  ;;  %v3525_v57 = vsel %vm459_vm0, %v10247_v56, 0.0  ;;  %v3581_v60 = vmul.f32 %v10247_v56, %v10247_v56  ;;  %v3608_v39 = vsel %vm459_vm0, %v3582_v62, 0.0 }
 0xc3a   : > { %3520 = vadd.xlane.f32.xlu0 %v3519_v63  ;;  %v10255_v35 = vpop.f32.mrf.mxu0 }
 0xc3b   : > { %11813 = vst [vmem:[#allocation5_spill] sm:$0xff] %v10255_v35  ;;  %v3605_v18 = vsel %vm459_vm0, %v3581_v60, 0.0  ;;  %v3534_v1 = vsel %vm459_vm0, %v10255_v35, 0.0  ;;  %v3584_v15 = vmul.f32 %v10255_v35, %v10255_v35 }
 0xc3c   : > { %3603 = vadd.xlane.f32.xlu1 %v3602_v54  ;;  %v10261_v61 = vpop.f32.mrf.mxu0 }
 0xc3d   : > { %11814 = vst [vmem:[#allocation6_spill] sm:$0xff] %v10261_v61  ;;  %v3531_v41 = vsel %vm459_vm0, %v10261_v61, 0.0  ;;  %v3583_v55 = vmul.f32 %v10261_v61, %v10261_v61  ;;  %v3614_v37 = vsel %vm459_vm0, %v3584_v15, 0.0 }
 0xc3e   : > { %3600 = vadd.xlane.f32.xlu0 %v3599_v31  ;;  %v10269_v50 = vpop.f32.mrf.mxu0 }
 0xc3f   : > { %11815 = vst [vmem:[#allocation7_spill] sm:$0xff] %v10269_v50  ;;  %v3611_v4 = vsel %vm459_vm0, %v3583_v55, 0.0  ;;  %v3540_v3 = vsel %vm459_vm0, %v10269_v50, 0.0  ;;  %v3586_v20 = vmul.f32 %v10269_v50, %v10269_v50 }
 0xc40   : > { %3529 = vadd.xlane.f32.xlu1 %v3528_v45  ;;  %v10275_v14 = vpop.f32.mrf.mxu0 }
 0xc41   : > { %11816 = vst [vmem:[#allocation8_spill] sm:$0xff] %v10275_v14  ;;  %v3537_v13 = vsel %vm459_vm0, %v10275_v14, 0.0  ;;  %v3585_v28 = vmul.f32 %v10275_v14, %v10275_v14  ;;  %v3620_v34 = vsel %vm459_vm0, %v3586_v20, 0.0 }
 0xc42   : > { %3526 = vadd.xlane.f32.xlu0 %v3525_v57  ;;  %v10283_v10 = vpop.f32.mrf.mxu0 }
 0xc43   : > { %11817 = vst [vmem:[#allocation9_spill] sm:$0xff] %v10283_v10  ;;  %v3617_v43 = vsel %vm459_vm0, %v3585_v28, 0.0  ;;  %v3546_v22 = vsel %vm459_vm0, %v10283_v10, 0.0  ;;  %v3588_v21 = vmul.f32 %v10283_v10, %v10283_v10 }
 0xc44   : > { %3609 = vadd.xlane.f32.xlu1 %v3608_v39  ;;  %v10292_v26 = vpop.f32.mrf.mxu0 }
 0xc45   : > { %11818 = vst [vmem:[#allocation10_spill] sm:$0xff] %v10292_v26  ;;  %v3543_v42 = vsel %vm459_vm0, %v10292_v26, 0.0  ;;  %v3587_v47 = vmul.f32 %v10292_v26, %v10292_v26  ;;  %v3626_v24 = vsel %vm459_vm0, %v3588_v21, 0.0 }
 0xc46   : > { %3606 = vadd.xlane.f32.xlu0 %v3605_v18  ;;  %v10306_v17 = vpop.f32.mrf.mxu0 }
 0xc47   : > { %11819 = vst [vmem:[#allocation11_spill] sm:$0xff] %v10306_v17  ;;  %v3623_v0 = vsel %vm459_vm0, %v3587_v47, 0.0  ;;  %v3552_v58 = vsel %vm459_vm0, %v10306_v17, 0.0  ;;  %v3590_v16 = vmul.f32 %v10306_v17, %v10306_v17 }
 0xc48   : > { %3535 = vadd.xlane.f32.xlu1 %v3534_v1  ;;  %v10315_v5 = vpop.f32.mrf.mxu0 }
 0xc49   : > { %11820 = vst [vmem:[#allocation12_spill] sm:$0xff] %v10315_v5  ;;  %v3549_v59 = vsel %vm459_vm0, %v10315_v5, 0.0  ;;  %v3589_v8 = vmul.f32 %v10315_v5, %v10315_v5  ;;  %v3632_v7 = vsel %vm459_vm0, %v3590_v16, 0.0 }
 0xc4a   : > { %3532 = vadd.xlane.f32.xlu0 %v3531_v41  ;;  %v10323_v32 = vpop.f32.mrf.mxu0 }
 0xc4b   : > { %11821 = vst [vmem:[#allocation13_spill] sm:$0xff] %v10323_v32  ;;  %v3629_v11 = vsel %vm459_vm0, %v3589_v8, 0.0  ;;  %v3558_v44 = vsel %vm459_vm0, %v10323_v32, 0.0  ;;  %v3592_v49 = vmul.f32 %v10323_v32, %v10323_v32 }
 0xc4c   : > { %3615 = vadd.xlane.f32.xlu1 %v3614_v37  ;;  %v10329_v53 = vpop.f32.mrf.mxu0 }
 0xc4d   : > { %11822 = vst [vmem:[#allocation14_spill] sm:$0xff] %v10329_v53  ;;  %v3555_v6 = vsel %vm459_vm0, %v10329_v53, 0.0  ;;  %v3591_v52 = vmul.f32 %v10329_v53, %v10329_v53  ;;  %v3638_v38 = vsel %vm459_vm0, %v3592_v49, 0.0 }
 0xc4e   : > { %3612 = vadd.xlane.f32.xlu0 %v3611_v4 }
 0xc4f   : > { %v3635_v23 = vsel %vm459_vm0, %v3591_v52, 0.0 }
 0xc50   : > { %3541 = vadd.xlane.f32.xlu1 %v3540_v3 }
 0xc52   : > { %3538 = vadd.xlane.f32.xlu0 %v3537_v13 }
 0xc54   : > { %3621 = vadd.xlane.f32.xlu1 %v3620_v34 }
 0xc56   : > { %3618 = vadd.xlane.f32.xlu0 %v3617_v43 }
 0xc58   : > { %3547 = vadd.xlane.f32.xlu1 %v3546_v22 }
 0xc5a   : > { %3544 = vadd.xlane.f32.xlu0 %v3543_v42 }
 0xc5c   : > { %3627 = vadd.xlane.f32.xlu1 %v3626_v24 }
 0xc5e   : > { %3624 = vadd.xlane.f32.xlu0 %v3623_v0 }
 0xc60   : > { %3553 = vadd.xlane.f32.xlu1 %v3552_v58 }
 0xc62   : > { %3550 = vadd.xlane.f32.xlu0 %v3549_v59 }
 0xc64   : > { %3633 = vadd.xlane.f32.xlu1 %v3632_v7 }
 0xc66   : > { %3630 = vadd.xlane.f32.xlu0 %v3629_v11 }
 0xc68   : > { %3559 = vadd.xlane.f32.xlu1 %v3558_v44 }
 0xc6a   : > { %3556 = vadd.xlane.f32.xlu0 %v3555_v6 }
 0xc6c   : > { %3639 = vadd.xlane.f32.xlu1 %v3638_v38  ;;  %v10361_v38 = vld [vmem:[%s11785_s5 + $0x1] ss:$0 sm:$0xff] }
 0xc6e   : > { %3636 = vadd.xlane.f32.xlu0 %v3635_v23 }
 0xcb9   : > { %v3518_v2 = vpop.xlane.xlu1 %3517 }
 0xcba   : > { %v3562_v29 = vmul.f32 0.03125, %v3518_v2 }
 0xcbb   : > { %v3515_v27 = vpop.xlane.xlu0 %3514 }
 0xcbc   : > { %v3561_v19 = vmul.f32 0.03125, %v3515_v27  ;;  %v3658_v12 = vmul.f32 %v3562_v29, %v3562_v29  ;;  %v3690_v58 = vsub.f32 %v10215_v48, %v3562_v29 }
 0xcbd   : > { %v3598_v63 = vpop.xlane.xlu1 %3597 }
 0xcbe   : > { %v3642_v54 = vmul.f32 0.03125, %v3598_v63  ;;  %v3657_v45 = vmul.f32 %v3561_v19, %v3561_v19  ;;  %v3689_v2 = vsub.f32 %v10221_v25, %v3561_v19 }
 0xcbf   : > { %v3595_v31 = vpop.xlane.xlu0 %3594 }
 0xcc0   : > { %v3674_v62 = vsub.f32 %v3642_v54, %v3658_v12  ;;  %v3641_v57 = vmul.f32 0.03125, %v3595_v31 }
 0xcc1   : > { %v3524_v60 = vpop.xlane.xlu1 %3523 }
 0xcc2   : > { %v3706_v39 = vadd.f32 1e-05, %v3674_v62  ;;  %v3673_v18 = vsub.f32 %v3641_v57, %v3657_v45  ;;  %v10339_v1 = vmul.f32 0.03125, %v3524_v60  ;;  %v10372_v57 = vld [vmem:[%s11786_s6 + $0x1] ss:$0 sm:$0xff] }
 0xcc3   : > { %v3521_v15 = vpop.xlane.xlu0 %3520 }
 0xcc4   : > { %8319 = vrsqrt.f32 %v3706_v39  ;;  %v3705_v41 = vadd.f32 1e-05, %v3673_v18  ;;  %v10341_v55 = vmul.f32 0.03125, %v3521_v15  ;;  %v3660_v4 = vmul.f32 %v10339_v1, %v10339_v1 }
 0xcc5   : > { %v3604_v37 = vpop.xlane.xlu1 %3603  ;;  %v3692_v39 = vsub.f32 %v10227_v51, %v10339_v1 }
 0xcc6   : > { %8321 = vrsqrt.f32 %v3705_v41  ;;  %v3644_v3 = vmul.f32 0.03125, %v3604_v37  ;;  %v3659_v13 = vmul.f32 %v10341_v55, %v10341_v55  ;;  %v3691_v1 = vsub.f32 %v10233_v36, %v10341_v55 }
 0xcc7   : > { %v3601_v20 = vpop.xlane.xlu0 %3600 }
 0xcc8   : > { %v3676_v28 = vsub.f32 %v3644_v3, %v3660_v4  ;;  %v3643_v34 = vmul.f32 0.03125, %v3601_v20 }
 0xcc9   : > { %v3530_v9 = vpop.xlane.xlu1 %3529 }
 0xcca   : > { %v3708_v43 = vadd.f32 1e-05, %v3676_v28  ;;  %v3675_v22 = vsub.f32 %v3643_v34, %v3659_v13  ;;  %v10347_v33 = vmul.f32 0.03125, %v3530_v9 }
 0xccb   : > { %v3527_v21 = vpop.xlane.xlu0 %3526 }
 0xccc   : > { %8323 = vrsqrt.f32 %v3708_v43  ;;  %v3707_v46 = vadd.f32 1e-05, %v3675_v22  ;;  %v10349_v42 = vmul.f32 0.03125, %v3527_v21  ;;  %v3662_v30 = vmul.f32 %v10347_v33, %v10347_v33 }
 0xccd   : > { %v3610_v47 = vpop.xlane.xlu1 %3609 }
 0xcce   : > { %8325 = vrsqrt.f32 %v3707_v46  ;;  %v3646_v24 = vmul.f32 0.03125, %v3610_v47  ;;  %v3661_v16 = vmul.f32 %v10349_v42, %v10349_v42 }
 0xccf   : > { %v3607_v0 = vpop.xlane.xlu0 %3606 }
 0xcd0   : > { %v3678_v59 = vsub.f32 %v3646_v24, %v3662_v30  ;;  %v3645_v8 = vmul.f32 0.03125, %v3607_v0 }
 0xcd1   : > { %v8320_v7 = vpop.eup %8319  ;;  %v3536_v11 = vpop.xlane.xlu1 %3535 }
 0xcd2   : > { %v3738_v44 = vmul.f32 %v8320_v7, %v3690_v58  ;;  %v3710_v49 = vadd.f32 1e-05, %v3678_v59  ;;  %v3677_v6 = vsub.f32 %v3645_v8, %v3661_v16  ;;  %v10356_v52 = vmul.f32 0.03125, %v3536_v11 }
 0xcd3   : > { %v8322_v23 = vpop.eup %8321  ;;  %v3533_v29 = vpop.xlane.xlu0 %3532  ;;  %v3694_v59 = vsub.f32 %v10241_v40, %v10347_v33  ;;  %v3693_v33 = vsub.f32 %v10247_v56, %v10349_v42 }
 0xcd4   : > { %8327 = vrsqrt.f32 %v3710_v49  ;;  %v3709_v27 = vadd.f32 1e-05, %v3677_v6  ;;  %v10364_v63 = vmul.f32 0.03125, %v3533_v29  ;;  %v3737_v54 = vmul.f32 %v8322_v23, %v3689_v2 }
 0xcd5   : > { %v3616_v12 = vpop.xlane.xlu1 %3615  ;;  %v3760_v31 = vmul.f32 %v10361_v38, %v3738_v44  ;;  %v3664_v45 = vmul.f32 %v10356_v52, %v10356_v52 }
 0xcd6   : > { %8329 = vrsqrt.f32 %v3709_v27  ;;  %v3648_v62 = vmul.f32 0.03125, %v3616_v12  ;;  %v3759_v60 = vmul.f32 %v10361_v38, %v3737_v54  ;;  %v3663_v18 = vmul.f32 %v10364_v63, %v10364_v63 }
 0xcd7   : > { %v3613_v19 = vpop.xlane.xlu0 %3612  ;;  %v3782_v20 = vadd.f32 %v10372_v57, %v3760_v31 }
 0xcd8   : > { %v3680_v15 = vsub.f32 %v3648_v62, %v3664_v45  ;;  %v3647_v41 = vmul.f32 0.03125, %v3613_v19  ;;  %v3781_v3 = vadd.f32 %v10372_v57, %v3759_v60 }
 0xcd9   : > { %v8324_v37 = vpop.eup %8323  ;;  %v3542_v4 = vpop.xlane.xlu1 %3541 }
 0xcda   : > { %v3712_v13 = vadd.f32 1e-05, %v3680_v15  ;;  %v3679_v28 = vsub.f32 %v3647_v41, %v3663_v18  ;;  %v10381_v34 = vmul.f32 0.03125, %v3542_v4  ;;  %v3740_v9 = vmul.f32 %v8324_v37, %v3692_v39  ;;  %7713 = vmatprep.mubr.msk.f32.mxu1 %vm459_vm0, %v3781_v3 }
 0xcdb   : > { %v8326_v43 = vpop.eup %8325  ;;  %v3539_v22 = vpop.xlane.xlu0 %3538  ;;  %7714 = vmatmul.mubr.msk.f32.vlgmr.msra.gmra.mxu1 %vm459_vm0, %v3782_v20  ;;  %v3696_v37 = vsub.f32 %v10255_v35, %v10356_v52  ;;  %v3695_v52 = vsub.f32 %v10261_v61, %v10364_v63 }
 0xcdc   : > { %8331 = vrsqrt.f32 %v3712_v13  ;;  %v3711_v21 = vadd.f32 1e-05, %v3679_v28  ;;  %v10387_v46 = vmul.f32 0.03125, %v3539_v22  ;;  %v3739_v30 = vmul.f32 %v8326_v43, %v3691_v1 }
 0xcdd   : > { %v3622_v47 = vpop.xlane.xlu1 %3621  ;;  %v3762_v24 = vmul.f32 %v10361_v38, %v3740_v9  ;;  %v3666_v0 = vmul.f32 %v10381_v34, %v10381_v34 }
 0xcde   : > { %8333 = vrsqrt.f32 %v3711_v21  ;;  %v3650_v58 = vmul.f32 0.03125, %v3622_v47  ;;  %v3761_v55 = vmul.f32 %v10361_v38, %v3739_v30  ;;  %v3665_v8 = vmul.f32 %v10387_v46, %v10387_v46 }
 0xcdf   : > { %v3619_v16 = vpop.xlane.xlu0 %3618  ;;  %v3784_v23 = vadd.f32 %v10372_v57, %v3762_v24 }
 0xce0   : > { %v3682_v7 = vsub.f32 %v3650_v58, %v3666_v0  ;;  %v3649_v11 = vmul.f32 0.03125, %v3619_v16  ;;  %v3783_v6 = vadd.f32 %v10372_v57, %v3761_v55 }
 0xce1   : > { %v8328_v44 = vpop.eup %8327  ;;  %v3548_v49 = vpop.xlane.xlu1 %3547 }
 0xce2   : > { %v3714_v2 = vadd.f32 1e-05, %v3682_v7  ;;  %v3681_v29 = vsub.f32 %v3649_v11, %v3665_v8  ;;  %v10399_v27 = vmul.f32 0.03125, %v3548_v49  ;;  %v3742_v12 = vmul.f32 %v8328_v44, %v3694_v59  ;;  %7716 = vmatprep.mubr.msk.f32.mxu1 %vm459_vm0, %v3783_v6 }
 0xce3   : > { %v8330_v54 = vpop.eup %8329  ;;  %v3545_v31 = vpop.xlane.xlu0 %3544  ;;  %7717 = vmatmul.mubr.msk.f32.gmra.mxu1 %vm459_vm0, %v3784_v23  ;;  %v3698_v44 = vsub.f32 %v10269_v50, %v10381_v34 }
 0xce4   : > { %8335 = vrsqrt.f32 %v3714_v2  ;;  %v3713_v45 = vadd.f32 1e-05, %v3681_v29  ;;  %v10405_v62 = vmul.f32 0.03125, %v3545_v31  ;;  %v3741_v60 = vmul.f32 %v8330_v54, %v3693_v33 }
 0xce5   : > { %v3628_v19 = vpop.xlane.xlu1 %3627  ;;  %v3764_v39 = vmul.f32 %v10361_v38, %v3742_v12  ;;  %v3668_v18 = vmul.f32 %v10399_v27, %v10399_v27 }
 0xce6   : > { %8337 = vrsqrt.f32 %v3713_v45  ;;  %v3652_v15 = vmul.f32 0.03125, %v3628_v19  ;;  %v3763_v42 = vmul.f32 %v10361_v38, %v3741_v60  ;;  %v3667_v4 = vmul.f32 %v10405_v62, %v10405_v62 }
 0xce7   : > { %v3625_v41 = vpop.xlane.xlu0 %3624  ;;  %v3786_v43 = vadd.f32 %v10372_v57, %v3764_v39  ;;  %v3697_v39 = vsub.f32 %v10275_v14, %v10387_v46  ;;  %v3700_v46 = vsub.f32 %v10283_v10, %v10399_v27 }
 0xce8   : > { %v3684_v3 = vsub.f32 %v3652_v15, %v3668_v18  ;;  %v3651_v20 = vmul.f32 0.03125, %v3625_v41  ;;  %v3785_v9 = vadd.f32 %v10372_v57, %v3763_v42 }
 0xce9   : > { %v8332_v13 = vpop.eup %8331  ;;  %v3554_v28 = vpop.xlane.xlu1 %3553 }
 0xcea   : > { %v3716_v1 = vadd.f32 1e-05, %v3684_v3  ;;  %v3683_v22 = vsub.f32 %v3651_v20, %v3667_v4  ;;  %v10417_v21 = vmul.f32 0.03125, %v3554_v28  ;;  %v3744_v47 = vmul.f32 %v8332_v13, %v3696_v37  ;;  %7719 = vmatprep.mubr.msk.f32.mxu1 %vm459_vm0, %v3785_v9 }
 0xceb   : > { %v8334_v30 = vpop.eup %8333  ;;  %v3551_v24 = vpop.xlane.xlu0 %3550  ;;  %7720 = vmatmul.mubr.msk.f32.gmra.mxu1 %vm459_vm0, %v3786_v43 }
 0xcec   : > { %8339 = vrsqrt.f32 %v3716_v1  ;;  %v3715_v0 = vadd.f32 1e-05, %v3683_v22  ;;  %v10423_v58 = vmul.f32 0.03125, %v3551_v24  ;;  %v3743_v55 = vmul.f32 %v8334_v30, %v3695_v52 }
 0xced   : > { %v3634_v16 = vpop.xlane.xlu1 %3633  ;;  %v3766_v59 = vmul.f32 %v10361_v38, %v3744_v47  ;;  %v3670_v8 = vmul.f32 %v10417_v21, %v10417_v21  ;;  %v3699_v22 = vsub.f32 %v10292_v26, %v10405_v62 }
 0xcee   : > { %8341 = vrsqrt.f32 %v3715_v0  ;;  %v3654_v7 = vmul.f32 0.03125, %v3634_v16  ;;  %v3765_v63 = vmul.f32 %v10361_v38, %v3743_v55  ;;  %v3669_v49 = vmul.f32 %v10423_v58, %v10423_v58 }
 0xcef   : > { %v3631_v11 = vpop.xlane.xlu0 %3630  ;;  %v3788_v54 = vadd.f32 %v10372_v57, %v3766_v59 }
 0xcf0   : > { %v3686_v6 = vsub.f32 %v3654_v7, %v3670_v8  ;;  %v3653_v23 = vmul.f32 0.03125, %v3631_v11  ;;  %v3787_v12 = vadd.f32 %v10372_v57, %v3765_v63  ;;  %v3702_v8 = vsub.f32 %v10306_v17, %v10417_v21 }
 0xcf1   : > { %v8336_v2 = vpop.eup %8335  ;;  %v3560_v29 = vpop.xlane.xlu1 %3559 }
 0xcf2   : > { %v3718_v33 = vadd.f32 1e-05, %v3686_v6  ;;  %v3685_v31 = vsub.f32 %v3653_v23, %v3669_v49  ;;  %v3576_v45 = vmul.f32 0.03125, %v3560_v29  ;;  %v3746_v19 = vmul.f32 %v8336_v2, %v3698_v44  ;;  %7722 = vmatprep.mubr.msk.f32.mxu1 %vm459_vm0, %v3787_v12 }
 0xcf3   : > { %v8338_v60 = vpop.eup %8337  ;;  %v3557_v34 = vpop.xlane.xlu0 %3556  ;;  %7723 = vmatmul.mubr.msk.f32.gmra.mxu1 %vm459_vm0, %v3788_v54  ;;  %v3701_v44 = vsub.f32 %v10315_v5, %v10423_v58 }
 0xcf4   : > { %8343 = vrsqrt.f32 %v3718_v33  ;;  %v3717_v18 = vadd.f32 1e-05, %v3685_v31  ;;  %v3575_v15 = vmul.f32 0.03125, %v3557_v34  ;;  %v3745_v42 = vmul.f32 %v8338_v60, %v3697_v39 }
 0xcf5   : > { %v3640_v41 = vpop.xlane.xlu1 %3639  ;;  %v3672_v37 = vmul.f32 %v3576_v45, %v3576_v45  ;;  %v3768_v3 = vmul.f32 %v10361_v38, %v3746_v19  ;;  %v3704_v21 = vsub.f32 %v10323_v32, %v3576_v45 }
 0xcf6   : > { %8345 = vrsqrt.f32 %v3717_v18  ;;  %v3656_v4 = vmul.f32 0.03125, %v3640_v41  ;;  %v3767_v13 = vmul.f32 %v10361_v38, %v3745_v42  ;;  %v3671_v28 = vmul.f32 %v3575_v15, %v3575_v15 }
 0xcf7   : > { %v3637_v20 = vpop.xlane.xlu0 %3636  ;;  %v3790_v24 = vadd.f32 %v10372_v57, %v3768_v3  ;;  %v3703_v58 = vsub.f32 %v10329_v53, %v3575_v15 }
 0xcf8   : > { %v3688_v9 = vsub.f32 %v3656_v4, %v3672_v37  ;;  %v3655_v43 = vmul.f32 0.03125, %v3637_v20  ;;  %v3789_v47 = vadd.f32 %v10372_v57, %v3767_v13 }
 0xcf9   : > { %v8340_v1 = vpop.eup %8339 }
 0xcfa   : > { %v3720_v30 = vadd.f32 1e-05, %v3688_v9  ;;  %v3687_v52 = vsub.f32 %v3655_v43, %v3671_v28  ;;  %v3748_v0 = vmul.f32 %v8340_v1, %v3700_v46  ;;  %7725 = vmatprep.mubr.msk.f32.mxu1 %vm459_vm0, %v3789_v47 }
 0xcfb   : > { %v8342_v16 = vpop.eup %8341  ;;  %7726 = vmatmul.mubr.msk.f32.gmra.mxu1 %vm459_vm0, %v3790_v24 }
 0xcfc   : > { %8347 = vrsqrt.f32 %v3720_v30  ;;  %v3719_v55 = vadd.f32 1e-05, %v3687_v52  ;;  %v3747_v27 = vmul.f32 %v8342_v16, %v3699_v22  ;;  %v3770_v59 = vmul.f32 %v10361_v38, %v3748_v0 }
 0xcfe   : > { %8349 = vrsqrt.f32 %v3719_v55  ;;  %v3769_v62 = vmul.f32 %v10361_v38, %v3747_v27  ;;  %v3792_v63 = vadd.f32 %v10372_v57, %v3770_v59 }
 0xd00   : > { %v3791_v7 = vadd.f32 %v10372_v57, %v3769_v62 }
 0xd01   : > { %v8344_v11 = vpop.eup %8343 }
 0xd02   : > { %7728 = vmatprep.mubr.msk.f32.mxu1 %vm459_vm0, %v3791_v7  ;;  %v3750_v49 = vmul.f32 %v8344_v11, %v3702_v8 }
 0xd03   : > { %v8346_v6 = vpop.eup %8345  ;;  %7729 = vmatmul.mubr.msk.f32.gmra.mxu1 %vm459_vm0, %v3792_v63 }
 0xd04   : > { %v3749_v23 = vmul.f32 %v8346_v6, %v3701_v44  ;;  %v3772_v2 = vmul.f32 %v10361_v38, %v3750_v49 }
 0xd06   : > { %v3771_v29 = vmul.f32 %v10361_v38, %v3749_v23  ;;  %v3794_v33 = vadd.f32 %v10372_v57, %v3772_v2 }
 0xd08   : > { %v3793_v12 = vadd.f32 %v10372_v57, %v3771_v29 }
 0xd09   : > { %v8348_v54 = vpop.eup %8347 }
 0xd0a   : > { %7731 = vmatprep.mubr.msk.f32.mxu1 %vm459_vm0, %v3793_v12  ;;  %v3752_v31 = vmul.f32 %v8348_v54, %v3704_v21 }
 0xd0b   : > { %v8350_v19 = vpop.eup %8349  ;;  %7732 = vmatmul.mubr.msk.f32.gmra.mxu1 %vm459_vm0, %v3794_v33 }
 0xd0c   : > { %v3751_v60 = vmul.f32 %v8350_v19, %v3703_v58  ;;  %v3774_v39 = vmul.f32 %v10361_v38, %v3752_v31 }
 0xd0e   : > { %v3773_v34 = vmul.f32 %v10361_v38, %v3751_v60  ;;  %v3796_v18 = vadd.f32 %v10372_v57, %v3774_v39 }
 0xd10   : > { %v3795_v45 = vadd.f32 %v10372_v57, %v3773_v34 }
 0xd12   : > { %7734 = vmatprep.mubr.msk.f32.mxu1 %vm459_vm0, %v3795_v45 }
 0xd13   : > { %7735 = vmatmul.mubr.msk.f32.gmra.mxu1 %vm459_vm0, %v3796_v18 }
 0xd9b   : > { %v10473_v15 = vpop.f32.mrf.mxu1 }
 0xd9d   : > { %v10475_v41 = vpop.f32.mrf.mxu1 }
 0xd9e   : > { %7769 = vmatprep.mubr.msk.f32.mxu0 %vm1006_vm1, %v10475_v41 }
 0xda3   : > { %v10479_v42 = vpop.f32.mrf.mxu1 }
 0xda5   : > { %v10481_v37 = vpop.f32.mrf.mxu1 }
 0xdab   : > { %v10483_v38 = vpop.f32.mrf.mxu1 }
 0xdad   : > { %v10485_v4 = vpop.f32.mrf.mxu1 }
 0xdb3   : > { %v10487_v57 = vpop.f32.mrf.mxu1 }
 0xdb5   : > { %v10489_v3 = vpop.f32.mrf.mxu1 }
 0xdbb   : > { %v10491_v20 = vpop.f32.mrf.mxu1 }
 0xdbd   : > { %v10493_v13 = vpop.f32.mrf.mxu1 }
 0xdc3   : > { %v10495_v46 = vpop.f32.mrf.mxu1 }
 0xdc5   : > { %v10497_v28 = vpop.f32.mrf.mxu1 }
 0xdcb   : > { %v10499_v9 = vpop.f32.mrf.mxu1 }
 0xdcd   : > { %v10501_v43 = vpop.f32.mrf.mxu1 }
 0xdd3   : > { %v10503_v1 = vpop.f32.mrf.mxu1 }
 0xdd4   : > { %4058 = vrot.lane.b32.xlu0 %v10503_v1, %s8567_s29 }
 0xdd5   : > { %v10507_v22 = vpop.f32.mrf.mxu1 }
 0xdd6   : > { %4056 = vrot.lane.b32.xlu1 %v10507_v22, %s8567_s29 }
 0xdd8   : > { %4052 = vrot.lane.b32.xlu0 %v10501_v43, %s8567_s29 }
 0xdda   : > { %4054 = vrot.lane.b32.xlu1 %v10499_v9, %s8567_s29 }
 0xddc   : > { %4048 = vrot.lane.b32.xlu0 %v10497_v28, %s8567_s29 }
 0xdde   : > { %4050 = vrot.lane.b32.xlu1 %v10495_v46, %s8567_s29 }
 0xde0   : > { %4044 = vrot.lane.b32.xlu0 %v10493_v13, %s8567_s29 }
 0xde2   : > { %4046 = vrot.lane.b32.xlu1 %v10491_v20, %s8567_s29 }
 0xde4   : > { %4040 = vrot.lane.b32.xlu0 %v10489_v3, %s8567_s29 }
 0xde6   : > { %4042 = vrot.lane.b32.xlu1 %v10487_v57, %s8567_s29 }
 0xde8   : > { %4036 = vrot.lane.b32.xlu0 %v10485_v4, %s8567_s29 }
 0xdea   : > { %4038 = vrot.lane.b32.xlu1 %v10483_v38, %s8567_s29 }
 0xdec   : > { %4032 = vrot.lane.b32.xlu0 %v10481_v37, %s8567_s29 }
 0xdee   : > { %4034 = vrot.lane.b32.xlu1 %v10479_v42, %s8567_s29 }
 0xdf0   : > { %4028 = vrot.lane.b32.xlu0 %v10475_v41, %s8567_s29 }
 0xdf2   : > { %4030 = vrot.lane.b32.xlu1 %v10473_v15, %s8567_s29 }
 0xdf4   : > { %4443 = vrot.lane.b32.xlu0 %v10503_v1, %s8568_s14 }
 0xdf6   : > { %4437 = vrot.lane.b32.xlu1 %v10501_v43, %s8568_s14 }
 0xdf8   : > { %4439 = vrot.lane.b32.xlu0 %v10499_v9, %s8568_s14 }
 0xdfa   : > { %4433 = vrot.lane.b32.xlu1 %v10497_v28, %s8568_s14 }
 0xdfc   : > { %4435 = vrot.lane.b32.xlu0 %v10495_v46, %s8568_s14 }
 0xdfe   : > { %4431 = vrot.lane.b32.xlu1 %v10491_v20, %s8568_s14 }
 0xe00   : > { %4429 = vrot.lane.b32.xlu0 %v10493_v13, %s8568_s14 }
 0xe02   : > { %4427 = vrot.lane.b32.xlu1 %v10487_v57, %s8568_s14 }
 0xe04   : > { %4425 = vrot.lane.b32.xlu0 %v10489_v3, %s8568_s14 }
 0xe06   : > { %4423 = vrot.lane.b32.xlu1 %v10483_v38, %s8568_s14 }
 0xe08   : > { %4421 = vrot.lane.b32.xlu0 %v10485_v4, %s8568_s14 }
 0xe0a   : > { %4419 = vrot.lane.b32.xlu1 %v10479_v42, %s8568_s14 }
 0xe0c   : > { %4417 = vrot.lane.b32.xlu0 %v10481_v37, %s8568_s14 }
 0xe0e   : > { %4415 = vrot.lane.b32.xlu1 %v10473_v15, %s8568_s14 }
 0xe10   : > { %4413 = vrot.lane.b32.xlu0 %v10475_v41, %s8568_s14 }
 0xe12   : > { %4685 = vrot.lane.b32.xlu1 %v10503_v1, %s8569_s15 }
 0xe14   : > { %4681 = vrot.lane.b32.xlu0 %v10499_v9, %s8569_s15 }
 0xe16   : > { %4679 = vrot.lane.b32.xlu1 %v10501_v43, %s8569_s15 }
 0xe18   : > { %4677 = vrot.lane.b32.xlu0 %v10495_v46, %s8569_s15 }
 0xe1a   : > { %4675 = vrot.lane.b32.xlu1 %v10497_v28, %s8569_s15 }
 0xe1c   : > { %4673 = vrot.lane.b32.xlu0 %v10491_v20, %s8569_s15 }
 0xe1e   : > { %4671 = vrot.lane.b32.xlu1 %v10493_v13, %s8569_s15 }
 0xe20   : > { %4669 = vrot.lane.b32.xlu0 %v10487_v57, %s8569_s15 }
 0xe22   : > { %4667 = vrot.lane.b32.xlu1 %v10489_v3, %s8569_s15 }
 0xe24   : > { %4665 = vrot.lane.b32.xlu0 %v10483_v38, %s8569_s15 }
 0xe26   : > { %4441 = vrot.lane.b32.xlu1 %v10507_v22, %s8568_s14 }
 0xe28   : > { %4663 = vrot.lane.b32.xlu0 %v10485_v4, %s8569_s15 }
 0xe2c   : > { %4683 = vrot.lane.b32.xlu0 %v10507_v22, %s8569_s15 }
 0xe46   : > { %v4059_v47 = vpop.permute.xlu0 %4058 }
 0xe47   : > { %7737 = vmatprep.subr.msk.mxu0 %vm1006_vm1, %v4059_v47 }
 0xe48   : > { %7738 = vmatpush3.xpose.msk.msra.mxu0 %vm1006_vm1, %v4059_v47  ;;  %v4057_v30 = vpop.permute.xlu1 %4056 }
 0xe49   : > { %7739 = vmatprep.subr.msk.mxu0 %vm1006_vm1, %v4057_v30 }
 0xe4a   : > { %v4053_v52 = vpop.permute.xlu0 %4052 }
 0xe4c   : > { %7740 = vmatpush3.xpose.msk.msra.mxu0 %vm1006_vm1, %v4057_v30  ;;  %v4055_v24 = vpop.permute.xlu1 %4054 }
 0xe4d   : > { %7741 = vmatprep.subr.msk.mxu0 %vm1006_vm1, %v4055_v24 }
 0xe4e   : > { %v4049_v0 = vpop.permute.xlu0 %4048 }
 0xe50   : > { %7742 = vmatpush3.xpose.msk.msra.mxu0 %vm1006_vm1, %v4055_v24  ;;  %v4051_v16 = vpop.permute.xlu1 %4050 }
 0xe51   : > { %7743 = vmatprep.subr.msk.mxu0 %vm1006_vm1, %v4053_v52 }
 0xe52   : > { %v4045_v55 = vpop.permute.xlu0 %4044 }
 0xe54   : > { %7744 = vmatpush3.xpose.msk.msra.mxu0 %vm1006_vm1, %v4053_v52  ;;  %v4047_v27 = vpop.permute.xlu1 %4046 }
 0xe55   : > { %7745 = vmatprep.subr.msk.mxu0 %vm1006_vm1, %v4051_v16 }
 0xe56   : > { %v4041_v59 = vpop.permute.xlu0 %4040 }
 0xe58   : > { %7746 = vmatpush3.xpose.msk.msra.mxu0 %vm1006_vm1, %v4051_v16  ;;  %v4043_v62 = vpop.permute.xlu1 %4042  ;;  %v6662_v16 = vld [vmem:[%s11782_s2 + $0x108] sm:$0xff] }
 0xe59   : > { %7747 = vmatprep.subr.msk.mxu0 %vm1006_vm1, %v4049_v0 }
 0xe5a   : > { %v4037_v8 = vpop.permute.xlu0 %4036 }
 0xe5c   : > { %7748 = vmatpush3.xpose.msk.msra.mxu0 %vm1006_vm1, %v4049_v0  ;;  %v4039_v7 = vpop.permute.xlu1 %4038 }
 0xe5d   : > { %7749 = vmatprep.subr.msk.mxu0 %vm1006_vm1, %v4047_v27 }
 0xe5e   : > { %v4033_v11 = vpop.permute.xlu0 %4032 }
 0xe60   : > { %7750 = vmatpush3.xpose.msk.msra.mxu0 %vm1006_vm1, %v4047_v27  ;;  %v4035_v63 = vpop.permute.xlu1 %4034  ;;  %v6661_v27 = vld [vmem:[%s11782_s2 + $0x100] sm:$0xff] }
 0xe61   : > { %7751 = vmatprep.subr.msk.mxu0 %vm1006_vm1, %v4045_v55 }
 0xe62   : > { %v4029_v44 = vpop.permute.xlu0 %4028 }
 0xe64   : > { %7752 = vmatpush3.xpose.msk.msra.mxu0 %vm1006_vm1, %v4045_v55  ;;  %v4031_v49 = vpop.permute.xlu1 %4030 }
 0xe65   : > { %7753 = vmatprep.subr.msk.mxu0 %vm1006_vm1, %v4043_v62 }
 0xe66   : > { %v4444_v6 = vpop.permute.xlu0 %4443 }
 0xe67   : > { %7793 = vmatprep.subr.mxu1 %v4444_v6 }
 0xe68   : > { %7754 = vmatpush3.xpose.msk.msra.mxu0 %vm1006_vm1, %v4043_v62  ;;  %7794 = vmatpush3.msra.mxu1 %v4444_v6  ;;  %v4438_v23 = vpop.permute.xlu1 %4437 }
 0xe69   : > { %7755 = vmatprep.subr.msk.mxu0 %vm1006_vm1, %v4041_v59 }
 0xe6a   : > { %v4440_v60 = vpop.permute.xlu0 %4439 }
 0xe6c   : > { %7756 = vmatpush3.xpose.msk.msra.mxu0 %vm1006_vm1, %v4041_v59  ;;  %v4434_v2 = vpop.permute.xlu1 %4433 }
 0xe6d   : > { %7757 = vmatprep.subr.msk.mxu0 %vm1006_vm1, %v4039_v7 }
 0xe6e   : > { %v4436_v45 = vpop.permute.xlu0 %4435 }
 0xe70   : > { %7758 = vmatpush3.xpose.msk.msra.mxu0 %vm1006_vm1, %v4039_v7  ;;  %v4432_v29 = vpop.permute.xlu1 %4431  ;;  %v6664_v7 = vld [vmem:[%s11782_s2 + $0x118] sm:$0xff] }
 0xe71   : > { %7759 = vmatprep.subr.msk.mxu0 %vm1006_vm1, %v4037_v8 }
 0xe72   : > { %v4430_v47 = vpop.permute.xlu0 %4429 }
 0xe74   : > { %7760 = vmatpush3.xpose.msk.msra.mxu0 %vm1006_vm1, %v4037_v8  ;;  %v4428_v21 = vpop.permute.xlu1 %4427 }
 0xe75   : > { %7761 = vmatprep.subr.msk.mxu0 %vm1006_vm1, %v4035_v63 }
 0xe76   : > { %v4426_v30 = vpop.permute.xlu0 %4425 }
 0xe78   : > { %7762 = vmatpush3.xpose.msk.msra.mxu0 %vm1006_vm1, %v4035_v63  ;;  %v4424_v12 = vpop.permute.xlu1 %4423  ;;  %v6663_v63 = vld [vmem:[%s11782_s2 + $0x110] sm:$0xff] }
 0xe79   : > { %7763 = vmatprep.subr.msk.mxu0 %vm1006_vm1, %v4033_v11 }
 0xe7a   : > { %v4422_v52 = vpop.permute.xlu0 %4421 }
 0xe7c   : > { %7764 = vmatpush3.xpose.msk.msra.mxu0 %vm1006_vm1, %v4033_v11  ;;  %v4420_v54 = vpop.permute.xlu1 %4419 }
 0xe7d   : > { %7765 = vmatprep.subr.msk.mxu0 %vm1006_vm1, %v4031_v49 }
 0xe7e   : > { %v4418_v24 = vpop.permute.xlu0 %4417 }
 0xe80   : > { %7766 = vmatpush3.xpose.msk.msra.mxu0 %vm1006_vm1, %v4031_v49  ;;  %v4416_v33 = vpop.permute.xlu1 %4415 }
 0xe81   : > { %7767 = vmatprep.subr.msk.mxu0 %vm1006_vm1, %v4029_v44 }
 0xe82   : > { %v4414_v0 = vpop.permute.xlu0 %4413 }
 0xe84   : > { %7768 = vmatpush3.xpose.msk.msra.mxu0 %vm1006_vm1, %v4029_v44  ;;  %v10627_v58 = vpop.permute.xlu1 %4685 }
 0xe87   : > { %7770 = vmatmul.mubr.msk.f32.vlgmr.msra.gmra.mxu0 %vm1006_vm1, %v10473_v15 }
 0xe88   : > { %7772 = vmatprep.mubr.msk.f32.mxu0 %vm1006_vm1, %v10481_v37  ;;  %v10633_v31 = vpop.permute.xlu1 %4679 }
 0xe8b   : > { %7773 = vmatmul.mubr.msk.f32.gmra.mxu0 %vm1006_vm1, %v10479_v42 }
 0xe8c   : > { %7775 = vmatprep.mubr.msk.f32.mxu0 %vm1006_vm1, %v10485_v4  ;;  %v10639_v19 = vpop.permute.xlu1 %4675 }
 0xe8f   : > { %7776 = vmatmul.mubr.msk.f32.gmra.mxu0 %vm1006_vm1, %v10483_v38 }
 0xe90   : > { %7778 = vmatprep.mubr.msk.f32.mxu0 %vm1006_vm1, %v10489_v3  ;;  %v10645_v39 = vpop.permute.xlu1 %4671 }
 0xe93   : > { %7779 = vmatmul.mubr.msk.f32.gmra.mxu0 %vm1006_vm1, %v10487_v57 }
 0xe94   : > { %7781 = vmatprep.mubr.msk.f32.mxu0 %vm1006_vm1, %v10493_v13  ;;  %v10651_v34 = vpop.permute.xlu1 %4667 }
 0xe97   : > { %7782 = vmatmul.mubr.msk.f32.gmra.mxu0 %vm1006_vm1, %v10491_v20 }
 0xe98   : > { %7784 = vmatprep.mubr.msk.f32.mxu0 %vm1006_vm1, %v10497_v28  ;;  %v4442_v18 = vpop.permute.xlu1 %4441 }
 0xe99   : > { %7795 = vmatprep.subr.mxu1 %v4442_v18 }
 0xe9a   : > { %7796 = vmatpush3.msra.mxu1 %v4442_v18 }
 0xe9b   : > { %7785 = vmatmul.mubr.msk.f32.gmra.mxu0 %vm1006_vm1, %v10495_v46  ;;  %7797 = vmatprep.subr.mxu1 %v4440_v60 }
 0xe9c   : > { %7787 = vmatprep.mubr.msk.f32.mxu0 %vm1006_vm1, %v10501_v43  ;;  %7798 = vmatpush3.msra.mxu1 %v4440_v60 }
 0xe9d   : > { %7799 = vmatprep.subr.mxu1 %v4438_v23 }
 0xe9e   : > { %7800 = vmatpush3.msra.mxu1 %v4438_v23  ;;  %v6666_v23 = vld [vmem:[%s11782_s2 + $0x128] sm:$0xff] }
 0xe9f   : > { %7788 = vmatmul.mubr.msk.f32.gmra.mxu0 %vm1006_vm1, %v10499_v9  ;;  %7801 = vmatprep.subr.mxu1 %v4436_v45 }
 0xea0   : > { %7790 = vmatprep.mubr.msk.f32.mxu0 %vm1006_vm1, %v10507_v22  ;;  %7802 = vmatpush3.msra.mxu1 %v4436_v45  ;;  %v6667_v45 = vld [vmem:[%s11782_s2 + $0x130] sm:$0xff] }
 0xea1   : > { %7803 = vmatprep.subr.mxu1 %v4434_v2 }
 0xea2   : > { %7804 = vmatpush3.msra.mxu1 %v4434_v2 }
 0xea3   : > { %7791 = vmatmul.mubr.msk.f32.gmra.mxu0 %vm1006_vm1, %v10503_v1  ;;  %7805 = vmatprep.subr.mxu1 %v4432_v29 }
 0xea4   : > { %7806 = vmatpush3.msra.mxu1 %v4432_v29  ;;  %v6665_v29 = vld [vmem:[%s11782_s2 + $0x120] sm:$0xff] }
 0xea5   : > { %7807 = vmatprep.subr.mxu1 %v4430_v47 }
 0xea6   : > { %7808 = vmatpush3.msra.mxu1 %v4430_v47 }
 0xea7   : > { %7809 = vmatprep.subr.mxu1 %v4428_v21 }
 0xea8   : > { %7810 = vmatpush3.msra.mxu1 %v4428_v21 }
 0xea9   : > { %7811 = vmatprep.subr.mxu1 %v4426_v30 }
 0xeaa   : > { %7812 = vmatpush3.msra.mxu1 %v4426_v30 }
 0xeab   : > { %7813 = vmatprep.subr.mxu1 %v4424_v12 }
 0xeac   : > { %7814 = vmatpush3.msra.mxu1 %v4424_v12 }
 0xead   : > { %7815 = vmatprep.subr.mxu1 %v4422_v52 }
 0xeae   : > { %7816 = vmatpush3.msra.mxu1 %v4422_v52  ;;  %v6670_v52 = vld [vmem:[%s11782_s2 + $0x148] sm:$0xff] }
 0xeaf   : > { %7817 = vmatprep.subr.mxu1 %v4420_v54 }
 0xeb0   : > { %7818 = vmatpush3.msra.mxu1 %v4420_v54 }
 0xeb1   : > { %7819 = vmatprep.subr.mxu1 %v4418_v24 }
 0xeb2   : > { %7820 = vmatpush3.msra.mxu1 %v4418_v24 }
 0xeb3   : > { %7821 = vmatprep.subr.mxu1 %v4416_v33 }
 0xeb4   : > { %7822 = vmatpush3.msra.mxu1 %v4416_v33  ;;  %v6668_v33 = vld [vmem:[%s11782_s2 + $0x138] sm:$0xff] }
 0xeb5   : > { %7823 = vmatprep.subr.mxu1 %v4414_v0 }
 0xeb6   : > { %7824 = vmatpush3.msra.mxu1 %v4414_v0  ;;  %v6669_v0 = vld [vmem:[%s11782_s2 + $0x140] sm:$0xff] }
 0xeb7   : > { %7849 = vmatprep.subr.msk.mxu1 %vm1006_vm1, %v10627_v58 }
 0xf47   : > { %v7771_v55 = vpop.f32.mrf.mxu0 }
 0xf48   : > { %v10675_v59 = vadd.f32 %v7771_v55, %v6662_v16 }
 0xf49   : > { %v4190_v62 = vpop.f32.mrf.mxu0 }
 0xf4a   : > { %v10677_v8 = vadd.f32 %v6661_v27, %v4190_v62  ;;  %4271 = vmax.xlane.f32.xlu0 %v10675_v59  ;;  %v6672_v62 = vld [vmem:[%s11782_s2 + $0x158] sm:$0xff] }
 0xf4b   : > { %v7774_v11 = vpop.f32.mrf.mxu0 }
 0xf4c   : > { %4269 = vmax.xlane.f32.xlu1 %v10677_v8  ;;  %v10687_v49 = vadd.f32 %v7774_v11, %v6664_v7  ;;  %v6671_v11 = vld [vmem:[%s11782_s2 + $0x150] sm:$0xff] }
 0xf4d   : > { %v4200_v44 = vpop.f32.mrf.mxu0 }
 0xf4e   : > { %v10689_v6 = vadd.f32 %v6663_v63, %v4200_v44 }
 0xf4f   : > { %v7777_v2 = vpop.f32.mrf.mxu0 }
 0xf50   : > { %4273 = vmax.xlane.f32.xlu0 %v10689_v6  ;;  %4275 = vmax.xlane.f32.xlu1 %v10687_v49  ;;  %v10699_v12 = vadd.f32 %v7777_v2, %v6666_v23  ;;  %v6674_v2 = vld [vmem:[%s11782_s2 + $0x168] sm:$0xff] }
 0xf51   : > { %v4210_v21 = vpop.f32.mrf.mxu0 }
 0xf52   : > { %v10701_v54 = vadd.f32 %v6665_v29, %v4210_v21  ;;  %v6673_v21 = vld [vmem:[%s11782_s2 + $0x160] sm:$0xff] }
 0xf53   : > { %v7780_v60 = vpop.f32.mrf.mxu0 }
 0xf54   : > { %4277 = vmax.xlane.f32.xlu0 %v10701_v54  ;;  %4279 = vmax.xlane.f32.xlu1 %v10699_v12  ;;  %v10711_v47 = vadd.f32 %v7780_v60, %v6668_v33 }
 0xf55   : > { %v4220_v18 = vpop.f32.mrf.mxu0 }
 0xf56   : > { %v10713_v30 = vadd.f32 %v6667_v45, %v4220_v18  ;;  %v6676_v18 = vld [vmem:[%s11782_s2 + $0x178] sm:$0xff] }
 0xf57   : > { %v7783_v24 = vpop.f32.mrf.mxu0 }
 0xf58   : > { %4281 = vmax.xlane.f32.xlu0 %v10713_v30  ;;  %4283 = vmax.xlane.f32.xlu1 %v10711_v47  ;;  %v10723_v55 = vadd.f32 %v7783_v24, %v6670_v52  ;;  %v6675_v24 = vld [vmem:[%s11782_s2 + $0x170] sm:$0xff] }
 0xf59   : > { %v4230_v16 = vpop.f32.mrf.mxu0 }
 0xf5a   : > { %v10725_v27 = vadd.f32 %v6669_v0, %v4230_v16 }
 0xf5b   : > { %v7786_v7 = vpop.f32.mrf.mxu0 }
 0xf5c   : > { %4285 = vmax.xlane.f32.xlu0 %v10725_v27  ;;  %4287 = vmax.xlane.f32.xlu1 %v10723_v55  ;;  %v10735_v44 = vadd.f32 %v7786_v7, %v6672_v62  ;;  %v10767_v7 = vpop.permute.xlu0 %4681 }
 0xf5d   : > { %v4240_v63 = vpop.f32.mrf.mxu0 }
 0xf5e   : > { %v10737_v23 = vadd.f32 %v6671_v11, %v4240_v63 }
 0xf5f   : > { %v7789_v29 = vpop.f32.mrf.mxu0 }
 0xf60   : > { %4289 = vmax.xlane.f32.xlu0 %v10737_v23  ;;  %4291 = vmax.xlane.f32.xlu1 %v10735_v44  ;;  %v10747_v60 = vadd.f32 %v7789_v29, %v6674_v2  ;;  %v10769_v11 = vpop.permute.xlu0 %4677 }
 0xf61   : > { %v4250_v33 = vpop.f32.mrf.mxu0 }
 0xf62   : > { %v10749_v45 = vadd.f32 %v6673_v21, %v4250_v33 }
 0xf63   : > { %v7792_v52 = vpop.f32.mrf.mxu0 }
 0xf64   : > { %4293 = vmax.xlane.f32.xlu0 %v10749_v45  ;;  %4295 = vmax.xlane.f32.xlu1 %v10747_v60  ;;  %v10759_v16 = vadd.f32 %v7792_v52, %v6676_v18  ;;  %v10771_v63 = vpop.permute.xlu0 %4673 }
 0xf65   : > { %v4260_v0 = vpop.f32.mrf.mxu0 }
 0xf66   : > { %v10761_v62 = vadd.f32 %v6675_v24, %v4260_v0 }
 0xf68   : > { %4297 = vmax.xlane.f32.xlu0 %v10761_v62  ;;  %4299 = vmax.xlane.f32.xlu1 %v10759_v16  ;;  %v10773_v2 = vpop.permute.xlu0 %4669 }
 0xf6c   : > { %v10775_v29 = vpop.permute.xlu0 %4665 }
 0xf70   : > { %v10777_v21 = vpop.permute.xlu0 %4663 }
 0xf74   : > { %v10779_v33 = vpop.permute.xlu0 %4683 }
 0xf7e   : > { %4661 = vrot.lane.b32.xlu0 %v10479_v42, %s8569_s15 }
 0xfd3   : > { %v4272_v18 = vpop.xlane.xlu0 %4271 }
 0xfd4   : > { %v4302_v52 = vsub.f32 %v10675_v59, %v4272_v18 }
 0xfd5   : > { %v4270_v24 = vpop.xlane.xlu1 %4269 }
 0xfd6   : > { %v4319_v0 = vmul.f32 1.442695, %v4302_v52  ;;  %v4301_v32 = vsub.f32 %v10677_v8, %v4270_v24 }
 0xfd8   : > { %8351 = vpow2.f32 %v4319_v0  ;;  %v4317_v53 = vmul.f32 1.442695, %v4301_v32 }
 0xfd9   : > { %v4274_v17 = vpop.xlane.xlu0 %4273  ;;  %v4276_v5 = vpop.xlane.xlu1 %4275 }
 0xfda   : > { %8353 = vpow2.f32 %v4317_v53  ;;  %v4303_v10 = vsub.f32 %v10689_v6, %v4274_v17  ;;  %v4304_v26 = vsub.f32 %v10687_v49, %v4276_v5 }
 0xfdc   : > { %v4321_v50 = vmul.f32 1.442695, %v4303_v10  ;;  %v4323_v14 = vmul.f32 1.442695, %v4304_v26 }
 0xfdd   : > { %v4278_v35 = vpop.xlane.xlu0 %4277  ;;  %v4280_v61 = vpop.xlane.xlu1 %4279 }
 0xfde   : > { %8355 = vpow2.f32 %v4321_v50  ;;  %v4306_v59 = vsub.f32 %v10699_v12, %v4280_v61  ;;  %v4305_v18 = vsub.f32 %v10701_v54, %v4278_v35 }
 0xfdf   : > { %8357 = vpow2.f32 %v4323_v14 }
 0xfe0   : > { %v4327_v8 = vmul.f32 1.442695, %v4306_v59  ;;  %v4325_v53 = vmul.f32 1.442695, %v4305_v18 }
 0xfe1   : > { %v4282_v52 = vpop.xlane.xlu0 %4281  ;;  %v4284_v32 = vpop.xlane.xlu1 %4283 }
 0xfe2   : > { %v4307_v24 = vsub.f32 %v10713_v30, %v4282_v52  ;;  %8359 = vpow2.f32 %v4327_v8  ;;  %v4308_v17 = vsub.f32 %v10711_v47, %v4284_v32 }
 0xfe4   : > { %v4329_v5 = vmul.f32 1.442695, %v4307_v24  ;;  %v4331_v61 = vmul.f32 1.442695, %v4308_v17 }
 0xfe5   : > { %v10789_v10 = vpop.eup %8351  ;;  %v4288_v54 = vpop.xlane.xlu1 %4287 }
 0xfe6   : > { %8361 = vpow2.f32 %v4329_v5  ;;  %4351 = vadd.xlane.f32.xlu0 %v10789_v10  ;;  %v4286_v47 = vpop.xlane.xlu0 %4285  ;;  %v4310_v32 = vsub.f32 %v10723_v55, %v4288_v54 }
 0xfe7   : > { %v10792_v50 = vpop.eup %8353  ;;  %8363 = vpow2.f32 %v4325_v53  ;;  %v4309_v5 = vsub.f32 %v10725_v27, %v4286_v47 }
 0xfe8   : > { %4349 = vadd.xlane.f32.xlu1 %v10792_v50  ;;  %8365 = vpow2.f32 %v4331_v61  ;;  %v4335_v61 = vmul.f32 1.442695, %v4310_v32 }
 0xfe9   : > { %v4292_v30 = vpop.xlane.xlu1 %4291  ;;  %v4333_v56 = vmul.f32 1.442695, %v4309_v5 }
 0xfea   : > { %v4290_v0 = vpop.xlane.xlu0 %4289  ;;  %v4312_v51 = vsub.f32 %v10735_v44, %v4292_v30 }
 0xfeb   : > { %v10795_v35 = vpop.eup %8355  ;;  %v4311_v18 = vsub.f32 %v10737_v23, %v4290_v0 }
 0xfec   : > { %v10797_v14 = vpop.eup %8357  ;;  %4353 = vadd.xlane.f32.xlu1 %v10795_v35 }
 0xfed   : > { %4355 = vadd.xlane.f32.xlu0 %v10797_v14  ;;  %v4296_v59 = vpop.xlane.xlu1 %4295  ;;  %v4337_v8 = vmul.f32 1.442695, %v4311_v18 }
 0xfee   : > { %v4314_v52 = vsub.f32 %v10747_v60, %v4296_v59  ;;  %v4294_v23 = vpop.xlane.xlu0 %4293  ;;  %v4339_v60 = vmul.f32 1.442695, %v4312_v51 }
 0xfef   : > { %v10801_v26 = vpop.eup %8359  ;;  %8367 = vpow2.f32 %v4337_v8  ;;  %v4313_v55 = vsub.f32 %v10749_v45, %v4294_v23 }
 0xff0   : > { %4359 = vadd.xlane.f32.xlu1 %v10801_v26  ;;  %v4343_v53 = vmul.f32 1.442695, %v4314_v52 }
 0xff1   : > { %v4300_v24 = vpop.xlane.xlu1 %4299  ;;  %v4341_v0 = vmul.f32 1.442695, %v4313_v55 }
 0xff2   : > { %v4316_v17 = vsub.f32 %v10759_v16, %v4300_v24  ;;  %8369 = vpow2.f32 %v4343_v53  ;;  %v4298_v45 = vpop.xlane.xlu0 %4297 }
 0xff3   : > { %v10804_v49 = vpop.eup %8361  ;;  %8371 = vpow2.f32 %v4335_v61  ;;  %v4315_v47 = vsub.f32 %v10761_v62, %v4298_v45 }
 0xff4   : > { %v10806_v6 = vpop.eup %8363  ;;  %4361 = vadd.xlane.f32.xlu0 %v10804_v49  ;;  %v4347_v40 = vmul.f32 1.442695, %v4316_v17 }
 0xff5   : > { %4357 = vadd.xlane.f32.xlu1 %v10806_v6  ;;  %v10810_v12 = vpop.eup %8365  ;;  %v4345_v30 = vmul.f32 1.442695, %v4315_v47 }
 0xff6   : > { %8373 = vpow2.f32 %v4347_v40  ;;  %v10866_v59 = vpop.permute.xlu0 %4661 }
 0xff7   : > { %8375 = vpow2.f32 %v4333_v56 }
 0xff8   : > { %8377 = vpow2.f32 %v4339_v60 }
 0xff9   : > { %4363 = vadd.xlane.f32.xlu1 %v10810_v12  ;;  %8379 = vpow2.f32 %v4341_v0 }
 0xffa   : > { %8381 = vpow2.f32 %v4345_v30 }
 0xffc   : > { %v10824_v54 = vpop.eup %8367 }
 0xfff   : > { %v10827_v27 = vpop.eup %8369 }
0x1000   : > { %v10829_v16 = vpop.eup %8371 }
0x1003   : > { %v10833_v40 = vpop.eup %8373 }
0x1004   : > { %v10835_v51 = vpop.eup %8375 }
0x1005   : > { %v10839_v56 = vpop.eup %8377 }
0x1006   : > { %v10842_v44 = vpop.eup %8379 }
0x1007   : > { %v10870_v62 = vpop.eup %8381 }
0x100a   : > { %4657 = vrot.lane.b32.xlu1 %v10473_v15, %s8569_s15  ;;  %4659 = vrot.lane.b32.xlu0 %v10481_v37, %s8569_s15 }
0x1029   : > { %4369 = vadd.xlane.f32.xlu0 %v10824_v54 }
0x102d   : > { %4375 = vadd.xlane.f32.xlu0 %v10827_v27 }
0x102e   : > { %4367 = vadd.xlane.f32.xlu1 %v10829_v16 }
0x1031   : > { %4379 = vadd.xlane.f32.xlu0 %v10833_v40 }
0x1032   : > { %4365 = vadd.xlane.f32.xlu1 %v10835_v51 }
0x1036   : > { %4371 = vadd.xlane.f32.xlu1 %v10839_v56 }
0x103a   : > { %4373 = vadd.xlane.f32.xlu1 %v10842_v44 }
0x1047   : > { %4655 = vrot.lane.b32.xlu0 %v10475_v41, %s8569_s15  ;;  %s11837_s15 = sshll.u32 %s11839_s26, 7 }
0x1048   : > { %s11712_s24 = scalar_lea.vmem %s11793_s13, %s11837_s15 }
0x104b   : > { %4623 = vrot.lane.b32.xlu1 %v10475_v41, %s8570_s18  ;;  %4625 = vrot.lane.b32.xlu0 %v10473_v15, %s8570_s18 }
0x104f   : > { %4629 = vrot.lane.b32.xlu0 %v10479_v42, %s8570_s18 }
0x1053   : > { %4633 = vrot.lane.b32.xlu0 %v10483_v38, %s8570_s18 }
0x1057   : > { %4637 = vrot.lane.b32.xlu0 %v10487_v57, %s8570_s18 }
0x105b   : > { %4641 = vrot.lane.b32.xlu0 %v10491_v20, %s8570_s18 }
0x105f   : > { %4645 = vrot.lane.b32.xlu0 %v10495_v46, %s8570_s18 }
0x1063   : > { %4649 = vrot.lane.b32.xlu0 %v10499_v9, %s8570_s18 }
0x1067   : > { %4653 = vrot.lane.b32.xlu0 %v10503_v1, %s8570_s18 }
0x106b   : > { %5070 = vrot.lane.b32.xlu0 %v10503_v1, %s8571_s19 }
0x106f   : > { %4377 = vadd.xlane.f32.xlu1 %v10870_v62  ;;  %v4352_v18 = vpop.xlane.xlu0 %4351  ;;  %5066 = vrot.lane.b32.xlu0 %v10499_v9, %s8571_s19 }
0x1070   : > { %8383 = vrcp.f32 %v4352_v18 }
0x1071   : > { %v4350_v8 = vpop.xlane.xlu1 %4349 }
0x1072   : > { %8385 = vrcp.f32 %v4350_v8 }
0x1073   : > { %5062 = vrot.lane.b32.xlu0 %v10495_v46, %s8571_s19 }
0x1075   : > { %v4354_v52 = vpop.xlane.xlu1 %4353 }
0x1076   : > { %v4356_v32 = vpop.xlane.xlu0 %4355  ;;  %8387 = vrcp.f32 %v4354_v52 }
0x1077   : > { %8389 = vrcp.f32 %v4356_v32  ;;  %5058 = vrot.lane.b32.xlu0 %v10491_v20, %s8571_s19 }
0x1079   : > { %v4360_v1 = vpop.xlane.xlu1 %4359 }
0x107a   : > { %8391 = vrcp.f32 %v4360_v1 }
0x107b   : > { %5054 = vrot.lane.b32.xlu0 %v10487_v57, %s8571_s19 }
0x107d   : > { %v4362_v24 = vpop.xlane.xlu0 %4361  ;;  %v8384_v9 = vpop.eup %8383 }
0x107e   : > { %8393 = vrcp.f32 %v4362_v24  ;;  %v4358_v53 = vpop.xlane.xlu1 %4357  ;;  %v4398_v5 = vmul.f32 %v8384_v9, %v10789_v10 }
0x107f   : > { %v8386_v17 = vpop.eup %8385  ;;  %8395 = vrcp.f32 %v4358_v53 }
0x1080   : > { %4627 = vrot.lane.b32.xlu1 %v10481_v37, %s8570_s18  ;;  %v4397_v46 = vmul.f32 %v8386_v17, %v10792_v50 }
0x1082   : > { %v4364_v61 = vpop.xlane.xlu1 %4363  ;;  %7825 = vmatprep.mubr.f32.mxu1 %v4397_v46 }
0x1083   : > { %v8388_v20 = vpop.eup %8387  ;;  %8397 = vrcp.f32 %v4364_v61  ;;  %7826 = vmatmul.mubr.f32.vlgmr.msra.gmra.mxu1 %v4398_v5 }
0x1084   : > { %v8390_v57 = vpop.eup %8389  ;;  %4631 = vrot.lane.b32.xlu1 %v10485_v4, %s8570_s18  ;;  %7850 = vmatpush3.xpose.msk.msra.mxu1 %vm1006_vm1, %v10627_v58  ;;  %v4399_v23 = vmul.f32 %v8388_v20, %v10795_v35 }
0x1085   : > { %7851 = vmatprep.subr.msk.mxu1 %vm1006_vm1, %v10779_v33  ;;  %v4400_v50 = vmul.f32 %v8390_v57, %v10797_v14 }
0x1086   : > { %7828 = vmatprep.mubr.f32.mxu1 %v4399_v23 }
0x1087   : > { %7829 = vmatmul.mubr.f32.gmra.mxu1 %v4400_v50  ;;  %v8392_v10 = vpop.eup %8391 }
0x1088   : > { %4635 = vrot.lane.b32.xlu1 %v10489_v3, %s8570_s18  ;;  %7852 = vmatpush3.xpose.msk.msra.mxu1 %vm1006_vm1, %v10779_v33  ;;  %v4402_v14 = vmul.f32 %v8392_v10, %v10801_v26 }
0x1089   : > { %7853 = vmatprep.subr.msk.mxu1 %vm1006_vm1, %v10767_v7 }
0x108b   : > { %v8394_v58 = vpop.eup %8393 }
0x108c   : > { %v8396_v60 = vpop.eup %8395  ;;  %4639 = vrot.lane.b32.xlu1 %v10493_v13, %s8570_s18  ;;  %7854 = vmatpush3.xpose.msk.msra.mxu1 %vm1006_vm1, %v10767_v7  ;;  %v4403_v33 = vmul.f32 %v8394_v58, %v10804_v49 }
0x108d   : > { %7855 = vmatprep.subr.msk.mxu1 %vm1006_vm1, %v10633_v31  ;;  %v4401_v35 = vmul.f32 %v8396_v60, %v10806_v6 }
0x108f   : > { %7831 = vmatprep.mubr.f32.mxu1 %v4401_v35 }
0x1090   : > { %v8398_v55 = vpop.eup %8397  ;;  %4643 = vrot.lane.b32.xlu1 %v10497_v28, %s8570_s18  ;;  %7832 = vmatmul.mubr.f32.gmra.mxu1 %v4402_v14 }
0x1091   : > { %7856 = vmatpush3.xpose.msk.msra.mxu1 %vm1006_vm1, %v10633_v31  ;;  %7834 = vmatprep.mubr.f32.mxu1 %v4403_v33  ;;  %v4404_v7 = vmul.f32 %v8398_v55, %v10810_v12 }
0x1092   : > { %7857 = vmatprep.subr.msk.mxu1 %vm1006_vm1, %v10769_v11 }
0x1094   : > { %4647 = vrot.lane.b32.xlu1 %v10501_v43, %s8570_s18  ;;  %7835 = vmatmul.mubr.f32.gmra.mxu1 %v4404_v7 }
0x1095   : > { %7858 = vmatpush3.xpose.msk.msra.mxu1 %vm1006_vm1, %v10769_v11 }
0x1096   : > { %7859 = vmatprep.subr.msk.mxu1 %vm1006_vm1, %v10639_v19 }
0x1098   : > { %4651 = vrot.lane.b32.xlu1 %v10507_v22, %s8570_s18 }
0x1099   : > { %7860 = vmatpush3.xpose.msk.msra.mxu1 %vm1006_vm1, %v10639_v19 }
0x109a   : > { %7861 = vmatprep.subr.msk.mxu1 %vm1006_vm1, %v10771_v63 }
0x109c   : > { %5068 = vrot.lane.b32.xlu1 %v10507_v22, %s8571_s19 }
0x109d   : > { %7862 = vmatpush3.xpose.msk.msra.mxu1 %vm1006_vm1, %v10771_v63 }
0x109e   : > { %7863 = vmatprep.subr.msk.mxu1 %vm1006_vm1, %v10645_v39 }
0x10a0   : > { %5064 = vrot.lane.b32.xlu1 %v10501_v43, %s8571_s19  ;;  %v4658_v43 = vpop.permute.xlu1 %4657 }
0x10a1   : > { %7864 = vmatpush3.xpose.msk.msra.mxu1 %vm1006_vm1, %v10645_v39 }
0x10a2   : > { %7865 = vmatprep.subr.msk.mxu1 %vm1006_vm1, %v10773_v2 }
0x10a4   : > { %5060 = vrot.lane.b32.xlu1 %v10497_v28, %s8571_s19  ;;  %v4660_v28 = vpop.permute.xlu0 %4659 }
0x10a5   : > { %7866 = vmatpush3.xpose.msk.msra.mxu1 %vm1006_vm1, %v10773_v2 }
0x10a6   : > { %7867 = vmatprep.subr.msk.mxu1 %vm1006_vm1, %v10651_v34 }
0x10a8   : > { %5056 = vrot.lane.b32.xlu1 %v10493_v13, %s8571_s19 }
0x10a9   : > { %7868 = vmatpush3.xpose.msk.msra.mxu1 %vm1006_vm1, %v10651_v34 }
0x10aa   : > { %7869 = vmatprep.subr.msk.mxu1 %vm1006_vm1, %v10775_v29 }
0x10ac   : > { %5052 = vrot.lane.b32.xlu1 %v10489_v3, %s8571_s19 }
0x10ad   : > { %7870 = vmatpush3.xpose.msk.msra.mxu1 %vm1006_vm1, %v10775_v29 }
0x10ae   : > { %7871 = vmatprep.subr.msk.mxu1 %vm1006_vm1, %v10777_v21 }
0x10b1   : > { %7872 = vmatpush3.xpose.msk.msra.mxu1 %vm1006_vm1, %v10777_v21 }
0x10b2   : > { %7873 = vmatprep.subr.msk.mxu1 %vm1006_vm1, %v10866_v59  ;;  %v4370_v13 = vpop.xlane.xlu0 %4369 }
0x10b3   : > { %8399 = vrcp.f32 %v4370_v13 }
0x10b5   : > { %7874 = vmatpush3.xpose.msk.msra.mxu1 %vm1006_vm1, %v10866_v59 }
0x10b6   : > { %7875 = vmatprep.subr.msk.mxu1 %vm1006_vm1, %v4660_v28  ;;  %v4376_v3 = vpop.xlane.xlu0 %4375 }
0x10b7   : > { %v4368_v22 = vpop.xlane.xlu1 %4367 }
0x10b8   : > { %8401 = vrcp.f32 %v4368_v22 }
0x10b9   : > { %7876 = vmatpush3.xpose.msk.msra.mxu1 %vm1006_vm1, %v4660_v28 }
0x10ba   : > { %7877 = vmatprep.subr.msk.mxu1 %vm1006_vm1, %v4658_v43  ;;  %v4380_v31 = vpop.xlane.xlu0 %4379 }
0x10bb   : > { %v4366_v19 = vpop.xlane.xlu1 %4365 }
0x10bc   : > { %8403 = vrcp.f32 %v4366_v19 }
0x10bd   : > { %7878 = vmatpush3.xpose.msk.msra.mxu1 %vm1006_vm1, %v4658_v43 }
0x10be   : > { %v4656_v39 = vpop.permute.xlu0 %4655 }
0x10bf   : > { %v4372_v34 = vpop.xlane.xlu1 %4371  ;;  %7879 = vmatprep.subr.msk.mxu1 %vm1006_vm1, %v4656_v39 }
0x10c0   : > { %8405 = vrcp.f32 %v4372_v34  ;;  %v8400_v29 = vpop.eup %8399 }
0x10c1   : > { %7880 = vmatpush3.xpose.msk.msra.mxu1 %vm1006_vm1, %v4656_v39  ;;  %8407 = vrcp.f32 %v4376_v3  ;;  %v4407_v0 = vmul.f32 %v8400_v29, %v10824_v54 }
0x10c2   : > { %v4626_v11 = vpop.permute.xlu0 %4625 }
0x10c3   : > { %v4374_v63 = vpop.xlane.xlu1 %4373 }
0x10c4   : > { %8409 = vrcp.f32 %v4374_v63 }
0x10c5   : > { %v8402_v21 = vpop.eup %8401  ;;  %8411 = vrcp.f32 %v4380_v31 }
0x10c6   : > { %v4630_v2 = vpop.permute.xlu0 %4629  ;;  %v4406_v12 = vmul.f32 %v8402_v21, %v10829_v16 }
0x10c7   : > { %v4624_v24 = vpop.permute.xlu1 %4623 }
0x10c9   : > { %v8404_v26 = vpop.eup %8403 }
0x10ca   : > { %v4634_v49 = vpop.permute.xlu0 %4633  ;;  %v4405_v6 = vmul.f32 %v8404_v26, %v10835_v51  ;;  %v6710_v26 = vld [vmem:[%s11782_s2 + $0x188] sm:$0xff] }
0x10cc   : > { %7837 = vmatprep.mubr.f32.mxu1 %v4405_v6  ;;  %v6709_v6 = vld [vmem:[%s11782_s2 + $0x180] sm:$0xff] }
0x10cd   : > { %v8406_v45 = vpop.eup %8405  ;;  %7838 = vmatmul.mubr.f32.gmra.mxu1 %v4406_v12 }
0x10ce   : > { %7840 = vmatprep.mubr.f32.mxu1 %v4407_v0  ;;  %v4638_v47 = vpop.permute.xlu0 %4637  ;;  %v4408_v30 = vmul.f32 %v8406_v45, %v10839_v56  ;;  %v8408_v59 = vpop.eup %8407 }
0x10cf   : > { %v4410_v32 = vmul.f32 %v8408_v59, %v10827_v27  ;;  %v6711_v59 = vld [vmem:[%s11782_s2 + $0x190] sm:$0xff] }
0x10d1   : > { %v8410_v18 = vpop.eup %8409  ;;  %7841 = vmatmul.mubr.f32.gmra.mxu1 %v4408_v30 }
0x10d2   : > { %v4642_v8 = vpop.permute.xlu0 %4641  ;;  %v4409_v52 = vmul.f32 %v8410_v18, %v10842_v44  ;;  %v8412_v46 = vpop.eup %8411 }
0x10d3   : > { %v4412_v61 = vmul.f32 %v8412_v46, %v10833_v40 }
0x10d4   : > { %7843 = vmatprep.mubr.f32.mxu1 %v4409_v52 }
0x10d5   : > { %7844 = vmatmul.mubr.f32.gmra.mxu1 %v4410_v32  ;;  %v6714_v32 = vld [vmem:[%s11782_s2 + $0x1a8] sm:$0xff] }
0x10d6   : > { %v4646_v16 = vpop.permute.xlu0 %4645 }
0x10da   : > { %v4650_v51 = vpop.permute.xlu0 %4649 }
0x10de   : > { %v4654_v1 = vpop.permute.xlu0 %4653 }
0x10e2   : > { %v5071_v54 = vpop.permute.xlu0 %5070 }
0x10e3   : > { %7905 = vmatprep.subr.mxu0 %v5071_v54 }
0x10e4   : > { %7906 = vmatpush3.msra.mxu0 %v5071_v54 }
0x10e6   : > { %v5067_v23 = vpop.permute.xlu0 %5066 }
0x10f8   : > { %v4378_v9 = vpop.xlane.xlu1 %4377 }
0x10f9   : > { %8413 = vrcp.f32 %v4378_v9  ;;  %v6716_v9 = vld [vmem:[%s11782_s2 + $0x1b8] sm:$0xff] }
0x10fc   : > { %v4628_v56 = vpop.permute.xlu1 %4627 }
0x1100   : > { %v4632_v53 = vpop.permute.xlu1 %4631 }
0x1104   : > { %v4636_v17 = vpop.permute.xlu1 %4635 }
0x1106   : > { %v8414_v5 = vpop.eup %8413 }
0x1107   : > { %v4411_v44 = vmul.f32 %v8414_v5, %v10870_v62  ;;  %v5063_v62 = vpop.permute.xlu0 %5062 }
0x1108   : > { %v4640_v27 = vpop.permute.xlu1 %4639 }
0x1109   : > { %7846 = vmatprep.mubr.f32.mxu1 %v4411_v44  ;;  %v6718_v44 = vld [vmem:[%s11782_s2 + $0x1c8] sm:$0xff] }
0x110a   : > { %7847 = vmatmul.mubr.f32.gmra.mxu1 %v4412_v61  ;;  %v6717_v61 = vld [vmem:[%s11782_s2 + $0x1c0] sm:$0xff] }
0x110b   : > { %7881 = vmatprep.mubr.msk.f32.mxu1 %vm1006_vm1, %v4624_v24  ;;  %v5059_v58 = vpop.permute.xlu0 %5058 }
0x110c   : > { %v4644_v20 = vpop.permute.xlu1 %4643 }
0x110e   : > { %7882 = vmatmul.mubr.msk.f32.vlgmr.msra.gmra.mxu1 %vm1006_vm1, %v4626_v11 }
0x110f   : > { %7884 = vmatprep.mubr.msk.f32.mxu1 %vm1006_vm1, %v4628_v56  ;;  %v5055_v14 = vpop.permute.xlu0 %5054 }
0x1110   : > { %v4648_v57 = vpop.permute.xlu1 %4647 }
0x1112   : > { %7885 = vmatmul.mubr.msk.f32.gmra.mxu1 %vm1006_vm1, %v4630_v2 }
0x1113   : > { %7887 = vmatprep.mubr.msk.f32.mxu1 %vm1006_vm1, %v4632_v53  ;;  %v6715_v53 = vld [vmem:[%s11782_s2 + $0x1b0] sm:$0xff] }
0x1114   : > { %v4652_v50 = vpop.permute.xlu1 %4651 }
0x1116   : > { %7888 = vmatmul.mubr.msk.f32.gmra.mxu1 %vm1006_vm1, %v4634_v49 }
0x1117   : > { %7890 = vmatprep.mubr.msk.f32.mxu1 %vm1006_vm1, %v4636_v17 }
0x1118   : > { %v5069_v40 = vpop.permute.xlu1 %5068 }
0x1119   : > { %7907 = vmatprep.subr.mxu0 %v5069_v40 }
0x111a   : > { %7891 = vmatmul.mubr.msk.f32.gmra.mxu1 %vm1006_vm1, %v4638_v47  ;;  %7908 = vmatpush3.msra.mxu0 %v5069_v40  ;;  %v6712_v47 = vld [vmem:[%s11782_s2 + $0x198] sm:$0xff] }
0x111b   : > { %7893 = vmatprep.mubr.msk.f32.mxu1 %vm1006_vm1, %v4640_v27  ;;  %7909 = vmatprep.subr.mxu0 %v5067_v23 }
0x111c   : > { %7910 = vmatpush3.msra.mxu0 %v5067_v23  ;;  %v5065_v10 = vpop.permute.xlu1 %5064 }
0x111d   : > { %7911 = vmatprep.subr.mxu0 %v5065_v10 }
0x111e   : > { %7894 = vmatmul.mubr.msk.f32.gmra.mxu1 %vm1006_vm1, %v4642_v8  ;;  %7912 = vmatpush3.msra.mxu0 %v5065_v10 }
0x111f   : > { %7896 = vmatprep.mubr.msk.f32.mxu1 %vm1006_vm1, %v4644_v20  ;;  %7913 = vmatprep.subr.mxu0 %v5063_v62 }
0x1120   : > { %7914 = vmatpush3.msra.mxu0 %v5063_v62  ;;  %v5061_v60 = vpop.permute.xlu1 %5060  ;;  %v6719_v62 = vld [vmem:[%s11782_s2 + $0x1d0] sm:$0xff] }
0x1121   : > { %7915 = vmatprep.subr.mxu0 %v5061_v60 }
0x1122   : > { %7897 = vmatmul.mubr.msk.f32.gmra.mxu1 %vm1006_vm1, %v4646_v16  ;;  %7916 = vmatpush3.msra.mxu0 %v5061_v60 }
0x1123   : > { %7899 = vmatprep.mubr.msk.f32.mxu1 %vm1006_vm1, %v4648_v57  ;;  %7917 = vmatprep.subr.mxu0 %v5059_v58 }
0x1124   : > { %7918 = vmatpush3.msra.mxu0 %v5059_v58  ;;  %v5057_v35 = vpop.permute.xlu1 %5056 }
0x1125   : > { %7919 = vmatprep.subr.mxu0 %v5057_v35 }
0x1126   : > { %7900 = vmatmul.mubr.msk.f32.gmra.mxu1 %vm1006_vm1, %v4650_v51  ;;  %7920 = vmatpush3.msra.mxu0 %v5057_v35  ;;  %v6713_v51 = vld [vmem:[%s11782_s2 + $0x1a0] sm:$0xff]  ;;  %v6722_v35 = vld [vmem:[%s11782_s2 + $0x1e8] sm:$0xff] }
0x1127   : > { %7902 = vmatprep.mubr.msk.f32.mxu1 %vm1006_vm1, %v4652_v50  ;;  %7921 = vmatprep.subr.mxu0 %v5055_v14  ;;  %v6720_v50 = vld [vmem:[%s11782_s2 + $0x1d8] sm:$0xff] }
0x1128   : > { %7922 = vmatpush3.msra.mxu0 %v5055_v14  ;;  %v5053_v33 = vpop.permute.xlu1 %5052 }
0x1129   : > { %7923 = vmatprep.subr.mxu0 %v5053_v33 }
0x112a   : > { %7903 = vmatmul.mubr.msk.f32.gmra.mxu1 %vm1006_vm1, %v4654_v1  ;;  %7924 = vmatpush3.msra.mxu0 %v5053_v33  ;;  %v6721_v33 = vld [vmem:[%s11782_s2 + $0x1e0] sm:$0xff] }
0x1143   : > { %v10993_v55 = vpop.f32.mrf.mxu1 }
0x1145   : > { %v10995_v7 = vpop.f32.mrf.mxu1 }
0x1147   : > { %v10997_v28 = vpop.f32.mrf.mxu1 }
0x1149   : > { %v10999_v13 = vpop.f32.mrf.mxu1 }
0x1150   : > { %v11001_v43 = vpop.f32.mrf.mxu1 }
0x1152   : > { %v11003_v3 = vpop.f32.mrf.mxu1 }
0x1154   : > { %v11005_v22 = vpop.f32.mrf.mxu1 }
0x1156   : > { %v11007_v31 = vpop.f32.mrf.mxu1 }
0x118d   : > { %v11009_v19 = vpop.f32.mrf.mxu1 }
0x118f   : > { %v11011_v39 = vpop.f32.mrf.mxu1 }
0x1191   : > { %v11013_v34 = vpop.f32.mrf.mxu1 }
0x1193   : > { %v11015_v11 = vpop.f32.mrf.mxu1 }
0x1195   : > { %v11017_v63 = vpop.f32.mrf.mxu1 }
0x1197   : > { %v11019_v2 = vpop.f32.mrf.mxu1 }
0x11ca   : > { %v11021_v29 = vpop.f32.mrf.mxu1 }
0x11cc   : > { %v11023_v21 = vpop.f32.mrf.mxu1 }
0x11ce   : > { %v7883_v49 = vpop.f32.mrf.mxu1 }
0x11cf   : > { %v11031_v12 = vadd.f32 %v7883_v49, %v6710_v26 }
0x11d0   : > { %v4817_v0 = vpop.f32.mrf.mxu1 }
0x11d1   : > { %v11033_v45 = vadd.f32 %v6709_v6, %v4817_v0  ;;  %4898 = vmax.xlane.f32.xlu0 %v11031_v12  ;;  %v6724_v0 = vld [vmem:[%s11782_s2 + $0x1f8] sm:$0xff] }
0x11d2   : > { %v7886_v30 = vpop.f32.mrf.mxu1 }
0x11d3   : > { %4896 = vmax.xlane.f32.xlu1 %v11033_v45  ;;  %v11043_v8 = vadd.f32 %v7886_v30, %v6712_v47  ;;  %v6723_v30 = vld [vmem:[%s11782_s2 + $0x1f0] sm:$0xff] }
0x11d4   : > { %v4827_v18 = vpop.f32.mrf.mxu1 }
0x11d5   : > { %v11045_v52 = vadd.f32 %v6711_v59, %v4827_v18 }
0x11d6   : > { %v7889_v16 = vpop.f32.mrf.mxu1 }
0x11d7   : > { %4902 = vmax.xlane.f32.xlu1 %v11043_v8  ;;  %4900 = vmax.xlane.f32.xlu0 %v11045_v52  ;;  %v11055_v54 = vadd.f32 %v7889_v16, %v6714_v32 }
0x11d8   : > { %v4837_v1 = vpop.f32.mrf.mxu1 }
0x11d9   : > { %v11057_v24 = vadd.f32 %v6713_v51, %v4837_v1 }
0x11da   : > { %v7892_v56 = vpop.f32.mrf.mxu1 }
0x11db   : > { %4906 = vmax.xlane.f32.xlu1 %v11055_v54  ;;  %4904 = vmax.xlane.f32.xlu0 %v11057_v24  ;;  %v11067_v46 = vadd.f32 %v7892_v56, %v6716_v9 }
0x11dc   : > { %v4847_v17 = vpop.f32.mrf.mxu1 }
0x11dd   : > { %v11069_v5 = vadd.f32 %v6715_v53, %v4847_v17 }
0x11de   : > { %v7895_v27 = vpop.f32.mrf.mxu1 }
0x11df   : > { %4910 = vmax.xlane.f32.xlu1 %v11067_v46  ;;  %4908 = vmax.xlane.f32.xlu0 %v11069_v5  ;;  %v11079_v57 = vadd.f32 %v7895_v27, %v6718_v44 }
0x11e0   : > { %v4857_v20 = vpop.f32.mrf.mxu1 }
0x11e1   : > { %v11081_v23 = vadd.f32 %v6717_v61, %v4857_v20 }
0x11e2   : > { %v7898_v40 = vpop.f32.mrf.mxu1 }
0x11e3   : > { %4914 = vmax.xlane.f32.xlu1 %v11079_v57  ;;  %4912 = vmax.xlane.f32.xlu0 %v11081_v23  ;;  %v11091_v58 = vadd.f32 %v7898_v40, %v6720_v50 }
0x11e4   : > { %v4867_v10 = vpop.f32.mrf.mxu1 }
0x11e5   : > { %v11093_v60 = vadd.f32 %v6719_v62, %v4867_v10 }
0x11e6   : > { %v7901_v14 = vpop.f32.mrf.mxu1 }
0x11e7   : > { %4918 = vmax.xlane.f32.xlu1 %v11091_v58  ;;  %4916 = vmax.xlane.f32.xlu0 %v11093_v60  ;;  %v11103_v49 = vadd.f32 %v7901_v14, %v6722_v35 }
0x11e8   : > { %v4877_v26 = vpop.f32.mrf.mxu1 }
0x11e9   : > { %v11105_v6 = vadd.f32 %v6721_v33, %v4877_v26 }
0x11ea   : > { %v7904_v47 = vpop.f32.mrf.mxu1 }
0x11eb   : > { %4922 = vmax.xlane.f32.xlu1 %v11103_v49  ;;  %4920 = vmax.xlane.f32.xlu0 %v11105_v6  ;;  %v11115_v18 = vadd.f32 %v7904_v47, %v6724_v0 }
0x11ec   : > { %v4887_v59 = vpop.f32.mrf.mxu1 }
0x11ed   : > { %v11117_v32 = vadd.f32 %v6723_v30, %v4887_v59 }
0x11ef   : > { %4926 = vmax.xlane.f32.xlu1 %v11115_v18  ;;  %4924 = vmax.xlane.f32.xlu0 %v11117_v32 }
0x1200   : > { %5048 = vrot.lane.b32.xlu1 %v10485_v4, %s8571_s19 }
0x1204   : > { %5044 = vrot.lane.b32.xlu1 %v10481_v37, %s8571_s19 }
0x1205   : > { %5050 = vrot.lane.b32.xlu0 %v10483_v38, %s8571_s19 }
0x1208   : > { %5040 = vrot.lane.b32.xlu1 %v10475_v41, %s8571_s19 }
0x1209   : > { %5046 = vrot.lane.b32.xlu0 %v10479_v42, %s8571_s19 }
0x120d   : > { %5042 = vrot.lane.b32.xlu0 %v10473_v15, %s8571_s19 }
0x125a   : > { %v4899_v16 = vpop.xlane.xlu0 %4898 }
0x125b   : > { %v4929_v51 = vsub.f32 %v11031_v12, %v4899_v16 }
0x125c   : > { %v4897_v1 = vpop.xlane.xlu1 %4896 }
0x125d   : > { %v4946_v4 = vmul.f32 1.442695, %v4929_v51  ;;  %v4928_v9 = vsub.f32 %v11033_v45, %v4897_v1 }
0x125f   : > { %8415 = vpow2.f32 %v4946_v4  ;;  %v4944_v37 = vmul.f32 1.442695, %v4928_v9 }
0x1260   : > { %v4901_v56 = vpop.xlane.xlu0 %4900  ;;  %v4903_v38 = vpop.xlane.xlu1 %4902 }
0x1261   : > { %8417 = vpow2.f32 %v4944_v37  ;;  %v4930_v41 = vsub.f32 %v11045_v52, %v4901_v56  ;;  %v4931_v53 = vsub.f32 %v11043_v8, %v4903_v38 }
0x1263   : > { %v4948_v42 = vmul.f32 1.442695, %v4930_v41  ;;  %v4950_v17 = vmul.f32 1.442695, %v4931_v53 }
0x1264   : > { %v4905_v44 = vpop.xlane.xlu0 %4904  ;;  %v4907_v15 = vpop.xlane.xlu1 %4906 }
0x1265   : > { %8419 = vpow2.f32 %v4948_v42  ;;  %v4932_v12 = vsub.f32 %v11057_v24, %v4905_v44  ;;  %v4933_v27 = vsub.f32 %v11055_v54, %v4907_v15 }
0x1266   : > { %8421 = vpow2.f32 %v4950_v17 }
0x1267   : > { %v4952_v45 = vmul.f32 1.442695, %v4932_v12  ;;  %v4954_v61 = vmul.f32 1.442695, %v4933_v27 }
0x1268   : > { %v4909_v20 = vpop.xlane.xlu0 %4908  ;;  %v4911_v50 = vpop.xlane.xlu1 %4910 }
0x1269   : > { %8423 = vpow2.f32 %v4952_v45  ;;  %v4934_v40 = vsub.f32 %v11069_v5, %v4909_v20  ;;  %v4935_v52 = vsub.f32 %v11067_v46, %v4911_v50 }
0x126a   : > { %8425 = vpow2.f32 %v4954_v61 }
0x126b   : > { %v4956_v8 = vmul.f32 1.442695, %v4934_v40  ;;  %v4958_v62 = vmul.f32 1.442695, %v4935_v52 }
0x126c   : > { %v11141_v10 = vpop.eup %8415  ;;  %v4913_v35 = vpop.xlane.xlu0 %4912 }
0x126d   : > { %v4915_v14 = vpop.xlane.xlu1 %4914  ;;  %8427 = vpow2.f32 %v4956_v8  ;;  %v4936_v54 = vsub.f32 %v11081_v23, %v4913_v35  ;;  %4978 = vadd.xlane.f32.xlu0 %v11141_v10 }
0x126e   : > { %v4937_v24 = vsub.f32 %v11079_v57, %v4915_v14  ;;  %v11146_v33 = vpop.eup %8417  ;;  %8429 = vpow2.f32 %v4958_v62 }
0x126f   : > { %v4960_v5 = vmul.f32 1.442695, %v4936_v54  ;;  %4976 = vadd.xlane.f32.xlu1 %v11146_v33 }
0x1270   : > { %v4962_v26 = vmul.f32 1.442695, %v4937_v24  ;;  %v4917_v46 = vpop.xlane.xlu0 %4916 }
0x1271   : > { %v4919_v0 = vpop.xlane.xlu1 %4918  ;;  %8431 = vpow2.f32 %v4960_v5  ;;  %v4938_v47 = vsub.f32 %v11093_v60, %v4917_v46 }
0x1272   : > { %v4939_v30 = vsub.f32 %v11091_v58, %v4919_v0  ;;  %v11151_v59 = vpop.eup %8419  ;;  %8433 = vpow2.f32 %v4962_v26 }
0x1273   : > { %v11153_v57 = vpop.eup %8421  ;;  %v4964_v23 = vmul.f32 1.442695, %v4938_v47  ;;  %4980 = vadd.xlane.f32.xlu1 %v11151_v59 }
0x1274   : > { %v4966_v16 = vmul.f32 1.442695, %v4939_v30  ;;  %4982 = vadd.xlane.f32.xlu0 %v11153_v57  ;;  %v4921_v51 = vpop.xlane.xlu0 %4920 }
0x1275   : > { %v4923_v1 = vpop.xlane.xlu1 %4922  ;;  %8435 = vpow2.f32 %v4964_v23  ;;  %v4940_v4 = vsub.f32 %v11105_v6, %v4921_v51 }
0x1276   : > { %v4941_v60 = vsub.f32 %v11103_v49, %v4923_v1  ;;  %v11159_v9 = vpop.eup %8423  ;;  %8437 = vpow2.f32 %v4966_v16 }
0x1277   : > { %v11161_v58 = vpop.eup %8425  ;;  %v4968_v37 = vmul.f32 1.442695, %v4940_v4  ;;  %4984 = vadd.xlane.f32.xlu1 %v11159_v9 }
0x1278   : > { %v4970_v56 = vmul.f32 1.442695, %v4941_v60  ;;  %4986 = vadd.xlane.f32.xlu0 %v11161_v58  ;;  %v4925_v38 = vpop.xlane.xlu0 %4924 }
0x1279   : > { %v4927_v41 = vpop.xlane.xlu1 %4926  ;;  %8439 = vpow2.f32 %v4968_v37  ;;  %v4942_v53 = vsub.f32 %v11117_v32, %v4925_v38 }
0x127a   : > { %v4943_v6 = vsub.f32 %v11115_v18, %v4927_v41  ;;  %v11167_v42 = vpop.eup %8427  ;;  %8441 = vpow2.f32 %v4970_v56 }
0x127b   : > { %v11169_v49 = vpop.eup %8429  ;;  %v4972_v17 = vmul.f32 1.442695, %v4942_v53  ;;  %4988 = vadd.xlane.f32.xlu1 %v11167_v42 }
0x127c   : > { %v4974_v44 = vmul.f32 1.442695, %v4943_v6  ;;  %4990 = vadd.xlane.f32.xlu0 %v11169_v49  ;;  %v5051_v15 = vpop.permute.xlu0 %5050 }
0x127d   : > { %v5049_v12 = vpop.permute.xlu1 %5048  ;;  %8443 = vpow2.f32 %v4972_v17  ;;  %7925 = vmatprep.subr.mxu0 %v5051_v15 }
0x127e   : > { %v11173_v27 = vpop.eup %8431  ;;  %8445 = vpow2.f32 %v4974_v44  ;;  %7926 = vmatpush3.msra.mxu0 %v5051_v15 }
0x127f   : > { %v11175_v18 = vpop.eup %8433  ;;  %4992 = vadd.xlane.f32.xlu1 %v11173_v27  ;;  %7927 = vmatprep.subr.mxu0 %v5049_v12 }
0x1280   : > { %4994 = vadd.xlane.f32.xlu0 %v11175_v18  ;;  %v5047_v32 = vpop.permute.xlu0 %5046  ;;  %7928 = vmatpush3.msra.mxu0 %v5049_v12 }
0x1281   : > { %v5045_v45 = vpop.permute.xlu1 %5044  ;;  %7929 = vmatprep.subr.mxu0 %v5047_v32 }
0x1282   : > { %v11179_v61 = vpop.eup %8435  ;;  %7930 = vmatpush3.msra.mxu0 %v5047_v32 }
0x1283   : > { %v11181_v20 = vpop.eup %8437  ;;  %4996 = vadd.xlane.f32.xlu1 %v11179_v61  ;;  %7931 = vmatprep.subr.mxu0 %v5045_v45 }
0x1284   : > { %4998 = vadd.xlane.f32.xlu0 %v11181_v20  ;;  %v5043_v50 = vpop.permute.xlu0 %5042  ;;  %7932 = vmatpush3.msra.mxu0 %v5045_v45 }
0x1285   : > { %7933 = vmatprep.subr.mxu0 %v5043_v50  ;;  %v5041_v52 = vpop.permute.xlu1 %5040 }
0x1286   : > { %v11185_v40 = vpop.eup %8439  ;;  %7934 = vmatpush3.msra.mxu0 %v5043_v50 }
0x1287   : > { %v11187_v8 = vpop.eup %8441  ;;  %5000 = vadd.xlane.f32.xlu1 %v11185_v40  ;;  %7935 = vmatprep.subr.mxu0 %v5041_v52 }
0x1288   : > { %5002 = vadd.xlane.f32.xlu0 %v11187_v8  ;;  %7936 = vmatpush3.msra.mxu0 %v5041_v52 }
0x128a   : > { %v11191_v62 = vpop.eup %8443 }
0x128b   : > { %v11193_v35 = vpop.eup %8445  ;;  %5004 = vadd.xlane.f32.xlu1 %v11191_v62 }
0x128c   : > { %5006 = vadd.xlane.f32.xlu0 %v11193_v35 }
0x12f6   : > { %v4979_v14 = vpop.xlane.xlu0 %4978 }
0x12f7   : > { %8447 = vrcp.f32 %v4979_v14 }
0x12f8   : > { %v4977_v54 = vpop.xlane.xlu1 %4976 }
0x12f9   : > { %8449 = vrcp.f32 %v4977_v54 }
0x12fc   : > { %v4981_v24 = vpop.xlane.xlu1 %4980 }
0x12fd   : > { %v4983_v5 = vpop.xlane.xlu0 %4982  ;;  %8451 = vrcp.f32 %v4981_v24 }
0x12fe   : > { %8453 = vrcp.f32 %v4983_v5 }
0x1300   : > { %v4985_v26 = vpop.xlane.xlu1 %4984 }
0x1301   : > { %v4987_v46 = vpop.xlane.xlu0 %4986  ;;  %8455 = vrcp.f32 %v4985_v26 }
0x1302   : > { %8457 = vrcp.f32 %v4987_v46 }
0x1304   : > { %v4989_v0 = vpop.xlane.xlu1 %4988  ;;  %v8448_v47 = vpop.eup %8447 }
0x1305   : > { %v4991_v30 = vpop.xlane.xlu0 %4990  ;;  %8459 = vrcp.f32 %v4989_v0  ;;  %v5025_v1 = vmul.f32 %v8448_v47, %v11141_v10 }
0x1306   : > { %v8450_v23 = vpop.eup %8449  ;;  %8461 = vrcp.f32 %v4991_v30 }
0x1307   : > { %v5024_v16 = vmul.f32 %v8450_v23, %v11146_v33 }
0x1308   : > { %v4993_v51 = vpop.xlane.xlu1 %4992 }
0x1309   : > { %v4995_v4 = vpop.xlane.xlu0 %4994  ;;  %8463 = vrcp.f32 %v4993_v51  ;;  %7937 = vmatprep.mubr.f32.mxu0 %v5024_v16 }
0x130a   : > { %v8452_v60 = vpop.eup %8451  ;;  %8465 = vrcp.f32 %v4995_v4  ;;  %7938 = vmatmul.mubr.f32.vlgmr.msra.gmra.mxu0 %v5025_v1 }
0x130b   : > { %v8454_v37 = vpop.eup %8453  ;;  %v5026_v56 = vmul.f32 %v8452_v60, %v11151_v59 }
0x130c   : > { %v4997_v38 = vpop.xlane.xlu1 %4996  ;;  %v5027_v41 = vmul.f32 %v8454_v37, %v11153_v57 }
0x130d   : > { %v4999_v53 = vpop.xlane.xlu0 %4998  ;;  %8467 = vrcp.f32 %v4997_v38  ;;  %7940 = vmatprep.mubr.f32.mxu0 %v5026_v56 }
0x130e   : > { %v8456_v6 = vpop.eup %8455  ;;  %8469 = vrcp.f32 %v4999_v53  ;;  %7941 = vmatmul.mubr.f32.gmra.mxu0 %v5027_v41 }
0x130f   : > { %v8458_v33 = vpop.eup %8457  ;;  %v5028_v10 = vmul.f32 %v8456_v6, %v11159_v9 }
0x1310   : > { %v5001_v17 = vpop.xlane.xlu1 %5000  ;;  %v5029_v44 = vmul.f32 %v8458_v33, %v11161_v58 }
0x1311   : > { %v5003_v15 = vpop.xlane.xlu0 %5002  ;;  %8471 = vrcp.f32 %v5001_v17  ;;  %7943 = vmatprep.mubr.f32.mxu0 %v5028_v10 }
0x1312   : > { %v8460_v12 = vpop.eup %8459  ;;  %8473 = vrcp.f32 %v5003_v15  ;;  %7944 = vmatmul.mubr.f32.gmra.mxu0 %v5029_v44 }
0x1313   : > { %v8462_v59 = vpop.eup %8461  ;;  %v5030_v57 = vmul.f32 %v8460_v12, %v11167_v42 }
0x1314   : > { %v5005_v32 = vpop.xlane.xlu1 %5004  ;;  %v5031_v45 = vmul.f32 %v8462_v59, %v11169_v49 }
0x1315   : > { %v5007_v50 = vpop.xlane.xlu0 %5006  ;;  %8475 = vrcp.f32 %v5005_v32  ;;  %7946 = vmatprep.mubr.f32.mxu0 %v5030_v57 }
0x1316   : > { %v8464_v52 = vpop.eup %8463  ;;  %8477 = vrcp.f32 %v5007_v50  ;;  %7947 = vmatmul.mubr.f32.gmra.mxu0 %v5031_v45 }
0x1317   : > { %v8466_v9 = vpop.eup %8465  ;;  %v5032_v58 = vmul.f32 %v8464_v52, %v11173_v27 }
0x1318   : > { %v5033_v14 = vmul.f32 %v8466_v9, %v11175_v18 }
0x1319   : > { %7949 = vmatprep.mubr.f32.mxu0 %v5032_v58 }
0x131a   : > { %v8468_v54 = vpop.eup %8467  ;;  %7950 = vmatmul.mubr.f32.gmra.mxu0 %v5033_v14 }
0x131b   : > { %v8470_v24 = vpop.eup %8469  ;;  %v5034_v42 = vmul.f32 %v8468_v54, %v11179_v61  ;;  %v6760_v61 = vld [vmem:[%s11784_s4 + $0x38] sm:$0xff] }
0x131c   : > { %v5035_v5 = vmul.f32 %v8470_v24, %v11181_v20  ;;  %v6759_v20 = vld [vmem:[%s11784_s4 + $0x30] sm:$0xff]  ;;  %7961 = vmatprep.subr.mxu0 %v6760_v61 }
0x131d   : > { %7952 = vmatprep.mubr.f32.mxu0 %v5034_v42  ;;  %7962 = vmatpush3.msra.mxu0 %v6760_v61 }
0x131e   : > { %v8472_v49 = vpop.eup %8471  ;;  %7953 = vmatmul.mubr.f32.gmra.mxu0 %v5035_v5  ;;  %7963 = vmatprep.subr.mxu0 %v6759_v20 }
0x131f   : > { %v8474_v26 = vpop.eup %8473  ;;  %v5036_v46 = vmul.f32 %v8472_v49, %v11185_v40  ;;  %v6758_v40 = vld [vmem:[%s11784_s4 + $0x28] sm:$0xff]  ;;  %7964 = vmatpush3.msra.mxu0 %v6759_v20 }
0x1320   : > { %v5037_v0 = vmul.f32 %v8474_v26, %v11187_v8  ;;  %v6757_v8 = vld [vmem:[%s11784_s4 + $0x20] sm:$0xff]  ;;  %7965 = vmatprep.subr.mxu0 %v6758_v40 }
0x1321   : > { %7955 = vmatprep.mubr.f32.mxu0 %v5036_v46  ;;  %7966 = vmatpush3.msra.mxu0 %v6758_v40  ;;  %v11824_v40 = vld [vmem:[#allocation2_spill] sm:$0xff] }
0x1322   : > { %v8476_v27 = vpop.eup %8475  ;;  %7956 = vmatmul.mubr.f32.gmra.mxu0 %v5037_v0  ;;  %7967 = vmatprep.subr.mxu0 %v6757_v8 }
0x1323   : > { %v8478_v18 = vpop.eup %8477  ;;  %v5038_v47 = vmul.f32 %v8476_v27, %v11191_v62  ;;  %7968 = vmatpush3.msra.mxu0 %v6757_v8 }
0x1324   : > { %v5039_v30 = vmul.f32 %v8478_v18, %v11193_v35 }
0x1325   : > { %7958 = vmatprep.mubr.f32.mxu0 %v5038_v47 }
0x1326   : > { %7959 = vmatmul.mubr.f32.gmra.mxu0 %v5039_v30 }
0x13ca   : > { %v7939_v62 = vpop.f32.mrf.mxu0 }
0x13cb   : > { %5251 = vrot.lane.b32.xlu1 %v7939_v62, %s11823_s21 }
0x13cc   : > { %v5154_v35 = vpop.f32.mrf.mxu0 }
0x13cd   : > { %5249 = vrot.lane.b32.xlu0 %v5154_v35, %s11823_s21 }
0x13ce   : > { %v7942_v23 = vpop.f32.mrf.mxu0 }
0x13d0   : > { %v5164_v16 = vpop.f32.mrf.mxu0 }
0x13d1   : > { %5255 = vrot.lane.b32.xlu0 %v7942_v23, %s11823_s21  ;;  %5253 = vrot.lane.b32.xlu1 %v5164_v16, %s11823_s21 }
0x13d2   : > { %v7945_v51 = vpop.f32.mrf.mxu0 }
0x13d4   : > { %v5174_v1 = vpop.f32.mrf.mxu0 }
0x13d5   : > { %5259 = vrot.lane.b32.xlu0 %v7945_v51, %s11823_s21  ;;  %5257 = vrot.lane.b32.xlu1 %v5174_v1, %s11823_s21  ;;  %v11825_v1 = vld [vmem:[#allocation4_spill] sm:$0xff] }
0x13d6   : > { %v7948_v4 = vpop.f32.mrf.mxu0 }
0x13d8   : > { %v5184_v60 = vpop.f32.mrf.mxu0 }
0x13d9   : > { %5263 = vrot.lane.b32.xlu0 %v7948_v4, %s11823_s21  ;;  %5261 = vrot.lane.b32.xlu1 %v5184_v60, %s11823_s21 }
0x13da   : > { %v7951_v37 = vpop.f32.mrf.mxu0 }
0x13dc   : > { %v5194_v56 = vpop.f32.mrf.mxu0 }
0x13dd   : > { %5267 = vrot.lane.b32.xlu0 %v7951_v37, %s11823_s21  ;;  %5265 = vrot.lane.b32.xlu1 %v5194_v56, %s11823_s21  ;;  %v11826_v56 = vld [vmem:[#allocation3_spill] sm:$0xff] }
0x13de   : > { %v7954_v38 = vpop.f32.mrf.mxu0 }
0x13e0   : > { %v5204_v41 = vpop.f32.mrf.mxu0 }
0x13e1   : > { %5271 = vrot.lane.b32.xlu0 %v7954_v38, %s11823_s21  ;;  %5269 = vrot.lane.b32.xlu1 %v5204_v41, %s11823_s21 }
0x13e2   : > { %v7957_v53 = vpop.f32.mrf.mxu0 }
0x13e4   : > { %v5214_v6 = vpop.f32.mrf.mxu0 }
0x13e5   : > { %5275 = vrot.lane.b32.xlu0 %v7957_v53, %s11823_s21  ;;  %5273 = vrot.lane.b32.xlu1 %v5214_v6, %s11823_s21 }
0x13e6   : > { %v7960_v33 = vpop.f32.mrf.mxu0 }
0x13e8   : > { %v5224_v10 = vpop.f32.mrf.mxu0 }
0x13e9   : > { %5279 = vrot.lane.b32.xlu0 %v7960_v33, %s11823_s21  ;;  %5277 = vrot.lane.b32.xlu1 %v5224_v10, %s11823_s21 }
0x143d   : > { %v5252_v17 = vpop.permute.xlu1 %5251 }
0x143e   : > { %v5298_v12 = vsel %vm1006_vm1, %v10993_v55, %v5252_v17 }
0x143f   : > { %v5250_v44 = vpop.permute.xlu0 %5249 }
0x1440   : > { %v5297_v15 = vsel %vm1006_vm1, %v10995_v7, %v5250_v44  ;;  %v11827_v44 = vld [vmem:[#allocation6_spill] sm:$0xff] }
0x1441   : > { %7969 = vmatprep.mubr.msk.f32.mxu0 %vm459_vm0, %v5297_v15 }
0x1442   : > { %7970 = vmatmul.mubr.msk.f32.vlgmr.msra.gmra.mxu0 %vm459_vm0, %v5298_v12 }
0x1443   : > { %v5256_v59 = vpop.permute.xlu0 %5255  ;;  %v5254_v57 = vpop.permute.xlu1 %5253 }
0x1444   : > { %v5300_v32 = vsel %vm1006_vm1, %v10997_v28, %v5256_v59  ;;  %v5299_v45 = vsel %vm1006_vm1, %v10999_v13, %v5254_v57  ;;  %v11828_v57 = vld [vmem:[#allocation5_spill] sm:$0xff] }
0x1445   : > { %7972 = vmatprep.mubr.msk.f32.mxu0 %vm459_vm0, %v5299_v45 }
0x1446   : > { %7973 = vmatmul.mubr.msk.f32.gmra.mxu0 %vm459_vm0, %v5300_v32 }
0x1447   : > { %v5260_v7 = vpop.permute.xlu0 %5259  ;;  %v5258_v50 = vpop.permute.xlu1 %5257 }
0x1448   : > { %v5302_v55 = vsel %vm1006_vm1, %v11001_v43, %v5260_v7  ;;  %v5301_v52 = vsel %vm1006_vm1, %v11003_v3, %v5258_v50 }
0x1449   : > { %7975 = vmatprep.mubr.msk.f32.mxu0 %vm459_vm0, %v5301_v52 }
0x144a   : > { %7976 = vmatmul.mubr.msk.f32.gmra.mxu0 %vm459_vm0, %v5302_v55 }
0x144b   : > { %v5264_v28 = vpop.permute.xlu0 %5263  ;;  %v5262_v9 = vpop.permute.xlu1 %5261 }
0x144c   : > { %v5304_v13 = vsel %vm1006_vm1, %v11005_v22, %v5264_v28  ;;  %v5303_v58 = vsel %vm1006_vm1, %v11007_v31, %v5262_v9  ;;  %v11829_v9 = vld [vmem:[#allocation8_spill] sm:$0xff] }
0x144d   : > { %7978 = vmatprep.mubr.msk.f32.mxu0 %vm459_vm0, %v5303_v58 }
0x144e   : > { %7979 = vmatmul.mubr.msk.f32.gmra.mxu0 %vm459_vm0, %v5304_v13 }
0x144f   : > { %v5268_v43 = vpop.permute.xlu0 %5267  ;;  %v5266_v14 = vpop.permute.xlu1 %5265 }
0x1450   : > { %v5306_v3 = vsel %vm1006_vm1, %v11009_v19, %v5268_v43  ;;  %v5305_v54 = vsel %vm1006_vm1, %v11011_v39, %v5266_v14  ;;  %v11830_v14 = vld [vmem:[#allocation7_spill] sm:$0xff] }
0x1451   : > { %7981 = vmatprep.mubr.msk.f32.mxu0 %vm459_vm0, %v5305_v54 }
0x1452   : > { %7982 = vmatmul.mubr.msk.f32.gmra.mxu0 %vm459_vm0, %v5306_v3 }
0x1453   : > { %v5272_v22 = vpop.permute.xlu0 %5271  ;;  %v5270_v24 = vpop.permute.xlu1 %5269 }
0x1454   : > { %v5308_v31 = vsel %vm1006_vm1, %v11013_v34, %v5272_v22  ;;  %v5307_v42 = vsel %vm1006_vm1, %v11015_v11, %v5270_v24 }
0x1455   : > { %7984 = vmatprep.mubr.msk.f32.mxu0 %vm459_vm0, %v5307_v42 }
0x1456   : > { %7985 = vmatmul.mubr.msk.f32.gmra.mxu0 %vm459_vm0, %v5308_v31 }
0x1457   : > { %v5276_v19 = vpop.permute.xlu0 %5275  ;;  %v5274_v5 = vpop.permute.xlu1 %5273 }
0x1458   : > { %v5310_v39 = vsel %vm1006_vm1, %v11017_v63, %v5276_v19  ;;  %v5309_v49 = vsel %vm1006_vm1, %v11019_v2, %v5274_v5  ;;  %v6784_v5 = vld [vmem:[%s11787_s7 + $0x38] sm:$0xff] }
0x1459   : > { %7987 = vmatprep.mubr.msk.f32.mxu0 %vm459_vm0, %v5309_v49  ;;  %7993 = vmatprep.subr.mxu1 %v6784_v5 }
0x145a   : > { %7988 = vmatmul.mubr.msk.f32.gmra.mxu0 %vm459_vm0, %v5310_v39  ;;  %v11831_v39 = vld [vmem:[#allocation10_spill] sm:$0xff]  ;;  %7994 = vmatpush3.msra.mxu1 %v6784_v5 }
0x145b   : > { %v5280_v34 = vpop.permute.xlu0 %5279  ;;  %v5278_v26 = vpop.permute.xlu1 %5277 }
0x145c   : > { %v5312_v11 = vsel %vm1006_vm1, %v11021_v29, %v5280_v34  ;;  %v5311_v46 = vsel %vm1006_vm1, %v11023_v21, %v5278_v26 }
0x145d   : > { %7990 = vmatprep.mubr.msk.f32.mxu0 %vm459_vm0, %v5311_v46  ;;  %v11832_v46 = vld [vmem:[#allocation9_spill] sm:$0xff] }
0x145e   : > { %7991 = vmatmul.mubr.msk.f32.gmra.mxu0 %vm459_vm0, %v5312_v11  ;;  %v6783_v11 = vld [vmem:[%s11787_s7 + $0x30] sm:$0xff] }
0x145f   : > { %7995 = vmatprep.subr.mxu1 %v6783_v11 }
0x1460   : > { %7996 = vmatpush3.msra.mxu1 %v6783_v11 }
0x1502   : > { %v7971_v63 = vpop.f32.mrf.mxu0 }
0x1503   : > { %v11290_v0 = vadd.f32 %v7971_v63, %v10215_v48 }
0x1504   : > { %v5432_v2 = vpop.f32.mrf.mxu0 }
0x1505   : > { %v11293_v27 = vadd.f32 %v5432_v2, %v10221_v25  ;;  %v5534_v18 = vsel %vm459_vm0, %v11290_v0, 0.0  ;;  %v5596_v30 = vmul.f32 %v11290_v0, %v11290_v0 }
0x1506   : > { %5535 = vadd.xlane.f32.xlu0 %v5534_v18  ;;  %v7974_v29 = vpop.f32.mrf.mxu0  ;;  %v6782_v18 = vld [vmem:[%s11787_s7 + $0x28] sm:$0xff] }
0x1507   : > { %v5531_v21 = vsel %vm459_vm0, %v11293_v27, 0.0  ;;  %v5595_v47 = vmul.f32 %v11293_v27, %v11293_v27  ;;  %v11308_v8 = vadd.f32 %v7974_v29, %v11824_v40  ;;  %v5614_v62 = vsel %vm459_vm0, %v5596_v30, 0.0  ;;  %7997 = vmatprep.subr.mxu1 %v6782_v18  ;;  %v6781_v30 = vld [vmem:[%s11787_s7 + $0x20] sm:$0xff] }
0x1508   : > { %5532 = vadd.xlane.f32.xlu1 %v5531_v21  ;;  %v5442_v48 = vpop.f32.mrf.mxu0  ;;  %7998 = vmatpush3.msra.mxu1 %v6782_v18 }
0x1509   : > { %v11304_v61 = vadd.f32 %v5442_v48, %v10233_v36  ;;  %v5611_v25 = vsel %vm459_vm0, %v5595_v47, 0.0  ;;  %v5540_v36 = vsel %vm459_vm0, %v11308_v8, 0.0  ;;  %v5598_v51 = vmul.f32 %v11308_v8, %v11308_v8  ;;  %7999 = vmatprep.subr.mxu1 %v6781_v30 }
0x150a   : > { %5612 = vadd.xlane.f32.xlu0 %v5611_v25  ;;  %v7977_v20 = vpop.f32.mrf.mxu0  ;;  %8000 = vmatpush3.msra.mxu1 %v6781_v30 }
0x150b   : > { %v5537_v35 = vsel %vm459_vm0, %v11304_v61, 0.0  ;;  %v5597_v23 = vmul.f32 %v11304_v61, %v11304_v61  ;;  %v11324_v38 = vadd.f32 %v7977_v20, %v11826_v56  ;;  %v5620_v41 = vsel %vm459_vm0, %v5598_v51, 0.0  ;;  %v11833_v20 = vld [vmem:[#allocation12_spill] sm:$0xff] }
0x150c   : > { %5615 = vadd.xlane.f32.xlu1 %v5614_v62  ;;  %v5452_v16 = vpop.f32.mrf.mxu0 }
0x150d   : > { %v11320_v4 = vadd.f32 %v5452_v16, %v11825_v1  ;;  %v5617_v60 = vsel %vm459_vm0, %v5597_v23, 0.0  ;;  %v5546_v10 = vsel %vm459_vm0, %v11324_v38, 0.0  ;;  %v5600_v17 = vmul.f32 %v11324_v38, %v11324_v38  ;;  %v11834_v23 = vld [vmem:[#allocation11_spill] sm:$0xff] }
0x150e   : > { %5538 = vadd.xlane.f32.xlu0 %v5537_v35  ;;  %v7980_v37 = vpop.f32.mrf.mxu0 }
0x150f   : > { %v5543_v53 = vsel %vm459_vm0, %v11320_v4, 0.0  ;;  %v5599_v6 = vmul.f32 %v11320_v4, %v11320_v4  ;;  %v11340_v32 = vadd.f32 %v7980_v37, %v11828_v57  ;;  %v5626_v45 = vsel %vm459_vm0, %v5600_v17, 0.0 }
0x1510   : > { %5541 = vadd.xlane.f32.xlu1 %v5540_v36  ;;  %v5462_v33 = vpop.f32.mrf.mxu0 }
0x1511   : > { %v11336_v15 = vadd.f32 %v5462_v33, %v11827_v44  ;;  %v5623_v12 = vsel %vm459_vm0, %v5599_v6, 0.0  ;;  %v5552_v52 = vsel %vm459_vm0, %v11340_v32, 0.0  ;;  %v5602_v28 = vmul.f32 %v11340_v32, %v11340_v32  ;;  %v11836_v33 = vld [vmem:[#allocation13_spill] sm:$0xff] }
0x1512   : > { %5618 = vadd.xlane.f32.xlu0 %v5617_v60  ;;  %v7983_v59 = vpop.f32.mrf.mxu0 }
0x1513   : > { %v5549_v7 = vsel %vm459_vm0, %v11336_v15, 0.0  ;;  %v5601_v50 = vmul.f32 %v11336_v15, %v11336_v15  ;;  %v11356_v3 = vadd.f32 %v7983_v59, %v11830_v14  ;;  %v5632_v54 = vsel %vm459_vm0, %v5602_v28, 0.0 }
0x1514   : > { %5621 = vadd.xlane.f32.xlu1 %v5620_v41  ;;  %v5472_v55 = vpop.f32.mrf.mxu0  ;;  %v11835_v41 = vld [vmem:[#allocation14_spill] sm:$0xff] }
0x1515   : > { %v11352_v13 = vadd.f32 %v5472_v55, %v11829_v9  ;;  %v5629_v58 = vsel %vm459_vm0, %v5601_v50, 0.0  ;;  %v5558_v42 = vsel %vm459_vm0, %v11356_v3, 0.0  ;;  %v5604_v19 = vmul.f32 %v11356_v3, %v11356_v3 }
0x1516   : > { %5544 = vadd.xlane.f32.xlu0 %v5543_v53  ;;  %v7986_v43 = vpop.f32.mrf.mxu0 }
0x1517   : > { %v5555_v22 = vsel %vm459_vm0, %v11352_v13, 0.0  ;;  %v5603_v24 = vmul.f32 %v11352_v13, %v11352_v13  ;;  %v11378_v63 = vadd.f32 %v7986_v43, %v11832_v46  ;;  %v5638_v2 = vsel %vm459_vm0, %v5604_v19, 0.0 }
0x1518   : > { %5547 = vadd.xlane.f32.xlu1 %v5546_v10  ;;  %v5482_v31 = vpop.f32.mrf.mxu0 }
0x1519   : > { %v11371_v49 = vadd.f32 %v5482_v31, %v11831_v39  ;;  %v5635_v34 = vsel %vm459_vm0, %v5603_v24, 0.0  ;;  %v5564_v48 = vsel %vm459_vm0, %v11378_v63, 0.0  ;;  %v5606_v25 = vmul.f32 %v11378_v63, %v11378_v63 }
0x151a   : > { %5624 = vadd.xlane.f32.xlu0 %v5623_v12  ;;  %v7989_v26 = vpop.f32.mrf.mxu0 }
0x151b   : > { %v5561_v29 = vsel %vm459_vm0, %v11371_v49, 0.0  ;;  %v5605_v21 = vmul.f32 %v11371_v49, %v11371_v49  ;;  %v11400_v16 = vadd.f32 %v7989_v26, %v11834_v23  ;;  %v5644_v36 = vsel %vm459_vm0, %v5606_v25, 0.0 }
0x151c   : > { %5627 = vadd.xlane.f32.xlu1 %v5626_v45  ;;  %v5492_v47 = vpop.f32.mrf.mxu0 }
0x151d   : > { %v11396_v40 = vadd.f32 %v5492_v47, %v11833_v20  ;;  %v5641_v62 = vsel %vm459_vm0, %v5605_v21, 0.0  ;;  %v5570_v37 = vsel %vm459_vm0, %v11400_v16, 0.0  ;;  %v5608_v56 = vmul.f32 %v11400_v16, %v11400_v16 }
0x151e   : > { %5550 = vadd.xlane.f32.xlu0 %v5549_v7  ;;  %v7992_v35 = vpop.f32.mrf.mxu0 }
0x151f   : > { %v5567_v51 = vsel %vm459_vm0, %v11396_v40, 0.0  ;;  %v5607_v1 = vmul.f32 %v11396_v40, %v11396_v40  ;;  %v11416_v10 = vadd.f32 %v7992_v35, %v11836_v33  ;;  %v5650_v17 = vsel %vm459_vm0, %v5608_v56, 0.0 }
0x1520   : > { %5553 = vadd.xlane.f32.xlu1 %v5552_v52  ;;  %v5502_v60 = vpop.f32.mrf.mxu0 }
0x1521   : > { %v11412_v53 = vadd.f32 %v5502_v60, %v11835_v41  ;;  %v5647_v6 = vsel %vm459_vm0, %v5607_v1, 0.0  ;;  %v5576_v59 = vsel %vm459_vm0, %v11416_v10, 0.0  ;;  %v5610_v57 = vmul.f32 %v11416_v10, %v11416_v10 }
0x1522   : > { %5630 = vadd.xlane.f32.xlu0 %v5629_v58 }
0x1523   : > { %v5573_v44 = vsel %vm459_vm0, %v11412_v53, 0.0  ;;  %v5609_v12 = vmul.f32 %v11412_v53, %v11412_v53  ;;  %v5656_v7 = vsel %vm459_vm0, %v5610_v57, 0.0 }
0x1524   : > { %5633 = vadd.xlane.f32.xlu1 %v5632_v54 }
0x1525   : > { %v5653_v45 = vsel %vm459_vm0, %v5609_v12, 0.0  ;;  %v11450_v12 = vld [vmem:[%s11791_s11 + $0x1] ss:$0 sm:$0xff] }
0x1526   : > { %5556 = vadd.xlane.f32.xlu0 %v5555_v22 }
0x1528   : > { %5559 = vadd.xlane.f32.xlu1 %v5558_v42 }
0x152a   : > { %5636 = vadd.xlane.f32.xlu0 %v5635_v34 }
0x152c   : > { %5639 = vadd.xlane.f32.xlu1 %v5638_v2 }
0x152e   : > { %5562 = vadd.xlane.f32.xlu0 %v5561_v29 }
0x1530   : > { %5565 = vadd.xlane.f32.xlu1 %v5564_v48 }
0x1532   : > { %5642 = vadd.xlane.f32.xlu0 %v5641_v62 }
0x1534   : > { %5645 = vadd.xlane.f32.xlu1 %v5644_v36 }
0x1536   : > { %5568 = vadd.xlane.f32.xlu0 %v5567_v51 }
0x1538   : > { %5571 = vadd.xlane.f32.xlu1 %v5570_v37 }
0x153a   : > { %5648 = vadd.xlane.f32.xlu0 %v5647_v6 }
0x153c   : > { %5651 = vadd.xlane.f32.xlu1 %v5650_v17 }
0x153e   : > { %5574 = vadd.xlane.f32.xlu0 %v5573_v44 }
0x1540   : > { %5577 = vadd.xlane.f32.xlu1 %v5576_v59 }
0x1542   : > { %5654 = vadd.xlane.f32.xlu0 %v5653_v45 }
0x1544   : > { %5657 = vadd.xlane.f32.xlu1 %v5656_v7 }
0x158f   : > { %v5536_v50 = vpop.xlane.xlu0 %5535 }
0x1590   : > { %v5580_v52 = vmul.f32 0.03125, %v5536_v50 }
0x1591   : > { %v5533_v55 = vpop.xlane.xlu1 %5532 }
0x1592   : > { %v5579_v28 = vmul.f32 0.03125, %v5533_v55  ;;  %v5676_v54 = vmul.f32 %v5580_v52, %v5580_v52  ;;  %v5708_v17 = vsub.f32 %v11290_v0, %v5580_v52 }
0x1593   : > { %v5613_v9 = vpop.xlane.xlu0 %5612 }
0x1594   : > { %v5675_v58 = vmul.f32 %v5579_v28, %v5579_v28  ;;  %v5659_v43 = vmul.f32 0.03125, %v5613_v9  ;;  %v5707_v37 = vsub.f32 %v11293_v27, %v5579_v28  ;;  %v11457_v28 = vld [vmem:[%s11792_s12 + $0x1] ss:$0 sm:$0xff] }
0x1595   : > { %v5616_v14 = vpop.xlane.xlu1 %5615 }
0x1596   : > { %v5691_v22 = vsub.f32 %v5659_v43, %v5675_v58  ;;  %v5660_v24 = vmul.f32 0.03125, %v5616_v14 }
0x1597   : > { %v5539_v31 = vpop.xlane.xlu0 %5538 }
0x1598   : > { %v5723_v42 = vadd.f32 1e-05, %v5691_v22  ;;  %v5692_v19 = vsub.f32 %v5660_v24, %v5676_v54  ;;  %v11429_v5 = vmul.f32 0.03125, %v5539_v31 }
0x1599   : > { %v5542_v39 = vpop.xlane.xlu1 %5541 }
0x159a   : > { %8479 = vrsqrt.f32 %v5723_v42  ;;  %v5724_v34 = vadd.f32 1e-05, %v5692_v19  ;;  %v11431_v26 = vmul.f32 0.03125, %v5542_v39  ;;  %v5677_v46 = vmul.f32 %v11429_v5, %v11429_v5 }
0x159b   : > { %v5619_v11 = vpop.xlane.xlu0 %5618  ;;  %v5709_v31 = vsub.f32 %v11304_v61, %v11429_v5 }
0x159c   : > { %8481 = vrsqrt.f32 %v5724_v34  ;;  %v5661_v2 = vmul.f32 0.03125, %v5619_v11  ;;  %v5678_v29 = vmul.f32 %v11431_v26, %v11431_v26 }
0x159d   : > { %v5622_v18 = vpop.xlane.xlu1 %5621 }
0x159e   : > { %v5693_v21 = vsub.f32 %v5661_v2, %v5677_v46  ;;  %v5662_v47 = vmul.f32 0.03125, %v5622_v18 }
0x159f   : > { %v5545_v30 = vpop.xlane.xlu0 %5544 }
0x15a0   : > { %v5725_v48 = vadd.f32 1e-05, %v5693_v21  ;;  %v5694_v25 = vsub.f32 %v5662_v47, %v5678_v29  ;;  %v11437_v20 = vmul.f32 0.03125, %v5545_v30 }
0x15a1   : > { %v5548_v62 = vpop.xlane.xlu1 %5547 }
0x15a2   : > { %8483 = vrsqrt.f32 %v5725_v48  ;;  %v5726_v35 = vadd.f32 1e-05, %v5694_v25  ;;  %v11439_v23 = vmul.f32 0.03125, %v5548_v62  ;;  %v5679_v51 = vmul.f32 %v11437_v20, %v11437_v20 }
0x15a3   : > { %v5625_v36 = vpop.xlane.xlu0 %5624  ;;  %v5710_v48 = vsub.f32 %v11308_v8, %v11431_v26  ;;  %v5711_v26 = vsub.f32 %v11320_v4, %v11437_v20 }
0x15a4   : > { %8485 = vrsqrt.f32 %v5726_v35  ;;  %v5663_v1 = vmul.f32 0.03125, %v5625_v36  ;;  %v5680_v56 = vmul.f32 %v11439_v23, %v11439_v23  ;;  %v5712_v20 = vsub.f32 %v11324_v38, %v11439_v23 }
0x15a5   : > { %v5628_v60 = vpop.xlane.xlu1 %5627 }
0x15a6   : > { %v5695_v41 = vsub.f32 %v5663_v1, %v5679_v51  ;;  %v5664_v6 = vmul.f32 0.03125, %v5628_v60 }
0x15a7   : > { %v8480_v33 = vpop.eup %8479  ;;  %v5551_v44 = vpop.xlane.xlu0 %5550 }
0x15a8   : > { %v5727_v59 = vadd.f32 1e-05, %v5695_v41  ;;  %v5696_v57 = vsub.f32 %v5664_v6, %v5680_v56  ;;  %v11452_v45 = vmul.f32 0.03125, %v5551_v44  ;;  %v5755_v7 = vmul.f32 %v8480_v33, %v5707_v37 }
0x15a9   : > { %v8482_v50 = vpop.eup %8481  ;;  %v5554_v55 = vpop.xlane.xlu1 %5553 }
0x15aa   : > { %v5756_v9 = vmul.f32 %v8482_v50, %v5708_v17  ;;  %8487 = vrsqrt.f32 %v5727_v59  ;;  %v5728_v52 = vadd.f32 1e-05, %v5696_v57  ;;  %v11459_v58 = vmul.f32 0.03125, %v5554_v55 }
0x15ab   : > { %v5631_v43 = vpop.xlane.xlu0 %5630  ;;  %v5777_v14 = vmul.f32 %v11450_v12, %v5755_v7  ;;  %v5681_v22 = vmul.f32 %v11452_v45, %v11452_v45 }
0x15ac   : > { %v5778_v54 = vmul.f32 %v11450_v12, %v5756_v9  ;;  %8489 = vrsqrt.f32 %v5728_v52  ;;  %v5665_v24 = vmul.f32 0.03125, %v5631_v43  ;;  %v5682_v34 = vmul.f32 %v11459_v58, %v11459_v58 }
0x15ad   : > { %v5634_v42 = vpop.xlane.xlu1 %5633  ;;  %v5799_v19 = vadd.f32 %v11457_v28, %v5777_v14 }
0x15ae   : > { %v5800_v39 = vadd.f32 %v11457_v28, %v5778_v54  ;;  %v5697_v11 = vsub.f32 %v5665_v24, %v5681_v22  ;;  %v5666_v46 = vmul.f32 0.03125, %v5634_v42 }
0x15af   : > { %v8484_v2 = vpop.eup %8483  ;;  %8001 = vmatprep.mubr.msk.f32.mxu1 %vm459_vm0, %v5799_v19  ;;  %v5557_v18 = vpop.xlane.xlu0 %5556 }
0x15b0   : > { %v5729_v29 = vadd.f32 1e-05, %v5697_v11  ;;  %v5698_v21 = vsub.f32 %v5666_v46, %v5682_v34  ;;  %v11472_v47 = vmul.f32 0.03125, %v5557_v18  ;;  %8002 = vmatmul.mubr.msk.f32.vlgmr.msra.gmra.mxu1 %vm459_vm0, %v5800_v39  ;;  %v5757_v5 = vmul.f32 %v8484_v2, %v5709_v31 }
0x15b1   : > { %v8486_v30 = vpop.eup %8485  ;;  %v5560_v25 = vpop.xlane.xlu1 %5559  ;;  %v5713_v46 = vsub.f32 %v11336_v15, %v11452_v45  ;;  %v5714_v45 = vsub.f32 %v11340_v32, %v11459_v58 }
0x15b2   : > { %8491 = vrsqrt.f32 %v5729_v29  ;;  %v5730_v62 = vadd.f32 1e-05, %v5698_v21  ;;  %v11477_v35 = vmul.f32 0.03125, %v5560_v25  ;;  %v5779_v51 = vmul.f32 %v11450_v12, %v5757_v5 }
0x15b3   : > { %v5637_v36 = vpop.xlane.xlu0 %5636  ;;  %v5758_v1 = vmul.f32 %v8486_v30, %v5710_v48  ;;  %v5683_v60 = vmul.f32 %v11472_v47, %v11472_v47 }
0x15b4   : > { %8493 = vrsqrt.f32 %v5730_v62  ;;  %v5667_v37 = vmul.f32 0.03125, %v5637_v36  ;;  %v5801_v41 = vadd.f32 %v11457_v28, %v5779_v51  ;;  %v5684_v33 = vmul.f32 %v11477_v35, %v11477_v35 }
0x15b5   : > { %v5640_v56 = vpop.xlane.xlu1 %5639  ;;  %v5780_v6 = vmul.f32 %v11450_v12, %v5758_v1 }
0x15b6   : > { %v5699_v17 = vsub.f32 %v5667_v37, %v5683_v60  ;;  %v5668_v44 = vmul.f32 0.03125, %v5640_v56  ;;  %8004 = vmatprep.mubr.msk.f32.mxu1 %vm459_vm0, %v5801_v41 }
0x15b7   : > { %v8488_v59 = vpop.eup %8487  ;;  %v5563_v57 = vpop.xlane.xlu0 %5562  ;;  %v5802_v7 = vadd.f32 %v11457_v28, %v5780_v6 }
0x15b8   : > { %v5731_v50 = vadd.f32 1e-05, %v5699_v17  ;;  %v5700_v55 = vsub.f32 %v5668_v44, %v5684_v33  ;;  %v11490_v9 = vmul.f32 0.03125, %v5563_v57  ;;  %v5759_v52 = vmul.f32 %v8488_v59, %v5711_v26 }
0x15b9   : > { %v8490_v43 = vpop.eup %8489  ;;  %8005 = vmatmul.mubr.msk.f32.gmra.mxu1 %vm459_vm0, %v5802_v7  ;;  %v5566_v14 = vpop.xlane.xlu1 %5565  ;;  %v5715_v59 = vsub.f32 %v11352_v13, %v11472_v47 }
0x15ba   : > { %8495 = vrsqrt.f32 %v5731_v50  ;;  %v5732_v54 = vadd.f32 1e-05, %v5700_v55  ;;  %v11495_v22 = vmul.f32 0.03125, %v5566_v14  ;;  %v5781_v31 = vmul.f32 %v11450_v12, %v5759_v52 }
0x15bb   : > { %v5643_v24 = vpop.xlane.xlu0 %5642  ;;  %v5760_v42 = vmul.f32 %v8490_v43, %v5712_v20  ;;  %v5685_v19 = vmul.f32 %v11490_v9, %v11490_v9 }
0x15bc   : > { %8497 = vrsqrt.f32 %v5732_v54  ;;  %v5669_v39 = vmul.f32 0.03125, %v5643_v24  ;;  %v5803_v11 = vadd.f32 %v11457_v28, %v5781_v31  ;;  %v5686_v2 = vmul.f32 %v11495_v22, %v11495_v22 }
0x15bd   : > { %v5646_v34 = vpop.xlane.xlu1 %5645  ;;  %v5782_v23 = vmul.f32 %v11450_v12, %v5760_v42  ;;  %v5716_v42 = vsub.f32 %v11356_v3, %v11477_v35  ;;  %v5717_v35 = vsub.f32 %v11371_v49, %v11490_v9 }
0x15be   : > { %v5701_v18 = vsub.f32 %v5669_v39, %v5685_v19  ;;  %v5670_v29 = vmul.f32 0.03125, %v5646_v34  ;;  %8007 = vmatprep.mubr.msk.f32.mxu1 %vm459_vm0, %v5803_v11 }
0x15bf   : > { %v8492_v21 = vpop.eup %8491  ;;  %v5569_v5 = vpop.xlane.xlu0 %5568  ;;  %v5804_v30 = vadd.f32 %v11457_v28, %v5782_v23 }
0x15c0   : > { %v5733_v48 = vadd.f32 1e-05, %v5701_v18  ;;  %v5702_v25 = vsub.f32 %v5670_v29, %v5686_v2  ;;  %v11508_v62 = vmul.f32 0.03125, %v5569_v5  ;;  %v5761_v36 = vmul.f32 %v8492_v21, %v5713_v46 }
0x15c1   : > { %v8494_v51 = vpop.eup %8493  ;;  %8008 = vmatmul.mubr.msk.f32.gmra.mxu1 %vm459_vm0, %v5804_v30  ;;  %v5572_v1 = vpop.xlane.xlu1 %5571 }
0x15c2   : > { %8499 = vrsqrt.f32 %v5733_v48  ;;  %v5734_v60 = vadd.f32 1e-05, %v5702_v25  ;;  %v11513_v37 = vmul.f32 0.03125, %v5572_v1  ;;  %v5783_v41 = vmul.f32 %v11450_v12, %v5761_v36 }
0x15c3   : > { %v5649_v56 = vpop.xlane.xlu0 %5648  ;;  %v5762_v6 = vmul.f32 %v8494_v51, %v5714_v45  ;;  %v5687_v26 = vmul.f32 %v11508_v62, %v11508_v62  ;;  %v5718_v51 = vsub.f32 %v11378_v63, %v11495_v22 }
0x15c4   : > { %8501 = vrsqrt.f32 %v5734_v60  ;;  %v5671_v33 = vmul.f32 0.03125, %v5649_v56  ;;  %v5805_v44 = vadd.f32 %v11457_v28, %v5783_v41  ;;  %v5688_v57 = vmul.f32 %v11513_v37, %v11513_v37 }
0x15c5   : > { %v5652_v17 = vpop.xlane.xlu1 %5651  ;;  %v5784_v58 = vmul.f32 %v11450_v12, %v5762_v6 }
0x15c6   : > { %v5703_v7 = vsub.f32 %v5671_v33, %v5687_v26  ;;  %v5672_v50 = vmul.f32 0.03125, %v5652_v17  ;;  %8010 = vmatprep.mubr.msk.f32.mxu1 %vm459_vm0, %v5805_v44  ;;  %v5719_v17 = vsub.f32 %v11396_v40, %v11508_v62 }
0x15c7   : > { %v8496_v55 = vpop.eup %8495  ;;  %v5575_v52 = vpop.xlane.xlu0 %5574  ;;  %v5806_v43 = vadd.f32 %v11457_v28, %v5784_v58  ;;  %v5720_v58 = vsub.f32 %v11400_v16, %v11513_v37 }
0x15c8   : > { %v5735_v20 = vadd.f32 1e-05, %v5703_v7  ;;  %v5704_v14 = vsub.f32 %v5672_v50, %v5688_v57  ;;  %v5593_v54 = vmul.f32 0.03125, %v5575_v52  ;;  %v5763_v24 = vmul.f32 %v8496_v55, %v5715_v59 }
0x15c9   : > { %v8498_v31 = vpop.eup %8497  ;;  %8011 = vmatmul.mubr.msk.f32.gmra.mxu1 %vm459_vm0, %v5806_v43  ;;  %v5578_v47 = vpop.xlane.xlu1 %5577 }
0x15ca   : > { %8503 = vrsqrt.f32 %v5735_v20  ;;  %v5736_v19 = vadd.f32 1e-05, %v5704_v14  ;;  %v5594_v39 = vmul.f32 0.03125, %v5578_v47  ;;  %v5785_v11 = vmul.f32 %v11450_v12, %v5763_v24 }
0x15cb   : > { %v5655_v34 = vpop.xlane.xlu0 %5654  ;;  %v5764_v23 = vmul.f32 %v8498_v31, %v5716_v42  ;;  %v5689_v46 = vmul.f32 %v5593_v54, %v5593_v54  ;;  %v5721_v62 = vsub.f32 %v11412_v53, %v5593_v54 }
0x15cc   : > { %8505 = vrsqrt.f32 %v5736_v19  ;;  %v5673_v2 = vmul.f32 0.03125, %v5655_v34  ;;  %v5807_v29 = vadd.f32 %v11457_v28, %v5785_v11  ;;  %v5690_v5 = vmul.f32 %v5594_v39, %v5594_v39  ;;  %v6809_v34 = vld [vmem:[%s11789_s9 + $0x70] sm:$0xff]  ;;  %v6806_v11 = vld [vmem:[%s11789_s9 + $0x58] sm:$0xff] }
0x15cd   : > { %v5658_v18 = vpop.xlane.xlu1 %5657  ;;  %v5786_v21 = vmul.f32 %v11450_v12, %v5764_v23  ;;  %v5722_v37 = vsub.f32 %v11416_v10, %v5594_v39  ;;  %v6810_v39 = vld [vmem:[%s11789_s9 + $0x78] sm:$0xff]  ;;  %v6805_v23 = vld [vmem:[%s11789_s9 + $0x50] sm:$0xff] }
0x15ce   : > { %v5705_v30 = vsub.f32 %v5673_v2, %v5689_v46  ;;  %v5674_v48 = vmul.f32 0.03125, %v5658_v18  ;;  %8013 = vmatprep.mubr.msk.f32.mxu1 %vm459_vm0, %v5807_v29  ;;  %8025 = vmatprep.subr.mxu0 %v6810_v39  ;;  %v6804_v46 = vld [vmem:[%s11789_s9 + $0x48] sm:$0xff]  ;;  %v6803_v2 = vld [vmem:[%s11789_s9 + $0x40] sm:$0xff] }
0x15cf   : > { %v8500_v25 = vpop.eup %8499  ;;  %v5808_v36 = vadd.f32 %v11457_v28, %v5786_v21  ;;  %8065 = vmatprep.subr.mxu1 %v6810_v39  ;;  %8026 = vmatpush3.msra.mxu0 %v6810_v39  ;;  %v11590_v18 = vld [vmem:[%s11788_s8 + $0x1] ss:$0 sm:$0xff] }
0x15d0   : > { %v5737_v45 = vadd.f32 1e-05, %v5705_v30  ;;  %v5706_v1 = vsub.f32 %v5674_v48, %v5690_v5  ;;  %v5765_v60 = vmul.f32 %v8500_v25, %v5717_v35  ;;  %8073 = vmatpush3.msra.mxu1 %v6810_v39  ;;  %8027 = vmatprep.subr.mxu0 %v6809_v34 }
0x15d1   : > { %v8502_v56 = vpop.eup %8501  ;;  %8014 = vmatmul.mubr.msk.f32.gmra.mxu1 %vm459_vm0, %v5808_v36  ;;  %8066 = vmatprep.subr.mxu1 %v6809_v34 }
0x15d2   : > { %8507 = vrsqrt.f32 %v5737_v45  ;;  %v5738_v41 = vadd.f32 1e-05, %v5706_v1  ;;  %v5787_v9 = vmul.f32 %v11450_v12, %v5765_v60  ;;  %v5766_v6 = vmul.f32 %v8502_v56, %v5718_v51  ;;  %8028 = vmatpush3.msra.mxu0 %v6809_v34  ;;  %8074 = vmatpush3.msra.mxu1 %v6809_v34 }
0x15d4   : > { %8509 = vrsqrt.f32 %v5738_v41  ;;  %v5809_v26 = vadd.f32 %v11457_v28, %v5787_v9  ;;  %v5788_v33 = vmul.f32 %v11450_v12, %v5766_v6 }
0x15d6   : > { %8016 = vmatprep.mubr.msk.f32.mxu1 %vm459_vm0, %v5809_v26  ;;  %v5810_v22 = vadd.f32 %v11457_v28, %v5788_v33 }
0x15d7   : > { %v8504_v44 = vpop.eup %8503 }
0x15d8   : > { %8017 = vmatmul.mubr.msk.f32.gmra.mxu1 %vm459_vm0, %v5810_v22  ;;  %v5767_v59 = vmul.f32 %v8504_v44, %v5719_v17 }
0x15d9   : > { %v8506_v57 = vpop.eup %8505 }
0x15da   : > { %v5789_v7 = vmul.f32 %v11450_v12, %v5767_v59  ;;  %v5768_v50 = vmul.f32 %v8506_v57, %v5720_v58 }
0x15dc   : > { %v5811_v55 = vadd.f32 %v11457_v28, %v5789_v7  ;;  %v5790_v52 = vmul.f32 %v11450_v12, %v5768_v50 }
0x15de   : > { %8019 = vmatprep.mubr.msk.f32.mxu1 %vm459_vm0, %v5811_v55  ;;  %v5812_v43 = vadd.f32 %v11457_v28, %v5790_v52 }
0x15df   : > { %v8508_v20 = vpop.eup %8507 }
0x15e0   : > { %8020 = vmatmul.mubr.msk.f32.gmra.mxu1 %vm459_vm0, %v5812_v43  ;;  %v5769_v14 = vmul.f32 %v8508_v20, %v5721_v62 }
0x15e1   : > { %v8510_v24 = vpop.eup %8509 }
0x15e2   : > { %v5791_v31 = vmul.f32 %v11450_v12, %v5769_v14  ;;  %v5770_v42 = vmul.f32 %v8510_v24, %v5722_v37 }
0x15e4   : > { %v5813_v47 = vadd.f32 %v11457_v28, %v5791_v31  ;;  %v5792_v19 = vmul.f32 %v11450_v12, %v5770_v42  ;;  %v6808_v12 = vld [vmem:[%s11789_s9 + $0x68] sm:$0xff] }
0x15e5   : > { %8029 = vmatprep.subr.mxu0 %v6808_v12  ;;  %8067 = vmatprep.subr.mxu1 %v6808_v12 }
0x15e6   : > { %8022 = vmatprep.mubr.msk.f32.mxu1 %vm459_vm0, %v5813_v47  ;;  %v5814_v54 = vadd.f32 %v11457_v28, %v5792_v19  ;;  %8030 = vmatpush3.msra.mxu0 %v6808_v12  ;;  %v6807_v28 = vld [vmem:[%s11789_s9 + $0x60] sm:$0xff] }
0x15e7   : > { %8075 = vmatpush3.msra.mxu1 %v6808_v12  ;;  %8031 = vmatprep.subr.mxu0 %v6807_v28 }
0x15e8   : > { %8023 = vmatmul.mubr.msk.f32.gmra.mxu1 %vm459_vm0, %v5814_v54  ;;  %8068 = vmatprep.subr.mxu1 %v6807_v28 }
0x15e9   : > { %8032 = vmatpush3.msra.mxu0 %v6807_v28  ;;  %8076 = vmatpush3.msra.mxu1 %v6807_v28 }
0x15ea   : > { %8033 = vmatprep.subr.mxu0 %v6806_v11  ;;  %8069 = vmatprep.subr.mxu1 %v6806_v11 }
0x15eb   : > { %8034 = vmatpush3.msra.mxu0 %v6806_v11  ;;  %8077 = vmatpush3.msra.mxu1 %v6806_v11 }
0x15ec   : > { %8035 = vmatprep.subr.mxu0 %v6805_v23  ;;  %8070 = vmatprep.subr.mxu1 %v6805_v23 }
0x15ed   : > { %8036 = vmatpush3.msra.mxu0 %v6805_v23  ;;  %8078 = vmatpush3.msra.mxu1 %v6805_v23 }
0x15ee   : > { %8037 = vmatprep.subr.mxu0 %v6804_v46  ;;  %8071 = vmatprep.subr.mxu1 %v6804_v46 }
0x15ef   : > { %8038 = vmatpush3.msra.mxu0 %v6804_v46  ;;  %8079 = vmatpush3.msra.mxu1 %v6804_v46 }
0x15f0   : > { %8039 = vmatprep.subr.mxu0 %v6803_v2  ;;  %8072 = vmatprep.subr.mxu1 %v6803_v2 }
0x15f1   : > { %8040 = vmatpush3.msra.mxu0 %v6803_v2  ;;  %8080 = vmatpush3.msra.mxu1 %v6803_v2 }
0x1670   : > { %v8003_v29 = vpop.f32.mrf.mxu1 }
0x1671   : > { %v5948_v21 = vadd.f32 %v8003_v29, %v11590_v18 }
0x1672   : > { %v5942_v35 = vpop.f32.mrf.mxu1 }
0x1673   : > { %v6038_v5 = vmul.f32 0.044715, %v5948_v21  ;;  %v5943_v30 = vadd.f32 %v11590_v18, %v5942_v35 }
0x1675   : > { %v6054_v48 = vmul.f32 %v6038_v5, %v5948_v21  ;;  %v6037_v25 = vmul.f32 0.044715, %v5943_v30  ;;  %v6021_v5 = vmul.f32 0.5, %v5943_v30 }
0x1677   : > { %v6070_v36 = vmul.f32 %v6054_v48, %v5948_v21  ;;  %v6053_v51 = vmul.f32 %v6037_v25, %v5943_v30  ;;  %v6022_v25 = vmul.f32 0.5, %v5948_v21 }
0x1679   : > { %v6086_v45 = vadd.f32 %v6070_v36, %v5948_v21  ;;  %v6069_v1 = vmul.f32 %v6053_v51, %v5943_v30  ;;  %v8006_v60 = vpop.f32.mrf.mxu1 }
0x167a   : > { %v11595_v56 = vadd.f32 %v8006_v60, %v11590_v18 }
0x167b   : > { %v6102_v41 = vmul.f32 0.7978846, %v6086_v45  ;;  %v6085_v9 = vadd.f32 %v6069_v1, %v5943_v30  ;;  %v5952_v6 = vpop.f32.mrf.mxu1 }
0x167c   : > { %v6040_v26 = vmul.f32 0.044715, %v11595_v56  ;;  %v5953_v33 = vadd.f32 %v11590_v18, %v5952_v6 }
0x167d   : > { %8511 = vtanh.f32 %v6102_v41  ;;  %v6101_v17 = vmul.f32 0.7978846, %v6085_v9 }
0x167e   : > { %v6056_v22 = vmul.f32 %v6040_v26, %v11595_v56  ;;  %v6039_v44 = vmul.f32 0.044715, %v5953_v33 }
0x167f   : > { %8513 = vtanh.f32 %v6101_v17 }
0x1680   : > { %v6072_v58 = vmul.f32 %v6056_v22, %v11595_v56  ;;  %v6055_v59 = vmul.f32 %v6039_v44, %v5953_v33 }
0x1681   : > { %v8009_v57 = vpop.f32.mrf.mxu1 }
0x1682   : > { %v6088_v7 = vadd.f32 %v6072_v58, %v11595_v56  ;;  %v6071_v50 = vmul.f32 %v6055_v59, %v5953_v33  ;;  %v11603_v55 = vadd.f32 %v8009_v57, %v11590_v18 }
0x1683   : > { %v5962_v52 = vpop.f32.mrf.mxu1 }
0x1684   : > { %v6104_v62 = vmul.f32 0.7978846, %v6088_v7  ;;  %v6087_v43 = vadd.f32 %v6071_v50, %v5953_v33  ;;  %v6042_v20 = vmul.f32 0.044715, %v11603_v55  ;;  %v11607_v37 = vadd.f32 %v11590_v18, %v5962_v52 }
0x1685   : > { %v6023_v50 = vmul.f32 0.5, %v5953_v33 }
0x1686   : > { %8515 = vtanh.f32 %v6104_v62  ;;  %v6058_v14 = vmul.f32 %v6042_v20, %v11603_v55  ;;  %v6103_v24 = vmul.f32 0.7978846, %v6087_v43  ;;  %v6041_v31 = vmul.f32 0.044715, %v11607_v37 }
0x1688   : > { %v6074_v42 = vmul.f32 %v6058_v14, %v11603_v55  ;;  %8517 = vtanh.f32 %v6103_v24  ;;  %v6057_v47 = vmul.f32 %v6041_v31, %v11607_v37  ;;  %v6024_v14 = vmul.f32 0.5, %v11595_v56 }
0x1689   : > { %v8012_v19 = vpop.f32.mrf.mxu1 }
0x168a   : > { %v8512_v54 = vpop.eup %8511  ;;  %v6090_v39 = vadd.f32 %v6074_v42, %v11603_v55  ;;  %v11615_v34 = vadd.f32 %v8012_v19, %v11590_v18  ;;  %v6073_v12 = vmul.f32 %v6057_v47, %v11607_v37 }
0x168b   : > { %v5972_v28 = vpop.f32.mrf.mxu1  ;;  %v6134_v23 = vadd.f32 1.0, %v8512_v54 }
0x168c   : > { %v8514_v11 = vpop.eup %8513  ;;  %v6106_v46 = vmul.f32 0.7978846, %v6090_v39  ;;  %v6044_v2 = vmul.f32 0.044715, %v11615_v34  ;;  %v11620_v29 = vadd.f32 %v11590_v18, %v5972_v28  ;;  %v6089_v35 = vadd.f32 %v6073_v12, %v11607_v37 }
0x168d   : > { %v6133_v48 = vadd.f32 1.0, %v8514_v11  ;;  %v6150_v60 = vmul.f32 %v6134_v23, %v6022_v25  ;;  %v6025_v25 = vmul.f32 0.5, %v11607_v37 }
0x168e   : > { %8519 = vtanh.f32 %v6106_v46  ;;  %v6060_v36 = vmul.f32 %v6044_v2, %v11615_v34  ;;  %v6043_v51 = vmul.f32 0.044715, %v11620_v29  ;;  %v6105_v1 = vmul.f32 0.7978846, %v6089_v35 }
0x168f   : > { %v6149_v45 = vmul.f32 %v6133_v48, %v6021_v5 }
0x1690   : > { %v6076_v41 = vmul.f32 %v6060_v36, %v11615_v34  ;;  %v6059_v9 = vmul.f32 %v6043_v51, %v11620_v29  ;;  %8521 = vtanh.f32 %v6105_v1 }
0x1691   : > { %v8015_v6 = vpop.f32.mrf.mxu1  ;;  %8041 = vmatprep.mubr.msk.f32.mxu0 %vm3115_vm2, %v6149_v45 }
0x1692   : > { %v6092_v30 = vadd.f32 %v6076_v41, %v11615_v34  ;;  %v6075_v21 = vmul.f32 %v6059_v9, %v11620_v29  ;;  %v11631_v26 = vadd.f32 %v8015_v6, %v11590_v18  ;;  %8042 = vmatmul.mubr.msk.f32.vlgmr.msra.gmra.mxu0 %vm3115_vm2, %v6150_v60  ;;  %v6026_v41 = vmul.f32 0.5, %v11603_v55 }
0x1693   : > { %v8516_v17 = vpop.eup %8515  ;;  %v5982_v22 = vpop.f32.mrf.mxu1 }
0x1694   : > { %v6108_v44 = vmul.f32 0.7978846, %v6092_v30  ;;  %v6091_v58 = vadd.f32 %v6075_v21, %v11620_v29  ;;  %v6046_v59 = vmul.f32 0.044715, %v11631_v26  ;;  %v11637_v7 = vadd.f32 %v11590_v18, %v5982_v22 }
0x1695   : > { %v8518_v57 = vpop.eup %8517  ;;  %v6136_v52 = vadd.f32 1.0, %v8516_v17 }
0x1696   : > { %8523 = vtanh.f32 %v6108_v44  ;;  %v6062_v62 = vmul.f32 %v6046_v59, %v11631_v26  ;;  %v6135_v43 = vadd.f32 1.0, %v8518_v57  ;;  %v6107_v20 = vmul.f32 0.7978846, %v6091_v58 }
0x1697   : > { %v6045_v24 = vmul.f32 0.044715, %v11637_v7  ;;  %v6152_v33 = vmul.f32 %v6136_v52, %v6024_v14  ;;  %v6027_v14 = vmul.f32 0.5, %v11620_v29 }
0x1698   : > { %v6078_v31 = vmul.f32 %v6062_v62, %v11631_v26  ;;  %v8018_v42 = vpop.f32.mrf.mxu1  ;;  %v6151_v47 = vmul.f32 %v6135_v43, %v6023_v50  ;;  %8525 = vtanh.f32 %v6107_v20 }
0x1699   : > { %v6061_v19 = vmul.f32 %v6045_v24, %v11637_v7  ;;  %v11645_v54 = vadd.f32 %v8018_v42, %v11590_v18 }
0x169a   : > { %v6094_v39 = vadd.f32 %v6078_v31, %v11631_v26  ;;  %8044 = vmatprep.mubr.msk.f32.mxu0 %vm3115_vm2, %v6151_v47  ;;  %v5992_v12 = vpop.f32.mrf.mxu1  ;;  %v6028_v31 = vmul.f32 0.5, %v11615_v34 }
0x169b   : > { %v8520_v28 = vpop.eup %8519  ;;  %v6077_v56 = vmul.f32 %v6061_v19, %v11637_v7  ;;  %v6048_v11 = vmul.f32 0.044715, %v11645_v54  ;;  %v11652_v23 = vadd.f32 %v11590_v18, %v5992_v12  ;;  %8045 = vmatmul.mubr.msk.f32.gmra.mxu0 %vm3115_vm2, %v6152_v33 }
0x169c   : > { %v6110_v46 = vmul.f32 0.7978846, %v6094_v39  ;;  %v6138_v36 = vadd.f32 1.0, %v8520_v28 }
0x169d   : > { %v6093_v2 = vadd.f32 %v6077_v56, %v11637_v7  ;;  %v6064_v35 = vmul.f32 %v6048_v11, %v11645_v54  ;;  %v6047_v5 = vmul.f32 0.044715, %v11652_v23  ;;  %v8522_v48 = vpop.eup %8521 }
0x169e   : > { %8527 = vtanh.f32 %v6110_v46  ;;  %v6137_v1 = vadd.f32 1.0, %v8522_v48  ;;  %v6154_v37 = vmul.f32 %v6138_v36, %v6026_v41 }
0x169f   : > { %v6080_v51 = vmul.f32 %v6064_v35, %v11645_v54  ;;  %v6063_v45 = vmul.f32 %v6047_v5, %v11652_v23  ;;  %v6109_v60 = vmul.f32 0.7978846, %v6093_v2 }
0x16a0   : > { %v8021_v9 = vpop.f32.mrf.mxu1  ;;  %v6153_v17 = vmul.f32 %v6137_v1, %v6025_v25 }
0x16a1   : > { %v6096_v6 = vadd.f32 %v6080_v51, %v11645_v54  ;;  %v6079_v30 = vmul.f32 %v6063_v45, %v11652_v23  ;;  %v11665_v21 = vadd.f32 %v8021_v9, %v11590_v18  ;;  %8529 = vtanh.f32 %v6109_v60 }
0x16a2   : > { %v6002_v22 = vpop.f32.mrf.mxu1  ;;  %8047 = vmatprep.mubr.msk.f32.mxu0 %vm3115_vm2, %v6153_v17  ;;  %v6029_v60 = vmul.f32 0.5, %v11637_v7  ;;  %v6030_v9 = vmul.f32 0.5, %v11631_v26  ;;  %v6031_v7 = vmul.f32 0.5, %v11652_v23  ;;  %v6032_v26 = vmul.f32 0.5, %v11645_v54 }
0x16a3   : > { %v8524_v44 = vpop.eup %8523  ;;  %v6112_v58 = vmul.f32 0.7978846, %v6096_v6  ;;  %v6095_v59 = vadd.f32 %v6079_v30, %v11652_v23  ;;  %v6050_v57 = vmul.f32 0.044715, %v11665_v21  ;;  %v11671_v55 = vadd.f32 %v11590_v18, %v6002_v22  ;;  %8048 = vmatmul.mubr.msk.f32.gmra.mxu0 %vm3115_vm2, %v6154_v37 }
0x16a4   : > { %v6140_v62 = vadd.f32 1.0, %v8524_v44 }
0x16a5   : > { %v8526_v50 = vpop.eup %8525  ;;  %8531 = vtanh.f32 %v6112_v58  ;;  %v6066_v52 = vmul.f32 %v6050_v57, %v11665_v21  ;;  %v6111_v43 = vmul.f32 0.7978846, %v6095_v59  ;;  %v6049_v20 = vmul.f32 0.044715, %v11671_v55 }
0x16a6   : > { %v6139_v24 = vadd.f32 1.0, %v8526_v50  ;;  %v6156_v28 = vmul.f32 %v6140_v62, %v6028_v31 }
0x16a7   : > { %v6082_v42 = vmul.f32 %v6066_v52, %v11665_v21  ;;  %8533 = vtanh.f32 %v6111_v43  ;;  %v6065_v47 = vmul.f32 %v6049_v20, %v11671_v55 }
0x16a8   : > { %v8024_v19 = vpop.f32.mrf.mxu1  ;;  %v6155_v33 = vmul.f32 %v6139_v24, %v6027_v14  ;;  %v6033_v24 = vmul.f32 0.5, %v11671_v55 }
0x16a9   : > { %v6098_v39 = vadd.f32 %v6082_v42, %v11665_v21  ;;  %v6018_v12 = vadd.f32 %v8024_v19, %v11590_v18  ;;  %v6081_v56 = vmul.f32 %v6065_v47, %v11671_v55  ;;  %v6034_v42 = vmul.f32 0.5, %v11665_v21 }
0x16aa   : > { %8050 = vmatprep.mubr.msk.f32.mxu0 %vm3115_vm2, %v6155_v33  ;;  %v6012_v29 = vpop.f32.mrf.mxu1 }
0x16ab   : > { %v8528_v11 = vpop.eup %8527  ;;  %v6114_v46 = vmul.f32 0.7978846, %v6098_v39  ;;  %v6052_v34 = vmul.f32 0.044715, %v6018_v12  ;;  %v6013_v2 = vadd.f32 %v11590_v18, %v6012_v29  ;;  %8051 = vmatmul.mubr.msk.f32.gmra.mxu0 %vm3115_vm2, %v6156_v28  ;;  %v6097_v35 = vadd.f32 %v6081_v56, %v11671_v55  ;;  %v11704_v55 = vld [vmem:[%s11790_s10 + $0x1] ss:$0 sm:$0xff] }
0x16ac   : > { %v6142_v1 = vadd.f32 1.0, %v8528_v11  ;;  %v6036_v56 = vmul.f32 0.5, %v6018_v12 }
0x16ad   : > { %8535 = vtanh.f32 %v6114_v46  ;;  %v6068_v5 = vmul.f32 %v6052_v34, %v6018_v12  ;;  %v6051_v48 = vmul.f32 0.044715, %v6013_v2  ;;  %v6113_v25 = vmul.f32 0.7978846, %v6097_v35 }
0x16ae   : > { %v8530_v36 = vpop.eup %8529  ;;  %v6158_v44 = vmul.f32 %v6142_v1, %v6030_v9  ;;  %v6035_v39 = vmul.f32 0.5, %v6013_v2 }
0x16af   : > { %v6084_v51 = vmul.f32 %v6068_v5, %v6018_v12  ;;  %v6067_v45 = vmul.f32 %v6051_v48, %v6013_v2  ;;  %v6141_v41 = vadd.f32 1.0, %v8530_v36  ;;  %8537 = vtanh.f32 %v6113_v25 }
0x16b1   : > { %v6100_v6 = vadd.f32 %v6084_v51, %v6018_v12  ;;  %v6083_v18 = vmul.f32 %v6067_v45, %v6013_v2  ;;  %v6157_v17 = vmul.f32 %v6141_v41, %v6029_v60 }
0x16b2   : > { %v8532_v30 = vpop.eup %8531 }
0x16b3   : > { %v6116_v22 = vmul.f32 0.7978846, %v6100_v6  ;;  %v6099_v37 = vadd.f32 %v6083_v18, %v6013_v2  ;;  %8053 = vmatprep.mubr.msk.f32.mxu0 %vm3115_vm2, %v6157_v17  ;;  %v6144_v59 = vadd.f32 1.0, %v8532_v30 }
0x16b4   : > { %v8534_v58 = vpop.eup %8533  ;;  %8054 = vmatmul.mubr.msk.f32.gmra.mxu0 %vm3115_vm2, %v6158_v44 }
0x16b5   : > { %8539 = vtanh.f32 %v6116_v22  ;;  %v6143_v57 = vadd.f32 1.0, %v8534_v58  ;;  %v6115_v50 = vmul.f32 0.7978846, %v6099_v37  ;;  %v6160_v62 = vmul.f32 %v6144_v59, %v6032_v26 }
0x16b7   : > { %v6159_v52 = vmul.f32 %v6143_v57, %v6031_v7  ;;  %8541 = vtanh.f32 %v6115_v50 }
0x16b9   : > { %8056 = vmatprep.mubr.msk.f32.mxu0 %vm3115_vm2, %v6159_v52 }
0x16ba   : > { %v8536_v43 = vpop.eup %8535  ;;  %8057 = vmatmul.mubr.msk.f32.gmra.mxu0 %vm3115_vm2, %v6160_v62 }
0x16bb   : > { %v6146_v14 = vadd.f32 1.0, %v8536_v43 }
0x16bc   : > { %v8538_v20 = vpop.eup %8537 }
0x16bd   : > { %v6145_v31 = vadd.f32 1.0, %v8538_v20  ;;  %v6162_v47 = vmul.f32 %v6146_v14, %v6034_v42 }
0x16bf   : > { %v6161_v23 = vmul.f32 %v6145_v31, %v6033_v24 }
0x16c1   : > { %8059 = vmatprep.mubr.msk.f32.mxu0 %vm3115_vm2, %v6161_v23 }
0x16c2   : > { %v8540_v19 = vpop.eup %8539  ;;  %8060 = vmatmul.mubr.msk.f32.gmra.mxu0 %vm3115_vm2, %v6162_v47 }
0x16c3   : > { %v6148_v33 = vadd.f32 1.0, %v8540_v19 }
0x16c4   : > { %v8542_v54 = vpop.eup %8541 }
0x16c5   : > { %v6147_v28 = vadd.f32 1.0, %v8542_v54  ;;  %v6164_v11 = vmul.f32 %v6148_v33, %v6036_v56 }
0x16c7   : > { %v6163_v29 = vmul.f32 %v6147_v28, %v6035_v39 }
0x16c9   : > { %8062 = vmatprep.mubr.msk.f32.mxu1 %vm3115_vm2, %v6163_v29 }
0x16ca   : > { %8063 = vmatmul.mubr.msk.f32.vlgmr.msra.gmra.mxu1 %vm3115_vm2, %v6164_v11 }
0x1752   : > { %v8043_v21 = vpop.f32.mrf.mxu0 }
0x1753   : > { %v6368_v46 = vadd.f32 %v8043_v21, %v11290_v0 }
0x1754   : > { %v6288_v12 = vpop.f32.mrf.mxu0 }
0x1755   : > { %v6392_v34 = vadd.f32 %v11704_v55, %v6368_v46  ;;  %v6367_v2 = vadd.f32 %v6288_v12, %v11293_v27 }
0x1757   : > { %6408 = vst.msk [vmem:[%s11712_s24 + $0x8] sm:$0xff] %vm459_vm0, %v6392_v34  ;;  %v6391_v0 = vadd.f32 %v11704_v55, %v6367_v2 }
0x1759   : > { %6407 = vst.msk [vmem:[%s11712_s24] sm:$0xff] %vm459_vm0, %v6391_v0 }
0x175b   : > { %v8046_v35 = vpop.f32.mrf.mxu0 }
0x175c   : > { %v6370_v5 = vadd.f32 %v8046_v35, %v11308_v8 }
0x175d   : > { %v6298_v48 = vpop.f32.mrf.mxu0 }
0x175e   : > { %v6394_v25 = vadd.f32 %v11704_v55, %v6370_v5  ;;  %v6369_v36 = vadd.f32 %v6298_v48, %v11304_v61 }
0x1760   : > { %6410 = vst.msk [vmem:[%s11712_s24 + $0x18] sm:$0xff] %vm459_vm0, %v6394_v25  ;;  %v6393_v27 = vadd.f32 %v11704_v55, %v6369_v36 }
0x1762   : > { %6409 = vst.msk [vmem:[%s11712_s24 + $0x10] sm:$0xff] %vm459_vm0, %v6393_v27 }
0x1763   : > { %v8049_v51 = vpop.f32.mrf.mxu0 }
0x1764   : > { %v6372_v45 = vadd.f32 %v8049_v51, %v11324_v38 }
0x1765   : > { %v6308_v1 = vpop.f32.mrf.mxu0 }
0x1766   : > { %v6396_v60 = vadd.f32 %v11704_v55, %v6372_v45  ;;  %v6371_v8 = vadd.f32 %v6308_v1, %v11320_v4 }
0x1768   : > { %6412 = vst.msk [vmem:[%s11712_s24 + $0x28] sm:$0xff] %vm459_vm0, %v6396_v60  ;;  %v6395_v61 = vadd.f32 %v11704_v55, %v6371_v8 }
0x176a   : > { %6411 = vst.msk [vmem:[%s11712_s24 + $0x20] sm:$0xff] %vm459_vm0, %v6395_v61 }
0x176b   : > { %v8052_v41 = vpop.f32.mrf.mxu0 }
0x176c   : > { %v6374_v9 = vadd.f32 %v8052_v41, %v11340_v32 }
0x176d   : > { %v6318_v6 = vpop.f32.mrf.mxu0 }
0x176e   : > { %v6398_v18 = vadd.f32 %v11704_v55, %v6374_v9  ;;  %v6373_v38 = vadd.f32 %v6318_v6, %v11336_v15 }
0x1770   : > { %6414 = vst.msk [vmem:[%s11712_s24 + $0x38] sm:$0xff] %vm459_vm0, %v6398_v18  ;;  %v6397_v4 = vadd.f32 %v11704_v55, %v6373_v38 }
0x1772   : > { %6413 = vst.msk [vmem:[%s11712_s24 + $0x30] sm:$0xff] %vm459_vm0, %v6397_v4 }
0x1774   : > { %v8055_v30 = vpop.f32.mrf.mxu0 }
0x1775   : > { %v6376_v17 = vadd.f32 %v8055_v30, %v11356_v3 }
0x1776   : > { %v6328_v22 = vpop.f32.mrf.mxu0 }
0x1777   : > { %v6400_v32 = vadd.f32 %v11704_v55, %v6376_v17  ;;  %v6375_v37 = vadd.f32 %v6328_v22, %v11352_v13 }
0x1779   : > { %6416 = vst.msk [vmem:[%s11712_s24 + $0x48] sm:$0xff] %vm459_vm0, %v6400_v32  ;;  %v6399_v15 = vadd.f32 %v11704_v55, %v6375_v37 }
0x177a   : > { %v8058_v44 = vpop.f32.mrf.mxu0 }
0x177b   : > { %v6378_v58 = vadd.f32 %v8058_v44, %v11378_v63  ;;  %6415 = vst.msk [vmem:[%s11712_s24 + $0x40] sm:$0xff] %vm459_vm0, %v6399_v15 }
0x177c   : > { %v6338_v59 = vpop.f32.mrf.mxu0 }
0x177d   : > { %v6402_v7 = vadd.f32 %v11704_v55, %v6378_v58  ;;  %v6377_v3 = vadd.f32 %v6338_v59, %v11371_v49 }
0x177f   : > { %6418 = vst.msk [vmem:[%s11712_s24 + $0x58] sm:$0xff] %vm459_vm0, %v6402_v7  ;;  %v6401_v13 = vadd.f32 %v11704_v55, %v6377_v3 }
0x1781   : > { %6417 = vst.msk [vmem:[%s11712_s24 + $0x50] sm:$0xff] %vm459_vm0, %v6401_v13 }
0x1782   : > { %v8061_v57 = vpop.f32.mrf.mxu0 }
0x1783   : > { %v6380_v50 = vadd.f32 %v8061_v57, %v11400_v16 }
0x1784   : > { %v6348_v26 = vpop.f32.mrf.mxu0 }
0x1785   : > { %v6404_v63 = vadd.f32 %v11704_v55, %v6380_v50  ;;  %v6379_v52 = vadd.f32 %v6348_v26, %v11396_v40 }
0x1787   : > { %6420 = vst.msk [vmem:[%s11712_s24 + $0x68] sm:$0xff] %vm459_vm0, %v6404_v63  ;;  %v6403_v49 = vadd.f32 %v11704_v55, %v6379_v52 }
0x1789   : > { %6419 = vst.msk [vmem:[%s11712_s24 + $0x60] sm:$0xff] %vm459_vm0, %v6403_v49 }
0x178a   : > { %v8064_v62 = vpop.f32.mrf.mxu1 }
0x178b   : > { %v6382_v43 = vadd.f32 %v8064_v62, %v11416_v10 }
0x178c   : > { %v6358_v20 = vpop.f32.mrf.mxu1 }
0x178d   : > { %v6406_v14 = vadd.f32 %v11704_v55, %v6382_v43  ;;  %v6381_v24 = vadd.f32 %v6358_v20, %v11412_v53 }
0x178f   : > { %6422 = vst.msk [vmem:[%s11712_s24 + $0x78] sm:$0xff] %vm459_vm0, %v6406_v14  ;;  %v6405_v16 = vadd.f32 %v11704_v55, %v6381_v24 }
0x1791   : > { %6421 = vst.msk [vmem:[%s11712_s24 + $0x70] sm:$0xff] %vm459_vm0, %v6405_v16 }
0x1792 PF: > { %s23_s25 = sadd.s32 1, %s8565_s25  }
0x1793   : > { %p20_p4 = scmp.ge.s32.totalorder %s23_s25, 4  }
0x1795   :  { %22 = sbr.rel (!%p20_p4) target bundleno = 1 (0x1), region = 115 }

</bundles_post_ra>
